<compile_context>
chip_gen: v5e
topology: v5e:2x2
jax: 0.10.0
libtpu: 0.0.40
codegen_flags: <defaults>
</compile_context>

<pallas_src>
import functools

import jax
import jax.numpy as jnp
from jax.experimental import pallas as pl
from jax.experimental.pallas import tpu as pltpu

_NEG = -1e30                      # finite "minus infinity" for masked logits
_VMEM_LIMIT = 32 * 1024 * 1024    # fits scoped-VMEM budgets on v5e/v6e/v7x


# ---------------------------------------------------------------------------
# Kernel 1: fused projection  z = h @ W (all heads)  +  attention scores
# ---------------------------------------------------------------------------
def _gat_project_kernel(h_ref, w_ref, a_ref, z_ref, s_ref):
    # MXU matmul, bf16 operands, f32 accumulation.
    z = jnp.dot(h_ref[...].astype(jnp.bfloat16),
                w_ref[...].astype(jnp.bfloat16),
                preferred_element_type=jnp.float32)            # (tn, H*Dh) f32
    z_ref[...] = z.astype(z_ref.dtype)                         # stored bf16
    # All per-head src/dst scores via one matmul against the block-diag matrix.
    s_ref[...] = jnp.dot(z.astype(jnp.bfloat16),
                         a_ref[...].astype(jnp.bfloat16),
                         preferred_element_type=jnp.float32)   # (tn, 2H) f32


def gat_project(h, W, A, *, t_n=128):
    """h:(N,Din)  W:(Din,H*Dh)  A:(H*Dh,2H) -> z:(N,H*Dh) bf16, s:(N,2H) f32."""
    N, din = h.shape
    dall = W.shape[1]
    two_h = A.shape[1]
    t_n = min(t_n, N)
    if N % t_n:
        t_n = N
    return pl.pallas_call(
        _gat_project_kernel,
        out_shape=(jax.ShapeDtypeStruct((N, dall), jnp.bfloat16),
                   jax.ShapeDtypeStruct((N, two_h), jnp.float32)),
        grid_spec=pltpu.PrefetchScalarGridSpec(
            num_scalar_prefetch=0,
            grid=(N // t_n,),
            in_specs=[
                pl.BlockSpec((t_n, din), lambda i: (i, 0)),
                pl.BlockSpec((din, dall), lambda i: (0, 0)),    # resident
                pl.BlockSpec((dall, two_h), lambda i: (0, 0)),  # resident
            ],
            out_specs=(
                pl.BlockSpec((t_n, dall), lambda i: (i, 0)),
                pl.BlockSpec((t_n, two_h), lambda i: (i, 0)),
            )),
        compiler_params=pltpu.CompilerParams(
            dimension_semantics=("parallel",),
            vmem_limit_bytes=_VMEM_LIMIT),
    )(h, W, A)


# ---------------------------------------------------------------------------
# Kernel 2: flash-style masked attention over source tiles (all heads fused)
# ---------------------------------------------------------------------------
def _gat_attn_kernel(*refs, num_heads, head_dim, apply_elu, fuse_head):
    if fuse_head:
        (s_dst_ref, s_srcT_ref, adj_ref, z_ref, wc_ref, bc_ref,
         out_ref, m_scr, l_scr, acc_scr) = refs
    else:
        (s_dst_ref, s_srcT_ref, adj_ref, z_ref,
         out_ref, m_scr, l_scr, acc_scr) = refs

    j = pl.program_id(1)

    @pl.when(j == 0)
    def _init():
        m_scr[...] = jnp.full(m_scr.shape, _NEG, jnp.float32)
        l_scr[...] = jnp.zeros(l_scr.shape, jnp.float32)
        acc_scr[...] = jnp.zeros(acc_scr.shape, jnp.float32)

    mask = adj_ref[...] != 0                       # (td, ts) bool (int8 source)
    z = z_ref[...]                                 # (ts, H*Dh) bf16
    s_dst = s_dst_ref[...]                         # (td, H)  f32
    s_srcT = s_srcT_ref[...]                       # (H, ts)  f32

    for h in range(num_heads):
        # Edge logits in (dst, src) orientation -> softmax over the lane axis.
        e = s_dst[:, h:h + 1] + s_srcT[h:h + 1, :]             # (td, ts)
        e = jnp.where(e > 0, e, 0.01 * e)                      # F.leaky_relu
        e = jnp.where(mask, e, _NEG)
        m_prev = m_scr[h]                                      # (td, 1)
        m_new = jnp.maximum(m_prev, jnp.max(e, axis=-1, keepdims=True))
        # Online softmax: explicit zeroing of masked entries keeps partially /
        # fully masked rows exact (no spurious denominator contributions).
        p = jnp.where(mask, jnp.exp(e - m_new), 0.0)           # (td, ts) f32
        corr = jnp.exp(m_prev - m_new)                         # (td, 1)
        l_scr[h] = corr * l_scr[h] + jnp.sum(p, axis=-1, keepdims=True)
        z_h = z[:, h * head_dim:(h + 1) * head_dim]            # (ts, Dh) bf16
        acc_scr[h] = corr * acc_scr[h] + jnp.dot(
            p.astype(jnp.bfloat16), z_h, preferred_element_type=jnp.float32)
        m_scr[h] = m_new

    @pl.when(j == pl.num_programs(1) - 1)
    def _finalize():
        outs = []
        for h in range(num_heads):
            inv_l = 1.0 / jnp.maximum(l_scr[h], 1e-30)         # (td, 1)
            o = acc_scr[h] * inv_l                             # (td, Dh) f32
            if apply_elu:                                      # F.elu, alpha=1
                o = jnp.where(o > 0, o, jnp.exp(o) - 1.0)
            outs.append(o)
        feat = outs[0] if num_heads == 1 else jnp.concatenate(outs, axis=-1)
        if fuse_head:
            # F.normalize(p=2, dim=1) -> fc2 -> log_softmax, fused epilogue.
            nrm = jnp.sqrt(jnp.sum(feat * feat, axis=-1, keepdims=True))
            feat = feat / jnp.maximum(nrm, 1e-12)
            logits = jnp.dot(feat.astype(jnp.bfloat16),
                             wc_ref[...].astype(jnp.bfloat16),
                             preferred_element_type=jnp.float32) + bc_ref[...]
            mx = jnp.max(logits, axis=-1, keepdims=True)
            sh = logits - mx
            lse = jnp.log(jnp.sum(jnp.exp(sh), axis=-1, keepdims=True))
            out_ref[...] = (sh - lse).astype(out_ref.dtype)
        else:
            out_ref[...] = feat.astype(out_ref.dtype)


def gat_attention(s_dst, s_srcT, adj, z, *, head_dim, apply_elu,
                  head_weights=None, out_dtype=jnp.float32,
                  t_dst=128, t_src=128):
    """Masked multi-head attention aggregation.

    s_dst:(N,H) f32   s_srcT:(H,N) f32   adj:(N,N) int8 dst-major
    z:(N,H*Dh) bf16   -> (N, H*Dh)  or (N, C) when head_weights=(Wc, bc).
    """
    N = adj.shape[0]
    num_heads = s_srcT.shape[0]
    t_dst = min(t_dst, N)
    t_src = min(t_src, N)
    if N % t_dst:
        t_dst = N
    if N % t_src:
        t_src = N
    grid = (N // t_dst, N // t_src)

    in_specs = [
        pl.BlockSpec((t_dst, num_heads), lambda i, j: (i, 0)),
        pl.BlockSpec((num_heads, t_src), lambda i, j: (0, j)),
        pl.BlockSpec((t_dst, t_src), lambda i, j: (i, j)),      # int8 adj tile
        pl.BlockSpec((t_src, num_heads * head_dim), lambda i, j: (j, 0)),
    ]
    inputs = [s_dst, s_srcT, adj, z]

    fuse_head = head_weights is not None
    if fuse_head:
        Wc, bc = head_weights
        n_cls = Wc.shape[1]
        in_specs += [
            pl.BlockSpec((Wc.shape[0], n_cls), lambda i, j: (0, 0)),
            pl.BlockSpec((1, n_cls), lambda i, j: (0, 0)),
        ]
        inputs += [Wc, bc.reshape(1, n_cls)]
        out_dim = n_cls
    else:
        out_dim = num_heads * head_dim

    kernel = functools.partial(_gat_attn_kernel, num_heads=num_heads,
                               head_dim=head_dim, apply_elu=apply_elu,
                               fuse_head=fuse_head)
    return pl.pallas_call(
        kernel,
        out_shape=jax.ShapeDtypeStruct((N, out_dim), out_dtype),
        grid_spec=pltpu.PrefetchScalarGridSpec(
            num_scalar_prefetch=0,
            grid=grid,
            in_specs=in_specs,
            out_specs=pl.BlockSpec((t_dst, out_dim), lambda i, j: (i, 0)),
            scratch_shapes=[
                pltpu.VMEM((num_heads, t_dst, 1), jnp.float32),        # run max
                pltpu.VMEM((num_heads, t_dst, 1), jnp.float32),        # run den
                pltpu.VMEM((num_heads, t_dst, head_dim), jnp.float32),  # acc
            ]),
        compiler_params=pltpu.CompilerParams(
            dimension_semantics=("parallel", "arbitrary"),
            vmem_limit_bytes=_VMEM_LIMIT),
    )(*inputs)


# ---------------------------------------------------------------------------
# Full Gat.forward
# ---------------------------------------------------------------------------
def gat_forward(h, adj, params, *, num_heads, hidden_dim, out_dim,
                t_dst=128, t_src=128):
    # layer 1: all heads fused, ELU fused into the epilogue, output bf16.
    z1, s1 = gat_project(h, params["W1"], params["A1"])
    h1 = gat_attention(s1[:, num_heads:], jnp.transpose(s1[:, :num_heads]),
                       adj, z1, head_dim=hidden_dim, apply_elu=True,
                       out_dtype=jnp.bfloat16, t_dst=t_dst, t_src=t_src)
    # layer 2: single head; normalize + fc2 + log_softmax fused in epilogue.
    z2, s2 = gat_project(h1, params["W2"], params["A2"])
    return gat_attention(s2[:, 1:], jnp.transpose(s2[:, :1]),
                         adj, z2, head_dim=out_dim, apply_elu=False,
                         head_weights=(params["Wc"], params["bc"]),
                         out_dtype=jnp.float32, t_dst=t_dst, t_src=t_src)


# ---------------------------------------------------------------------------
# Pure-JAX reference (same math, same bf16-operand matmuls) for correctness
# ---------------------------------------------------------------------------
def _bf16_dot(a, b):
    return jnp.dot(a.astype(jnp.bfloat16), b.astype(jnp.bfloat16),
                   preferred_element_type=jnp.float32)


def _ref_gat_layer(h, W, A, adj, num_heads, head_dim, apply_elu):
    z = _bf16_dot(h, W)                            # (N, H*Dh)
    s = _bf16_dot(z, A)                            # (N, 2H): [src | dst]
    mask = adj != 0                                # (dst, src)
    outs = []
    for hd in range(num_heads):
        e = s[:, num_heads + hd][:, None] + s[:, hd][None, :]
        e = jnp.where(e > 0, e, 0.01 * e)
        e = jnp.where(mask, e, _NEG)
        m = jnp.max(e, axis=-1, keepdims=True)
        p = jnp.where(mask, jnp.exp(e - m), 0.0)
        l = jnp.maximum(jnp.sum(p, axis=-1, keepdims=True), 1e-30)
        o = _bf16_dot(p, z[:, hd * head_dim:(hd + 1) * head_dim]) / l
        if apply_elu:
            o = jnp.where(o > 0, o, jnp.exp(o) - 1.0)
        outs.append(o)
    return outs[0] if num_heads == 1 else jnp.concatenate(outs, axis=-1)


def _ref_forward(h, adj, params, *, num_heads, hidden_dim, out_dim):
    h1 = _ref_gat_layer(h, params["W1"], params["A1"], adj,
                        num_heads, hidden_dim, True)
    h2 = _ref_gat_layer(h1, params["W2"], params["A2"], adj, 1, out_dim, False)
    nrm = jnp.maximum(jnp.sqrt(jnp.sum(h2 * h2, axis=-1, keepdims=True)), 1e-12)
    logits = _bf16_dot(h2 / nrm, params["Wc"]) + params["bc"][None, :]
    return jax.nn.log_softmax(logits, axis=-1)


# ---------------------------------------------------------------------------
# Parameter init (xavier_normal with gain=sqrt(2) for GAT weights) and graph
# ---------------------------------------------------------------------------
def _xavier_normal(key, shape, gain):
    fan_in, fan_out = shape
    std = gain * (2.0 / (fan_in + fan_out)) ** 0.5
    return std * jax.random.normal(key, shape, dtype=jnp.float32)


def _stack_attn_vectors(a_list, head_dim):
    """[(2*Dh,)]*H -> block-diagonal (H*Dh, 2H): col h = a_src_h, col H+h = a_dst_h."""
    H = len(a_list)
    A = jnp.zeros((H * head_dim, 2 * H), jnp.float32)
    for h, a in enumerate(a_list):
        A = A.at[h * head_dim:(h + 1) * head_dim, h].set(a[:head_dim])
        A = A.at[h * head_dim:(h + 1) * head_dim, H + h].set(a[head_dim:])
    return A


def init_params(key, in_dim, hidden_dim, out_dim, num_heads, num_cluster):
    gain = 2.0 ** 0.5  # nn.init.calculate_gain('relu')
    keys = jax.random.split(key, 2 * num_heads + 4)
    W1_heads, a1_heads = [], []
    for i in range(num_heads):
        W1_heads.append(_xavier_normal(keys[2 * i], (in_dim, hidden_dim), gain))
        a1_heads.append(
            _xavier_normal(keys[2 * i + 1], (2 * hidden_dim, 1), gain)[:, 0])
    W2 = _xavier_normal(keys[-4], (hidden_dim * num_heads, out_dim), gain)
    a2 = _xavier_normal(keys[-3], (2 * out_dim, 1), gain)[:, 0]
    # fc2: default nn.Linear init is uniform; deterministic normal is fine here.
    Wc = 0.1 * jax.random.normal(keys[-2], (out_dim, num_cluster), jnp.float32)
    bc = 0.1 * jax.random.normal(keys[-1], (num_cluster,), jnp.float32)
    return {
        "W1": jnp.concatenate(W1_heads, axis=1),           # (Din, H*Dh)
        "A1": _stack_attn_vectors(a1_heads, hidden_dim),   # (H*Dh, 2H)
        "W2": W2,                                          # (H*Dh, Dout)
        "A2": _stack_attn_vectors([a2], out_dim),          # (Dout, 2)
        "Wc": Wc,                                          # (Dout, C)
        "bc": bc,                                          # (C,)
    }


def build_graph(n_nodes):
    """Deterministic synthetic graph, dst-major int8: self-loops + ring + skip-3."""
    idx = jnp.arange(n_nodes)
    adj = jnp.zeros((n_nodes, n_nodes), dtype=jnp.int8)
    adj = adj.at[idx, idx].set(1)                    # self-loops
    adj = adj.at[(idx + 1) % n_nodes, idx].set(1)    # u -> u+1
    adj = adj.at[(idx + 3) % n_nodes, idx].set(1)    # u -> u+3
    return adj


# ---------------------------------------------------------------------------
if __name__ == "__main__":
    N, IN_DIM, HIDDEN, OUT_DIM, HEADS, CLUSTERS = 256, 64, 64, 64, 2, 8

    key = jax.random.PRNGKey(0)
    k_h, k_p = jax.random.split(key)
    h = jax.random.normal(k_h, (N, IN_DIM), dtype=jnp.float32)
    adj = build_graph(N)
    params = init_params(k_p, IN_DIM, HIDDEN, OUT_DIM, HEADS, CLUSTERS)

    fwd = jax.jit(functools.partial(gat_forward, num_heads=HEADS,
                                    hidden_dim=HIDDEN, out_dim=OUT_DIM))
    out = jax.block_until_ready(fwd(h, adj, params))
    ref = jax.block_until_ready(
        _ref_forward(h, adj, params, num_heads=HEADS, hidden_dim=HIDDEN,
                     out_dim=OUT_DIM))

    assert out.shape == (N, CLUSTERS), out.shape
    assert bool(jnp.all(jnp.isfinite(out)))
    max_err = float(jnp.max(jnp.abs(out - ref)))
    assert bool(jnp.allclose(out, ref, atol=2e-2, rtol=2e-2)), max_err
    # rows of log_softmax should exp-sum to 1
    assert bool(jnp.allclose(jnp.sum(jnp.exp(out), axis=1), 1.0, atol=1e-3))

    print("KERNEL_OK")
</pallas_src>

<mosaic_0001>
module attributes {stable_mosaic.version = 11 : i64} {
  func.func @_gat_project_kernel(%arg0: i32, %arg1: memref<128x64xf32, #tpu.memory_space<vmem>>, %arg2: memref<64x128xf32, #tpu.memory_space<vmem>>, %arg3: memref<128x4xf32, #tpu.memory_space<vmem>>, %arg4: memref<128x128xbf16, #tpu.memory_space<vmem>>, %arg5: memref<128x4xf32, #tpu.memory_space<vmem>>) attributes {dimension_semantics = [#tpu.dimension_semantics<parallel>], iteration_bounds = array<i64: 2>, scalar_prefetch = 0 : i64, scratch_operands = 0 : i64, tpu.core_type = #tpu.core_type<tc>, window_params = [{transform_indices = @transform_0, window_bounds = array<i64: 128, 64>}, {pipeline_mode = #tpu.pipeline_mode<synchronous>, transform_indices = @transform_1, window_bounds = array<i64: 64, 128>}, {pipeline_mode = #tpu.pipeline_mode<synchronous>, transform_indices = @transform_2, window_bounds = array<i64: 128, 4>}, {transform_indices = @transform_3, window_bounds = array<i64: 128, 128>}, {transform_indices = @transform_4, window_bounds = array<i64: 128, 4>}]} {
    %c0 = arith.constant 0 : index
    %c0_0 = arith.constant 0 : index
    %0 = vector.load %arg1[%c0, %c0_0] : memref<128x64xf32, #tpu.memory_space<vmem>>, vector<128x64xf32>
    %1 = arith.truncf %0 : vector<128x64xf32> to vector<128x64xbf16>
    %c0_1 = arith.constant 0 : index
    %c0_2 = arith.constant 0 : index
    %2 = vector.load %arg2[%c0_1, %c0_2] : memref<64x128xf32, #tpu.memory_space<vmem>>, vector<64x128xf32>
    %3 = arith.truncf %2 : vector<64x128xf32> to vector<64x128xbf16>
    %cst = arith.constant dense<0.000000e+00> : vector<128x128xf32>
    %4 = tpu.matmul %1, %3, %cst {dimension_numbers = #tpu.dot_dimension_numbers<[1], [0], [0], [1], [0, 0, 1, 1], [], []>} : vector<128x64xbf16>, vector<64x128xbf16>, vector<128x128xf32> -> vector<128x128xf32>
    %5 = arith.truncf %4 : vector<128x128xf32> to vector<128x128xbf16>
    %c0_3 = arith.constant 0 : index
    %c0_4 = arith.constant 0 : index
    %6 = vector.load %arg4[%c0_3, %c0_4] : memref<128x128xbf16, #tpu.memory_space<vmem>>, vector<128x128xbf16>
    tpu.vector_store %arg4[%c0_3, %c0_4], %5 {strides = array<i32>} : memref<128x128xbf16, #tpu.memory_space<vmem>>, vector<128x128xbf16>,
    %7 = arith.truncf %4 : vector<128x128xf32> to vector<128x128xbf16>
    %c0_5 = arith.constant 0 : index
    %c0_6 = arith.constant 0 : index
    %8 = vector.load %arg3[%c0_5, %c0_6] : memref<128x4xf32, #tpu.memory_space<vmem>>, vector<128x4xf32>
    %9 = arith.truncf %8 : vector<128x4xf32> to vector<128x4xbf16>
    %cst_7 = arith.constant dense<0.000000e+00> : vector<128x4xf32>
    %10 = tpu.matmul %7, %9, %cst_7 {dimension_numbers = #tpu.dot_dimension_numbers<[1], [0], [0], [1], [0, 0, 1, 1], [], []>} : vector<128x128xbf16>, vector<128x4xbf16>, vector<128x4xf32> -> vector<128x4xf32>
    %c0_8 = arith.constant 0 : index
    %c0_9 = arith.constant 0 : index
    %11 = vector.load %arg5[%c0_8, %c0_9] : memref<128x4xf32, #tpu.memory_space<vmem>>, vector<128x4xf32>
    tpu.vector_store %arg5[%c0_8, %c0_9], %10 {strides = array<i32>} : memref<128x4xf32, #tpu.memory_space<vmem>>, vector<128x4xf32>,
    return
  }
  func.func @transform_0(%arg0: i32) -> (i32, i32) {
    %c0_i32 = arith.constant 0 : i32
    %c0_i32_0 = arith.constant 0 : i32
    return %arg0, %c0_i32 : i32, i32
  }
  func.func @transform_1(%arg0: i32) -> (i32, i32) {
    %c0_i32 = arith.constant 0 : i32
    %c0_i32_0 = arith.constant 0 : i32
    %c0_i32_1 = arith.constant 0 : i32
    return %c0_i32, %c0_i32_0 : i32, i32
  }
  func.func @transform_2(%arg0: i32) -> (i32, i32) {
    %c0_i32 = arith.constant 0 : i32
    %c0_i32_0 = arith.constant 0 : i32
    %c0_i32_1 = arith.constant 0 : i32
    return %c0_i32, %c0_i32_0 : i32, i32
  }
  func.func @transform_3(%arg0: i32) -> (i32, i32) {
    %c0_i32 = arith.constant 0 : i32
    %c0_i32_0 = arith.constant 0 : i32
    return %arg0, %c0_i32 : i32, i32
  }
  func.func @transform_4(%arg0: i32) -> (i32, i32) {
    %c0_i32 = arith.constant 0 : i32
    %c0_i32_0 = arith.constant 0 : i32
    return %arg0, %c0_i32 : i32, i32
  }
}

module attributes {stable_mosaic.version = 11 : i64} {
  func.func @_gat_attn_kernel(%arg0: i32, %arg1: i32, %arg2: memref<128x2xf32, #tpu.memory_space<vmem>>, %arg3: memref<2x128xf32, #tpu.memory_space<vmem>>, %arg4: memref<128x128xi8, #tpu.memory_space<vmem>>, %arg5: memref<128x128xbf16, #tpu.memory_space<vmem>>, %arg6: memref<128x128xbf16, #tpu.memory_space<vmem>>, %arg7: memref<2x128x1xf32, #tpu.memory_space<vmem>>, %arg8: memref<2x128x1xf32, #tpu.memory_space<vmem>>, %arg9: memref<2x128x64xf32, #tpu.memory_space<vmem>>) attributes {dimension_semantics = [#tpu.dimension_semantics<parallel>, #tpu.dimension_semantics<arbitrary>], iteration_bounds = array<i64: 2, 2>, scalar_prefetch = 0 : i64, scratch_operands = 3 : i64, tpu.core_type = #tpu.core_type<tc>, window_params = [{transform_indices = @transform_0, window_bounds = array<i64: 128, 2>}, {transform_indices = @transform_1, window_bounds = array<i64: 2, 128>}, {transform_indices = @transform_2, window_bounds = array<i64: 128, 128>}, {transform_indices = @transform_3, window_bounds = array<i64: 128, 128>}, {transform_indices = @transform_4, window_bounds = array<i64: 128, 128>}]} {
    %c0_i32 = arith.constant 0 : i32
    %0 = arith.cmpi eq, %arg1, %c0_i32 : i32
    %1 = arith.extui %0 : i1 to i32
    %c0_i32_0 = arith.constant 0 : i32
    %2 = arith.cmpi ne, %1, %c0_i32_0 : i32
    scf.if %2 {
      %cst_57 = arith.constant -1.000000e+30 : f32
      %106 = vector.broadcast %cst_57 : f32 to vector<2x128x1xf32>
      %c0_58 = arith.constant 0 : index
      %c0_59 = arith.constant 0 : index
      %c0_60 = arith.constant 0 : index
      %107 = vector.load %arg7[%c0_58, %c0_59, %c0_60] : memref<2x128x1xf32, #tpu.memory_space<vmem>>, vector<2x128x1xf32>
      tpu.vector_store %arg7[%c0_58, %c0_59, %c0_60], %106 {strides = array<i32>} : memref<2x128x1xf32, #tpu.memory_space<vmem>>, vector<2x128x1xf32>,
      %cst_61 = arith.constant 0.000000e+00 : f32
      %108 = vector.broadcast %cst_61 : f32 to vector<2x128x1xf32>
      %c0_62 = arith.constant 0 : index
      %c0_63 = arith.constant 0 : index
      %c0_64 = arith.constant 0 : index
      %109 = vector.load %arg8[%c0_62, %c0_63, %c0_64] : memref<2x128x1xf32, #tpu.memory_space<vmem>>, vector<2x128x1xf32>
      tpu.vector_store %arg8[%c0_62, %c0_63, %c0_64], %108 {strides = array<i32>} : memref<2x128x1xf32, #tpu.memory_space<vmem>>, vector<2x128x1xf32>,
      %cst_65 = arith.constant 0.000000e+00 : f32
      %110 = vector.broadcast %cst_65 : f32 to vector<2x128x64xf32>
      %c0_66 = arith.constant 0 : index
      %c0_67 = arith.constant 0 : index
      %c0_68 = arith.constant 0 : index
      %111 = vector.load %arg9[%c0_66, %c0_67, %c0_68] : memref<2x128x64xf32, #tpu.memory_space<vmem>>, vector<2x128x64xf32>
      tpu.vector_store %arg9[%c0_66, %c0_67, %c0_68], %110 {strides = array<i32>} : memref<2x128x64xf32, #tpu.memory_space<vmem>>, vector<2x128x64xf32>,
    } else {
    }
    %c0 = arith.constant 0 : index
    %c0_1 = arith.constant 0 : index
    %3 = vector.load %arg4[%c0, %c0_1] : memref<128x128xi8, #tpu.memory_space<vmem>>, vector<128x128xi8>
    %c0_i8 = arith.constant 0 : i8
    %4 = vector.broadcast %c0_i8 : i8 to vector<128x128xi8>
    %5 = arith.cmpi ne, %3, %4 : vector<128x128xi8>
    %c0_2 = arith.constant 0 : index
    %c0_3 = arith.constant 0 : index
    %6 = vector.load %arg5[%c0_2, %c0_3] : memref<128x128xbf16, #tpu.memory_space<vmem>>, vector<128x128xbf16>
    %c0_4 = arith.constant 0 : index
    %c0_5 = arith.constant 0 : index
    %7 = vector.load %arg2[%c0_4, %c0_5] : memref<128x2xf32, #tpu.memory_space<vmem>>, vector<128x2xf32>
    %c0_6 = arith.constant 0 : index
    %c0_7 = arith.constant 0 : index
    %8 = vector.load %arg3[%c0_6, %c0_7] : memref<2x128xf32, #tpu.memory_space<vmem>>, vector<2x128xf32>
    %9 = vector.extract_strided_slice %7 {offsets = [0, 0], sizes = [128, 1], strides = [1, 1]} : vector<128x2xf32> to vector<128x1xf32>
    %10 = vector.extract_strided_slice %8 {offsets = [0, 0], sizes = [1, 128], strides = [1, 1]} : vector<2x128xf32> to vector<1x128xf32>
    %11 = vector.broadcast %9 : vector<128x1xf32> to vector<128x128xf32>
    %12 = vector.broadcast %10 : vector<1x128xf32> to vector<128x128xf32>
    %13 = arith.addf %11, %12 : vector<128x128xf32>
    %cst = arith.constant 0.000000e+00 : f32
    %14 = vector.broadcast %cst : f32 to vector<128x128xf32>
    %15 = arith.cmpf ogt, %13, %14 : vector<128x128xf32>
    %cst_8 = arith.constant 0.00999999977 : f32
    %16 = vector.broadcast %cst_8 : f32 to vector<128x128xf32>
    %17 = arith.mulf %16, %13 : vector<128x128xf32>
    %18 = arith.select %15, %13, %17 : vector<128x128xi1>, vector<128x128xf32>
    %cst_9 = arith.constant -1.000000e+30 : f32
    %19 = vector.broadcast %cst_9 : f32 to vector<128x128xf32>
    %20 = arith.select %5, %18, %19 : vector<128x128xi1>, vector<128x128xf32>
    %c0_10 = arith.constant 0 : index
    %c0_11 = arith.constant 0 : index
    %c0_12 = arith.constant 0 : index
    %21 = vector.load %arg7[%c0_10, %c0_11, %c0_12] : memref<2x128x1xf32, #tpu.memory_space<vmem>>, vector<1x128x1xf32>
    %22 = vector.shape_cast %21 : vector<1x128x1xf32> to vector<128x1xf32>
    %cst_13 = arith.constant dense<0xFF800000> : vector<128xf32>
    %23 = vector.multi_reduction <maximumf>, %20, %cst_13 [1] : vector<128x128xf32> to vector<128xf32>
    %24 = vector.shape_cast %23 : vector<128xf32> to vector<128x1xf32>
    %25 = arith.maximumf %22, %24 : vector<128x1xf32>
    %26 = vector.broadcast %25 : vector<128x1xf32> to vector<128x128xf32>
    %27 = arith.subf %20, %26 : vector<128x128xf32>
    %28 = math.exp %27 : vector<128x128xf32>
    %cst_14 = arith.constant 0.000000e+00 : f32
    %29 = vector.broadcast %cst_14 : f32 to vector<128x128xf32>
    %30 = arith.select %5, %28, %29 : vector<128x128xi1>, vector<128x128xf32>
    %31 = arith.subf %22, %25 : vector<128x1xf32>
    %32 = math.exp %31 : vector<128x1xf32>
    %c0_15 = arith.constant 0 : index
    %c0_16 = arith.constant 0 : index
    %c0_17 = arith.constant 0 : index
    %33 = vector.load %arg8[%c0_15, %c0_16, %c0_17] : memref<2x128x1xf32, #tpu.memory_space<vmem>>, vector<1x128x1xf32>
    %34 = vector.shape_cast %33 : vector<1x128x1xf32> to vector<128x1xf32>
    %35 = arith.mulf %32, %34 : vector<128x1xf32>
    %cst_18 = arith.constant dense<0.000000e+00> : vector<128xf32>
    %36 = vector.multi_reduction <add>, %30, %cst_18 [1] : vector<128x128xf32> to vector<128xf32>
    %37 = vector.shape_cast %36 : vector<128xf32> to vector<128x1xf32>
    %38 = arith.addf %35, %37 : vector<128x1xf32>
    %c0_19 = arith.constant 0 : index
    %c0_20 = arith.constant 0 : index
    %c0_21 = arith.constant 0 : index
    %39 = vector.load %arg8[%c0_19, %c0_20, %c0_21] : memref<2x128x1xf32, #tpu.memory_space<vmem>>, vector<1x128x1xf32>
    %40 = vector.shape_cast %39 : vector<1x128x1xf32> to vector<128x1xf32>
    %41 = vector.shape_cast %38 : vector<128x1xf32> to vector<1x128x1xf32>
    tpu.vector_store %arg8[%c0_19, %c0_20, %c0_21], %41 {strides = array<i32>} : memref<2x128x1xf32, #tpu.memory_space<vmem>>, vector<1x128x1xf32>,
    %42 = vector.extract_strided_slice %6 {offsets = [0, 0], sizes = [128, 64], strides = [1, 1]} : vector<128x128xbf16> to vector<128x64xbf16>
    %c0_22 = arith.constant 0 : index
    %c0_23 = arith.constant 0 : index
    %c0_24 = arith.constant 0 : index
    %43 = vector.load %arg9[%c0_22, %c0_23, %c0_24] : memref<2x128x64xf32, #tpu.memory_space<vmem>>, vector<1x128x64xf32>
    %44 = vector.shape_cast %43 : vector<1x128x64xf32> to vector<128x64xf32>
    %45 = vector.broadcast %32 : vector<128x1xf32> to vector<128x64xf32>
    %46 = arith.mulf %45, %44 : vector<128x64xf32>
    %47 = arith.truncf %30 : vector<128x128xf32> to vector<128x128xbf16>
    %cst_25 = arith.constant dense<0.000000e+00> : vector<128x64xf32>
    %48 = tpu.matmul %47, %42, %cst_25 {dimension_numbers = #tpu.dot_dimension_numbers<[1], [0], [0], [1], [0, 0, 1, 1], [], []>} : vector<128x128xbf16>, vector<128x64xbf16>, vector<128x64xf32> -> vector<128x64xf32>
    %49 = arith.addf %46, %48 : vector<128x64xf32>
    %c0_26 = arith.constant 0 : index
    %c0_27 = arith.constant 0 : index
    %c0_28 = arith.constant 0 : index
    %50 = vector.load %arg9[%c0_26, %c0_27, %c0_28] : memref<2x128x64xf32, #tpu.memory_space<vmem>>, vector<1x128x64xf32>
    %51 = vector.shape_cast %50 : vector<1x128x64xf32> to vector<128x64xf32>
    %52 = vector.shape_cast %49 : vector<128x64xf32> to vector<1x128x64xf32>
    tpu.vector_store %arg9[%c0_26, %c0_27, %c0_28], %52 {strides = array<i32>} : memref<2x128x64xf32, #tpu.memory_space<vmem>>, vector<1x128x64xf32>,
    %c0_29 = arith.constant 0 : index
    %c0_30 = arith.constant 0 : index
    %c0_31 = arith.constant 0 : index
    %53 = vector.load %arg7[%c0_29, %c0_30, %c0_31] : memref<2x128x1xf32, #tpu.memory_space<vmem>>, vector<1x128x1xf32>
    %54 = vector.shape_cast %53 : vector<1x128x1xf32> to vector<128x1xf32>
    %55 = vector.shape_cast %25 : vector<128x1xf32> to vector<1x128x1xf32>
    tpu.vector_store %arg7[%c0_29, %c0_30, %c0_31], %55 {strides = array<i32>} : memref<2x128x1xf32, #tpu.memory_space<vmem>>, vector<1x128x1xf32>,
    %56 = vector.extract_strided_slice %7 {offsets = [0, 1], sizes = [128, 1], strides = [1, 1]} : vector<128x2xf32> to vector<128x1xf32>
    %57 = vector.extract_strided_slice %8 {offsets = [1, 0], sizes = [1, 128], strides = [1, 1]} : vector<2x128xf32> to vector<1x128xf32>
    %58 = vector.broadcast %56 : vector<128x1xf32> to vector<128x128xf32>
    %59 = vector.broadcast %57 : vector<1x128xf32> to vector<128x128xf32>
    %60 = arith.addf %58, %59 : vector<128x128xf32>
    %cst_32 = arith.constant 0.000000e+00 : f32
    %61 = vector.broadcast %cst_32 : f32 to vector<128x128xf32>
    %62 = arith.cmpf ogt, %60, %61 : vector<128x128xf32>
    %cst_33 = arith.constant 0.00999999977 : f32
    %63 = vector.broadcast %cst_33 : f32 to vector<128x128xf32>
    %64 = arith.mulf %63, %60 : vector<128x128xf32>
    %65 = arith.select %62, %60, %64 : vector<128x128xi1>, vector<128x128xf32>
    %cst_34 = arith.constant -1.000000e+30 : f32
    %66 = vector.broadcast %cst_34 : f32 to vector<128x128xf32>
    %67 = arith.select %5, %65, %66 : vector<128x128xi1>, vector<128x128xf32>
    %c1 = arith.constant 1 : index
    %c0_35 = arith.constant 0 : index
    %c0_36 = arith.constant 0 : index
    %68 = vector.load %arg7[%c1, %c0_35, %c0_36] : memref<2x128x1xf32, #tpu.memory_space<vmem>>, vector<1x128x1xf32>
    %69 = vector.shape_cast %68 : vector<1x128x1xf32> to vector<128x1xf32>
    %cst_37 = arith.constant dense<0xFF800000> : vector<128xf32>
    %70 = vector.multi_reduction <maximumf>, %67, %cst_37 [1] : vector<128x128xf32> to vector<128xf32>
    %71 = vector.shape_cast %70 : vector<128xf32> to vector<128x1xf32>
    %72 = arith.maximumf %69, %71 : vector<128x1xf32>
    %73 = vector.broadcast %72 : vector<128x1xf32> to vector<128x128xf32>
    %74 = arith.subf %67, %73 : vector<128x128xf32>
    %75 = math.exp %74 : vector<128x128xf32>
    %cst_38 = arith.constant 0.000000e+00 : f32
    %76 = vector.broadcast %cst_38 : f32 to vector<128x128xf32>
    %77 = arith.select %5, %75, %76 : vector<128x128xi1>, vector<128x128xf32>
    %78 = arith.subf %69, %72 : vector<128x1xf32>
    %79 = math.exp %78 : vector<128x1xf32>
    %c1_39 = arith.constant 1 : index
    %c0_40 = arith.constant 0 : index
    %c0_41 = arith.constant 0 : index
    %80 = vector.load %arg8[%c1_39, %c0_40, %c0_41] : memref<2x128x1xf32, #tpu.memory_space<vmem>>, vector<1x128x1xf32>
    %81 = vector.shape_cast %80 : vector<1x128x1xf32> to vector<128x1xf32>
    %82 = arith.mulf %79, %81 : vector<128x1xf32>
    %cst_42 = arith.constant dense<0.000000e+00> : vector<128xf32>
    %83 = vector.multi_reduction <add>, %77, %cst_42 [1] : vector<128x128xf32> to vector<128xf32>
    %84 = vector.shape_cast %83 : vector<128xf32> to vector<128x1xf32>
    %85 = arith.addf %82, %84 : vector<128x1xf32>
    %c1_43 = arith.constant 1 : index
    %c0_44 = arith.constant 0 : index
    %c0_45 = arith.constant 0 : index
    %86 = vector.load %arg8[%c1_43, %c0_44, %c0_45] : memref<2x128x1xf32, #tpu.memory_space<vmem>>, vector<1x128x1xf32>
    %87 = vector.shape_cast %86 : vector<1x128x1xf32> to vector<128x1xf32>
    %88 = vector.shape_cast %85 : vector<128x1xf32> to vector<1x128x1xf32>
    tpu.vector_store %arg8[%c1_43, %c0_44, %c0_45], %88 {strides = array<i32>} : memref<2x128x1xf32, #tpu.memory_space<vmem>>, vector<1x128x1xf32>,
    %89 = vector.extract_strided_slice %6 {offsets = [0, 64], sizes = [128, 64], strides = [1, 1]} : vector<128x128xbf16> to vector<128x64xbf16>
    %c1_46 = arith.constant 1 : index
    %c0_47 = arith.constant 0 : index
    %c0_48 = arith.constant 0 : index
    %90 = vector.load %arg9[%c1_46, %c0_47, %c0_48] : memref<2x128x64xf32, #tpu.memory_space<vmem>>, vector<1x128x64xf32>
    %91 = vector.shape_cast %90 : vector<1x128x64xf32> to vector<128x64xf32>
    %92 = vector.broadcast %79 : vector<128x1xf32> to vector<128x64xf32>
    %93 = arith.mulf %92, %91 : vector<128x64xf32>
    %94 = arith.truncf %77 : vector<128x128xf32> to vector<128x128xbf16>
    %cst_49 = arith.constant dense<0.000000e+00> : vector<128x64xf32>
    %95 = tpu.matmul %94, %89, %cst_49 {dimension_numbers = #tpu.dot_dimension_numbers<[1], [0], [0], [1], [0, 0, 1, 1], [], []>} : vector<128x128xbf16>, vector<128x64xbf16>, vector<128x64xf32> -> vector<128x64xf32>
    %96 = arith.addf %93, %95 : vector<128x64xf32>
    %c1_50 = arith.constant 1 : index
    %c0_51 = arith.constant 0 : index
    %c0_52 = arith.constant 0 : index
    %97 = vector.load %arg9[%c1_50, %c0_51, %c0_52] : memref<2x128x64xf32, #tpu.memory_space<vmem>>, vector<1x128x64xf32>
    %98 = vector.shape_cast %97 : vector<1x128x64xf32> to vector<128x64xf32>
    %99 = vector.shape_cast %96 : vector<128x64xf32> to vector<1x128x64xf32>
    tpu.vector_store %arg9[%c1_50, %c0_51, %c0_52], %99 {strides = array<i32>} : memref<2x128x64xf32, #tpu.memory_space<vmem>>, vector<1x128x64xf32>,
    %c1_53 = arith.constant 1 : index
    %c0_54 = arith.constant 0 : index
    %c0_55 = arith.constant 0 : index
    %100 = vector.load %arg7[%c1_53, %c0_54, %c0_55] : memref<2x128x1xf32, #tpu.memory_space<vmem>>, vector<1x128x1xf32>
    %101 = vector.shape_cast %100 : vector<1x128x1xf32> to vector<128x1xf32>
    %102 = vector.shape_cast %72 : vector<128x1xf32> to vector<1x128x1xf32>
    tpu.vector_store %arg7[%c1_53, %c0_54, %c0_55], %102 {strides = array<i32>} : memref<2x128x1xf32, #tpu.memory_space<vmem>>, vector<1x128x1xf32>,
    %c1_i32 = arith.constant 1 : i32
    %103 = arith.cmpi eq, %arg1, %c1_i32 : i32
    %104 = arith.extui %103 : i1 to i32
    %c0_i32_56 = arith.constant 0 : i32
    %105 = arith.cmpi ne, %104, %c0_i32_56 : i32
    scf.if %105 {
      %c0_57 = arith.constant 0 : index
      %c0_58 = arith.constant 0 : index
      %c0_59 = arith.constant 0 : index
      %106 = vector.load %arg8[%c0_57, %c0_58, %c0_59] : memref<2x128x1xf32, #tpu.memory_space<vmem>>, vector<1x128x1xf32>
      %107 = vector.shape_cast %106 : vector<1x128x1xf32> to vector<128x1xf32>
      %cst_60 = arith.constant 1.000000e-30 : f32
      %108 = vector.broadcast %cst_60 : f32 to vector<128x1xf32>
      %109 = arith.maximumf %107, %108 : vector<128x1xf32>
      %cst_61 = arith.constant 1.000000e+00 : f32
      %110 = vector.broadcast %cst_61 : f32 to vector<128x1xf32>
      %111 = arith.divf %110, %109 : vector<128x1xf32>
      %c0_62 = arith.constant 0 : index
      %c0_63 = arith.constant 0 : index
      %c0_64 = arith.constant 0 : index
      %112 = vector.load %arg9[%c0_62, %c0_63, %c0_64] : memref<2x128x64xf32, #tpu.memory_space<vmem>>, vector<1x128x64xf32>
      %113 = vector.shape_cast %112 : vector<1x128x64xf32> to vector<128x64xf32>
      %114 = vector.broadcast %111 : vector<128x1xf32> to vector<128x64xf32>
      %115 = arith.mulf %113, %114 : vector<128x64xf32>
      %cst_65 = arith.constant 0.000000e+00 : f32
      %116 = vector.broadcast %cst_65 : f32 to vector<128x64xf32>
      %117 = arith.cmpf ogt, %115, %116 : vector<128x64xf32>
      %118 = math.exp %115 : vector<128x64xf32>
      %cst_66 = arith.constant 1.000000e+00 : f32
      %119 = vector.broadcast %cst_66 : f32 to vector<128x64xf32>
      %120 = arith.subf %118, %119 : vector<128x64xf32>
      %121 = arith.select %117, %115, %120 : vector<128x64xi1>, vector<128x64xf32>
      %c1_67 = arith.constant 1 : index
      %c0_68 = arith.constant 0 : index
      %c0_69 = arith.constant 0 : index
      %122 = vector.load %arg8[%c1_67, %c0_68, %c0_69] : memref<2x128x1xf32, #tpu.memory_space<vmem>>, vector<1x128x1xf32>
      %123 = vector.shape_cast %122 : vector<1x128x1xf32> to vector<128x1xf32>
      %cst_70 = arith.constant 1.000000e-30 : f32
      %124 = vector.broadcast %cst_70 : f32 to vector<128x1xf32>
      %125 = arith.maximumf %123, %124 : vector<128x1xf32>
      %cst_71 = arith.constant 1.000000e+00 : f32
      %126 = vector.broadcast %cst_71 : f32 to vector<128x1xf32>
      %127 = arith.divf %126, %125 : vector<128x1xf32>
      %c1_72 = arith.constant 1 : index
      %c0_73 = arith.constant 0 : index
      %c0_74 = arith.constant 0 : index
      %128 = vector.load %arg9[%c1_72, %c0_73, %c0_74] : memref<2x128x64xf32, #tpu.memory_space<vmem>>, vector<1x128x64xf32>
      %129 = vector.shape_cast %128 : vector<1x128x64xf32> to vector<128x64xf32>
      %130 = vector.broadcast %127 : vector<128x1xf32> to vector<128x64xf32>
      %131 = arith.mulf %129, %130 : vector<128x64xf32>
      %cst_75 = arith.constant 0.000000e+00 : f32
      %132 = vector.broadcast %cst_75 : f32 to vector<128x64xf32>
      %133 = arith.cmpf ogt, %131, %132 : vector<128x64xf32>
      %134 = math.exp %131 : vector<128x64xf32>
      %cst_76 = arith.constant 1.000000e+00 : f32
      %135 = vector.broadcast %cst_76 : f32 to vector<128x64xf32>
      %136 = arith.subf %134, %135 : vector<128x64xf32>
      %137 = arith.select %133, %131, %136 : vector<128x64xi1>, vector<128x64xf32>
      %138 = tpu.concatenate %121, %137 in 1 : vector<128x64xf32>, vector<128x64xf32> -> vector<128x128xf32>
      %139 = arith.truncf %138 : vector<128x128xf32> to vector<128x128xbf16>
      %c0_77 = arith.constant 0 : index
      %c0_78 = arith.constant 0 : index
      %140 = vector.load %arg6[%c0_77, %c0_78] : memref<128x128xbf16, #tpu.memory_space<vmem>>, vector<128x128xbf16>
      tpu.vector_store %arg6[%c0_77, %c0_78], %139 {strides = array<i32>} : memref<128x128xbf16, #tpu.memory_space<vmem>>, vector<128x128xbf16>,
    } else {
    }
    return
  }
  func.func @transform_0(%arg0: i32, %arg1: i32) -> (i32, i32) {
    %c0_i32 = arith.constant 0 : i32
    %c0_i32_0 = arith.constant 0 : i32
    return %arg0, %c0_i32 : i32, i32
  }
  func.func @transform_1(%arg0: i32, %arg1: i32) -> (i32, i32) {
    %c0_i32 = arith.constant 0 : i32
    %c0_i32_0 = arith.constant 0 : i32
    return %c0_i32, %arg1 : i32, i32
  }
  func.func @transform_2(%arg0: i32, %arg1: i32) -> (i32, i32) {
    %c0_i32 = arith.constant 0 : i32
    return %arg0, %arg1 : i32, i32
  }
  func.func @transform_3(%arg0: i32, %arg1: i32) -> (i32, i32) {
    %c0_i32 = arith.constant 0 : i32
    %c0_i32_0 = arith.constant 0 : i32
    return %arg1, %c0_i32 : i32, i32
  }
  func.func @transform_4(%arg0: i32, %arg1: i32) -> (i32, i32) {
    %c0_i32 = arith.constant 0 : i32
    %c0_i32_0 = arith.constant 0 : i32
    return %arg0, %c0_i32 : i32, i32
  }
}

module attributes {stable_mosaic.version = 11 : i64} {
  func.func @_gat_project_kernel(%arg0: i32, %arg1: memref<128x128xbf16, #tpu.memory_space<vmem>>, %arg2: memref<128x64xf32, #tpu.memory_space<vmem>>, %arg3: memref<64x2xf32, #tpu.memory_space<vmem>>, %arg4: memref<128x64xbf16, #tpu.memory_space<vmem>>, %arg5: memref<128x2xf32, #tpu.memory_space<vmem>>) attributes {dimension_semantics = [#tpu.dimension_semantics<parallel>], iteration_bounds = array<i64: 2>, scalar_prefetch = 0 : i64, scratch_operands = 0 : i64, tpu.core_type = #tpu.core_type<tc>, window_params = [{transform_indices = @transform_0, window_bounds = array<i64: 128, 128>}, {pipeline_mode = #tpu.pipeline_mode<synchronous>, transform_indices = @transform_1, window_bounds = array<i64: 128, 64>}, {pipeline_mode = #tpu.pipeline_mode<synchronous>, transform_indices = @transform_2, window_bounds = array<i64: 64, 2>}, {transform_indices = @transform_3, window_bounds = array<i64: 128, 64>}, {transform_indices = @transform_4, window_bounds = array<i64: 128, 2>}]} {
    %c0 = arith.constant 0 : index
    %c0_0 = arith.constant 0 : index
    %0 = vector.load %arg1[%c0, %c0_0] : memref<128x128xbf16, #tpu.memory_space<vmem>>, vector<128x128xbf16>
    %c0_1 = arith.constant 0 : index
    %c0_2 = arith.constant 0 : index
    %1 = vector.load %arg2[%c0_1, %c0_2] : memref<128x64xf32, #tpu.memory_space<vmem>>, vector<128x64xf32>
    %2 = arith.truncf %1 : vector<128x64xf32> to vector<128x64xbf16>
    %cst = arith.constant dense<0.000000e+00> : vector<128x64xf32>
    %3 = tpu.matmul %0, %2, %cst {dimension_numbers = #tpu.dot_dimension_numbers<[1], [0], [0], [1], [0, 0, 1, 1], [], []>} : vector<128x128xbf16>, vector<128x64xbf16>, vector<128x64xf32> -> vector<128x64xf32>
    %4 = arith.truncf %3 : vector<128x64xf32> to vector<128x64xbf16>
    %c0_3 = arith.constant 0 : index
    %c0_4 = arith.constant 0 : index
    %5 = vector.load %arg4[%c0_3, %c0_4] : memref<128x64xbf16, #tpu.memory_space<vmem>>, vector<128x64xbf16>
    tpu.vector_store %arg4[%c0_3, %c0_4], %4 {strides = array<i32>} : memref<128x64xbf16, #tpu.memory_space<vmem>>, vector<128x64xbf16>,
    %6 = arith.truncf %3 : vector<128x64xf32> to vector<128x64xbf16>
    %c0_5 = arith.constant 0 : index
    %c0_6 = arith.constant 0 : index
    %7 = vector.load %arg3[%c0_5, %c0_6] : memref<64x2xf32, #tpu.memory_space<vmem>>, vector<64x2xf32>
    %8 = arith.truncf %7 : vector<64x2xf32> to vector<64x2xbf16>
    %cst_7 = arith.constant dense<0.000000e+00> : vector<128x2xf32>
    %9 = tpu.matmul %6, %8, %cst_7 {dimension_numbers = #tpu.dot_dimension_numbers<[1], [0], [0], [1], [0, 0, 1, 1], [], []>} : vector<128x64xbf16>, vector<64x2xbf16>, vector<128x2xf32> -> vector<128x2xf32>
    %c0_8 = arith.constant 0 : index
    %c0_9 = arith.constant 0 : index
    %10 = vector.load %arg5[%c0_8, %c0_9] : memref<128x2xf32, #tpu.memory_space<vmem>>, vector<128x2xf32>
    tpu.vector_store %arg5[%c0_8, %c0_9], %9 {strides = array<i32>} : memref<128x2xf32, #tpu.memory_space<vmem>>, vector<128x2xf32>,
    return
  }
  func.func @transform_0(%arg0: i32) -> (i32, i32) {
    %c0_i32 = arith.constant 0 : i32
    %c0_i32_0 = arith.constant 0 : i32
    return %arg0, %c0_i32 : i32, i32
  }
  func.func @transform_1(%arg0: i32) -> (i32, i32) {
    %c0_i32 = arith.constant 0 : i32
    %c0_i32_0 = arith.constant 0 : i32
    %c0_i32_1 = arith.constant 0 : i32
    return %c0_i32, %c0_i32_0 : i32, i32
  }
  func.func @transform_2(%arg0: i32) -> (i32, i32) {
    %c0_i32 = arith.constant 0 : i32
    %c0_i32_0 = arith.constant 0 : i32
    %c0_i32_1 = arith.constant 0 : i32
    return %c0_i32, %c0_i32_0 : i32, i32
  }
  func.func @transform_3(%arg0: i32) -> (i32, i32) {
    %c0_i32 = arith.constant 0 : i32
    %c0_i32_0 = arith.constant 0 : i32
    return %arg0, %c0_i32 : i32, i32
  }
  func.func @transform_4(%arg0: i32) -> (i32, i32) {
    %c0_i32 = arith.constant 0 : i32
    %c0_i32_0 = arith.constant 0 : i32
    return %arg0, %c0_i32 : i32, i32
  }
}

module attributes {stable_mosaic.version = 11 : i64} {
  func.func @_gat_attn_kernel(%arg0: i32, %arg1: i32, %arg2: memref<128x1xf32, #tpu.memory_space<vmem>>, %arg3: memref<1x128xf32, #tpu.memory_space<vmem>>, %arg4: memref<128x128xi8, #tpu.memory_space<vmem>>, %arg5: memref<128x64xbf16, #tpu.memory_space<vmem>>, %arg6: memref<64x8xf32, #tpu.memory_space<vmem>>, %arg7: memref<1x8xf32, #tpu.memory_space<vmem>>, %arg8: memref<128x8xf32, #tpu.memory_space<vmem>>, %arg9: memref<1x128x1xf32, #tpu.memory_space<vmem>>, %arg10: memref<1x128x1xf32, #tpu.memory_space<vmem>>, %arg11: memref<1x128x64xf32, #tpu.memory_space<vmem>>) attributes {dimension_semantics = [#tpu.dimension_semantics<parallel>, #tpu.dimension_semantics<arbitrary>], iteration_bounds = array<i64: 2, 2>, scalar_prefetch = 0 : i64, scratch_operands = 3 : i64, tpu.core_type = #tpu.core_type<tc>, window_params = [{transform_indices = @transform_0, window_bounds = array<i64: 128, 1>}, {transform_indices = @transform_1, window_bounds = array<i64: 1, 128>}, {transform_indices = @transform_2, window_bounds = array<i64: 128, 128>}, {transform_indices = @transform_3, window_bounds = array<i64: 128, 64>}, {pipeline_mode = #tpu.pipeline_mode<synchronous>, transform_indices = @transform_4, window_bounds = array<i64: 64, 8>}, {pipeline_mode = #tpu.pipeline_mode<synchronous>, transform_indices = @transform_5, window_bounds = array<i64: 1, 8>}, {transform_indices = @transform_6, window_bounds = array<i64: 128, 8>}]} {
    %c0_i32 = arith.constant 0 : i32
    %0 = arith.cmpi eq, %arg1, %c0_i32 : i32
    %1 = arith.extui %0 : i1 to i32
    %c0_i32_0 = arith.constant 0 : i32
    %2 = arith.cmpi ne, %1, %c0_i32_0 : i32
    scf.if %2 {
      %cst_33 = arith.constant -1.000000e+30 : f32
      %56 = vector.broadcast %cst_33 : f32 to vector<1x128x1xf32>
      %c0_34 = arith.constant 0 : index
      %c0_35 = arith.constant 0 : index
      %c0_36 = arith.constant 0 : index
      %57 = vector.load %arg9[%c0_34, %c0_35, %c0_36] : memref<1x128x1xf32, #tpu.memory_space<vmem>>, vector<1x128x1xf32>
      tpu.vector_store %arg9[%c0_34, %c0_35, %c0_36], %56 {strides = array<i32>} : memref<1x128x1xf32, #tpu.memory_space<vmem>>, vector<1x128x1xf32>,
      %cst_37 = arith.constant 0.000000e+00 : f32
      %58 = vector.broadcast %cst_37 : f32 to vector<1x128x1xf32>
      %c0_38 = arith.constant 0 : index
      %c0_39 = arith.constant 0 : index
      %c0_40 = arith.constant 0 : index
      %59 = vector.load %arg10[%c0_38, %c0_39, %c0_40] : memref<1x128x1xf32, #tpu.memory_space<vmem>>, vector<1x128x1xf32>
      tpu.vector_store %arg10[%c0_38, %c0_39, %c0_40], %58 {strides = array<i32>} : memref<1x128x1xf32, #tpu.memory_space<vmem>>, vector<1x128x1xf32>,
      %cst_41 = arith.constant 0.000000e+00 : f32
      %60 = vector.broadcast %cst_41 : f32 to vector<1x128x64xf32>
      %c0_42 = arith.constant 0 : index
      %c0_43 = arith.constant 0 : index
      %c0_44 = arith.constant 0 : index
      %61 = vector.load %arg11[%c0_42, %c0_43, %c0_44] : memref<1x128x64xf32, #tpu.memory_space<vmem>>, vector<1x128x64xf32>
      tpu.vector_store %arg11[%c0_42, %c0_43, %c0_44], %60 {strides = array<i32>} : memref<1x128x64xf32, #tpu.memory_space<vmem>>, vector<1x128x64xf32>,
    } else {
    }
    %c0 = arith.constant 0 : index
    %c0_1 = arith.constant 0 : index
    %3 = vector.load %arg4[%c0, %c0_1] : memref<128x128xi8, #tpu.memory_space<vmem>>, vector<128x128xi8>
    %c0_i8 = arith.constant 0 : i8
    %4 = vector.broadcast %c0_i8 : i8 to vector<128x128xi8>
    %5 = arith.cmpi ne, %3, %4 : vector<128x128xi8>
    %c0_2 = arith.constant 0 : index
    %c0_3 = arith.constant 0 : index
    %6 = vector.load %arg5[%c0_2, %c0_3] : memref<128x64xbf16, #tpu.memory_space<vmem>>, vector<128x64xbf16>
    %c0_4 = arith.constant 0 : index
    %c0_5 = arith.constant 0 : index
    %7 = vector.load %arg2[%c0_4, %c0_5] : memref<128x1xf32, #tpu.memory_space<vmem>>, vector<128x1xf32>
    %c0_6 = arith.constant 0 : index
    %c0_7 = arith.constant 0 : index
    %8 = vector.load %arg3[%c0_6, %c0_7] : memref<1x128xf32, #tpu.memory_space<vmem>>, vector<1x128xf32>
    %9 = vector.broadcast %7 : vector<128x1xf32> to vector<128x128xf32>
    %10 = vector.broadcast %8 : vector<1x128xf32> to vector<128x128xf32>
    %11 = arith.addf %9, %10 : vector<128x128xf32>
    %cst = arith.constant 0.000000e+00 : f32
    %12 = vector.broadcast %cst : f32 to vector<128x128xf32>
    %13 = arith.cmpf ogt, %11, %12 : vector<128x128xf32>
    %cst_8 = arith.constant 0.00999999977 : f32
    %14 = vector.broadcast %cst_8 : f32 to vector<128x128xf32>
    %15 = arith.mulf %14, %11 : vector<128x128xf32>
    %16 = arith.select %13, %11, %15 : vector<128x128xi1>, vector<128x128xf32>
    %cst_9 = arith.constant -1.000000e+30 : f32
    %17 = vector.broadcast %cst_9 : f32 to vector<128x128xf32>
    %18 = arith.select %5, %16, %17 : vector<128x128xi1>, vector<128x128xf32>
    %c0_10 = arith.constant 0 : index
    %c0_11 = arith.constant 0 : index
    %c0_12 = arith.constant 0 : index
    %19 = vector.load %arg9[%c0_10, %c0_11, %c0_12] : memref<1x128x1xf32, #tpu.memory_space<vmem>>, vector<1x128x1xf32>
    %20 = vector.shape_cast %19 : vector<1x128x1xf32> to vector<128x1xf32>
    %cst_13 = arith.constant dense<0xFF800000> : vector<128xf32>
    %21 = vector.multi_reduction <maximumf>, %18, %cst_13 [1] : vector<128x128xf32> to vector<128xf32>
    %22 = vector.shape_cast %21 : vector<128xf32> to vector<128x1xf32>
    %23 = arith.maximumf %20, %22 : vector<128x1xf32>
    %24 = vector.broadcast %23 : vector<128x1xf32> to vector<128x128xf32>
    %25 = arith.subf %18, %24 : vector<128x128xf32>
    %26 = math.exp %25 : vector<128x128xf32>
    %cst_14 = arith.constant 0.000000e+00 : f32
    %27 = vector.broadcast %cst_14 : f32 to vector<128x128xf32>
    %28 = arith.select %5, %26, %27 : vector<128x128xi1>, vector<128x128xf32>
    %29 = arith.subf %20, %23 : vector<128x1xf32>
    %30 = math.exp %29 : vector<128x1xf32>
    %c0_15 = arith.constant 0 : index
    %c0_16 = arith.constant 0 : index
    %c0_17 = arith.constant 0 : index
    %31 = vector.load %arg10[%c0_15, %c0_16, %c0_17] : memref<1x128x1xf32, #tpu.memory_space<vmem>>, vector<1x128x1xf32>
    %32 = vector.shape_cast %31 : vector<1x128x1xf32> to vector<128x1xf32>
    %33 = arith.mulf %30, %32 : vector<128x1xf32>
    %cst_18 = arith.constant dense<0.000000e+00> : vector<128xf32>
    %34 = vector.multi_reduction <add>, %28, %cst_18 [1] : vector<128x128xf32> to vector<128xf32>
    %35 = vector.shape_cast %34 : vector<128xf32> to vector<128x1xf32>
    %36 = arith.addf %33, %35 : vector<128x1xf32>
    %c0_19 = arith.constant 0 : index
    %c0_20 = arith.constant 0 : index
    %c0_21 = arith.constant 0 : index
    %37 = vector.load %arg10[%c0_19, %c0_20, %c0_21] : memref<1x128x1xf32, #tpu.memory_space<vmem>>, vector<1x128x1xf32>
    %38 = vector.shape_cast %37 : vector<1x128x1xf32> to vector<128x1xf32>
    %39 = vector.shape_cast %36 : vector<128x1xf32> to vector<1x128x1xf32>
    tpu.vector_store %arg10[%c0_19, %c0_20, %c0_21], %39 {strides = array<i32>} : memref<1x128x1xf32, #tpu.memory_space<vmem>>, vector<1x128x1xf32>,
    %c0_22 = arith.constant 0 : index
    %c0_23 = arith.constant 0 : index
    %c0_24 = arith.constant 0 : index
    %40 = vector.load %arg11[%c0_22, %c0_23, %c0_24] : memref<1x128x64xf32, #tpu.memory_space<vmem>>, vector<1x128x64xf32>
    %41 = vector.shape_cast %40 : vector<1x128x64xf32> to vector<128x64xf32>
    %42 = vector.broadcast %30 : vector<128x1xf32> to vector<128x64xf32>
    %43 = arith.mulf %42, %41 : vector<128x64xf32>
    %44 = arith.truncf %28 : vector<128x128xf32> to vector<128x128xbf16>
    %cst_25 = arith.constant dense<0.000000e+00> : vector<128x64xf32>
    %45 = tpu.matmul %44, %6, %cst_25 {dimension_numbers = #tpu.dot_dimension_numbers<[1], [0], [0], [1], [0, 0, 1, 1], [], []>} : vector<128x128xbf16>, vector<128x64xbf16>, vector<128x64xf32> -> vector<128x64xf32>
    %46 = arith.addf %43, %45 : vector<128x64xf32>
    %c0_26 = arith.constant 0 : index
    %c0_27 = arith.constant 0 : index
    %c0_28 = arith.constant 0 : index
    %47 = vector.load %arg11[%c0_26, %c0_27, %c0_28] : memref<1x128x64xf32, #tpu.memory_space<vmem>>, vector<1x128x64xf32>
    %48 = vector.shape_cast %47 : vector<1x128x64xf32> to vector<128x64xf32>
    %49 = vector.shape_cast %46 : vector<128x64xf32> to vector<1x128x64xf32>
    tpu.vector_store %arg11[%c0_26, %c0_27, %c0_28], %49 {strides = array<i32>} : memref<1x128x64xf32, #tpu.memory_space<vmem>>, vector<1x128x64xf32>,
    %c0_29 = arith.constant 0 : index
    %c0_30 = arith.constant 0 : index
    %c0_31 = arith.constant 0 : index
    %50 = vector.load %arg9[%c0_29, %c0_30, %c0_31] : memref<1x128x1xf32, #tpu.memory_space<vmem>>, vector<1x128x1xf32>
    %51 = vector.shape_cast %50 : vector<1x128x1xf32> to vector<128x1xf32>
    %52 = vector.shape_cast %23 : vector<128x1xf32> to vector<1x128x1xf32>
    tpu.vector_store %arg9[%c0_29, %c0_30, %c0_31], %52 {strides = array<i32>} : memref<1x128x1xf32, #tpu.memory_space<vmem>>, vector<1x128x1xf32>,
    %c1_i32 = arith.constant 1 : i32
    %53 = arith.cmpi eq, %arg1, %c1_i32 : i32
    %54 = arith.extui %53 : i1 to i32
    %c0_i32_32 = arith.constant 0 : i32
    %55 = arith.cmpi ne, %54, %c0_i32_32 : i32
    scf.if %55 {
      %c0_33 = arith.constant 0 : index
      %c0_34 = arith.constant 0 : index
      %c0_35 = arith.constant 0 : index
      %56 = vector.load %arg10[%c0_33, %c0_34, %c0_35] : memref<1x128x1xf32, #tpu.memory_space<vmem>>, vector<1x128x1xf32>
      %57 = vector.shape_cast %56 : vector<1x128x1xf32> to vector<128x1xf32>
      %cst_36 = arith.constant 1.000000e-30 : f32
      %58 = vector.broadcast %cst_36 : f32 to vector<128x1xf32>
      %59 = arith.maximumf %57, %58 : vector<128x1xf32>
      %cst_37 = arith.constant 1.000000e+00 : f32
      %60 = vector.broadcast %cst_37 : f32 to vector<128x1xf32>
      %61 = arith.divf %60, %59 : vector<128x1xf32>
      %c0_38 = arith.constant 0 : index
      %c0_39 = arith.constant 0 : index
      %c0_40 = arith.constant 0 : index
      %62 = vector.load %arg11[%c0_38, %c0_39, %c0_40] : memref<1x128x64xf32, #tpu.memory_space<vmem>>, vector<1x128x64xf32>
      %63 = vector.shape_cast %62 : vector<1x128x64xf32> to vector<128x64xf32>
      %64 = vector.broadcast %61 : vector<128x1xf32> to vector<128x64xf32>
      %65 = arith.mulf %63, %64 : vector<128x64xf32>
      %66 = arith.mulf %65, %65 : vector<128x64xf32>
      %cst_41 = arith.constant dense<0.000000e+00> : vector<128xf32>
      %67 = vector.multi_reduction <add>, %66, %cst_41 [1] : vector<128x64xf32> to vector<128xf32>
      %68 = vector.shape_cast %67 : vector<128xf32> to vector<128x1xf32>
      %69 = math.sqrt %68 : vector<128x1xf32>
      %cst_42 = arith.constant 9.99999996E-13 : f32
      %70 = vector.broadcast %cst_42 : f32 to vector<128x1xf32>
      %71 = arith.maximumf %69, %70 : vector<128x1xf32>
      %72 = vector.broadcast %71 : vector<128x1xf32> to vector<128x64xf32>
      %73 = arith.divf %65, %72 : vector<128x64xf32>
      %74 = arith.truncf %73 : vector<128x64xf32> to vector<128x64xbf16>
      %c0_43 = arith.constant 0 : index
      %c0_44 = arith.constant 0 : index
      %75 = vector.load %arg6[%c0_43, %c0_44] : memref<64x8xf32, #tpu.memory_space<vmem>>, vector<64x8xf32>
      %76 = arith.truncf %75 : vector<64x8xf32> to vector<64x8xbf16>
      %cst_45 = arith.constant dense<0.000000e+00> : vector<128x8xf32>
      %77 = tpu.matmul %74, %76, %cst_45 {dimension_numbers = #tpu.dot_dimension_numbers<[1], [0], [0], [1], [0, 0, 1, 1], [], []>} : vector<128x64xbf16>, vector<64x8xbf16>, vector<128x8xf32> -> vector<128x8xf32>
      %c0_46 = arith.constant 0 : index
      %c0_47 = arith.constant 0 : index
      %78 = vector.load %arg7[%c0_46, %c0_47] : memref<1x8xf32, #tpu.memory_space<vmem>>, vector<1x8xf32>
      %79 = vector.broadcast %78 : vector<1x8xf32> to vector<128x8xf32>
      %80 = arith.addf %77, %79 : vector<128x8xf32>
      %cst_48 = arith.constant dense<0xFF800000> : vector<128xf32>
      %81 = vector.multi_reduction <maximumf>, %80, %cst_48 [1] : vector<128x8xf32> to vector<128xf32>
      %82 = vector.shape_cast %81 : vector<128xf32> to vector<128x1xf32>
      %83 = vector.broadcast %82 : vector<128x1xf32> to vector<128x8xf32>
      %84 = arith.subf %80, %83 : vector<128x8xf32>
      %85 = math.exp %84 : vector<128x8xf32>
      %cst_49 = arith.constant dense<0.000000e+00> : vector<128xf32>
      %86 = vector.multi_reduction <add>, %85, %cst_49 [1] : vector<128x8xf32> to vector<128xf32>
      %87 = vector.shape_cast %86 : vector<128xf32> to vector<128x1xf32>
      %88 = math.log %87 : vector<128x1xf32>
      %89 = vector.broadcast %88 : vector<128x1xf32> to vector<128x8xf32>
      %90 = arith.subf %84, %89 : vector<128x8xf32>
      %c0_50 = arith.constant 0 : index
      %c0_51 = arith.constant 0 : index
      %91 = vector.load %arg8[%c0_50, %c0_51] : memref<128x8xf32, #tpu.memory_space<vmem>>, vector<128x8xf32>
      tpu.vector_store %arg8[%c0_50, %c0_51], %90 {strides = array<i32>} : memref<128x8xf32, #tpu.memory_space<vmem>>, vector<128x8xf32>,
    } else {
    }
    return
  }
  func.func @transform_0(%arg0: i32, %arg1: i32) -> (i32, i32) {
    %c0_i32 = arith.constant 0 : i32
    %c0_i32_0 = arith.constant 0 : i32
    return %arg0, %c0_i32 : i32, i32
  }
  func.func @transform_1(%arg0: i32, %arg1: i32) -> (i32, i32) {
    %c0_i32 = arith.constant 0 : i32
    %c0_i32_0 = arith.constant 0 : i32
    return %c0_i32, %arg1 : i32, i32
  }
  func.func @transform_2(%arg0: i32, %arg1: i32) -> (i32, i32) {
    %c0_i32 = arith.constant 0 : i32
    return %arg0, %arg1 : i32, i32
  }
  func.func @transform_3(%arg0: i32, %arg1: i32) -> (i32, i32) {
    %c0_i32 = arith.constant 0 : i32
    %c0_i32_0 = arith.constant 0 : i32
    return %arg1, %c0_i32 : i32, i32
  }
  func.func @transform_4(%arg0: i32, %arg1: i32) -> (i32, i32) {
    %c0_i32 = arith.constant 0 : i32
    %c0_i32_0 = arith.constant 0 : i32
    %c0_i32_1 = arith.constant 0 : i32
    return %c0_i32, %c0_i32_0 : i32, i32
  }
  func.func @transform_5(%arg0: i32, %arg1: i32) -> (i32, i32) {
    %c0_i32 = arith.constant 0 : i32
    %c0_i32_0 = arith.constant 0 : i32
    %c0_i32_1 = arith.constant 0 : i32
    return %c0_i32, %c0_i32_0 : i32, i32
  }
  func.func @transform_6(%arg0: i32, %arg1: i32) -> (i32, i32) {
    %c0_i32 = arith.constant 0 : i32
    %c0_i32_0 = arith.constant 0 : i32
    return %arg0, %c0_i32 : i32, i32
  }
}

</mosaic_0001>

<bundles_post_ra>
// kernel: gat_forward.4
= control target key start
LH: loop header
LB: loop body
LE: loop exit
PB: predicated region body
PF: predicated region fallthrough
CT: control target
= control target key end

     0   :  { %s707_s15 = smov 0   ;;  %s877_s0 = inlined_call_operand.vmem [shape: f32[256,64], index: 0, kind: input, shape index: {}]   ;;  %s878_s1 = inlined_call_operand.vmem [shape: f32[64,128], index: 1, kind: input, shape index: {}]   ;;  %s879_s2 = inlined_call_operand.vmem [shape: f32[128,4], index: 2, kind: input, shape index: {}]   ;;  %s880_s3 = inlined_call_operand.vmem [shape: bf16[256,128], index: 3, kind: output, shape index: {0}]   ;;  %s881_s4 = inlined_call_operand.vmem [shape: f32[256,4], index: 4, kind: output, shape index: {1}]  }
   0x1 LB: > { %s586_s16 = sadd.s32 4294967295, %s680_s15   ;;  %p590_p0 = scmp.ge.s32.totalorder %s680_s15, 1  ;;  %s680_s15 = sphi %s707_s15, %s15_s15  }
   0x2   : > { %p166_p1 = scmp.lt.s32.totalorder %s680_s15, 3 }
   0x4   : > { %p167_p2 = pnand %p590_p0, %p166_p1 }
   0x5   : > { %s591_s23 = sshll.u32 (!%p167_p2), %s586_s16, 4 }
   0x6   : > { %170 = sbr.rel (%p167_p2) target bundleno = 422 (0x1a6), region = 32  ;;  %p198_p3 = scmp.lt.s32.totalorder (!%p167_p2), %s591_s23, 31 }
   0xb   : > { %v246_v0 = vld [vmem:[%s878_s1 + $0x30] sm:$0xff]  ;;  %v247_v1 = vld [vmem:[%s878_s1 + $0x38] sm:$0xff]  ;;  %v244_v2 = vld [vmem:[%s878_s1 + $0x20] sm:$0xff]  ;;  %s883_s23 = smov (!%p198_p3, %s591_s23), 31  ;;  %vm252_vm0 = vcmask 523264   ;;  %vm479_vm1 = vcmask 31744  }
   0xc   : > { %v251_v3 = vpack.c.bf16 %v247_v1, %v246_v0  ;;  %v245_v4 = vld [vmem:[%s878_s1 + $0x28] sm:$0xff]  ;;  %v242_v6 = vld [vmem:[%s878_s1 + $0x10] sm:$0xff]  ;;  %v243_v7 = vld [vmem:[%s878_s1 + $0x18] sm:$0xff]  ;;  %s592_s30 = sshll.u32 %s883_s23, 3  ;;  %s594_s22 = sshll.u32 %s883_s23, 2 }
   0xd   : > { %v250_v5 = vpack.c.bf16 %v245_v4, %v244_v2  ;;  %v249_v8 = vpack.c.bf16 %v243_v7, %v242_v6  ;;  %v240_v9 = vld [vmem:[%s878_s1] sm:$0xff]  ;;  %v241_v10 = vld [vmem:[%s878_s1 + $0x8] sm:$0xff]  ;;  %s747_s11 = scalar_lea.vmem %s877_s0, %s592_s30  ;;  %v372_v24 = vld [vmem:[%s879_s2 + $0x70] sm:$0xff]  ;;  %s825_s26 = scalar_lea.vmem %s880_s3, %s594_s22 }
   0xe   : > { %281 = vmatpush.bf16.msra.mxu0 %v251_v3  ;;  %654 = vmatpush.bf16.msra.mxu3 %v251_v3  ;;  %v248_v11 = vpack.c.bf16 %v241_v10, %v240_v9  ;;  %v216_v12 = vld [vmem:[%s747_s11] sm:$0xff]  ;;  %v217_v13 = vld [vmem:[%s747_s11 + $0x8] sm:$0xff]  ;;  %v218_v15 = vld [vmem:[%s747_s11 + $0x10] sm:$0xff]  ;;  %s840_s29 = scalar_lea.vmem %s881_s4, %s592_s30 }
   0xf   : > { %v232_v14 = vpack.c.bf16 %v217_v13, %v216_v12  ;;  %v219_v16 = vld [vmem:[%s747_s11 + $0x18] sm:$0xff]  ;;  %v220_v18 = vld [vmem:[%s747_s11 + $0x20] sm:$0xff]  ;;  %v221_v19 = vld [vmem:[%s747_s11 + $0x28] sm:$0xff] }
  0x10   : > { %v233_v17 = vpack.c.bf16 %v219_v16, %v218_v15  ;;  %v234_v20 = vpack.c.bf16 %v221_v19, %v220_v18  ;;  %v226_v21 = vld [vmem:[%s747_s11 + $0x50] sm:$0xff]  ;;  %v227_v22 = vld [vmem:[%s747_s11 + $0x58] sm:$0xff]  ;;  %v370_v26 = vld [vmem:[%s879_s2 + $0x60] sm:$0xff] }
  0x11   : > { %v237_v23 = vpack.c.bf16 %v227_v22, %v226_v21  ;;  %v373_v25 = vld [vmem:[%s879_s2 + $0x78] sm:$0xff]  ;;  %v371_v28 = vld [vmem:[%s879_s2 + $0x68] sm:$0xff]  ;;  %v368_v30 = vld [vmem:[%s879_s2 + $0x50] sm:$0xff] }
  0x12   : > { %282 = vmatpush.bf16.msra.mxu0 %v250_v5  ;;  %655 = vmatpush.bf16.msra.mxu3 %v250_v5  ;;  %v381_v27 = vpack.c.bf16 %v373_v25, %v372_v24  ;;  %v380_v29 = vpack.c.bf16 %v371_v28, %v370_v26  ;;  %v369_v31 = vld [vmem:[%s879_s2 + $0x58] sm:$0xff]  ;;  %v222_v32 = vld [vmem:[%s747_s11 + $0x30] sm:$0xff]  ;;  %v366_v35 = vld [vmem:[%s879_s2 + $0x40] sm:$0xff] }
  0x13   : > { %v223_v33 = vld [vmem:[%s747_s11 + $0x38] sm:$0xff]  ;;  %v379_v34 = vpack.c.bf16 %v369_v31, %v368_v30  ;;  %v367_v36 = vld [vmem:[%s879_s2 + $0x48] sm:$0xff]  ;;  %v228_v37 = vld [vmem:[%s747_s11 + $0x60] sm:$0xff] }
  0x14   : > { %430 = vmatpush.bf16.msra.mxu1 %v381_v27  ;;  %658 = vmatpush.bf16.msra.mxu2 %v381_v27  ;;  %v229_v38 = vld [vmem:[%s747_s11 + $0x68] sm:$0xff]  ;;  %v235_v39 = vpack.c.bf16 %v223_v33, %v222_v32  ;;  %v378_v40 = vpack.c.bf16 %v367_v36, %v366_v35  ;;  %v224_v42 = vld [vmem:[%s747_s11 + $0x40] sm:$0xff]  ;;  %v230_v44 = vld [vmem:[%s747_s11 + $0x70] sm:$0xff] }
  0x15   : > { %v238_v41 = vpack.c.bf16 %v229_v38, %v228_v37  ;;  %v225_v43 = vld [vmem:[%s747_s11 + $0x48] sm:$0xff]  ;;  %v231_v45 = vld [vmem:[%s747_s11 + $0x78] sm:$0xff]  ;;  %v364_v48 = vld [vmem:[%s879_s2 + $0x30] sm:$0xff] }
  0x16   : > { %283 = vmatpush.bf16.msra.mxu0 %v249_v8  ;;  %656 = vmatpush.bf16.msra.mxu3 %v249_v8  ;;  %v236_v46 = vpack.c.bf16 %v225_v43, %v224_v42  ;;  %v239_v47 = vpack.c.bf16 %v231_v45, %v230_v44  ;;  %v365_v49 = vld [vmem:[%s879_s2 + $0x38] sm:$0xff]  ;;  %v362_v51 = vld [vmem:[%s879_s2 + $0x20] sm:$0xff]  ;;  %v363_v52 = vld [vmem:[%s879_s2 + $0x28] sm:$0xff] }
  0x17   : > { %v377_v50 = vpack.c.bf16 %v365_v49, %v364_v48  ;;  %v376_v53 = vpack.c.bf16 %v363_v52, %v362_v51  ;;  %v360_v54 = vld [vmem:[%s879_s2 + $0x10] sm:$0xff]  ;;  %v361_v55 = vld [vmem:[%s879_s2 + $0x18] sm:$0xff]  ;;  %v358_v57 = vld [vmem:[%s879_s2] sm:$0xff] }
  0x18   : > { %431 = vmatpush.bf16.msra.mxu1 %v380_v29  ;;  %659 = vmatpush.bf16.msra.mxu2 %v380_v29  ;;  %v375_v56 = vpack.c.bf16 %v361_v55, %v360_v54  ;;  %v359_v58 = vld [vmem:[%s879_s2 + $0x8] sm:$0xff] }
  0x19   : > { %v374_v59 = vpack.c.bf16 %v359_v58, %v358_v57 }
  0x1a   : > { %284 = vmatpush.bf16.msra.mxu0 %v248_v11  ;;  %657 = vmatpush.bf16.msra.mxu3 %v248_v11 }
  0x1c   : > { %432 = vmatpush.bf16.msra.mxu1 %v379_v34  ;;  %660 = vmatpush.bf16.msra.mxu2 %v379_v34 }
  0x1d   : > { %597 = vmatmul.msk.bf16.vlgmr.msra.gmra.mxu0 %vm252_vm0, %v232_v14  ;;  %602 = vmatmul.msk.bf16.vlgmr.msra.gmra.mxu3 %vm252_vm0, %v237_v23 }
  0x20   : > { %433 = vmatpush.bf16.msra.mxu1 %v378_v40  ;;  %661 = vmatpush.bf16.msra.mxu2 %v378_v40 }
  0x24   : > { %434 = vmatpush.bf16.msra.mxu1 %v377_v50  ;;  %662 = vmatpush.bf16.msra.mxu2 %v377_v50 }
  0x28   : > { %435 = vmatpush.bf16.msra.mxu1 %v376_v53  ;;  %663 = vmatpush.bf16.msra.mxu2 %v376_v53 }
  0x2c   : > { %436 = vmatpush.bf16.msra.mxu1 %v375_v56  ;;  %664 = vmatpush.bf16.msra.mxu2 %v375_v56 }
  0x2d   : > { %598 = vmatmul.msk.bf16.gmra.mxu0 %vm252_vm0, %v233_v17  ;;  %603 = vmatmul.msk.bf16.gmra.mxu3 %vm252_vm0, %v238_v41 }
  0x30   : > { %437 = vmatpush.bf16.msra.mxu1 %v374_v59  ;;  %665 = vmatpush.bf16.msra.mxu2 %v374_v59 }
  0x3d   : > { %599 = vmatmul.msk.bf16.gmra.mxu0 %vm252_vm0, %v234_v20  ;;  %604 = vmatmul.msk.bf16.gmra.mxu3 %vm252_vm0, %v239_v47 }
  0x4d   : > { %600 = vmatmul.msk.bf16.gmra.mxu0 %vm252_vm0, %v235_v39 }
  0x5d   : > { %601 = vmatmul.msk.bf16.gmra.mxu0 %vm252_vm0, %v236_v46 }
  0x9a   : > { %v286_v60 = vpop.f32.mrf.mxu0 }
  0x9b   : > { %v326_v61 = vpack.c.bf16 %v286_v60, %v286_v60 }
  0x9d   : > { %v398_v1 = vunpack.c.l.b16 %v326_v61 }
  0xa0   : > { %v311_v15 = vpop.f32.mrf.mxu3 }
  0xa1   : > { %v336_v45 = vpack.c.bf16 %v311_v15, %v311_v15 }
  0xa2   : > { %v288_v62 = vpop.f32.mrf.mxu0 }
  0xa3   : > { %v327_v63 = vpack.c.bf16 %v288_v62, %v288_v62  ;;  %v610_v0 = vpack.c.bf16 %v288_v62, %v286_v60  ;;  %v408_v47 = vunpack.c.l.b16 %v336_v45 }
  0xa5   : > { %611 = vst [vmem:[%s825_s26] sm:$0xff] %v610_v0   ;;  %v399_v2 = vunpack.c.l.b16 %v327_v63 }
  0xa7   : > { %v414_v3 = vpack.c.b16 %v399_v2, %v398_v1 }
  0xa8   : > { %v313_v22 = vpop.f32.mrf.mxu3 }
  0xa9   : > { %438 = vmatmul.bf16.vlgmr.msra.gmra.mxu1 %v414_v3  ;;  %v635_v23 = vpack.c.bf16 %v313_v22, %v311_v15  ;;  %v337_v46 = vpack.c.bf16 %v313_v22, %v313_v22 }
  0xaa   : > { %v291_v4 = vpop.f32.mrf.mxu0 }
  0xab   : > { %v328_v5 = vpack.c.bf16 %v291_v4, %v291_v4  ;;  %651 = vst [vmem:[%s825_s26 + $0x28] sm:$0xff] %v635_v23   ;;  %v409_v48 = vunpack.c.l.b16 %v337_v46 }
  0xad   : > { %v400_v9 = vunpack.c.l.b16 %v328_v5  ;;  %v419_v49 = vpack.c.b16 %v409_v48, %v408_v47 }
  0xb0   : > { %v316_v26 = vpop.f32.mrf.mxu3 }
  0xb1   : > { %v338_v50 = vpack.c.bf16 %v316_v26, %v316_v26 }
  0xb2   : > { %v293_v6 = vpop.f32.mrf.mxu0 }
  0xb3   : > { %v329_v7 = vpack.c.bf16 %v293_v6, %v293_v6  ;;  %v615_v8 = vpack.c.bf16 %v293_v6, %v291_v4  ;;  %v410_v52 = vunpack.c.l.b16 %v338_v50 }
  0xb5   : > { %647 = vst [vmem:[%s825_s26 + $0x8] sm:$0xff] %v615_v8   ;;  %v401_v10 = vunpack.c.l.b16 %v329_v7 }
  0xb7   : > { %v415_v11 = vpack.c.b16 %v401_v10, %v400_v9 }
  0xb8   : > { %v318_v33 = vpop.f32.mrf.mxu3 }
  0xb9   : > { %443 = vmatmul.bf16.gmra.mxu1 %v415_v11  ;;  %v640_v34 = vpack.c.bf16 %v318_v33, %v316_v26  ;;  %v339_v51 = vpack.c.bf16 %v318_v33, %v318_v33 }
  0xba   : > { %v296_v12 = vpop.f32.mrf.mxu0 }
  0xbb   : > { %v330_v13 = vpack.c.bf16 %v296_v12, %v296_v12  ;;  %652 = vst [vmem:[%s825_s26 + $0x30] sm:$0xff] %v640_v34   ;;  %v411_v53 = vunpack.c.l.b16 %v339_v51 }
  0xbd   : > { %v402_v18 = vunpack.c.l.b16 %v330_v13  ;;  %v420_v54 = vpack.c.b16 %v411_v53, %v410_v52 }
  0xc0   : > { %v321_v37 = vpop.f32.mrf.mxu3 }
  0xc1   : > { %v340_v55 = vpack.c.bf16 %v321_v37, %v321_v37 }
  0xc2   : > { %v298_v14 = vpop.f32.mrf.mxu0 }
  0xc3   : > { %v331_v16 = vpack.c.bf16 %v298_v14, %v298_v14  ;;  %v620_v17 = vpack.c.bf16 %v298_v14, %v296_v12  ;;  %v412_v57 = vunpack.c.l.b16 %v340_v55 }
  0xc5   : > { %648 = vst [vmem:[%s825_s26 + $0x10] sm:$0xff] %v620_v17   ;;  %v403_v19 = vunpack.c.l.b16 %v331_v16 }
  0xc7   : > { %v416_v20 = vpack.c.b16 %v403_v19, %v402_v18 }
  0xc8   : > { %v323_v43 = vpop.f32.mrf.mxu3 }
  0xc9   : > { %448 = vmatmul.bf16.gmra.mxu1 %v416_v20  ;;  %v645_v44 = vpack.c.bf16 %v323_v43, %v321_v37  ;;  %v341_v56 = vpack.c.bf16 %v323_v43, %v323_v43 }
  0xca   : > { %v301_v21 = vpop.f32.mrf.mxu0 }
  0xcb   : > { %v332_v24 = vpack.c.bf16 %v301_v21, %v301_v21  ;;  %653 = vst [vmem:[%s825_s26 + $0x38] sm:$0xff] %v645_v44   ;;  %v413_v58 = vunpack.c.l.b16 %v341_v56 }
  0xcd   : > { %v404_v29 = vunpack.c.l.b16 %v332_v24  ;;  %v421_v59 = vpack.c.b16 %v413_v58, %v412_v57 }
  0xd2   : > { %v303_v25 = vpop.f32.mrf.mxu0 }
  0xd3   : > { %v333_v27 = vpack.c.bf16 %v303_v25, %v303_v25  ;;  %v625_v28 = vpack.c.bf16 %v303_v25, %v301_v21 }
  0xd5   : > { %649 = vst [vmem:[%s825_s26 + $0x18] sm:$0xff] %v625_v28   ;;  %v405_v30 = vunpack.c.l.b16 %v333_v27 }
  0xd7   : > { %v417_v31 = vpack.c.b16 %v405_v30, %v404_v29 }
  0xd9   : > { %453 = vmatmul.bf16.gmra.mxu1 %v417_v31 }
  0xda   : > { %v306_v32 = vpop.f32.mrf.mxu0 }
  0xdb   : > { %v334_v35 = vpack.c.bf16 %v306_v32, %v306_v32 }
  0xdd   : > { %v406_v40 = vunpack.c.l.b16 %v334_v35 }
  0xe2   : > { %v308_v36 = vpop.f32.mrf.mxu0 }
  0xe3   : > { %v335_v38 = vpack.c.bf16 %v308_v36, %v308_v36  ;;  %v630_v39 = vpack.c.bf16 %v308_v36, %v306_v32 }
  0xe5   : > { %650 = vst [vmem:[%s825_s26 + $0x20] sm:$0xff] %v630_v39   ;;  %v407_v41 = vunpack.c.l.b16 %v335_v38 }
  0xe7   : > { %v418_v42 = vpack.c.b16 %v407_v41, %v406_v40 }
  0xe9   : > { %458 = vmatmul.bf16.vlgmr.msra.gmra.mxu2 %v418_v42 }
  0xf9   : > { %463 = vmatmul.bf16.gmra.mxu2 %v419_v49 }
 0x109   : > { %468 = vmatmul.bf16.gmra.mxu2 %v420_v54 }
 0x119   : > { %473 = vmatmul.bf16.gmra.mxu2 %v421_v59 }
 0x126   : > { %v439_v60 = vpop.f32.mrf.mxu1 }
 0x127   : > { %480 = vst.msk [vmem:[%s840_s29] sm:$0xff] %vm479_vm1, %v439_v60 }
 0x12e   : > { %v441_v61 = vpop.f32.mrf.mxu1 }
 0x12f   : > { %481 = vst.msk [vmem:[%s840_s29 + $0x8] sm:$0xff] %vm479_vm1, %v441_v61 }
 0x136   : > { %v444_v62 = vpop.f32.mrf.mxu1 }
 0x137   : > { %482 = vst.msk [vmem:[%s840_s29 + $0x10] sm:$0xff] %vm479_vm1, %v444_v62 }
 0x13e   : > { %v446_v63 = vpop.f32.mrf.mxu1 }
 0x13f   : > { %483 = vst.msk [vmem:[%s840_s29 + $0x18] sm:$0xff] %vm479_vm1, %v446_v63 }
 0x146   : > { %v449_v0 = vpop.f32.mrf.mxu1 }
 0x147   : > { %484 = vst.msk [vmem:[%s840_s29 + $0x20] sm:$0xff] %vm479_vm1, %v449_v0 }
 0x14e   : > { %v451_v1 = vpop.f32.mrf.mxu1 }
 0x14f   : > { %485 = vst.msk [vmem:[%s840_s29 + $0x28] sm:$0xff] %vm479_vm1, %v451_v1 }
 0x156   : > { %v454_v2 = vpop.f32.mrf.mxu1 }
 0x157   : > { %486 = vst.msk [vmem:[%s840_s29 + $0x30] sm:$0xff] %vm479_vm1, %v454_v2 }
 0x15e   : > { %v456_v3 = vpop.f32.mrf.mxu1 }
 0x15f   : > { %487 = vst.msk [vmem:[%s840_s29 + $0x38] sm:$0xff] %vm479_vm1, %v456_v3 }
 0x16c   : > { %v459_v4 = vpop.f32.mrf.mxu2 }
 0x16d   : > { %488 = vst.msk [vmem:[%s840_s29 + $0x40] sm:$0xff] %vm479_vm1, %v459_v4 }
 0x174   : > { %v461_v5 = vpop.f32.mrf.mxu2 }
 0x175   : > { %489 = vst.msk [vmem:[%s840_s29 + $0x48] sm:$0xff] %vm479_vm1, %v461_v5 }
 0x17c   : > { %v464_v6 = vpop.f32.mrf.mxu2 }
 0x17d   : > { %490 = vst.msk [vmem:[%s840_s29 + $0x50] sm:$0xff] %vm479_vm1, %v464_v6 }
 0x184   : > { %v466_v7 = vpop.f32.mrf.mxu2 }
 0x185   : > { %491 = vst.msk [vmem:[%s840_s29 + $0x58] sm:$0xff] %vm479_vm1, %v466_v7 }
 0x18c   : > { %v469_v8 = vpop.f32.mrf.mxu2 }
 0x18d   : > { %492 = vst.msk [vmem:[%s840_s29 + $0x60] sm:$0xff] %vm479_vm1, %v469_v8 }
 0x194   : > { %v471_v9 = vpop.f32.mrf.mxu2 }
 0x195   : > { %493 = vst.msk [vmem:[%s840_s29 + $0x68] sm:$0xff] %vm479_vm1, %v471_v9 }
 0x19c   : > { %v474_v10 = vpop.f32.mrf.mxu2 }
 0x19d   : > { %494 = vst.msk [vmem:[%s840_s29 + $0x70] sm:$0xff] %vm479_vm1, %v474_v10 }
 0x1a4   : > { %v476_v11 = vpop.f32.mrf.mxu2 }
 0x1a5   : > { %495 = vst.msk [vmem:[%s840_s29 + $0x78] sm:$0xff] %vm479_vm1, %v476_v11 }
 0x1a6 PF: > { %s15_s15 = sadd.s32 1, %s680_s15  }
 0x1a7   : > { %p12_p4 = scmp.ge.s32.totalorder %s15_s15, 4  }
 0x1a9   :  { %14 = sbr.rel (!%p12_p4) target bundleno = 1 (0x1), region = 74 }

// kernel: gat_forward.6
= control target key start
LH: loop header
LB: loop body
LE: loop exit
PB: predicated region body
PF: predicated region fallthrough
CT: control target
= control target key end

     0   :  { %s733_s15 = smov 0   ;;  %s917_s0 = inlined_call_operand.vmem [shape: bf16[256,128], index: 0, kind: input, shape index: {}]   ;;  %s918_s1 = inlined_call_operand.vmem [shape: f32[128,64], index: 1, kind: input, shape index: {}]   ;;  %s919_s2 = inlined_call_operand.vmem [shape: f32[64,2], index: 2, kind: input, shape index: {}]   ;;  %s920_s3 = inlined_call_operand.vmem [shape: bf16[256,64], index: 3, kind: output, shape index: {0}]   ;;  %s921_s4 = inlined_call_operand.vmem [shape: f32[256,2], index: 4, kind: output, shape index: {1}]  }
   0x1 LB: > { %s619_s16 = sadd.s32 4294967295, %s706_s15   ;;  %p623_p0 = scmp.ge.s32.totalorder %s706_s15, 1  ;;  %s706_s15 = sphi %s733_s15, %s15_s15  }
   0x2   : > { %p166_p1 = scmp.lt.s32.totalorder %s706_s15, 3 }
   0x4   : > { %p167_p2 = pnand %p623_p0, %p166_p1 }
   0x5   : > { %s624_s11 = sshll.u32 (!%p167_p2), %s619_s16, 4 }
   0x6   : > { %170 = sbr.rel (%p167_p2) target bundleno = 384 (0x180), region = 32  ;;  %p198_p3 = scmp.lt.s32.totalorder (!%p167_p2), %s624_s11, 31 }
   0xb   : > { %v246_v0 = vld [vmem:[%s918_s1 + $0x70] sm:$0xff]  ;;  %v247_v1 = vld [vmem:[%s918_s1 + $0x78] sm:$0xff]  ;;  %v244_v2 = vld [vmem:[%s918_s1 + $0x60] sm:$0xff]  ;;  %s923_s11 = smov (!%p198_p3, %s624_s11), 31  ;;  %vm369_vm0 = vcmask 519168   ;;  %vm438_vm1 = vcmask 523264  }
   0xc   : > { %v255_v3 = vpack.c.bf16 %v247_v1, %v246_v0  ;;  %v245_v4 = vld [vmem:[%s918_s1 + $0x68] sm:$0xff]  ;;  %v242_v6 = vld [vmem:[%s918_s1 + $0x50] sm:$0xff]  ;;  %v243_v7 = vld [vmem:[%s918_s1 + $0x58] sm:$0xff]  ;;  %s625_s25 = sshll.u32 %s923_s11, 2  ;;  %s629_s24 = sshll.u32 %s923_s11, 3  ;;  %vm512_vm2 = vcmask 15360  }
   0xd   : > { %v254_v5 = vpack.c.bf16 %v245_v4, %v244_v2  ;;  %v253_v8 = vpack.c.bf16 %v243_v7, %v242_v6  ;;  %v240_v9 = vld [vmem:[%s918_s1 + $0x40] sm:$0xff]  ;;  %v241_v10 = vld [vmem:[%s918_s1 + $0x48] sm:$0xff]  ;;  %v238_v12 = vld [vmem:[%s918_s1 + $0x30] sm:$0xff]  ;;  %s201_s28 = scalar_lea.vmem %s917_s0, %s625_s25  ;;  %s826_s23 = scalar_lea.vmem %s920_s3, %s625_s25 }
   0xe   : > { %304 = vmatpush.bf16.msra.mxu0 %v255_v3  ;;  %680 = vmatpush.bf16.msra.mxu2 %v255_v3  ;;  %v252_v11 = vpack.c.bf16 %v241_v10, %v240_v9  ;;  %v239_v13 = vld [vmem:[%s918_s1 + $0x38] sm:$0xff]  ;;  %v236_v15 = vld [vmem:[%s918_s1 + $0x20] sm:$0xff]  ;;  %v237_v16 = vld [vmem:[%s918_s1 + $0x28] sm:$0xff]  ;;  %s880_s27 = scalar_lea.vmem %s921_s4, %s629_s24 }
   0xf   : > { %v251_v14 = vpack.c.bf16 %v239_v13, %v238_v12  ;;  %v250_v17 = vpack.c.bf16 %v237_v16, %v236_v15  ;;  %v234_v18 = vld [vmem:[%s918_s1 + $0x10] sm:$0xff]  ;;  %v235_v19 = vld [vmem:[%s918_s1 + $0x18] sm:$0xff]  ;;  %v232_v21 = vld [vmem:[%s918_s1] sm:$0xff] }
  0x10   : > { %v249_v20 = vpack.c.bf16 %v235_v19, %v234_v18  ;;  %v233_v22 = vld [vmem:[%s918_s1 + $0x8] sm:$0xff]  ;;  %v672_v24 = vld [vmem:[%s201_s28] sm:$0xff]  ;;  %v674_v28 = vld [vmem:[%s201_s28 + $0x10] sm:$0xff] }
  0x11   : > { %v248_v23 = vpack.c.bf16 %v233_v22, %v232_v21  ;;  %v676_v25 = vld [vmem:[%s201_s28 + $0x20] sm:$0xff]  ;;  %v673_v26 = vld [vmem:[%s201_s28 + $0x8] sm:$0xff]  ;;  %v678_v29 = vld [vmem:[%s201_s28 + $0x30] sm:$0xff] }
  0x12   : > { %305 = vmatpush.bf16.msra.mxu0 %v254_v5  ;;  %681 = vmatpush.bf16.msra.mxu2 %v254_v5  ;;  %v677_v27 = vld [vmem:[%s201_s28 + $0x28] sm:$0xff]  ;;  %v675_v30 = vld [vmem:[%s201_s28 + $0x18] sm:$0xff]  ;;  %v392_v32 = vld [vmem:[%s919_s2 + $0x30] sm:$0xff] }
  0x13   : > { %v679_v31 = vld [vmem:[%s201_s28 + $0x38] sm:$0xff]  ;;  %v390_v35 = vld [vmem:[%s919_s2 + $0x20] sm:$0xff]  ;;  %v391_v36 = vld [vmem:[%s919_s2 + $0x28] sm:$0xff] }
  0x14   : > { %v393_v33 = vld [vmem:[%s919_s2 + $0x38] sm:$0xff]  ;;  %v396_v37 = vpack.c.bf16 %v391_v36, %v390_v35  ;;  %v388_v38 = vld [vmem:[%s919_s2 + $0x10] sm:$0xff]  ;;  %v386_v41 = vld [vmem:[%s919_s2] sm:$0xff] }
  0x15   : > { %v397_v34 = vpack.c.bf16 %v393_v33, %v392_v32  ;;  %v389_v39 = vld [vmem:[%s919_s2 + $0x18] sm:$0xff]  ;;  %v387_v42 = vld [vmem:[%s919_s2 + $0x8] sm:$0xff] }
  0x16   : > { %306 = vmatpush.bf16.msra.mxu0 %v253_v8  ;;  %682 = vmatpush.bf16.msra.mxu2 %v253_v8  ;;  %v395_v40 = vpack.c.bf16 %v389_v39, %v388_v38  ;;  %v394_v43 = vpack.c.bf16 %v387_v42, %v386_v41 }
  0x17   : > { %467 = vmatpush.bf16.msra.mxu1 %v397_v34  ;;  %688 = vmatpush.bf16.msra.mxu3 %v397_v34 }
  0x1a   : > { %307 = vmatpush.bf16.msra.mxu0 %v252_v11  ;;  %683 = vmatpush.bf16.msra.mxu2 %v252_v11 }
  0x1b   : > { %468 = vmatpush.bf16.msra.mxu1 %v396_v37  ;;  %689 = vmatpush.bf16.msra.mxu3 %v396_v37 }
  0x1e   : > { %308 = vmatpush.bf16.msra.mxu0 %v251_v14  ;;  %684 = vmatpush.bf16.msra.mxu2 %v251_v14 }
  0x1f   : > { %469 = vmatpush.bf16.msra.mxu1 %v395_v40  ;;  %690 = vmatpush.bf16.msra.mxu3 %v395_v40 }
  0x22   : > { %309 = vmatpush.bf16.msra.mxu0 %v250_v17  ;;  %685 = vmatpush.bf16.msra.mxu2 %v250_v17 }
  0x23   : > { %470 = vmatpush.bf16.msra.mxu1 %v394_v43  ;;  %691 = vmatpush.bf16.msra.mxu3 %v394_v43 }
  0x26   : > { %310 = vmatpush.bf16.msra.mxu0 %v249_v20  ;;  %686 = vmatpush.bf16.msra.mxu2 %v249_v20 }
  0x2a   : > { %311 = vmatpush.bf16.msra.mxu0 %v248_v23  ;;  %687 = vmatpush.bf16.msra.mxu2 %v248_v23 }
  0x2d   : > { %312 = vmatmul.bf16.vlgmr.msra.gmra.mxu0 %v672_v24  ;;  %332 = vmatmul.bf16.vlgmr.msra.gmra.mxu2 %v676_v25 }
  0x3d   : > { %317 = vmatmul.bf16.gmra.mxu0 %v673_v26  ;;  %337 = vmatmul.bf16.gmra.mxu2 %v677_v27 }
  0x4d   : > { %322 = vmatmul.bf16.gmra.mxu0 %v674_v28  ;;  %342 = vmatmul.bf16.gmra.mxu2 %v678_v29 }
  0x5d   : > { %327 = vmatmul.bf16.gmra.mxu0 %v675_v30  ;;  %347 = vmatmul.bf16.gmra.mxu2 %v679_v31 }
  0xaa   : > { %v313_v44 = vpop.f32.mrf.mxu0 }
  0xab   : > { %v353_v45 = vpack.c.bf16 %v313_v44, %v313_v44 }
  0xad   : > { %370 = vst.msk [vmem:[%s826_s23] sm:$0xf] %vm369_vm0, %v353_v45  ;;  %v414_v50 = vunpack.c.l.b16 %v353_v45 }
  0xb0   : > { %v333_v46 = vpop.f32.mrf.mxu2 }
  0xb1   : > { %v830_v47 = vpack.c.bf16 %v333_v46, %v333_v46 }
  0xb2   : > { %v315_v48 = vpop.f32.mrf.mxu0 }
  0xb3   : > { %378 = vst.msk [vmem:[%s826_s23 + $0x20] sm:$0xf] %vm369_vm0, %v830_v47  ;;  %v354_v49 = vpack.c.bf16 %v315_v48, %v315_v48  ;;  %v422_v34 = vunpack.c.l.b16 %v830_v47 }
  0xb5   : > { %371 = vst.msk [vmem:[%s826_s23 + $0x4] sm:$0xf] %vm369_vm0, %v354_v49  ;;  %v415_v51 = vunpack.c.l.b16 %v354_v49 }
  0xb7   : > { %v430_v52 = vpack.c.b16 %v415_v51, %v414_v50 }
  0xb8   : > { %v335_v53 = vpop.f32.mrf.mxu2 }
  0xb9   : > { %v837_v54 = vpack.c.bf16 %v335_v53, %v335_v53  ;;  %662 = vmatmul.msk.bf16.vlgmr.msra.gmra.mxu1 %vm438_vm1, %v430_v52 }
  0xba   : > { %v318_v55 = vpop.f32.mrf.mxu0 }
  0xbb   : > { %379 = vst.msk [vmem:[%s826_s23 + $0x24] sm:$0xf] %vm369_vm0, %v837_v54  ;;  %v355_v56 = vpack.c.bf16 %v318_v55, %v318_v55  ;;  %v423_v33 = vunpack.c.l.b16 %v837_v54 }
  0xbd   : > { %372 = vst.msk [vmem:[%s826_s23 + $0x8] sm:$0xf] %vm369_vm0, %v355_v56  ;;  %v416_v61 = vunpack.c.l.b16 %v355_v56  ;;  %v434_v35 = vpack.c.b16 %v423_v33, %v422_v34 }
  0xc0   : > { %v338_v57 = vpop.f32.mrf.mxu2 }
  0xc1   : > { %v363_v58 = vpack.c.bf16 %v338_v57, %v338_v57 }
  0xc2   : > { %v320_v59 = vpop.f32.mrf.mxu0 }
  0xc3   : > { %380 = vst.msk [vmem:[%s826_s23 + $0x28] sm:$0xf] %vm369_vm0, %v363_v58  ;;  %v356_v60 = vpack.c.bf16 %v320_v59, %v320_v59  ;;  %v424_v3 = vunpack.c.l.b16 %v363_v58 }
  0xc5   : > { %373 = vst.msk [vmem:[%s826_s23 + $0xc] sm:$0xf] %vm369_vm0, %v356_v60  ;;  %v417_v62 = vunpack.c.l.b16 %v356_v60 }
  0xc7   : > { %v431_v63 = vpack.c.b16 %v417_v62, %v416_v61 }
  0xc8   : > { %v340_v0 = vpop.f32.mrf.mxu2 }
  0xc9   : > { %v364_v1 = vpack.c.bf16 %v340_v0, %v340_v0  ;;  %663 = vmatmul.msk.bf16.gmra.mxu1 %vm438_vm1, %v431_v63 }
  0xca   : > { %v323_v2 = vpop.f32.mrf.mxu0 }
  0xcb   : > { %381 = vst.msk [vmem:[%s826_s23 + $0x2c] sm:$0xf] %vm369_vm0, %v364_v1  ;;  %v425_v4 = vunpack.c.l.b16 %v364_v1  ;;  %v357_v5 = vpack.c.bf16 %v323_v2, %v323_v2 }
  0xcd   : > { %374 = vst.msk [vmem:[%s826_s23 + $0x10] sm:$0xf] %vm369_vm0, %v357_v5  ;;  %v435_v6 = vpack.c.b16 %v425_v4, %v424_v3  ;;  %v418_v11 = vunpack.c.l.b16 %v357_v5 }
  0xcf   : > { %667 = vmatmul.msk.bf16.vlgmr.msra.gmra.mxu3 %vm438_vm1, %v435_v6 }
  0xd0   : > { %v343_v7 = vpop.f32.mrf.mxu2 }
  0xd1   : > { %v365_v8 = vpack.c.bf16 %v343_v7, %v343_v7 }
  0xd2   : > { %v325_v9 = vpop.f32.mrf.mxu0 }
  0xd3   : > { %382 = vst.msk [vmem:[%s826_s23 + $0x30] sm:$0xf] %vm369_vm0, %v365_v8  ;;  %v358_v10 = vpack.c.bf16 %v325_v9, %v325_v9  ;;  %v426_v17 = vunpack.c.l.b16 %v365_v8 }
  0xd5   : > { %375 = vst.msk [vmem:[%s826_s23 + $0x14] sm:$0xf] %vm369_vm0, %v358_v10  ;;  %v419_v12 = vunpack.c.l.b16 %v358_v10 }
  0xd7   : > { %v432_v13 = vpack.c.b16 %v419_v12, %v418_v11 }
  0xd8   : > { %v345_v14 = vpop.f32.mrf.mxu2 }
  0xd9   : > { %v366_v15 = vpack.c.bf16 %v345_v14, %v345_v14  ;;  %664 = vmatmul.msk.bf16.gmra.mxu1 %vm438_vm1, %v432_v13 }
  0xda   : > { %v328_v16 = vpop.f32.mrf.mxu0 }
  0xdb   : > { %383 = vst.msk [vmem:[%s826_s23 + $0x34] sm:$0xf] %vm369_vm0, %v366_v15  ;;  %v427_v18 = vunpack.c.l.b16 %v366_v15  ;;  %v359_v19 = vpack.c.bf16 %v328_v16, %v328_v16 }
  0xdd   : > { %376 = vst.msk [vmem:[%s826_s23 + $0x18] sm:$0xf] %vm369_vm0, %v359_v19  ;;  %v436_v20 = vpack.c.b16 %v427_v18, %v426_v17  ;;  %v420_v25 = vunpack.c.l.b16 %v359_v19 }
  0xdf   : > { %668 = vmatmul.msk.bf16.gmra.mxu3 %vm438_vm1, %v436_v20 }
  0xe0   : > { %v348_v21 = vpop.f32.mrf.mxu2 }
  0xe1   : > { %v367_v22 = vpack.c.bf16 %v348_v21, %v348_v21 }
  0xe2   : > { %v330_v23 = vpop.f32.mrf.mxu0 }
  0xe3   : > { %384 = vst.msk [vmem:[%s826_s23 + $0x38] sm:$0xf] %vm369_vm0, %v367_v22  ;;  %v360_v24 = vpack.c.bf16 %v330_v23, %v330_v23  ;;  %v428_v30 = vunpack.c.l.b16 %v367_v22 }
  0xe5   : > { %377 = vst.msk [vmem:[%s826_s23 + $0x1c] sm:$0xf] %vm369_vm0, %v360_v24  ;;  %v421_v26 = vunpack.c.l.b16 %v360_v24 }
  0xe7   : > { %v433_v27 = vpack.c.b16 %v421_v26, %v420_v25 }
  0xe8   : > { %v350_v28 = vpop.f32.mrf.mxu2 }
  0xe9   : > { %v368_v29 = vpack.c.bf16 %v350_v28, %v350_v28  ;;  %665 = vmatmul.msk.bf16.gmra.mxu1 %vm438_vm1, %v433_v27 }
  0xeb   : > { %385 = vst.msk [vmem:[%s826_s23 + $0x3c] sm:$0xf] %vm369_vm0, %v368_v29  ;;  %v429_v31 = vunpack.c.l.b16 %v368_v29 }
  0xed   : > { %v437_v32 = vpack.c.b16 %v429_v31, %v428_v30 }
  0xef   : > { %669 = vmatmul.msk.bf16.gmra.mxu3 %vm438_vm1, %v437_v32 }
  0xf9   : > { %666 = vmatmul.msk.bf16.gmra.mxu1 %vm438_vm1, %v434_v35 }
 0x136   : > { %v472_v36 = vpop.f32.mrf.mxu1 }
 0x137   : > { %513 = vst.msk [vmem:[%s880_s27] sm:$0xff] %vm512_vm2, %v472_v36 }
 0x13e   : > { %v474_v37 = vpop.f32.mrf.mxu1 }
 0x13f   : > { %514 = vst.msk [vmem:[%s880_s27 + $0x8] sm:$0xff] %vm512_vm2, %v474_v37 }
 0x146   : > { %v477_v38 = vpop.f32.mrf.mxu1 }
 0x147   : > { %515 = vst.msk [vmem:[%s880_s27 + $0x10] sm:$0xff] %vm512_vm2, %v477_v38 }
 0x14e   : > { %v479_v39 = vpop.f32.mrf.mxu1 }
 0x14f   : > { %516 = vst.msk [vmem:[%s880_s27 + $0x18] sm:$0xff] %vm512_vm2, %v479_v39 }
 0x152   : > { %v497_v40 = vpop.f32.mrf.mxu3 }
 0x153   : > { %523 = vst.msk [vmem:[%s880_s27 + $0x50] sm:$0xff] %vm512_vm2, %v497_v40 }
 0x156   : > { %v482_v41 = vpop.f32.mrf.mxu1 }
 0x157   : > { %517 = vst.msk [vmem:[%s880_s27 + $0x20] sm:$0xff] %vm512_vm2, %v482_v41 }
 0x15a   : > { %v499_v42 = vpop.f32.mrf.mxu3 }
 0x15b   : > { %524 = vst.msk [vmem:[%s880_s27 + $0x58] sm:$0xff] %vm512_vm2, %v499_v42 }
 0x15e   : > { %v484_v43 = vpop.f32.mrf.mxu1 }
 0x15f   : > { %518 = vst.msk [vmem:[%s880_s27 + $0x28] sm:$0xff] %vm512_vm2, %v484_v43 }
 0x162   : > { %v502_v44 = vpop.f32.mrf.mxu3 }
 0x163   : > { %525 = vst.msk [vmem:[%s880_s27 + $0x60] sm:$0xff] %vm512_vm2, %v502_v44 }
 0x166   : > { %v487_v45 = vpop.f32.mrf.mxu1 }
 0x167   : > { %519 = vst.msk [vmem:[%s880_s27 + $0x30] sm:$0xff] %vm512_vm2, %v487_v45 }
 0x16a   : > { %v504_v46 = vpop.f32.mrf.mxu3 }
 0x16b   : > { %526 = vst.msk [vmem:[%s880_s27 + $0x68] sm:$0xff] %vm512_vm2, %v504_v46 }
 0x16e   : > { %v489_v47 = vpop.f32.mrf.mxu1 }
 0x16f   : > { %520 = vst.msk [vmem:[%s880_s27 + $0x38] sm:$0xff] %vm512_vm2, %v489_v47 }
 0x172   : > { %v507_v48 = vpop.f32.mrf.mxu3 }
 0x173   : > { %527 = vst.msk [vmem:[%s880_s27 + $0x70] sm:$0xff] %vm512_vm2, %v507_v48 }
 0x176   : > { %v492_v49 = vpop.f32.mrf.mxu1 }
 0x177   : > { %521 = vst.msk [vmem:[%s880_s27 + $0x40] sm:$0xff] %vm512_vm2, %v492_v49 }
 0x17a   : > { %v509_v50 = vpop.f32.mrf.mxu3 }
 0x17b   : > { %528 = vst.msk [vmem:[%s880_s27 + $0x78] sm:$0xff] %vm512_vm2, %v509_v50 }
 0x17e   : > { %v494_v51 = vpop.f32.mrf.mxu1 }
 0x17f   : > { %522 = vst.msk [vmem:[%s880_s27 + $0x48] sm:$0xff] %vm512_vm2, %v494_v51 }
 0x180 PF: > { %s15_s15 = sadd.s32 1, %s706_s15  }
 0x181   : > { %p12_p4 = scmp.ge.s32.totalorder %s15_s15, 4  }
 0x183   :  { %14 = sbr.rel (!%p12_p4) target bundleno = 1 (0x1), region = 74 }

// kernel: gat_forward.7
= control target key start
LH: loop header
LB: loop body
LE: loop exit
PB: predicated region body
PF: predicated region fallthrough
CT: control target
= control target key end

     0   :  { %s5060_s0 = inlined_call_operand.vmem [shape: f32[256,1], index: 0, kind: input, shape index: {}]   ;;  %s5061_s1 = inlined_call_operand.vmem [shape: f32[1,256], index: 1, kind: input, shape index: {}]   ;;  %s5062_s2 = inlined_call_operand.vmem [shape: s8[256,256], index: 2, kind: input, shape index: {}]   ;;  %s5063_s3 = inlined_call_operand.vmem [shape: bf16[256,64], index: 3, kind: input, shape index: {}]   ;;  %s5064_s4 = inlined_call_operand.vmem [shape: f32[64,8], index: 4, kind: input, shape index: {}]   ;;  %s5065_s5 = inlined_call_operand.vmem [shape: f32[1,8], index: 5, kind: input, shape index: {}]   ;;  %s5066_s6 = inlined_call_operand.vmem [shape: f32[256,8], index: 6, kind: output, shape index: {}]  }
   0x1   :  { %5080 = sst [smem:[#allocation11_spill]] %s5062_s2 }
   0x2   :  { %s3203_s21 = smov 0   ;;  %s3205_s22 = smov 0  }
   0x3   :  { %s3207_s23 = smov 0   ;;  %s3209_s24 = smov 0  }
   0x4   :  { %s3211_s25 = smov 0   ;;  %s3213_s26 = smov 0  }
   0x5   :  { %s3215_s27 = smov 0  }
   0x6 LB: > { %s25_s28 = sadd.s32 1, %s3154_s25  ;;  %s28_s29 = sadd.s32 1, %s3158_s26  ;;  %s3162_s27 = sphi %s3215_s27, %s16_s27   ;;  %s3158_s26 = sphi %s3213_s26, %s5200_s26   ;;  %s3154_s25 = sphi %s3211_s25, %s5199_s25   ;;  %s3150_s24 = sphi %s3209_s24, %s5198_s24   ;;  %s3146_s23 = sphi %s3207_s23, %s5197_s23   ;;  %s3142_s22 = sphi %s3205_s22, %s5196_s22   ;;  %s3138_s21 = sphi %s3203_s21, %s5195_s21  }
   0x7   : > { %p26_p0 = scmp.ge.s32.totalorder %s25_s28, 2  ;;  %p96_p1 = scmp.ne.s32.totalorder %s3142_s22, %s3138_s21 }
   0x8   : > { %p97_p2 = scmp.eq.s32.totalorder %s3162_s27, 0  ;;  %s89_s9 = sadd.s32 1, %s3142_s22 }
   0x9   : > { %s5202_s28 = smov (%p26_p0, %s25_s28), 0  ;;  %s5204_s29 = smov (!%p26_p0, %s28_s29), %s3158_s26 }
   0xa   : > { %p98_p3 = por %p97_p2, %p96_p1  ;;  %p30_p4 = scmp.ge.s32.totalorder %s5204_s29, 2 }
   0xb   : > { %s85_s30 = ssub.s32 %s3154_s25, %s5202_s28  ;;  %p2690_p6 = scmp.ge.s32.totalorder %s3162_s27, 4 }
   0xc   : > { %s5206_s29 = smov (%p30_p4, %s5204_s29), 0 }
   0xd   : > { %s84_s7 = ssub.s32 %s3158_s26, %s5206_s29  ;;  %222 = sbr.rel (%p2690_p6) target bundleno = 32 (0x20), region = 24 }
   0xe   : > { %s86_s8 = sor.u32 %s85_s30, %s84_s7 }
   0xf   : > { %p87_p5 = scmp.eq.s32.totalorder %s86_s8, 0 }
  0x11   : > { %s3254_s10 = scalar_select %p87_p5, %s3142_s22, %s89_s9  }
  0x12   : > { %240 = sbr.rel (!%p98_p3) target bundleno = 32 (0x20), region = 36  ;;  %s242_s11 = sand.u32 (%p98_p3), 1, %s3142_s22  }
  0x13   : > { %s2771_s12 = sshll.u32 (%p98_p3), %s3158_s26, 3  ;;  %s2691_s13 = sshll.u32 (%p98_p3), %s242_s11, 5 }
  0x14   : > { %s247_s14 = sadd.s32 (%p98_p3), %s3154_s25, %s2771_s12  ;;  %s5081_s2 = sld [smem:[#allocation11_spill]] (%p98_p3) }
  0x15   : > { %s2694_s15 = sshll.u32 (%p98_p3), %s247_s14, 3  ;;  %s244_s19 = scalar_lea.vmem (%p98_p3), [#allocation5], %s2691_s13 }
  0x1a   : > { %s249_s18 = scalar_lea.vmem %s5081_s2, %s2694_s15 }
  0x1b   : > { %v284_v0 = vld [vmem:[%s249_s18] sm:$0xff]  ;;  %v286_v1 = vld [vmem:[%s249_s18 + $0x10] sm:$0xff] }
  0x1c   : > { %v288_v2 = vld [vmem:[%s249_s18 + $0x20] sm:$0xff]  ;;  %285 = vst [vmem:[%s244_s19] sm:$0xff] %v284_v0  ;;  %v290_v3 = vld [vmem:[%s249_s18 + $0x30] sm:$0xff] }
  0x1d   : > { %287 = vst [vmem:[%s244_s19 + $0x8] sm:$0xff] %v286_v1 }
  0x1e   : > { %289 = vst [vmem:[%s244_s19 + $0x10] sm:$0xff] %v288_v2 }
  0x1f   : > { %291 = vst [vmem:[%s244_s19 + $0x18] sm:$0xff] %v290_v3 }
  0x20 PF: > { %p2695_p7 = scmp.ge.s32.totalorder %s3162_s27, 1  ;;  %p305_p8 = scmp.lt.s32.totalorder %s3162_s27, 5 }
  0x22   : > { %p306_p9 = pnand %p2695_p7, %p305_p8 }
  0x24   : > { %309 = sbr.rel (%p306_p9) target bundleno = 1455 (0x5af), region = 78 }
  0x29   : > { %s312_s20 = sand.u32 1, %s3138_s21   ;;  %s2697_s30 = sshll.u32 %s3150_s24, 4 }
  0x2a   : > { %s2696_s7 = sshll.u32 %s312_s20, 5  ;;  %p355_p10 = scmp.lt.s32.totalorder %s2697_s30, 31 }
  0x2b   : > { %p360_p11 = scmp.lt.s32.totalorder %s3146_s23, 1  ;;  %s2699_s11 = sshll.u32 %s3146_s23, 4 }
  0x2c   : > { %s5208_s30 = smov (!%p355_p10, %s2697_s30), 31  ;;  %p365_p12 = scmp.lt.s32.totalorder %s2699_s11, 31 }
  0x2d   : > { %s3269_s8 = scalar_select %p360_p11, %s3146_s23, 1 }
  0x2e   : > { %s2698_s9 = sshll.u32 %s5208_s30, 3  ;;  %s5210_s11 = smov (!%p365_p12, %s2699_s11), 31 }
  0x2f   : > { %s3275_s14 = scalar_lea.vmem %s5060_s0, %s2698_s9  ;;  %s362_s17 = scalar_lea.vmem %s5061_s1, %s3269_s8 }
  0x30   : > { %s3284_s18 = scalar_lea.vmem %s5066_s6, %s2698_s9  ;;  %s2700_s19 = sshll.u32 %s5210_s11, 2 }
  0x31   : > { %s3289_s2 = scalar_lea.vmem %s5063_s3, %s2700_s19  ;;  %s3291_s12 = scalar_lea.vmem [#allocation5], %s2696_s7 }
  0x32   : > { %p2703_p13 = scmp.ne.s32.totalorder %s3146_s23, 0 }
  0x34   : > { %382 = sbr.rel (%p2703_p13) target bundleno = 106 (0x6a), region = 86 }
  0x39   : > { %vm383_vm0 = vcmask 7168   ;;  %v3164_v4 = vmov -1e+30   ;;  %v3165_v5 = vmov 0.0   ;;  %vm416_vm1 = vcmask 523264  }
  0x3a   : > { %384 = vst.msk [vmem:[#allocation2] sm:$0xff] %vm383_vm0, %v3164_v4 }
  0x3b   : > { %385 = vst.msk [vmem:[#allocation2 + $0x8] sm:$0xff] %vm383_vm0, %v3164_v4 }
  0x3c   : > { %386 = vst.msk [vmem:[#allocation2 + $0x10] sm:$0xff] %vm383_vm0, %v3164_v4 }
  0x3d   : > { %387 = vst.msk [vmem:[#allocation2 + $0x18] sm:$0xff] %vm383_vm0, %v3164_v4 }
  0x3e   : > { %388 = vst.msk [vmem:[#allocation2 + $0x20] sm:$0xff] %vm383_vm0, %v3164_v4 }
  0x3f   : > { %389 = vst.msk [vmem:[#allocation2 + $0x28] sm:$0xff] %vm383_vm0, %v3164_v4 }
  0x40   : > { %390 = vst.msk [vmem:[#allocation2 + $0x30] sm:$0xff] %vm383_vm0, %v3164_v4 }
  0x41   : > { %391 = vst.msk [vmem:[#allocation2 + $0x38] sm:$0xff] %vm383_vm0, %v3164_v4 }
  0x42   : > { %392 = vst.msk [vmem:[#allocation2 + $0x40] sm:$0xff] %vm383_vm0, %v3164_v4 }
  0x43   : > { %393 = vst.msk [vmem:[#allocation2 + $0x48] sm:$0xff] %vm383_vm0, %v3164_v4 }
  0x44   : > { %394 = vst.msk [vmem:[#allocation2 + $0x50] sm:$0xff] %vm383_vm0, %v3164_v4 }
  0x45   : > { %395 = vst.msk [vmem:[#allocation2 + $0x58] sm:$0xff] %vm383_vm0, %v3164_v4 }
  0x46   : > { %396 = vst.msk [vmem:[#allocation2 + $0x60] sm:$0xff] %vm383_vm0, %v3164_v4 }
  0x47   : > { %397 = vst.msk [vmem:[#allocation2 + $0x68] sm:$0xff] %vm383_vm0, %v3164_v4 }
  0x48   : > { %398 = vst.msk [vmem:[#allocation2 + $0x70] sm:$0xff] %vm383_vm0, %v3164_v4 }
  0x49   : > { %399 = vst.msk [vmem:[#allocation2 + $0x78] sm:$0xff] %vm383_vm0, %v3164_v4 }
  0x4a   : > { %400 = vst.msk [vmem:[#allocation3] sm:$0xff] %vm383_vm0, %v3165_v5 }
  0x4b   : > { %401 = vst.msk [vmem:[#allocation3 + $0x8] sm:$0xff] %vm383_vm0, %v3165_v5 }
  0x4c   : > { %402 = vst.msk [vmem:[#allocation3 + $0x10] sm:$0xff] %vm383_vm0, %v3165_v5 }
  0x4d   : > { %403 = vst.msk [vmem:[#allocation3 + $0x18] sm:$0xff] %vm383_vm0, %v3165_v5 }
  0x4e   : > { %404 = vst.msk [vmem:[#allocation3 + $0x20] sm:$0xff] %vm383_vm0, %v3165_v5 }
  0x4f   : > { %405 = vst.msk [vmem:[#allocation3 + $0x28] sm:$0xff] %vm383_vm0, %v3165_v5 }
  0x50   : > { %406 = vst.msk [vmem:[#allocation3 + $0x30] sm:$0xff] %vm383_vm0, %v3165_v5 }
  0x51   : > { %407 = vst.msk [vmem:[#allocation3 + $0x38] sm:$0xff] %vm383_vm0, %v3165_v5 }
  0x52   : > { %408 = vst.msk [vmem:[#allocation3 + $0x40] sm:$0xff] %vm383_vm0, %v3165_v5 }
  0x53   : > { %409 = vst.msk [vmem:[#allocation3 + $0x48] sm:$0xff] %vm383_vm0, %v3165_v5 }
  0x54   : > { %410 = vst.msk [vmem:[#allocation3 + $0x50] sm:$0xff] %vm383_vm0, %v3165_v5 }
  0x55   : > { %411 = vst.msk [vmem:[#allocation3 + $0x58] sm:$0xff] %vm383_vm0, %v3165_v5 }
  0x56   : > { %412 = vst.msk [vmem:[#allocation3 + $0x60] sm:$0xff] %vm383_vm0, %v3165_v5 }
  0x57   : > { %413 = vst.msk [vmem:[#allocation3 + $0x68] sm:$0xff] %vm383_vm0, %v3165_v5 }
  0x58   : > { %414 = vst.msk [vmem:[#allocation3 + $0x70] sm:$0xff] %vm383_vm0, %v3165_v5 }
  0x59   : > { %415 = vst.msk [vmem:[#allocation3 + $0x78] sm:$0xff] %vm383_vm0, %v3165_v5 }
  0x5a   : > { %417 = vst.msk [vmem:[#allocation4] sm:$0xff] %vm416_vm1, %v3165_v5 }
  0x5b   : > { %418 = vst.msk [vmem:[#allocation4 + $0x8] sm:$0xff] %vm416_vm1, %v3165_v5 }
  0x5c   : > { %419 = vst.msk [vmem:[#allocation4 + $0x10] sm:$0xff] %vm416_vm1, %v3165_v5 }
  0x5d   : > { %420 = vst.msk [vmem:[#allocation4 + $0x18] sm:$0xff] %vm416_vm1, %v3165_v5 }
  0x5e   : > { %421 = vst.msk [vmem:[#allocation4 + $0x20] sm:$0xff] %vm416_vm1, %v3165_v5 }
  0x5f   : > { %422 = vst.msk [vmem:[#allocation4 + $0x28] sm:$0xff] %vm416_vm1, %v3165_v5 }
  0x60   : > { %423 = vst.msk [vmem:[#allocation4 + $0x30] sm:$0xff] %vm416_vm1, %v3165_v5 }
  0x61   : > { %424 = vst.msk [vmem:[#allocation4 + $0x38] sm:$0xff] %vm416_vm1, %v3165_v5 }
  0x62   : > { %425 = vst.msk [vmem:[#allocation4 + $0x40] sm:$0xff] %vm416_vm1, %v3165_v5 }
  0x63   : > { %426 = vst.msk [vmem:[#allocation4 + $0x48] sm:$0xff] %vm416_vm1, %v3165_v5 }
  0x64   : > { %427 = vst.msk [vmem:[#allocation4 + $0x50] sm:$0xff] %vm416_vm1, %v3165_v5 }
  0x65   : > { %428 = vst.msk [vmem:[#allocation4 + $0x58] sm:$0xff] %vm416_vm1, %v3165_v5 }
  0x66   : > { %429 = vst.msk [vmem:[#allocation4 + $0x60] sm:$0xff] %vm416_vm1, %v3165_v5 }
  0x67   : > { %430 = vst.msk [vmem:[#allocation4 + $0x68] sm:$0xff] %vm416_vm1, %v3165_v5 }
  0x68   : > { %431 = vst.msk [vmem:[#allocation4 + $0x70] sm:$0xff] %vm416_vm1, %v3165_v5 }
  0x69   : > { %432 = vst.msk [vmem:[#allocation4 + $0x78] sm:$0xff] %vm416_vm1, %v3165_v5 }
  0x6a PF: > { %v459_v6 = vld [vmem:[%s3275_s14 + $0x10] sm:$0xff]  ;;  %v457_v7 = vld [vmem:[%s3275_s14] sm:$0xff]  ;;  %v3166_v8 = vmov 0   ;;  %v460_v10 = vld [vmem:[%s3275_s14 + $0x18] sm:$0xff]  ;;  %p2760_p0 = scmp.ne.s32.totalorder %s3146_s23, 1 }
  0x6b   : > { %2877 = vset.pattern.permute.xlu1 %v3166_v8  ;;  %2876 = vset.pattern.permute.xlu0 %v3166_v8  ;;  %v461_v9 = vld [vmem:[%s3275_s14 + $0x20] sm:$0xff]  ;;  %v458_v11 = vld [vmem:[%s3275_s14 + $0x8] sm:$0xff]  ;;  %v464_v13 = vld [vmem:[%s3275_s14 + $0x38] sm:$0xff] }
  0x6c   : > { %486 = vperm.xlu1 %2877, %v459_v6   ;;  %476 = vperm.xlu0 %2876, %v457_v7   ;;  %v462_v12 = vld [vmem:[%s3275_s14 + $0x28] sm:$0xff]  ;;  %v463_v14 = vld [vmem:[%s3275_s14 + $0x30] sm:$0xff]  ;;  %v465_v15 = vld [vmem:[%s3275_s14 + $0x40] sm:$0xff] }
  0x6d   : > { %2878 = vset.pattern.permute.xlu2 %v3166_v8  ;;  %v467_v16 = vld [vmem:[%s3275_s14 + $0x50] sm:$0xff]  ;;  %v466_v17 = vld [vmem:[%s3275_s14 + $0x48] sm:$0xff]  ;;  %v468_v18 = vld [vmem:[%s3275_s14 + $0x58] sm:$0xff] }
  0x6e   : > { %496 = vperm.xlu2 %2878, %v461_v9   ;;  %v470_v19 = vld [vmem:[%s3275_s14 + $0x68] sm:$0xff]  ;;  %v469_v20 = vld [vmem:[%s3275_s14 + $0x60] sm:$0xff]  ;;  %v471_v21 = vld [vmem:[%s3275_s14 + $0x70] sm:$0xff] }
  0x6f   : > { %v472_v22 = vld [vmem:[%s3275_s14 + $0x78] sm:$0xff]  ;;  %v433_v23 = vld [vmem:[%s3291_s12] sm:$0xff]  ;;  %v434_v26 = vld [vmem:[%s3291_s12 + $0x8] sm:$0xff] }
  0x70   : > { %vm437_vm2 = vnez %v433_v23  ;;  %vm438_vm3 = vnez %v434_v26  ;;  %v435_v45 = vld [vmem:[%s3291_s12 + $0x10] sm:$0xff]  ;;  %v3373_v49 = vld [vmem:[%s362_s17] ss:$0 sm:$0xff]  ;;  %v436_v9 = vld [vmem:[%s3291_s12 + $0x18] sm:$0xff] }
  0x71   : > { %v621_v24 = vsel %vm437_vm2, 16843009, %v3166_v8  ;;  %v622_v30 = vsel %vm438_vm3, 16843009, %v3166_v8  ;;  %vm439_vm7 = vnez %v435_v45  ;;  %vm440_vm0 = vnez %v436_v9 }
  0x72   : > { %v627_v25 = vunpack.c.2.s8 %v621_v24  ;;  %v625_v27 = vunpack.c.0.s8 %v621_v24  ;;  %v626_v31 = vunpack.c.1.s8 %v621_v24  ;;  %v629_v34 = vunpack.c.0.s8 %v622_v30 }
  0x73   : > { %v628_v35 = vunpack.c.3.s8 %v621_v24  ;;  %v631_v43 = vunpack.c.2.s8 %v622_v30  ;;  %v632_v44 = vunpack.c.3.s8 %v622_v30  ;;  %v3386_v59 = vsel %vm439_vm7, 16843009, %v3166_v8 }
  0x74   : > { %491 = vperm.xlu1 %2877, %v460_v10   ;;  %481 = vperm.xlu0 %2876, %v458_v11   ;;  %v645_v28 = vpack.c.b16 %v627_v25, %v627_v25  ;;  %v641_v29 = vpack.c.b16 %v625_v27, %v625_v27  ;;  %v643_v36 = vpack.c.b16 %v626_v31, %v626_v31  ;;  %v630_v60 = vunpack.c.1.s8 %v622_v30 }
  0x75   : > { %v649_v37 = vpack.c.b16 %v629_v34, %v629_v34  ;;  %v647_v38 = vpack.c.b16 %v628_v35, %v628_v35  ;;  %v653_v50 = vpack.c.b16 %v631_v43, %v631_v43  ;;  %v655_v51 = vpack.c.b16 %v632_v44, %v632_v44 }
  0x76   : > { %501 = vperm.xlu2 %2878, %v462_v12   ;;  %v646_v32 = vpack.c.b8 %v645_v28, %v645_v28  ;;  %v642_v33 = vpack.c.b8 %v641_v29, %v641_v29  ;;  %v644_v40 = vpack.c.b8 %v643_v36, %v643_v36  ;;  %v634_v0 = vunpack.c.1.s8 %v3386_v59 }
  0x77   : > { %v650_v42 = vpack.c.b8 %v649_v37, %v649_v37  ;;  %v648_v47 = vpack.c.b8 %v647_v38, %v647_v38  ;;  %v654_v2 = vpack.c.b8 %v653_v50, %v653_v50  ;;  %v656_v4 = vpack.c.b8 %v655_v51, %v655_v51 }
  0x78   : > { %vm675_vm4 = vnez %v646_v32  ;;  %vm673_vm5 = vnez %v642_v33  ;;  %vm674_vm6 = vnez %v644_v40  ;;  %v635_v7 = vunpack.c.2.s8 %v3386_v59 }
  0x79   : > { %v691_v39 = vsel %vm675_vm4, 16843009, %v3166_v8  ;;  %v689_v41 = vsel %vm673_vm5, 16843009, %v3166_v8  ;;  %vm677_vm8 = vnez %v650_v42  ;;  %v690_v54 = vsel %vm674_vm6, 16843009, %v3166_v8 }
  0x7a   : > { %v707_v46 = vunpack.c.0.s8 %v691_v39  ;;  %v705_v48 = vunpack.c.0.s8 %v689_v41  ;;  %vm676_vm10 = vnez %v648_v47  ;;  %v693_v63 = vsel %vm677_vm8, 16843009, %v3166_v8 }
  0x7b   : > { %v706_v1 = vunpack.c.0.s8 %v690_v54  ;;  %v692_v3 = vsel %vm676_vm10, 16843009, %v3166_v8  ;;  %v709_v11 = vunpack.c.0.s8 %v693_v63  ;;  %v651_v12 = vpack.c.b16 %v630_v60, %v630_v60 }
  0x7c   : > { %511 = vperm.xlu1 %2877, %v464_v13   ;;  %506 = vperm.xlu0 %2876, %v463_v14   ;;  %vm3375_vm9 = vcmp.ne.s32.totalorder %v707_v46, 0  ;;  %vm3381_vm11 = vcmp.ne.s32.totalorder %v705_v48, 0  ;;  %vm679_vm15 = vnez %v654_v2  ;;  %vm680_vm2 = vnez %v656_v4 }
  0x7d   : > { %vm3405_vm1 = vcmp.ne.s32.totalorder %v706_v1, 0  ;;  %vm3409_vm3 = vcmp.ne.s32.totalorder %v709_v11, 0  ;;  %v652_v25 = vpack.c.b8 %v651_v12, %v651_v12  ;;  %v633_v26 = vunpack.c.0.s8 %v3386_v59 }
  0x7e   : > { %516 = vperm.xlu2 %2878, %v465_v15   ;;  %v659_v15 = vpack.c.b16 %v634_v0, %v634_v0  ;;  %v695_v28 = vsel %vm679_vm15, 16843009, %v3166_v8  ;;  %v3418_v30 = vsel %vm440_vm0, 16843009, %v3166_v8  ;;  %v696_v33 = vsel %vm680_vm2, 16843009, %v3166_v8 }
  0x7f   : > { %v637_v34 = vunpack.c.0.s8 %v3418_v30  ;;  %v638_v35 = vunpack.c.1.s8 %v3418_v30  ;;  %v711_v39 = vunpack.c.0.s8 %v695_v28  ;;  %vm678_vm5 = vnez %v652_v25 }
  0x80   : > { %v660_v29 = vpack.c.b8 %v659_v15, %v659_v15  ;;  %v657_v40 = vpack.c.b16 %v633_v26, %v633_v26  ;;  %v636_v41 = vunpack.c.3.s8 %v3386_v59  ;;  %v712_v43 = vunpack.c.0.s8 %v696_v33 }
  0x81   : > { %v665_v47 = vpack.c.b16 %v637_v34, %v637_v34  ;;  %v667_v48 = vpack.c.b16 %v638_v35, %v638_v35  ;;  %v694_v51 = vsel %vm678_vm5, 16843009, %v3166_v8  ;;  %v5104_v35 = vmov 0 }
  0x82   : > { %vm3429_vm6 = vnez %v660_v29  ;;  %v663_v59 = vpack.c.b16 %v636_v41, %v636_v41  ;;  %v710_v9 = vunpack.c.0.s8 %v694_v51  ;;  %v639_v44 = vunpack.c.2.s8 %v3418_v30 }
  0x83   : > { %v698_v63 = vsel %vm3429_vm6, 16843009, %v3166_v8  ;;  %v666_v2 = vpack.c.b8 %v665_v47, %v665_v47 }
  0x84   : > { %526 = vperm.xlu1 %2877, %v467_v16   ;;  %521 = vperm.xlu0 %2876, %v466_v17   ;;  %vm3480_vm6 = vcmp.ne.s32.totalorder %v710_v9, 0  ;;  %v664_v28 = vpack.c.b8 %v663_v59, %v663_v59 }
  0x86   : > { %531 = vperm.xlu2 %2878, %v468_v18  }
  0x8c   : > { %541 = vperm.xlu1 %2877, %v470_v19   ;;  %536 = vperm.xlu0 %2876, %v469_v20   ;;  %v708_v19 = vunpack.c.0.s8 %v692_v3  ;;  %v661_v20 = vpack.c.b16 %v635_v7, %v635_v7  ;;  %v668_v3 = vpack.c.b8 %v667_v48, %v667_v48 }
  0x8e   : > { %546 = vperm.xlu2 %2878, %v471_v21   ;;  %v662_v38 = vpack.c.b8 %v661_v20, %v661_v20  ;;  %vm3439_vm8 = vcmp.ne.s32.totalorder %v708_v19, 0  ;;  %vm686_vm5 = vnez %v668_v3 }
  0x90   : > { %vm683_vm10 = vnez %v662_v38  ;;  %v702_v38 = vsel %vm686_vm5, 16843009, %v3166_v8 }
  0x91   : > { %v699_v1 = vsel %vm683_vm10, 16843009, %v3166_v8  ;;  %v718_v59 = vunpack.c.0.s8 %v702_v38 }
  0x94   : > { %551 = vperm.xlu0 %2876, %v472_v22  }
  0xc8   : > { %v497_v52 = vpop.permute.xlu2 %496 }
  0xc9   : > { %v561_v55 = vadd.f32 %v3373_v49, %v497_v52 }
  0xcb   : > { %v593_v10 = vmul.f32 0.01, %v561_v55  ;;  %vm577_vm14 = vcmp.gt.f32.partialorder %v561_v55, 0.0 }
  0xcd   : > { %v609_v23 = vsel %vm577_vm14, %v561_v55, %v593_v10 }
  0xce   : > { %v3426_v37 = vsel %vm3409_vm3, %v609_v23, -1e+30 }
  0xd0   : > { %v502_v31 = vpop.permute.xlu2 %501 }
  0xd1   : > { %v562_v52 = vadd.f32 %v3373_v49, %v502_v31 }
  0xd3   : > { %vm578_vm0 = vcmp.gt.f32.partialorder %v562_v52, 0.0 }
  0xd8   : > { %v517_v7 = vpop.permute.xlu2 %516 }
  0xd9   : > { %v565_v29 = vadd.f32 %v3373_v49, %v517_v7 }
  0xde   : > { %v487_v56 = vpop.permute.xlu1 %486  ;;  %v477_v57 = vpop.permute.xlu0 %476 }
  0xdf   : > { %v559_v61 = vadd.f32 %v3373_v49, %v487_v56  ;;  %v557_v62 = vadd.f32 %v3373_v49, %v477_v57  ;;  %v658_v57 = vpack.c.b8 %v657_v40, %v657_v40 }
  0xe1   : > { %v591_v5 = vmul.f32 0.01, %v559_v61  ;;  %v589_v6 = vmul.f32 0.01, %v557_v62  ;;  %vm575_vm12 = vcmp.gt.f32.partialorder %v559_v61, 0.0  ;;  %vm573_vm13 = vcmp.gt.f32.partialorder %v557_v62, 0.0 }
  0xe2   : > { %vm3459_vm2 = vnez %v658_v57 }
  0xe3   : > { %v607_v13 = vsel %vm575_vm12, %v559_v61, %v591_v5  ;;  %v605_v14 = vsel %vm573_vm13, %v557_v62, %v589_v6  ;;  %vm3445_vm12 = vcmp.ne.s32.totalorder %v711_v39, 0  ;;  %vm3451_vm13 = vcmp.ne.s32.totalorder %v712_v43, 0 }
  0xe4   : > { %v3397_v16 = vsel %vm3375_vm9, %v607_v13, -1e+30  ;;  %v3401_v17 = vsel %vm3381_vm11, %v605_v14, -1e+30  ;;  %v594_v6 = vmul.f32 0.01, %v562_v52  ;;  %v714_v13 = vunpack.c.0.s8 %v698_v63 }
  0xe5   : > { %773 = vmax.xlane.f32.xlu0 %v3397_v16  ;;  %769 = vmax.xlane.f32.xlu1 %v3401_v17  ;;  %v640_v14 = vunpack.c.3.s8 %v3418_v30  ;;  %v669_v63 = vpack.c.b16 %v639_v44, %v639_v44 }
  0xe6   : > { %v492_v21 = vpop.permute.xlu1 %491  ;;  %v482_v22 = vpop.permute.xlu0 %481  ;;  %v610_v25 = vsel %vm578_vm0, %v562_v52, %v594_v6  ;;  %vm3504_vm0 = vnez %v664_v28  ;;  %v5112_v6 = vmov 0 }
  0xe7   : > { %v558_v27 = vadd.f32 %v3373_v49, %v482_v22  ;;  %v560_v32 = vadd.f32 %v3373_v49, %v492_v21  ;;  %v715_v21 = vunpack.c.0.s8 %v699_v1  ;;  %v671_v33 = vpack.c.b16 %v640_v14, %v640_v14  ;;  %v532_v52 = vpop.permute.xlu2 %531 }
  0xe8   : > { %v3502_v41 = vsel %vm3480_vm6, %v610_v25, -1e+30  ;;  %v568_v3 = vadd.f32 %v3373_v49, %v532_v52  ;;  %v670_v14 = vpack.c.b8 %v669_v63, %v669_v63  ;;  %v3586_v52 = vld [vmem:[#allocation2] sm:$0xff] }
  0xe9   : > { %v590_v36 = vmul.f32 0.01, %v558_v27  ;;  %vm574_vm4 = vcmp.gt.f32.partialorder %v558_v27, 0.0  ;;  %v592_v45 = vmul.f32 0.01, %v560_v32  ;;  %vm576_vm7 = vcmp.gt.f32.partialorder %v560_v32, 0.0 }
  0xea   : > { %vm3494_vm10 = vcmp.ne.s32.totalorder %v715_v21, 0  ;;  %v672_v51 = vpack.c.b8 %v671_v33, %v671_v33  ;;  %v600_v21 = vmul.f32 0.01, %v568_v3  ;;  %v3602_v63 = vld [vmem:[#allocation2 + $0x20] sm:$0xff] }
  0xeb   : > { %v606_v42 = vsel %vm574_vm4, %v558_v27, %v590_v36  ;;  %v608_v0 = vsel %vm576_vm7, %v560_v32, %v592_v45  ;;  %vm685_vm4 = vnez %v666_v2  ;;  %v697_v27 = vsel %vm3459_vm2, 16843009, %v3166_v8 }
  0xec   : > { %v3435_v46 = vsel %vm3405_vm1, %v606_v42, -1e+30  ;;  %v3470_v19 = vsel %vm3439_vm8, %v608_v0, -1e+30  ;;  %vm3490_vm7 = vcmp.ne.s32.totalorder %v714_v13, 0  ;;  %v5105_v35 = vsel %vm3494_vm10, 4294967295, %v5104_v35 }
  0xed   : > { %771 = vmax.xlane.f32.xlu2 %v3435_v46  ;;  %777 = vmax.xlane.f32.xlu1 %v3426_v37  ;;  %v701_v36 = vsel %vm685_vm4, 16843009, %v3166_v8  ;;  %v713_v42 = vunpack.c.0.s8 %v697_v27  ;;  %v597_v45 = vmul.f32 0.01, %v565_v29  ;;  %vm581_vm2 = vcmp.gt.f32.partialorder %v565_v29, 0.0 }
  0xee   : > { %v512_v54 = vpop.permute.xlu1 %511  ;;  %v507_v55 = vpop.permute.xlu0 %506  ;;  %v717_v57 = vunpack.c.0.s8 %v701_v36  ;;  %vm688_vm5 = vnez %v672_v51  ;;  %v3584_v51 = vld [vmem:[#allocation2 + $0x10] sm:$0xff] }
  0xef   : > { %v564_v60 = vadd.f32 %v3373_v49, %v512_v54  ;;  %v563_v61 = vadd.f32 %v3373_v49, %v507_v55  ;;  %vm3525_vm4 = vcmp.ne.s32.totalorder %v713_v42, 0  ;;  %v704_v10 = vsel %vm688_vm5, 16843009, %v3166_v8  ;;  %v547_v28 = vpop.permute.xlu2 %546 }
  0xf0   : > { %v720_v27 = vunpack.c.0.s8 %v704_v10  ;;  %v571_v36 = vadd.f32 %v3373_v49, %v547_v28  ;;  %v3620_v10 = vld [vmem:[#allocation2 + $0x38] sm:$0xff]  ;;  %v3639_v28 = vld [vmem:[#allocation2 + $0x48] sm:$0xff] }
  0xf1   : > { %v596_v4 = vmul.f32 0.01, %v564_v60  ;;  %v595_v5 = vmul.f32 0.01, %v563_v61  ;;  %vm579_vm14 = vcmp.gt.f32.partialorder %v563_v61, 0.0  ;;  %vm580_vm15 = vcmp.gt.f32.partialorder %v564_v60, 0.0 }
  0xf3   : > { %v611_v11 = vsel %vm579_vm14, %v563_v61, %v595_v5  ;;  %v612_v12 = vsel %vm580_vm15, %v564_v60, %v596_v4  ;;  %v700_v61 = vsel %vm3504_vm0, 16843009, %v3166_v8  ;;  %v5110_v4 = vmov 0 }
  0xf4   : > { %v3466_v15 = vsel %vm3445_vm12, %v611_v11, -1e+30  ;;  %v3474_v20 = vsel %vm3451_vm13, %v612_v12, -1e+30  ;;  %v613_v5 = vsel %vm581_vm2, %v565_v29, %v597_v45  ;;  %v716_v25 = vunpack.c.0.s8 %v700_v61  ;;  %v3600_v61 = vld [vmem:[#allocation2 + $0x8] sm:$0xff] }
  0xf5   : > { %781 = vmax.xlane.f32.xlu0 %v3466_v15  ;;  %775 = vmax.xlane.f32.xlu2 %v3470_v19  ;;  %v3541_v12 = vsel %vm3525_vm4, %v613_v5, -1e+30  ;;  %vm584_vm2 = vcmp.gt.f32.partialorder %v568_v3, 0.0  ;;  %v603_v45 = vmul.f32 0.01, %v571_v36 }
  0xf6   : > { %783 = vmax.xlane.f32.xlu1 %v3474_v20  ;;  %v527_v22 = vpop.permute.xlu1 %526  ;;  %v522_v23 = vpop.permute.xlu0 %521  ;;  %vm3555_vm5 = vcmp.ne.s32.totalorder %v716_v25, 0 }
  0xf7   : > { %v567_v31 = vadd.f32 %v3373_v49, %v527_v22  ;;  %v566_v32 = vadd.f32 %v3373_v49, %v522_v23 }
  0xf9   : > { %v599_v39 = vmul.f32 0.01, %v567_v31  ;;  %v598_v40 = vmul.f32 0.01, %v566_v32  ;;  %vm582_vm14 = vcmp.gt.f32.partialorder %v566_v32, 0.0  ;;  %vm583_vm15 = vcmp.gt.f32.partialorder %v567_v31, 0.0 }
  0xfb   : > { %v614_v47 = vsel %vm582_vm14, %v566_v32, %v598_v40  ;;  %v615_v48 = vsel %vm583_vm15, %v567_v31, %v599_v39  ;;  %vm3530_vm14 = vcmp.ne.s32.totalorder %v717_v57, 0  ;;  %vm3534_vm15 = vcmp.ne.s32.totalorder %v718_v59, 0 }
  0xfc   : > { %v3511_v54 = vsel %vm3490_vm7, %v614_v47, -1e+30  ;;  %v3515_v55 = vsel %vm3494_vm10, %v615_v48, -1e+30  ;;  %v5111_v4 = vsel %vm3530_vm14, 4294967295, %v5110_v4  ;;  %v5113_v6 = vsel %vm3534_vm15, 4294967295, %v5112_v6 }
  0xfd   : > { %787 = vmax.xlane.f32.xlu0 %v3511_v54  ;;  %779 = vmax.xlane.f32.xlu2 %v3502_v41  ;;  %v616_v32 = vsel %vm584_vm2, %v568_v3, %v600_v21  ;;  %v5116_v39 = vmov 0  ;;  %vm587_vm2 = vcmp.gt.f32.partialorder %v571_v36, 0.0  ;;  %v5119_v48 = vmov 0 }
  0xfe   : > { %789 = vmax.xlane.f32.xlu1 %v3515_v55  ;;  %v542_v30 = vpop.permute.xlu1 %541  ;;  %v537_v60 = vpop.permute.xlu0 %536  ;;  %v3571_v44 = vsel %vm3555_vm5, %v616_v32, -1e+30  ;;  %v619_v47 = vsel %vm587_vm2, %v571_v36, %v603_v45 }
  0xff   : > { %v570_v0 = vadd.f32 %v3373_v49, %v542_v30  ;;  %v569_v1 = vadd.f32 %v3373_v49, %v537_v60 }
 0x101   : > { %v602_v7 = vmul.f32 0.01, %v570_v0  ;;  %v601_v9 = vmul.f32 0.01, %v569_v1  ;;  %vm585_vm0 = vcmp.gt.f32.partialorder %v569_v1, 0.0  ;;  %vm586_vm10 = vcmp.gt.f32.partialorder %v570_v0, 0.0 }
 0x103   : > { %v617_v11 = vsel %vm585_vm0, %v569_v1, %v601_v9  ;;  %v618_v13 = vsel %vm586_vm10, %v570_v0, %v602_v7  ;;  %vm687_vm10 = vnez %v670_v14  ;;  %v3616_v7 = vld [vmem:[#allocation2 + $0x30] sm:$0xff]  ;;  %v3618_v9 = vld [vmem:[#allocation2 + $0x18] sm:$0xff] }
 0x104   : > { %v3545_v22 = vsel %vm3530_vm14, %v617_v11, -1e+30  ;;  %v3549_v23 = vsel %vm3534_vm15, %v618_v13, -1e+30  ;;  %vm3560_vm15 = vcmp.ne.s32.totalorder %v720_v27, 0 }
 0x105   : > { %793 = vmax.xlane.f32.xlu0 %v3545_v22  ;;  %785 = vmax.xlane.f32.xlu2 %v3541_v12  ;;  %v5117_v39 = vsel %vm3560_vm15, 4294967295, %v5116_v39  ;;  %v703_v40 = vsel %vm687_vm10, 16843009, %v3166_v8  ;;  %vm1089_vm10 = vcmask 7168  }
 0x106   : > { %795 = vmax.xlane.f32.xlu1 %v3549_v23  ;;  %v552_v29 = vpop.permute.xlu0 %551  ;;  %5118 = vst [vmem:[#allocation6_spill] sm:$0xff] %v5117_v39 }
 0x107   : > { %v572_v31 = vadd.f32 %v3373_v49, %v552_v29  ;;  %v719_v49 = vunpack.c.0.s8 %v703_v40  ;;  %v3641_v29 = vld [vmem:[#allocation2 + $0x28] sm:$0xff] }
 0x109   : > { %v604_v38 = vmul.f32 0.01, %v572_v31  ;;  %vm588_vm0 = vcmp.gt.f32.partialorder %v572_v31, 0.0  ;;  %vm3575_vm14 = vcmp.ne.s32.totalorder %v719_v49, 0  ;;  %v3658_v49 = vld [vmem:[#allocation2 + $0x60] sm:$0xff] }
 0x10a   : > { %v5120_v48 = vsel %vm3575_vm14, 4294967295, %v5119_v48  ;;  %v3581_v8 = vsel %vm3575_vm14, %v619_v47, -1e+30  ;;  %v3660_v47 = vld [vmem:[#allocation2 + $0x40] sm:$0xff] }
 0x10b   : > { %v620_v42 = vsel %vm588_vm0, %v572_v31, %v604_v38  ;;  %5121 = vst [vmem:[#allocation7_spill] sm:$0xff] %v5120_v48  ;;  %v3643_v31 = vld [vmem:[#allocation2 + $0x50] sm:$0xff]  ;;  %vm2736_vm0 = vmpackc.low %vm3405_vm1, %vm3381_vm11 }
 0x10c   : > { %v3567_v43 = vsel %vm3560_vm15, %v620_v42, -1e+30 }
 0x10d   : > { %799 = vmax.xlane.f32.xlu0 %v3567_v43  ;;  %791 = vmax.xlane.f32.xlu2 %v3571_v44 }
 0x115   : > { %797 = vmax.xlane.f32.xlu2 %v3581_v8 }
 0x158   : > { %v774_v57 = vpop.xlane.xlu0 %773  ;;  %v770_v59 = vpop.xlane.xlu1 %769 }
 0x159   : > { %v3589_v30 = vmax.f32 %v3584_v51, %v774_v57  ;;  %v3592_v60 = vmax.f32 %v3586_v52, %v770_v59  ;;  %v3662_v57 = vld [vmem:[#allocation2 + $0x68] sm:$0xff] }
 0x15a   : > { %5122 = vst [vmem:[#allocation8_spill] sm:$0xff] %v3662_v57 }
 0x15b   : > { %1358 = vst.msk [vmem:[#allocation2 + $0x10] sm:$0xff] %vm1089_vm10, %v3589_v30  ;;  %829 = vperm.xlu0 %2876, %v3589_v30   ;;  %819 = vperm.xlu1 %2877, %v3592_v60  }
 0x15c   : > { %1356 = vst.msk [vmem:[#allocation2] sm:$0xff] %vm1089_vm10, %v3592_v60 }
 0x160   : > { %v772_v0 = vpop.xlane.xlu2 %771  ;;  %v778_v1 = vpop.xlane.xlu1 %777 }
 0x161   : > { %v3605_v3 = vmax.f32 %v3600_v61, %v772_v0  ;;  %v3608_v5 = vmax.f32 %v3602_v63, %v778_v1 }
 0x163   : > { %1357 = vst.msk [vmem:[#allocation2 + $0x8] sm:$0xff] %vm1089_vm10, %v3605_v3  ;;  %824 = vperm.xlu2 %2878, %v3605_v3   ;;  %839 = vperm.xlu0 %2876, %v3608_v5  }
 0x164   : > { %1360 = vst.msk [vmem:[#allocation2 + $0x20] sm:$0xff] %vm1089_vm10, %v3608_v5 }
 0x168   : > { %v782_v11 = vpop.xlane.xlu0 %781  ;;  %v776_v13 = vpop.xlane.xlu2 %775 }
 0x169   : > { %v3623_v14 = vmax.f32 %v3616_v7, %v782_v11  ;;  %v3626_v21 = vmax.f32 %v3618_v9, %v776_v13  ;;  %v784_v25 = vpop.xlane.xlu1 %783 }
 0x16a   : > { %v3629_v27 = vmax.f32 %v3620_v10, %v784_v25 }
 0x16b   : > { %1362 = vst.msk [vmem:[#allocation2 + $0x30] sm:$0xff] %vm1089_vm10, %v3623_v14  ;;  %834 = vperm.xlu1 %2877, %v3626_v21  }
 0x16c   : > { %1359 = vst.msk [vmem:[#allocation2 + $0x18] sm:$0xff] %vm1089_vm10, %v3626_v21  ;;  %854 = vperm.xlu0 %2876, %v3629_v27  }
 0x16d   : > { %1363 = vst.msk [vmem:[#allocation2 + $0x38] sm:$0xff] %vm1089_vm10, %v3629_v27 }
 0x170   : > { %v788_v32 = vpop.xlane.xlu0 %787  ;;  %v780_v36 = vpop.xlane.xlu2 %779 }
 0x171   : > { %v3646_v38 = vmax.f32 %v3639_v28, %v788_v32  ;;  %v806_v40 = vmax.f32 %v3641_v29, %v780_v36  ;;  %v790_v42 = vpop.xlane.xlu1 %789  ;;  %v963_v36 = vsub.f32 %v3584_v51, %v3589_v30  ;;  %v962_v30 = vsub.f32 %v3600_v61, %v3605_v3 }
 0x172   : > { %v3650_v45 = vmax.f32 %v3643_v31, %v790_v42  ;;  %v3686_v42 = vld [vmem:[#allocation2 + $0x78] sm:$0xff]  ;;  %v964_v61 = vsub.f32 %v3618_v9, %v3626_v21  ;;  %v968_v3 = vsub.f32 %v3620_v10, %v3629_v27 }
 0x173   : > { %1365 = vst.msk [vmem:[#allocation2 + $0x48] sm:$0xff] %vm1089_vm10, %v3646_v38  ;;  %844 = vperm.xlu2 %2878, %v806_v40   ;;  %849 = vperm.xlu1 %2877, %v3623_v14   ;;  %v981_v48 = vmul.f32 1.442695, %v963_v36 }
 0x174   : > { %1361 = vst.msk [vmem:[#allocation2 + $0x28] sm:$0xff] %vm1089_vm10, %v806_v40  ;;  %v971_v27 = vsub.f32 %v3643_v31, %v3650_v45 }
 0x175   : > { %1366 = vst.msk [vmem:[#allocation2 + $0x50] sm:$0xff] %vm1089_vm10, %v3650_v45  ;;  %2880 = vpow2.f32 %v981_v48 }
 0x176   : > { %5124 = vst [vmem:[#allocation10_spill] sm:$0xff] %v3686_v42 }
 0x178   : > { %v794_v59 = vpop.xlane.xlu0 %793  ;;  %v786_v0 = vpop.xlane.xlu2 %785 }
 0x179   : > { %v3665_v1 = vmax.f32 %v3658_v49, %v794_v59  ;;  %v3668_v11 = vmax.f32 %v3660_v47, %v786_v0  ;;  %v796_v13 = vpop.xlane.xlu1 %795  ;;  %v3688_v59 = vld [vmem:[#allocation2 + $0x58] sm:$0xff] }
 0x17a   : > { %v3671_v25 = vmax.f32 %v3662_v57, %v796_v13  ;;  %v961_v57 = vsub.f32 %v3586_v52, %v3592_v60  ;;  %v965_v52 = vsub.f32 %v3602_v63, %v3608_v5  ;;  %v3711_v60 = vld [vmem:[#allocation2 + $0x70] sm:$0xff]  ;;  %v966_v63 = vsub.f32 %v3641_v29, %v806_v40  ;;  %v2779_v29 = vld [vmem:[%s3289_s2 + $0x38] sm:$0xff] }
 0x17b   : > { %1368 = vst.msk [vmem:[#allocation2 + $0x60] sm:$0xff] %vm1089_vm10, %v3665_v1  ;;  %859 = vperm.xlu2 %2878, %v3668_v11   ;;  %864 = vperm.xlu1 %2877, %v3646_v38   ;;  %v983_v5 = vmul.f32 1.442695, %v964_v61  ;;  %v969_v10 = vsub.f32 %v3660_v47, %v3668_v11  ;;  %v2778_v61 = vld [vmem:[%s3289_s2 + $0x30] sm:$0xff] }
 0x17c   : > { %5123 = vst [vmem:[#allocation9_spill] sm:$0xff] %v3671_v25  ;;  %879 = vperm.xlu0 %2876, %v3665_v1   ;;  %v977_v36 = vmul.f32 1.442695, %v961_v57  ;;  %v985_v51 = vmul.f32 1.442695, %v965_v52  ;;  %1274 = vmatpush.bf16.msra.mxu0 %v2779_v29 }
 0x17d   : > { %1364 = vst.msk [vmem:[#allocation2 + $0x40] sm:$0xff] %vm1089_vm10, %v3668_v11  ;;  %v987_v9 = vmul.f32 1.442695, %v966_v63  ;;  %v991_v57 = vmul.f32 1.442695, %v968_v3  ;;  %2780 = vmatpush.bf16.msra.mxu1 %v2779_v29  ;;  %2781 = vmatpush.bf16.msra.mxu2 %v2779_v29  ;;  %v970_v11 = vsub.f32 %v3639_v28, %v3646_v38  ;;  %v2777_v28 = vld [vmem:[%s3289_s2 + $0x28] sm:$0xff] }
 0x17e   : > { %1369 = vst.msk [vmem:[#allocation2 + $0x68] sm:$0xff] %vm1089_vm10, %v3671_v25  ;;  %2882 = vpow2.f32 %v977_v36  ;;  %v967_v36 = vsub.f32 %v3616_v7, %v3623_v14  ;;  %2782 = vmatpush.bf16.msra.mxu3 %v2779_v29  ;;  %v993_v14 = vmul.f32 1.442695, %v969_v10  ;;  %v2773_v29 = vld [vmem:[%s3289_s2 + $0x8] sm:$0xff]  ;;  %v2772_v10 = vld [vmem:[%s3289_s2] sm:$0xff] }
 0x180   : > { %v800_v0 = vpop.xlane.xlu0 %799  ;;  %v792_v13 = vpop.xlane.xlu2 %791  ;;  %v989_v7 = vmul.f32 1.442695, %v967_v36  ;;  %1275 = vmatpush.bf16.msra.mxu0 %v2778_v61  ;;  %v2775_v36 = vld [vmem:[%s3289_s2 + $0x18] sm:$0xff] }
 0x181   : > { %v3691_v39 = vmax.f32 %v3686_v42, %v800_v0  ;;  %v3694_v32 = vmax.f32 %v3688_v59, %v792_v13  ;;  %v979_v0 = vmul.f32 1.442695, %v962_v30  ;;  %2783 = vmatpush.bf16.msra.mxu1 %v2778_v61  ;;  %2784 = vmatpush.bf16.msra.mxu2 %v2778_v61 }
 0x182   : > { %2785 = vmatpush.bf16.msra.mxu3 %v2778_v61 }
 0x183   : > { %1371 = vst.msk [vmem:[#allocation2 + $0x78] sm:$0xff] %vm1089_vm10, %v3691_v39  ;;  %869 = vperm.xlu1 %2877, %v3650_v45   ;;  %884 = vperm.xlu2 %2878, %v3671_v25   ;;  %v3716_v25 = vpop.eup %2880  ;;  %2884 = vpow2.f32 %v979_v0  ;;  %v972_v31 = vsub.f32 %v3688_v59, %v3694_v32  ;;  %v995_v45 = vmul.f32 1.442695, %v970_v11  ;;  %v2776_v59 = vld [vmem:[%s3289_s2 + $0x20] sm:$0xff] }
 0x184   : > { %1367 = vst.msk [vmem:[#allocation2 + $0x58] sm:$0xff] %vm1089_vm10, %v3694_v32  ;;  %874 = vperm.xlu0 %2876, %v3694_v32   ;;  %2886 = vpow2.f32 %v985_v51  ;;  %v3730_v21 = vpop.eup %2882  ;;  %v997_v51 = vmul.f32 1.442695, %v971_v27  ;;  %v973_v32 = vsub.f32 %v3658_v49, %v3665_v1  ;;  %1276 = vmatpush.bf16.msra.mxu0 %v2777_v28  ;;  %v2774_v49 = vld [vmem:[%s3289_s2 + $0x10] sm:$0xff] }
 0x185   : > { %2888 = vpow2.f32 %v983_v5  ;;  %2786 = vmatpush.bf16.msra.mxu1 %v2777_v28  ;;  %2787 = vmatpush.bf16.msra.mxu2 %v2777_v28 }
 0x186   : > { %2890 = vpow2.f32 %v987_v9  ;;  %v1001_v5 = vmul.f32 1.442695, %v973_v32  ;;  %2788 = vmatpush.bf16.msra.mxu3 %v2777_v28 }
 0x187   : > { %2892 = vpow2.f32 %v991_v57 }
 0x188   : > { %v798_v13 = vpop.xlane.xlu2 %797  ;;  %2894 = vpow2.f32 %v989_v7  ;;  %1277 = vmatpush.bf16.msra.mxu0 %v2776_v59 }
 0x189   : > { %v3714_v42 = vmax.f32 %v3711_v60, %v798_v13  ;;  %v3732_v30 = vpop.eup %2884  ;;  %2896 = vpow2.f32 %v993_v14  ;;  %v999_v13 = vmul.f32 1.442695, %v972_v31  ;;  %2789 = vmatpush.bf16.msra.mxu1 %v2776_v59  ;;  %2790 = vmatpush.bf16.msra.mxu2 %v2776_v59 }
 0x18a   : > { %v3734_v52 = vpop.eup %2886  ;;  %2898 = vpow2.f32 %v997_v51  ;;  %2791 = vmatpush.bf16.msra.mxu3 %v2776_v59 }
 0x18b   : > { %v975_v48 = vsub.f32 %v3711_v60, %v3714_v42  ;;  %1370 = vst.msk [vmem:[#allocation2 + $0x70] sm:$0xff] %vm1089_vm10, %v3714_v42  ;;  %894 = vperm.xlu1 %2877, %v3691_v39   ;;  %889 = vperm.xlu2 %2878, %v3714_v42   ;;  %v3746_v40 = vpop.eup %2888  ;;  %2900 = vpow2.f32 %v995_v45 }
 0x18c   : > { %1134 = vperm.xlu0 %2876, %v3716_v25   ;;  %v3748_v0 = vpop.eup %2890  ;;  %2902 = vpow2.f32 %v999_v13  ;;  %1278 = vmatpush.bf16.msra.mxu0 %v2775_v36 }
 0x18d   : > { %v3750_v47 = vpop.eup %2892  ;;  %2904 = vpow2.f32 %v1001_v5  ;;  %2792 = vmatpush.bf16.msra.mxu1 %v2775_v36  ;;  %2793 = vmatpush.bf16.msra.mxu2 %v2775_v36 }
 0x18e   : > { %v3760_v63 = vpop.eup %2894  ;;  %2794 = vmatpush.bf16.msra.mxu3 %v2775_v36 }
 0x18f   : > { %v3762_v3 = vpop.eup %2896 }
 0x190   : > { %v3765_v38 = vpop.eup %2898  ;;  %1279 = vmatpush.bf16.msra.mxu0 %v2774_v49 }
 0x191   : > { %v3773_v9 = vpop.eup %2900  ;;  %2795 = vmatpush.bf16.msra.mxu1 %v2774_v49  ;;  %2796 = vmatpush.bf16.msra.mxu2 %v2774_v49 }
 0x192   : > { %v3775_v57 = vpop.eup %2902  ;;  %2797 = vmatpush.bf16.msra.mxu3 %v2774_v49 }
 0x193   : > { %1129 = vperm.xlu1 %2877, %v3732_v30   ;;  %1124 = vperm.xlu2 %2878, %v3730_v21   ;;  %v3781_v1 = vpop.eup %2904 }
 0x194   : > { %1144 = vperm.xlu0 %2876, %v3734_v52   ;;  %1280 = vmatpush.bf16.msra.mxu0 %v2773_v29 }
 0x195   : > { %2798 = vmatpush.bf16.msra.mxu1 %v2773_v29  ;;  %2799 = vmatpush.bf16.msra.mxu2 %v2773_v29 }
 0x196   : > { %2800 = vmatpush.bf16.msra.mxu3 %v2773_v29 }
 0x198   : > { %1281 = vmatpush.bf16.msra.mxu0 %v2772_v10 }
 0x199   : > { %2801 = vmatpush.bf16.msra.mxu1 %v2772_v10  ;;  %2802 = vmatpush.bf16.msra.mxu2 %v2772_v10 }
 0x19a   : > { %2803 = vmatpush.bf16.msra.mxu3 %v2772_v10 }
 0x19b   : > { %1149 = vperm.xlu1 %2877, %v3748_v0   ;;  %1139 = vperm.xlu2 %2878, %v3746_v40  }
 0x19c   : > { %1159 = vperm.xlu0 %2876, %v3750_v47  }
 0x1a3   : > { %1164 = vperm.xlu1 %2877, %v3762_v3   ;;  %1154 = vperm.xlu2 %2878, %v3760_v63  }
 0x1a4   : > { %1174 = vperm.xlu0 %2876, %v3765_v38  }
 0x1ab   : > { %1179 = vperm.xlu1 %2877, %v3775_v57   ;;  %1169 = vperm.xlu2 %2878, %v3773_v9  }
 0x1b3   : > { %1184 = vperm.xlu2 %2878, %v3781_v1  }
 0x1bd   : > { %v825_v27 = vpop.permute.xlu2 %824 }
 0x1be   : > { %v898_v7 = vsub.f32 %v3435_v46, %v825_v27 }
 0x1c0   : > { %v915_v14 = vmul.f32 1.442695, %v898_v7 }
 0x1c2   : > { %2906 = vpow2.f32 %v915_v14 }
 0x1c8   : > { %v2907_v49 = vpop.eup %2906 }
 0x1c9   : > { %v946_v7 = vsel %vm3405_vm1, %v2907_v49, 0.0  ;;  %vm2739_vm1 = vmpackc.low %vm3439_vm8, %vm3375_vm9 }
 0x1cd   : > { %v830_v51 = vpop.permute.xlu0 %829  ;;  %v845_v11 = vpop.permute.xlu2 %844 }
 0x1ce   : > { %v899_v31 = vsub.f32 %v3397_v16, %v830_v51  ;;  %v820_v45 = vpop.permute.xlu1 %819  ;;  %v902_v28 = vsub.f32 %v3502_v41, %v845_v11 }
 0x1cf   : > { %v897_v13 = vsub.f32 %v3401_v17, %v820_v45 }
 0x1d0   : > { %v917_v61 = vmul.f32 1.442695, %v899_v31  ;;  %v923_v59 = vmul.f32 1.442695, %v902_v28 }
 0x1d1   : > { %v913_v32 = vmul.f32 1.442695, %v897_v13 }
 0x1d2   : > { %2908 = vpow2.f32 %v917_v61 }
 0x1d3   : > { %2910 = vpow2.f32 %v913_v32 }
 0x1d4   : > { %2912 = vpow2.f32 %v923_v59 }
 0x1d5   : > { %v860_v5 = vpop.permute.xlu2 %859  ;;  %v840_v36 = vpop.permute.xlu0 %839 }
 0x1d6   : > { %v901_v46 = vsub.f32 %v3426_v37, %v840_v36  ;;  %v905_v16 = vsub.f32 %v3541_v12, %v860_v5 }
 0x1d8   : > { %v2909_v29 = vpop.eup %2908  ;;  %v921_v10 = vmul.f32 1.442695, %v901_v46  ;;  %v929_v12 = vmul.f32 1.442695, %v905_v16 }
 0x1d9   : > { %v947_v17 = vsel %vm3375_vm9, %v2909_v29, 0.0  ;;  %v2911_v27 = vpop.eup %2910  ;;  %vm2745_vm9 = vmpackc.low %vm3451_vm13, %vm3445_vm12 }
 0x1da   : > { %1045 = vadd.xlane.f32.xlu1 %v947_v17  ;;  %2914 = vpow2.f32 %v921_v10  ;;  %v945_v37 = vsel %vm3381_vm11, %v2911_v27, 0.0  ;;  %v2737_v41 = vpack.c.bf16 %v2907_v49, %v2911_v27  ;;  %v2913_v51 = vpop.eup %2912  ;;  %vm2742_vm11 = vmpackc.low %vm3480_vm6, %vm3409_vm3 }
 0x1db   : > { %1041 = vadd.xlane.f32.xlu0 %v945_v37  ;;  %2916 = vpow2.f32 %v929_v12  ;;  %v950_v28 = vsel %vm3480_vm6, %v2913_v51, 0.0  ;;  %vm5127_vm6 = vnez %v5105_v35  ;;  %v5130_v35 = vld [vmem:[#allocation8_spill] sm:$0xff] }
 0x1dc   : > { %1043 = vadd.xlane.f32.xlu2 %v946_v7  ;;  %2738 = vmatmul.msk.bf16.vlgmr.msra.gmra.mxu0 %vm2736_vm0, %v2737_v41 }
 0x1dd   : > { %v835_v14 = vpop.permute.xlu1 %834  ;;  %v885_v59 = vpop.permute.xlu2 %884 }
 0x1de   : > { %v855_v11 = vpop.permute.xlu0 %854  ;;  %v900_v31 = vsub.f32 %v3470_v19, %v835_v14  ;;  %v910_v49 = vsub.f32 %v3549_v23, %v885_v59 }
 0x1df   : > { %v904_v45 = vsub.f32 %v3474_v20, %v855_v11 }
 0x1e0   : > { %v919_v13 = vmul.f32 1.442695, %v900_v31  ;;  %v2915_v61 = vpop.eup %2914  ;;  %v939_v23 = vmul.f32 1.442695, %v910_v49 }
 0x1e1   : > { %v927_v58 = vmul.f32 1.442695, %v904_v45  ;;  %v2743_v18 = vpack.c.bf16 %v2913_v51, %v2915_v61  ;;  %v949_v19 = vsel %vm3409_vm3, %v2915_v61, 0.0  ;;  %v2917_v32 = vpop.eup %2916  ;;  %vm2748_vm3 = vmpackc.low %vm3490_vm7, %vm3525_vm4 }
 0x1e2   : > { %1051 = vadd.xlane.f32.xlu1 %v950_v28  ;;  %v953_v26 = vsel %vm3525_vm4, %v2917_v32, 0.0  ;;  %vm2757_vm4 = vmpackc.low %vm3560_vm15, %vm3575_vm14 }
 0x1e3   : > { %2918 = vpow2.f32 %v927_v58  ;;  %2744 = vmatmul.msk.bf16.vlgmr.msra.gmra.mxu1 %vm2742_vm11, %v2743_v18 }
 0x1e4   : > { %2920 = vpow2.f32 %v919_v13  ;;  %1049 = vadd.xlane.f32.xlu2 %v949_v19 }
 0x1e5   : > { %v850_v20 = vpop.permute.xlu1 %849  ;;  %v890_v14 = vpop.permute.xlu2 %889 }
 0x1e6   : > { %v903_v5 = vsub.f32 %v3466_v15, %v850_v20  ;;  %v911_v62 = vsub.f32 %v3581_v8, %v890_v14 }
 0x1e8   : > { %v925_v36 = vmul.f32 1.442695, %v903_v5  ;;  %v941_v2 = vmul.f32 1.442695, %v911_v62 }
 0x1e9   : > { %v2919_v46 = vpop.eup %2918 }
 0x1ea   : > { %v2921_v16 = vpop.eup %2920  ;;  %1057 = vadd.xlane.f32.xlu1 %v953_v26  ;;  %2922 = vpow2.f32 %v925_v36  ;;  %v952_v15 = vsel %vm3451_vm13, %v2919_v46, 0.0 }
 0x1eb   : > { %v948_v24 = vsel %vm3439_vm8, %v2921_v16, 0.0  ;;  %v2740_v10 = vpack.c.bf16 %v2921_v16, %v2909_v29  ;;  %2924 = vpow2.f32 %v939_v23  ;;  %vm5125_vm8 = vnez %v5111_v4  ;;  %v1110_v16 = vld [vmem:[#allocation4 + $0x20] sm:$0xff] }
 0x1ec   : > { %1047 = vadd.xlane.f32.xlu0 %v948_v24  ;;  %1055 = vadd.xlane.f32.xlu2 %v952_v15  ;;  %v5133_v15 = vld [vmem:[#allocation10_spill] sm:$0xff] }
 0x1ed   : > { %2741 = vmatmul.msk.bf16.gmra.mxu0 %vm2739_vm1, %v2740_v10  ;;  %v865_v17 = vpop.permute.xlu1 %864  ;;  %v5134_v23 = vsub.f32 %v5133_v15, %v3691_v39 }
 0x1ee   : > { %v880_v27 = vpop.permute.xlu0 %879  ;;  %v906_v37 = vsub.f32 %v3511_v54, %v865_v17 }
 0x1ef   : > { %v909_v53 = vsub.f32 %v3545_v22, %v880_v27  ;;  %v1007_v17 = vmul.f32 1.442695, %v5134_v23  ;;  %v1005_v27 = vmul.f32 1.442695, %v975_v48 }
 0x1f0   : > { %v931_v41 = vmul.f32 1.442695, %v906_v37  ;;  %v2923_v7 = vpop.eup %2922 }
 0x1f1   : > { %v937_v12 = vmul.f32 1.442695, %v909_v53  ;;  %v951_v50 = vsel %vm3445_vm12, %v2923_v7, 0.0  ;;  %v2746_v29 = vpack.c.bf16 %v2919_v46, %v2923_v7  ;;  %v2925_v11 = vpop.eup %2924  ;;  %vm5126_vm12 = vnez %v5113_v6  ;;  %v5131_v6 = vld [vmem:[#allocation9_spill] sm:$0xff]  ;;  %v1125_v53 = vpop.permute.xlu2 %1124 }
 0x1f2   : > { %2926 = vpow2.f32 %v931_v41  ;;  %vm2754_vm13 = vmpackc.low %vm5126_vm12, %vm5125_vm8  ;;  %v5132_v33 = vsub.f32 %v5130_v35, %v5131_v6 }
 0x1f3   : > { %2928 = vpow2.f32 %v937_v12  ;;  %2747 = vmatmul.msk.bf16.gmra.mxu1 %vm2745_vm9, %v2746_v29 }
 0x1f4   : > { %1053 = vadd.xlane.f32.xlu0 %v951_v50  ;;  %v1003_v10 = vmul.f32 1.442695, %v5132_v33 }
 0x1f5   : > { %v870_v54 = vpop.permute.xlu1 %869 }
 0x1f6   : > { %v875_v22 = vpop.permute.xlu0 %874  ;;  %v907_v51 = vsub.f32 %v3515_v55, %v870_v54 }
 0x1f7   : > { %v908_v31 = vsub.f32 %v3571_v44, %v875_v22 }
 0x1f8   : > { %v2927_v45 = vpop.eup %2926  ;;  %v933_v13 = vmul.f32 1.442695, %v907_v51 }
 0x1f9   : > { %v2929_v56 = vpop.eup %2928  ;;  %v935_v61 = vmul.f32 1.442695, %v908_v31  ;;  %v954_v58 = vsel %vm3490_vm7, %v2927_v45, 0.0  ;;  %v2749_v28 = vpack.c.bf16 %v2927_v45, %v2917_v32  ;;  %vm2751_vm7 = vmpackc.low %vm3555_vm5, %vm5127_vm6  ;;  %v3884_v12 = vpop.permute.xlu2 %1139  ;;  %v1011_v31 = vld [vmem:[#allocation3 + $0x10] sm:$0xff]  ;;  %v1009_v45 = vld [vmem:[#allocation3] sm:$0xff] }
 0x1fa   : > { %2930 = vpow2.f32 %v933_v13  ;;  %v2755_v55 = vpack.c.bf16 %v2925_v11, %v2929_v56  ;;  %v957_v59 = vsel %vm5125_vm8, %v2929_v56, 0.0  ;;  %v1010_v13 = vld [vmem:[#allocation3 + $0x8] sm:$0xff]  ;;  %v1027_v56 = vmul.f32 %v3716_v25, %v1011_v31 }
 0x1fb   : > { %2932 = vpow2.f32 %v935_v61  ;;  %2750 = vmatmul.msk.bf16.vlgmr.msra.gmra.mxu2 %vm2748_vm3, %v2749_v28  ;;  %v1025_v61 = vmul.f32 %v3730_v21, %v1009_v45  ;;  %v1026_v28 = vmul.f32 %v3732_v30, %v1010_v13 }
 0x1fc   : > { %1059 = vadd.xlane.f32.xlu0 %v954_v58  ;;  %2756 = vmatmul.msk.bf16.vlgmr.msra.gmra.mxu3 %vm2754_vm13, %v2755_v55  ;;  %2934 = vpow2.f32 %v941_v2 }
 0x1fd   : > { %v895_v44 = vpop.permute.xlu1 %894 }
 0x1fe   : > { %v912_v8 = vsub.f32 %v3567_v43, %v895_v44  ;;  %v958_v43 = vsel %vm5126_vm12, %v2925_v11, 0.0  ;;  %v3886_v42 = vpop.permute.xlu0 %1134 }
 0x200   : > { %v2931_v18 = vpop.eup %2930  ;;  %v943_v19 = vmul.f32 1.442695, %v912_v8 }
 0x201   : > { %v2933_v34 = vpop.eup %2932  ;;  %v955_v20 = vsel %vm5127_vm6, %v2931_v18, 0.0  ;;  %v3890_v48 = vpop.permute.xlu2 %1154 }
 0x202   : > { %2936 = vpow2.f32 %v943_v19  ;;  %v956_v32 = vsel %vm3555_vm5, %v2933_v34, 0.0  ;;  %1061 = vadd.xlane.f32.xlu2 %v955_v20  ;;  %v2935_v5 = vpop.eup %2934  ;;  %v2752_v26 = vpack.c.bf16 %v2933_v34, %v2931_v18  ;;  %v1014_v18 = vld [vmem:[#allocation3 + $0x28] sm:$0xff]  ;;  %v1013_v19 = vld [vmem:[#allocation3 + $0x20] sm:$0xff] }
 0x203   : > { %1063 = vadd.xlane.f32.xlu1 %v956_v32  ;;  %v959_v24 = vsel %vm3575_vm14, %v2935_v5, 0.0  ;;  %2938 = vpow2.f32 %v1003_v10  ;;  %v1030_v25 = vmul.f32 %v3748_v0, %v1014_v18  ;;  %v1106_v20 = vld [vmem:[#allocation4] sm:$0xff]  ;;  %v1029_v32 = vmul.f32 %v3734_v52, %v1013_v19  ;;  %v1107_v52 = vld [vmem:[#allocation4 + $0x8] sm:$0xff]  ;;  %v1109_v18 = vld [vmem:[#allocation4 + $0x18] sm:$0xff] }
 0x204   : > { %1065 = vadd.xlane.f32.xlu0 %v957_v59  ;;  %2940 = vpow2.f32 %v1007_v17  ;;  %vm1339_vm14 = vcmask 523264  }
 0x205   : > { %2942 = vpow2.f32 %v1005_v27  ;;  %v1130_v39 = vpop.permute.xlu1 %1129 }
 0x206   : > { %v1145_v50 = vpop.permute.xlu0 %1144  ;;  %v1203_v27 = vmul.f32 %v1130_v39, %v1107_v52  ;;  %v1022_v52 = vld [vmem:[#allocation3 + $0x68] sm:$0xff] }
 0x207   : > { %v1206_v15 = vmul.f32 %v1145_v50, %v1110_v16  ;;  %v1108_v50 = vld [vmem:[#allocation4 + $0x10] sm:$0xff] }
 0x208   : > { %v2937_v36 = vpop.eup %2936 }
 0x209   : > { %v960_v49 = vsel %vm3560_vm15, %v2937_v36, 0.0  ;;  %v2758_v4 = vpack.c.bf16 %v2937_v36, %v2935_v5  ;;  %v3875_v37 = vpop.eup %2938  ;;  %v3894_v54 = vpop.permute.xlu2 %1169  ;;  %v1202_v5 = vmul.f32 %v1125_v53, %v1106_v20  ;;  %v1017_v36 = vld [vmem:[#allocation3 + $0x40] sm:$0xff]  ;;  %v1019_v20 = vld [vmem:[#allocation3 + $0x50] sm:$0xff] }
 0x20a   : > { %1067 = vadd.xlane.f32.xlu2 %v958_v43  ;;  %v3878_v41 = vpop.eup %2940  ;;  %v1033_v0 = vmul.f32 %v3762_v3, %v1017_v36  ;;  %v1035_v36 = vmul.f32 %v3765_v38, %v1019_v20 }
 0x20b   : > { %1069 = vadd.xlane.f32.xlu1 %v959_v24  ;;  %2753 = vmatmul.msk.bf16.gmra.mxu2 %vm2751_vm7, %v2752_v26  ;;  %v3881_v7 = vpop.eup %2942  ;;  %v1016_v26 = vld [vmem:[#allocation3 + $0x38] sm:$0xff] }
 0x20c   : > { %1071 = vadd.xlane.f32.xlu0 %v960_v49  ;;  %2759 = vmatmul.msk.bf16.gmra.mxu3 %vm2757_vm4, %v2758_v4  ;;  %v1012_v49 = vld [vmem:[#allocation3 + $0x18] sm:$0xff]  ;;  %v1032_v6 = vmul.f32 %v3750_v47, %v1016_v26  ;;  %v1111_v47 = vld [vmem:[#allocation4 + $0x28] sm:$0xff] }
 0x20d   : > { %v3888_v60 = vpop.permute.xlu1 %1149  ;;  %v1028_v24 = vmul.f32 %v3746_v40, %v1012_v49  ;;  %v1015_v40 = vld [vmem:[#allocation3 + $0x30] sm:$0xff] }
 0x20e   : > { %v3896_v14 = vpop.permute.xlu0 %1159  ;;  %v1031_v13 = vmul.f32 %v3760_v63, %v1015_v40  ;;  %v1207_v39 = vmul.f32 %v3888_v60, %v1111_v47 }
 0x211   : > { %v3900_v51 = vpop.permute.xlu2 %1184 }
 0x215   : > { %v3892_v29 = vpop.permute.xlu1 %1164 }
 0x216   : > { %v3902_v11 = vpop.permute.xlu0 %1174 }
 0x21d   : > { %v3898_v22 = vpop.permute.xlu1 %1179 }
 0x220   : > { %1189 = vperm.xlu0 %2876, %v3875_v37  }
 0x222   : > { %1199 = vperm.xlu2 %2878, %v3878_v41  }
 0x224   : > { %1194 = vperm.xlu1 %2877, %v3881_v7  }
 0x24d   : > { %v1046_v62 = vpop.xlane.xlu1 %1045 }
 0x24e   : > { %v1075_v58 = vadd.f32 %v1046_v62, %v1027_v56  ;;  %v1042_v55 = vpop.xlane.xlu0 %1041 }
 0x24f   : > { %v1044_v2 = vpop.xlane.xlu2 %1043  ;;  %v1073_v44 = vadd.f32 %v1042_v55, %v1025_v61  ;;  %v1204_v61 = vmul.f32 %v3886_v42, %v1108_v50  ;;  %v1205_v42 = vmul.f32 %v3884_v12, %v1109_v18 }
 0x250   : > { %1092 = vst.msk [vmem:[#allocation3 + $0x10] sm:$0xff] %vm1089_vm10, %v1075_v58  ;;  %v1074_v8 = vadd.f32 %v1044_v2, %v1026_v28 }
 0x251   : > { %1090 = vst.msk [vmem:[#allocation3] sm:$0xff] %vm1089_vm10, %v1073_v44  ;;  %v1018_v44 = vld [vmem:[#allocation3 + $0x48] sm:$0xff] }
 0x252   : > { %1091 = vst.msk [vmem:[#allocation3 + $0x8] sm:$0xff] %vm1089_vm10, %v1074_v8  ;;  %v1112_v8 = vld [vmem:[#allocation4 + $0x30] sm:$0xff]  ;;  %v1034_v63 = vmul.f32 %v3773_v9, %v1018_v44  ;;  %v1113_v9 = vld [vmem:[#allocation4 + $0x38] sm:$0xff] }
 0x253   : > { %v1208_v60 = vmul.f32 %v3890_v48, %v1112_v8  ;;  %v1209_v16 = vmul.f32 %v3896_v14, %v1113_v9  ;;  %v1121_v44 = vld [vmem:[#allocation4 + $0x78] sm:$0xff] }
 0x255   : > { %v1052_v34 = vpop.xlane.xlu1 %1051 }
 0x256   : > { %v1078_v21 = vadd.f32 %v1052_v34, %v1030_v25 }
 0x257   : > { %v1050_v30 = vpop.xlane.xlu2 %1049 }
 0x258   : > { %1095 = vst.msk [vmem:[#allocation3 + $0x28] sm:$0xff] %vm1089_vm10, %v1078_v21  ;;  %v1077_v59 = vadd.f32 %v1050_v30, %v1029_v32  ;;  %v1020_v30 = vld [vmem:[#allocation3 + $0x58] sm:$0xff] }
 0x259   : > { %v1283_v43 = vpop.f32.mrf.mxu0 }
 0x25a   : > { %1094 = vst.msk [vmem:[#allocation3 + $0x20] sm:$0xff] %vm1089_vm10, %v1077_v59  ;;  %v1323_v46 = vadd.f32 %v1283_v43, %v1202_v5  ;;  %v1021_v5 = vld [vmem:[#allocation3 + $0x60] sm:$0xff]  ;;  %v1036_v43 = vmul.f32 %v3775_v57, %v1020_v30  ;;  %v1023_v57 = vld [vmem:[#allocation3 + $0x70] sm:$0xff] }
 0x25b   : > { %v1037_v12 = vmul.f32 %v3781_v1, %v1021_v5  ;;  %v1024_v1 = vld [vmem:[#allocation3 + $0x78] sm:$0xff] }
 0x25c   : > { %1340 = vst.msk [vmem:[#allocation4] sm:$0xff] %vm1339_vm14, %v1323_v46 }
 0x25d   : > { %v1058_v4 = vpop.xlane.xlu1 %1057 }
 0x25e   : > { %v1081_v35 = vadd.f32 %v1058_v4, %v1033_v0 }
 0x25f   : > { %v1048_v33 = vpop.xlane.xlu0 %1047  ;;  %v1056_v10 = vpop.xlane.xlu2 %1055 }
 0x260   : > { %v1076_v23 = vadd.f32 %v1048_v33, %v1028_v24  ;;  %1098 = vst.msk [vmem:[#allocation3 + $0x40] sm:$0xff] %vm1089_vm10, %v1081_v35  ;;  %v1080_v17 = vadd.f32 %v1056_v10, %v1032_v6  ;;  %v1293_v53 = vpop.f32.mrf.mxu1  ;;  %v1114_v24 = vld [vmem:[#allocation4 + $0x40] sm:$0xff]  ;;  %v1038_v33 = vmul.f32 %v3875_v37, %v1022_v52 }
 0x261   : > { %v1285_v3 = vpop.f32.mrf.mxu0  ;;  %v1327_v31 = vadd.f32 %v1293_v53, %v1206_v15  ;;  %v1118_v6 = vld [vmem:[#allocation4 + $0x60] sm:$0xff]  ;;  %v1210_v14 = vmul.f32 %v3892_v29, %v1114_v24  ;;  %v1039_v15 = vmul.f32 %v3881_v7, %v1023_v57  ;;  %v1115_v29 = vld [vmem:[#allocation4 + $0x48] sm:$0xff] }
 0x262   : > { %1093 = vst.msk [vmem:[#allocation3 + $0x18] sm:$0xff] %vm1089_vm10, %v1076_v23  ;;  %v1324_v45 = vadd.f32 %v1285_v3, %v1203_v27  ;;  %v1214_v23 = vmul.f32 %v3900_v51, %v1118_v6  ;;  %v1040_v27 = vmul.f32 %v3878_v41, %v1024_v1  ;;  %v1211_v41 = vmul.f32 %v3894_v54, %v1115_v29  ;;  %v1120_v54 = vld [vmem:[#allocation4 + $0x70] sm:$0xff] }
 0x263   : > { %1097 = vst.msk [vmem:[#allocation3 + $0x38] sm:$0xff] %vm1089_vm10, %v1080_v17 }
 0x264   : > { %1344 = vst.msk [vmem:[#allocation4 + $0x20] sm:$0xff] %vm1339_vm14, %v1327_v31 }
 0x265   : > { %1341 = vst.msk [vmem:[#allocation4 + $0x8] sm:$0xff] %vm1339_vm14, %v1324_v45 }
 0x267   : > { %v1054_v56 = vpop.xlane.xlu0 %1053 }
 0x268   : > { %v1079_v62 = vadd.f32 %v1054_v56, %v1031_v13  ;;  %v1295_v58 = vpop.f32.mrf.mxu1  ;;  %v1116_v56 = vld [vmem:[#allocation4 + $0x50] sm:$0xff] }
 0x269   : > { %v1328_v55 = vadd.f32 %v1295_v58, %v1207_v39  ;;  %v1212_v39 = vmul.f32 %v3902_v11, %v1116_v56 }
 0x26a   : > { %1096 = vst.msk [vmem:[#allocation3 + $0x30] sm:$0xff] %vm1089_vm10, %v1079_v62  ;;  %v1288_v28 = vpop.f32.mrf.mxu0 }
 0x26b   : > { %v1325_v2 = vadd.f32 %v1288_v28, %v1204_v61  ;;  %1345 = vst.msk [vmem:[#allocation4 + $0x28] sm:$0xff] %vm1339_vm14, %v1328_v55  ;;  %v1119_v28 = vld [vmem:[#allocation4 + $0x68] sm:$0xff]  ;;  %v1117_v55 = vld [vmem:[#allocation4 + $0x58] sm:$0xff] }
 0x26d   : > { %1342 = vst.msk [vmem:[#allocation4 + $0x10] sm:$0xff] %vm1339_vm14, %v1325_v2 }
 0x26f   : > { %v1060_v19 = vpop.xlane.xlu0 %1059 }
 0x270   : > { %v1082_v25 = vadd.f32 %v1060_v19, %v1034_v63  ;;  %v1298_v34 = vpop.f32.mrf.mxu1  ;;  %v1213_v63 = vmul.f32 %v3898_v22, %v1117_v55 }
 0x271   : > { %v1329_v32 = vadd.f32 %v1298_v34, %v1208_v60 }
 0x272   : > { %1099 = vst.msk [vmem:[#allocation3 + $0x48] sm:$0xff] %vm1089_vm10, %v1082_v25  ;;  %v1290_v21 = vpop.f32.mrf.mxu0 }
 0x273   : > { %v1326_v59 = vadd.f32 %v1290_v21, %v1205_v42  ;;  %1346 = vst.msk [vmem:[#allocation4 + $0x30] sm:$0xff] %vm1339_vm14, %v1329_v32 }
 0x275   : > { %1343 = vst.msk [vmem:[#allocation4 + $0x18] sm:$0xff] %vm1339_vm14, %v1326_v59  ;;  %v1062_v48 = vpop.xlane.xlu2 %1061 }
 0x276   : > { %v1083_v46 = vadd.f32 %v1062_v48, %v1035_v36  ;;  %v1064_v49 = vpop.xlane.xlu1 %1063 }
 0x277   : > { %v1066_v26 = vpop.xlane.xlu0 %1065  ;;  %v1084_v0 = vadd.f32 %v1064_v49, %v1036_v43 }
 0x278   : > { %v1085_v4 = vadd.f32 %v1066_v26, %v1037_v12  ;;  %1100 = vst.msk [vmem:[#allocation3 + $0x50] sm:$0xff] %vm1089_vm10, %v1083_v46  ;;  %v1300_v38 = vpop.f32.mrf.mxu1 }
 0x279   : > { %1101 = vst.msk [vmem:[#allocation3 + $0x58] sm:$0xff] %vm1089_vm10, %v1084_v0  ;;  %v1330_v35 = vadd.f32 %v1300_v38, %v1209_v16 }
 0x27a   : > { %1102 = vst.msk [vmem:[#allocation3 + $0x60] sm:$0xff] %vm1089_vm10, %v1085_v4 }
 0x27b   : > { %1347 = vst.msk [vmem:[#allocation4 + $0x38] sm:$0xff] %vm1339_vm14, %v1330_v35 }
 0x27d   : > { %v1068_v10 = vpop.xlane.xlu2 %1067 }
 0x27e   : > { %v1086_v17 = vadd.f32 %v1068_v10, %v1038_v33  ;;  %v1070_v53 = vpop.xlane.xlu1 %1069  ;;  %v1303_v3 = vpop.f32.mrf.mxu2 }
 0x27f   : > { %v1072_v31 = vpop.xlane.xlu0 %1071  ;;  %v1087_v45 = vadd.f32 %v1070_v53, %v1039_v15  ;;  %v1331_v40 = vadd.f32 %v1303_v3, %v1210_v14  ;;  %v1313_v47 = vpop.f32.mrf.mxu3 }
 0x280   : > { %1103 = vst.msk [vmem:[#allocation3 + $0x68] sm:$0xff] %vm1089_vm10, %v1086_v17  ;;  %v1088_v50 = vadd.f32 %v1072_v31, %v1040_v27  ;;  %v1335_v37 = vadd.f32 %v1313_v47, %v1214_v23 }
 0x281   : > { %1104 = vst.msk [vmem:[#allocation3 + $0x70] sm:$0xff] %vm1089_vm10, %v1087_v45 }
 0x282   : > { %1105 = vst.msk [vmem:[#allocation3 + $0x78] sm:$0xff] %vm1089_vm10, %v1088_v50 }
 0x283   : > { %1348 = vst.msk [vmem:[#allocation4 + $0x40] sm:$0xff] %vm1339_vm14, %v1331_v40 }
 0x284   : > { %1352 = vst.msk [vmem:[#allocation4 + $0x60] sm:$0xff] %vm1339_vm14, %v1335_v37 }
 0x285   : > { %v1200_v8 = vpop.permute.xlu2 %1199 }
 0x286   : > { %v1305_v7 = vpop.f32.mrf.mxu2  ;;  %v1217_v60 = vmul.f32 %v1200_v8, %v1121_v44 }
 0x287   : > { %v1332_v51 = vadd.f32 %v1305_v7, %v1211_v41  ;;  %v1315_v13 = vpop.f32.mrf.mxu3 }
 0x289   : > { %1349 = vst.msk [vmem:[#allocation4 + $0x48] sm:$0xff] %vm1339_vm14, %v1332_v51 }
 0x28e   : > { %v1308_v62 = vpop.f32.mrf.mxu2 }
 0x28f   : > { %v1333_v61 = vadd.f32 %v1308_v62, %v1212_v39  ;;  %v1318_v58 = vpop.f32.mrf.mxu3 }
 0x291   : > { %1350 = vst.msk [vmem:[#allocation4 + $0x50] sm:$0xff] %vm1339_vm14, %v1333_v61 }
 0x292   : > { %v1190_v2 = vpop.permute.xlu0 %1189 }
 0x293   : > { %v1215_v18 = vmul.f32 %v1190_v2, %v1119_v28 }
 0x295   : > { %v1336_v19 = vadd.f32 %v1315_v13, %v1215_v18 }
 0x296   : > { %v1195_v25 = vpop.permute.xlu1 %1194  ;;  %v1310_v42 = vpop.f32.mrf.mxu2 }
 0x297   : > { %1353 = vst.msk [vmem:[#allocation4 + $0x68] sm:$0xff] %vm1339_vm14, %v1336_v19  ;;  %v1216_v11 = vmul.f32 %v1195_v25, %v1120_v54  ;;  %v1334_v34 = vadd.f32 %v1310_v42, %v1213_v63  ;;  %v1320_v20 = vpop.f32.mrf.mxu3  ;;  %1375 = sbr.rel (%p2760_p0) target bundleno = 1455 (0x5af), region = 90 }
 0x298   : > { %v1338_v21 = vadd.f32 %v1320_v20, %v1217_v60 }
 0x299   : > { %v1337_v32 = vadd.f32 %v1318_v58, %v1216_v11  ;;  %1351 = vst.msk [vmem:[#allocation4 + $0x58] sm:$0xff] %vm1339_vm14, %v1334_v34 }
 0x29a   : > { %1355 = vst.msk [vmem:[#allocation4 + $0x78] sm:$0xff] %vm1339_vm14, %v1338_v21 }
 0x29b   : > { %1354 = vst.msk [vmem:[#allocation4 + $0x70] sm:$0xff] %vm1339_vm14, %v1337_v32 }
 0x29c   : > { %v1388_v22 = vld [vmem:[#allocation3 + $0x60] sm:$0xff]  ;;  %v1389_v59 = vld [vmem:[#allocation3 + $0x68] sm:$0xff]  ;;  %v3167_v5 = vmov 0  }
 0x29d   : > { %v1384_v30 = vld [vmem:[#allocation3 + $0x40] sm:$0xff]  ;;  %2945 = vset.pattern.permute.xlu1 %v3167_v5  ;;  %2944 = vset.pattern.permute.xlu0 %v3167_v5  ;;  %v1404_v36 = vmax.f32 %v1388_v22, 1e-30  ;;  %v3963_v48 = vmax.f32 %v1389_v59, 1e-30  ;;  %v1385_v46 = vld [vmem:[#allocation3 + $0x48] sm:$0xff] }
 0x29e   : > { %v1400_v9 = vmax.f32 %v1384_v30, 1e-30  ;;  %2946 = vset.pattern.permute.xlu2 %v3167_v5  ;;  %v1376_v49 = vld [vmem:[#allocation3] sm:$0xff]  ;;  %v1381_v4 = vld [vmem:[#allocation3 + $0x28] sm:$0xff]  ;;  %v3967_v38 = vmax.f32 %v1385_v46, 1e-30 }
 0x29f   : > { %2948 = vrcp.f32 %v1404_v36  ;;  %v1597_v43 = vand.u32 2147483647, %v1404_v36  ;;  %v1599_v12 = vand.u32 2147483648, %v1404_v36  ;;  %v1614_v16 = vand.u32 2147483648, %v3963_v48  ;;  %v1380_v57 = vld [vmem:[#allocation3 + $0x20] sm:$0xff]  ;;  %v1377_v6 = vld [vmem:[#allocation3 + $0x8] sm:$0xff] }
 0x2a0   : > { %2950 = vrcp.f32 %v1400_v9  ;;  %v1537_v26 = vand.u32 2147483647, %v1400_v9  ;;  %v1539_v0 = vand.u32 2147483648, %v1400_v9  ;;  %vm1593_vm15 = vweird.f32 %v1404_v36 }
 0x2a1   : > { %2952 = vrcp.f32 %v3963_v48  ;;  %v3969_v52 = vmax.f32 %v1376_v49, 1e-30  ;;  %vm3971_vm5 = vcmp.eq.f32.partialorder %v1597_v43, 8.507059e+37  ;;  %v1600_v35 = vor.u32 1.1754944e-38, %v1599_v12 }
 0x2a2   : > { %vm1533_vm2 = vweird.f32 %v1400_v9  ;;  %vm1608_vm10 = vweird.f32 %v3963_v48  ;;  %vm3976_vm0 = vcmp.eq.f32.partialorder %v1537_v26, 8.507059e+37  ;;  %v1540_v14 = vor.u32 1.1754944e-38, %v1539_v0 }
 0x2a3   : > { %v1612_v10 = vand.u32 2147483647, %v3963_v48  ;;  %2954 = vrcp.f32 %v3967_v38  ;;  %v3982_v15 = vmax.f32 %v1381_v4, 1e-30  ;;  %v3984_v27 = vor.u32 1.1754944e-38, %v1614_v16 }
 0x2a4   : > { %v1552_v53 = vand.u32 2147483647, %v3967_v38  ;;  %2956 = vrcp.f32 %v3969_v52  ;;  %v1554_v45 = vand.u32 2147483648, %v3967_v38  ;;  %v3991_v40 = vmax.f32 %v1380_v57, 1e-30  ;;  %v1390_v57 = vld [vmem:[#allocation3 + $0x70] sm:$0xff] }
 0x2a5   : > { %v2949_v1 = vpop.eup %2948  ;;  %v3993_v47 = vmax.f32 %v1377_v6, 1e-30  ;;  %vm1548_vm1 = vweird.f32 %v3967_v38  ;;  %v1417_v41 = vand.u32 2147483647, %v3969_v52  ;;  %2958 = vrcp.f32 %v3982_v15  ;;  %v1387_v6 = vld [vmem:[#allocation3 + $0x58] sm:$0xff] }
 0x2a6   : > { %v2951_v23 = vpop.eup %2950  ;;  %v1589_v17 = vmul.f32 %v2949_v1, %v1404_v36  ;;  %vm1594_vm11 = vweird.f32 %v2949_v1  ;;  %vm4000_vm3 = vcmp.eq.f32.partialorder %v1612_v10, 8.507059e+37  ;;  %vm4004_vm8 = vcmp.eq.f32.partialorder %v1552_v53, 8.507059e+37 }
 0x2a7   : > { %v3988_v3 = vpop.eup %2952  ;;  %v1529_v31 = vmul.f32 %v2951_v23, %v1400_v9  ;;  %vm1534_vm9 = vweird.f32 %v2951_v23  ;;  %vm1413_vm12 = vweird.f32 %v3969_v52  ;;  %vm4010_vm13 = vmor %vm1593_vm15, %vm1594_vm11  ;;  %v1555_v58 = vor.u32 1.1754944e-38, %v1554_v45 }
 0x2a8   : > { %v1590_v50 = vsub.f32 1.0, %v1589_v17  ;;  %v1604_v37 = vmul.f32 %v3988_v3, %v3963_v48  ;;  %vm1609_vm6 = vweird.f32 %v3988_v3  ;;  %2960 = vrcp.f32 %v3991_v40  ;;  %vm4018_vm7 = vmor %vm1533_vm2, %vm1534_vm9 }
 0x2a9   : > { %v1530_v29 = vsub.f32 1.0, %v1529_v31  ;;  %v2955_v39 = vpop.eup %2954  ;;  %v1419_v18 = vand.u32 2147483648, %v3969_v52  ;;  %vm4026_vm4 = vcmp.eq.f32.partialorder %v1417_v41, 8.507059e+37  ;;  %vm1488_vm15 = vweird.f32 %v3982_v15  ;;  %vm4044_vm11 = vmor %vm1608_vm10, %vm1609_vm6  ;;  %v1386_v31 = vld [vmem:[#allocation3 + $0x50] sm:$0xff] }
 0x2aa   : > { %v1591_v7 = vmul.f32 %v2949_v1, %v1590_v50  ;;  %v1605_v51 = vsub.f32 1.0, %v1604_v37  ;;  %v2957_v28 = vpop.eup %2956  ;;  %v1544_v8 = vmul.f32 %v2955_v39, %v3967_v38  ;;  %vm1549_vm2 = vweird.f32 %v2955_v39 }
 0x2ab   : > { %v1531_v61 = vmul.f32 %v2951_v23, %v1530_v29  ;;  %v1409_v63 = vmul.f32 %v2957_v28, %v3969_v52  ;;  %v4034_v11 = vpop.eup %2958  ;;  %vm1414_vm9 = vweird.f32 %v2957_v28  ;;  %v1492_v5 = vand.u32 2147483647, %v3982_v15 }
 0x2ac   : > { %v1592_v55 = vadd.f32 %v2949_v1, %v1591_v7  ;;  %v1606_v44 = vmul.f32 %v3988_v3, %v1605_v51  ;;  %v1545_v42 = vsub.f32 1.0, %v1544_v8  ;;  %v1484_v59 = vmul.f32 %v4034_v11, %v3982_v15 }
 0x2ad   : > { %v1532_v54 = vadd.f32 %v2951_v23, %v1531_v61  ;;  %v1410_v32 = vsub.f32 1.0, %v1409_v63  ;;  %v1420_v43 = vor.u32 1.1754944e-38, %v1419_v18  ;;  %v1494_v12 = vand.u32 2147483648, %v3982_v15  ;;  %v1378_v63 = vld [vmem:[#allocation3 + $0x10] sm:$0xff] }
 0x2ae   : > { %v1596_v60 = vsel %vm4010_vm13, %v2949_v1, %v1592_v55  ;;  %v1607_v25 = vadd.f32 %v3988_v3, %v1606_v44  ;;  %v1546_v30 = vmul.f32 %v2955_v39, %v1545_v42  ;;  %v4053_v36 = vpop.eup %2960  ;;  %vm1473_vm10 = vweird.f32 %v3991_v40  ;;  %v1379_v44 = vld [vmem:[#allocation3 + $0x18] sm:$0xff] }
 0x2af   : > { %v1601_v34 = vsel %vm3971_vm5, %v1600_v35, %v1596_v60  ;;  %v1536_v20 = vsel %vm4018_vm7, %v2951_v23, %v1532_v54  ;;  %vm4057_vm5 = vmor %vm1548_vm1, %vm1549_vm2  ;;  %v1411_v48 = vmul.f32 %v2957_v28, %v1410_v32  ;;  %v1485_v0 = vsub.f32 1.0, %v1484_v59 }
 0x2b0   : > { %1726 = vperm.xlu1 %2945, %v1601_v34   ;;  %v1541_v22 = vsel %vm3976_vm0, %v1540_v14, %v1536_v20  ;;  %v1611_v46 = vsel %vm4044_vm11, %v3988_v3, %v1607_v25  ;;  %v1547_v49 = vadd.f32 %v2955_v39, %v1546_v30  ;;  %vm4069_vm0 = vmor %vm1413_vm12, %vm1414_vm9  ;;  %v1469_v16 = vmul.f32 %v4053_v36, %v3991_v40  ;;  %v1391_v20 = vld [vmem:[#allocation3 + $0x78] sm:$0xff] }
 0x2b1   : > { %1706 = vperm.xlu0 %2944, %v1541_v22   ;;  %v1412_v4 = vadd.f32 %v2957_v28, %v1411_v48  ;;  %vm1489_vm1 = vweird.f32 %v4034_v11  ;;  %v1477_v38 = vand.u32 2147483647, %v3991_v40  ;;  %2962 = vrcp.f32 %v3993_v47 }
 0x2b2   : > { %v1551_v24 = vsel %vm4057_vm5, %v2955_v39, %v1547_v49  ;;  %v1486_v52 = vmul.f32 %v4034_v11, %v1485_v0  ;;  %v1470_v35 = vsub.f32 1.0, %v1469_v16  ;;  %vm1474_vm12 = vweird.f32 %v4053_v36  ;;  %vm4097_vm13 = vmor %vm1488_vm15, %vm1489_vm1 }
 0x2b3   : > { %v1616_v1 = vsel %vm4000_vm3, %v3984_v27, %v1611_v46  ;;  %v1556_v33 = vsel %vm4004_vm8, %v1555_v58, %v1551_v24  ;;  %v1416_v14 = vsel %vm4069_vm0, %v2957_v28, %v1412_v4  ;;  %v1479_v10 = vand.u32 2147483648, %v3991_v40  ;;  %vm4105_vm3 = vmor %vm1473_vm10, %vm1474_vm12 }
 0x2b4   : > { %v1421_v23 = vsel %vm4026_vm4, %v1420_v43, %v1416_v14  ;;  %v1487_v17 = vadd.f32 %v4034_v11, %v1486_v52  ;;  %v1471_v27 = vmul.f32 %v4053_v36, %v1470_v35  ;;  %v1432_v3 = vand.u32 2147483647, %v3993_v47 }
 0x2b5   : > { %1666 = vperm.xlu2 %2946, %v1421_v23   ;;  %v1434_v50 = vand.u32 2147483648, %v3993_v47  ;;  %v4110_v37 = vmax.f32 %v1390_v57, 1e-30  ;;  %v4112_v15 = vmax.f32 %v1387_v6, 1e-30  ;;  %vm4114_vm8 = vcmp.eq.f32.partialorder %v1492_v5, 8.507059e+37 }
 0x2b6   : > { %v1495_v41 = vor.u32 1.1754944e-38, %v1494_v12  ;;  %v1472_v7 = vadd.f32 %v4053_v36, %v1471_v27  ;;  %vm4119_vm6 = vcmp.eq.f32.partialorder %v1477_v38, 8.507059e+37  ;;  %v1491_v13 = vsel %vm4097_vm13, %v4034_v11, %v1487_v17  ;;  %v1648_v27 = vld [vmem:[#allocation4] sm:$0xff] }
 0x2b7   : > { %v2963_v51 = vpop.eup %2962  ;;  %v1480_v56 = vor.u32 1.1754944e-38, %v1479_v10  ;;  %2964 = vrcp.f32 %v4110_v37  ;;  %v4127_v39 = vmax.f32 %v1386_v31, 1e-30  ;;  %v1627_v58 = vand.u32 2147483647, %v4110_v37 }
 0x2b8   : > { %1731 = vperm.xlu1 %2945, %v1616_v1   ;;  %v1476_v62 = vsel %vm4105_vm3, %v4053_v36, %v1472_v7  ;;  %v1424_v61 = vmul.f32 %v2963_v51, %v3993_v47  ;;  %v1629_v28 = vand.u32 2147483648, %v4110_v37  ;;  %vm1428_vm7 = vweird.f32 %v3993_v47  ;;  %v1382_v7 = vld [vmem:[#allocation3 + $0x30] sm:$0xff] }
 0x2b9   : > { %1711 = vperm.xlu0 %2944, %v1556_v33   ;;  %vm4136_vm4 = vcmp.eq.f32.partialorder %v1432_v3, 8.507059e+37  ;;  %v1435_v2 = vor.u32 1.1754944e-38, %v1434_v50  ;;  %2966 = vrcp.f32 %v4112_v15  ;;  %vm1429_vm15 = vweird.f32 %v2963_v51 }
 0x2ba   : > { %v1425_v8 = vsub.f32 1.0, %v1424_v61  ;;  %v1582_v18 = vand.u32 2147483647, %v4112_v15  ;;  %v1584_v54 = vand.u32 2147483648, %v4112_v15  ;;  %v1496_v19 = vsel %vm4114_vm8, %v1495_v41, %v1491_v13  ;;  %vm4159_vm5 = vmor %vm1428_vm7, %vm1429_vm15 }
 0x2bb   : > { %v1481_v60 = vsel %vm4119_vm6, %v1480_v56, %v1476_v62  ;;  %vm1623_vm2 = vweird.f32 %v4110_v37  ;;  %2968 = vrcp.f32 %v4127_v39  ;;  %vm4149_vm11 = vcmp.eq.f32.partialorder %v1627_v58, 8.507059e+37 }
 0x2bc   : > { %v1426_v25 = vmul.f32 %v2963_v51, %v1425_v8  ;;  %v1630_v11 = vor.u32 1.1754944e-38, %v1629_v28  ;;  %vm1578_vm9 = vweird.f32 %v4112_v15  ;;  %v4154_v34 = vmax.f32 %v1379_v44, 1e-30 }
 0x2bd   : > { %v2965_v21 = vpop.eup %2964  ;;  %vm1563_vm10 = vweird.f32 %v4127_v39  ;;  %v1567_v22 = vand.u32 2147483647, %v4127_v39  ;;  %v1569_v30 = vand.u32 2147483648, %v4127_v39  ;;  %v4166_v59 = vmax.f32 %v1378_v63, 1e-30 }
 0x2be   : > { %v1427_v5 = vadd.f32 %v2963_v51, %v1426_v25  ;;  %v1619_v36 = vmul.f32 %v2965_v21, %v4110_v37  ;;  %vm4169_vm0 = vcmp.eq.f32.partialorder %v1582_v18, 8.507059e+37  ;;  %v1585_v47 = vor.u32 1.1754944e-38, %v1584_v54 }
 0x2bf   : > { %2970 = vrcp.f32 %v4154_v34  ;;  %v2967_v48 = vpop.eup %2966  ;;  %v1462_v43 = vand.u32 2147483647, %v4154_v34  ;;  %v1464_v12 = vand.u32 2147483648, %v4154_v34  ;;  %v4177_v46 = vmax.f32 %v1391_v20, 1e-30 }
 0x2c0   : > { %1691 = vperm.xlu1 %2945, %v1496_v19   ;;  %2972 = vrcp.f32 %v4166_v59  ;;  %v1431_v49 = vsel %vm4159_vm5, %v2963_v51, %v1427_v5  ;;  %v1620_v26 = vsub.f32 1.0, %v1619_v36  ;;  %vm1624_vm1 = vweird.f32 %v2965_v21 }
 0x2c1   : > { %1686 = vperm.xlu0 %2944, %v1481_v60   ;;  %v1574_v0 = vmul.f32 %v2967_v48, %v4112_v15  ;;  %v2969_v16 = vpop.eup %2968  ;;  %v1436_v4 = vsel %vm4136_vm4, %v1435_v2, %v1431_v49  ;;  %vm4184_vm12 = vcmp.eq.f32.partialorder %v1567_v22, 8.507059e+37  ;;  %v1570_v24 = vor.u32 1.1754944e-38, %v1569_v30  ;;  %vm4192_vm8 = vmor %vm1623_vm2, %vm1624_vm1  ;;  %v1383_v15 = vld [vmem:[#allocation3 + $0x38] sm:$0xff] }
 0x2c2   : > { %vm1458_vm13 = vweird.f32 %v4154_v34  ;;  %1671 = vperm.xlu2 %2946, %v1436_v4   ;;  %v1621_v52 = vmul.f32 %v2965_v21, %v1620_v26  ;;  %vm1579_vm3 = vweird.f32 %v2967_v48  ;;  %v1559_v57 = vmul.f32 %v2969_v16, %v4127_v39 }
 0x2c3   : > { %v1575_v35 = vsub.f32 1.0, %v1574_v0  ;;  %vm4196_vm6 = vcmp.eq.f32.partialorder %v1462_v43, 8.507059e+37  ;;  %v1465_v33 = vor.u32 1.1754944e-38, %v1464_v12  ;;  %vm1443_vm7 = vweird.f32 %v4166_v59  ;;  %vm4204_vm15 = vmor %vm1578_vm9, %vm1579_vm3 }
 0x2c4   : > { %2974 = vrcp.f32 %v4177_v46  ;;  %v1622_v10 = vadd.f32 %v2965_v21, %v1621_v52  ;;  %v1560_v17 = vsub.f32 1.0, %v1559_v57  ;;  %vm1564_vm4 = vweird.f32 %v2969_v16 }
 0x2c5   : > { %v2971_v14 = vpop.eup %2970  ;;  %v1576_v23 = vmul.f32 %v2967_v48, %v1575_v35  ;;  %v1447_v31 = vand.u32 2147483647, %v4166_v59  ;;  %v1449_v45 = vand.u32 2147483648, %v4166_v59  ;;  %vm1638_vm2 = vweird.f32 %v4177_v46  ;;  %vm4219_vm9 = vmor %vm1563_vm10, %vm1564_vm4 }
 0x2c6   : > { %v2973_v53 = vpop.eup %2972  ;;  %v1454_v3 = vmul.f32 %v2971_v14, %v4154_v34  ;;  %v1626_v50 = vsel %vm4192_vm8, %v2965_v21, %v1622_v10  ;;  %v1561_v29 = vmul.f32 %v2969_v16, %v1560_v17  ;;  %vm1459_vm5 = vweird.f32 %v2971_v14  ;;  %v1656_v17 = vld [vmem:[#allocation4 + $0x40] sm:$0xff] }
 0x2c7   : > { %v1577_v37 = vadd.f32 %v2967_v48, %v1576_v23  ;;  %v1439_v41 = vmul.f32 %v2973_v53, %v4166_v59  ;;  %v1631_v40 = vsel %vm4149_vm11, %v1630_v11, %v1626_v50  ;;  %v1642_v56 = vand.u32 2147483647, %v4177_v46  ;;  %vm4232_vm11 = vmor %vm1458_vm13, %vm1459_vm5  ;;  %v1660_v23 = vld [vmem:[#allocation4 + $0x60] sm:$0xff] }
 0x2c8   : > { %v1455_v13 = vsub.f32 1.0, %v1454_v3  ;;  %1736 = vperm.xlu1 %2945, %v1631_v40   ;;  %v1562_v61 = vadd.f32 %v2969_v16, %v1561_v29  ;;  %vm1444_vm1 = vweird.f32 %v2973_v53  ;;  %v1399_v2 = vmax.f32 %v1383_v15, 1e-30  ;;  %v1657_v40 = vld [vmem:[#allocation4 + $0x48] sm:$0xff] }
 0x2c9   : > { %v1581_v62 = vsel %vm4204_vm15, %v2967_v48, %v1577_v37  ;;  %v1440_v58 = vsub.f32 1.0, %v1439_v41  ;;  %v1398_v44 = vmax.f32 %v1382_v7, 1e-30  ;;  %v1450_v63 = vor.u32 1.1754944e-38, %v1449_v45  ;;  %vm1445_vm10 = vmor %vm1443_vm7, %vm1444_vm1 }
 0x2ca   : > { %v2975_v28 = vpop.eup %2974  ;;  %v1586_v55 = vsel %vm4169_vm0, %v1585_v47, %v1581_v62  ;;  %v1456_v39 = vmul.f32 %v2971_v14, %v1455_v13  ;;  %v1566_v8 = vsel %vm4219_vm9, %v2969_v16, %v1562_v61  ;;  %v1644_v42 = vand.u32 2147483648, %v4177_v46  ;;  %v1661_v61 = vld [vmem:[#allocation4 + $0x68] sm:$0xff] }
 0x2cb   : > { %1721 = vperm.xlu0 %2944, %v1586_v55   ;;  %v1441_v54 = vmul.f32 %v2973_v53, %v1440_v58  ;;  %v1634_v19 = vmul.f32 %v2975_v28, %v4177_v46  ;;  %v1571_v60 = vsel %vm4184_vm12, %v1570_v24, %v1566_v8  ;;  %2976 = vrcp.f32 %v1399_v2  ;;  %v1652_v8 = vld [vmem:[#allocation4 + $0x20] sm:$0xff] }
 0x2cc   : > { %v1457_v25 = vadd.f32 %v2971_v14, %v1456_v39  ;;  %1716 = vperm.xlu2 %2946, %v1571_v60   ;;  %vm1448_vm0 = vcmp.eq.f32.partialorder %v1447_v31, 8.507059e+37  ;;  %vm1639_vm13 = vweird.f32 %v2975_v28  ;;  %2978 = vrcp.f32 %v1398_v44 }
 0x2cd   : > { %v1442_v11 = vadd.f32 %v2973_v53, %v1441_v54  ;;  %v1635_v34 = vsub.f32 1.0, %v1634_v19  ;;  %vm1640_vm12 = vmor %vm1638_vm2, %vm1639_vm13  ;;  %v1645_v59 = vor.u32 1.1754944e-38, %v1644_v42  ;;  %vm1643_vm3 = vcmp.eq.f32.partialorder %v1642_v56, 8.507059e+37 }
 0x2ce   : > { %v1461_v20 = vsel %vm4232_vm11, %v2971_v14, %v1457_v25  ;;  %vm1518_vm8 = vweird.f32 %v1399_v2  ;;  %v1524_v12 = vand.u32 2147483648, %v1399_v2  ;;  %v1522_v26 = vand.u32 2147483647, %v1399_v2  ;;  %v1649_v25 = vld [vmem:[#allocation4 + $0x8] sm:$0xff] }
 0x2cf   : > { %v1466_v21 = vsel %vm4196_vm6, %v1465_v33, %v1461_v20  ;;  %v1446_v32 = vsel %vm1445_vm10, %v2973_v53, %v1442_v11  ;;  %v1636_v22 = vmul.f32 %v2975_v28, %v1635_v34  ;;  %vm1503_vm7 = vweird.f32 %v1398_v44 }
 0x2d0   : > { %v1451_v30 = vsel %vm1448_vm0, %v1450_v63, %v1446_v32  ;;  %1681 = vperm.xlu1 %2945, %v1466_v21   ;;  %v1509_v46 = vand.u32 2147483648, %v1398_v44  ;;  %v1507_v38 = vand.u32 2147483647, %v1398_v44  ;;  %v1525_v24 = vor.u32 1.1754944e-38, %v1524_v12 }
 0x2d1   : > { %v1637_v5 = vadd.f32 %v2975_v28, %v1636_v22  ;;  %v2977_v36 = vpop.eup %2976  ;;  %vm1523_vm2 = vcmp.eq.f32.partialorder %v1522_v26, 8.507059e+37 }
 0x2d2   : > { %v1514_v47 = vmul.f32 %v2977_v36, %v1399_v2  ;;  %v2979_v48 = vpop.eup %2978  ;;  %vm1519_vm6 = vweird.f32 %v2977_v36  ;;  %v1510_v57 = vor.u32 1.1754944e-38, %v1509_v46  ;;  %vm1508_vm5 = vcmp.eq.f32.partialorder %v1507_v38, 8.507059e+37 }
 0x2d3   : > { %1676 = vperm.xlu0 %2944, %v1451_v30   ;;  %v1641_v9 = vsel %vm1640_vm12, %v2975_v28, %v1637_v5  ;;  %v1499_v0 = vmul.f32 %v2979_v48, %v1398_v44  ;;  %vm1504_vm4 = vweird.f32 %v2979_v48  ;;  %vm1520_vm15 = vmor %vm1518_vm8, %vm1519_vm6  ;;  %v1653_v44 = vld [vmem:[#allocation4 + $0x28] sm:$0xff]  ;;  %v1662_v30 = vld [vmem:[#allocation4 + $0x70] sm:$0xff] }
 0x2d4   : > { %v1646_v43 = vsel %vm1643_vm3, %v1645_v59, %v1641_v9  ;;  %v1515_v49 = vsub.f32 1.0, %v1514_v47  ;;  %vm1505_vm9 = vmor %vm1503_vm7, %vm1504_vm4  ;;  %v1659_v5 = vld [vmem:[#allocation4 + $0x58] sm:$0xff]  ;;  %v1658_v9 = vld [vmem:[#allocation4 + $0x50] sm:$0xff] }
 0x2d5   : > { %1741 = vperm.xlu2 %2946, %v1646_v43   ;;  %v1500_v4 = vsub.f32 1.0, %v1499_v0 }
 0x2d6   : > { %v1516_v16 = vmul.f32 %v2977_v36, %v1515_v49 }
 0x2d7   : > { %v1501_v35 = vmul.f32 %v2979_v48, %v1500_v4 }
 0x2d8   : > { %v1517_v52 = vadd.f32 %v2977_v36, %v1516_v16  ;;  %v1651_v16 = vld [vmem:[#allocation4 + $0x18] sm:$0xff] }
 0x2d9   : > { %v1502_v1 = vadd.f32 %v2979_v48, %v1501_v35 }
 0x2da   : > { %v1521_v6 = vsel %vm1520_vm15, %v2977_v36, %v1517_v52  ;;  %v1650_v52 = vld [vmem:[#allocation4 + $0x10] sm:$0xff] }
 0x2db   : > { %v1526_v33 = vsel %vm1523_vm2, %v1525_v24, %v1521_v6  ;;  %v1506_v14 = vsel %vm1505_vm9, %v2979_v48, %v1502_v1 }
 0x2dc   : > { %1701 = vperm.xlu0 %2944, %v1526_v33   ;;  %v1511_v10 = vsel %vm1508_vm5, %v1510_v57, %v1506_v14  ;;  %v1663_v57 = vld [vmem:[#allocation4 + $0x78] sm:$0xff] }
 0x2dd   : > { %1696 = vperm.xlu2 %2946, %v1511_v10  }
 0x30f   : > { %v1667_v50 = vpop.permute.xlu2 %1666 }
 0x310   : > { %v4254_v29 = vmul.f32 %v1667_v50, %v1648_v27  ;;  %v1654_v50 = vld [vmem:[#allocation4 + $0x30] sm:$0xff] }
 0x312   : > { %v1760_v13 = vmul.f32 %v4254_v29, %v4254_v29 }
 0x314   : > { %v1776_v28 = vsel %vm1339_vm14, %v1760_v13, 0.0 }
 0x31c   : > { %v1672_v55 = vpop.permute.xlu2 %1671 }
 0x31d   : > { %v4281_v20 = vmul.f32 %v1672_v55, %v1649_v25 }
 0x31f   : > { %v1761_v36 = vmul.f32 %v4281_v20, %v4281_v20 }
 0x321   : > { %v1779_v26 = vsel %vm1339_vm14, %v1761_v36, 0.0 }
 0x322   : > { %v1727_v53 = vpop.permute.xlu1 %1726 }
 0x323   : > { %v4248_v3 = vmul.f32 %v1727_v53, %v1660_v23  ;;  %v1707_v31 = vpop.permute.xlu0 %1706 }
 0x324   : > { %v4250_v45 = vmul.f32 %v1707_v31, %v1656_v17 }
 0x325   : > { %v1772_v37 = vmul.f32 %v4248_v3, %v4248_v3 }
 0x326   : > { %v1768_v41 = vmul.f32 %v4250_v45, %v4250_v45  ;;  %v1717_v22 = vpop.permute.xlu2 %1716 }
 0x327   : > { %v1812_v15 = vsel %vm1339_vm14, %v1772_v37, 0.0  ;;  %v4293_v49 = vmul.f32 %v1717_v22, %v1658_v9 }
 0x328   : > { %v1800_v7 = vsel %vm1339_vm14, %v1768_v41, 0.0  ;;  %1813 = vadd.xlane.f32.xlu0 %v1812_v15  ;;  %v1655_v41 = vld [vmem:[#allocation4 + $0x38] sm:$0xff] }
 0x329   : > { %1801 = vadd.xlane.f32.xlu1 %v1800_v7  ;;  %v1770_v35 = vmul.f32 %v4293_v49, %v4293_v49 }
 0x32a   : > { %v1732_v51 = vpop.permute.xlu1 %1731 }
 0x32b   : > { %v1712_v56 = vpop.permute.xlu0 %1711  ;;  %v4267_v39 = vmul.f32 %v1732_v51, %v1661_v61  ;;  %v1806_v23 = vsel %vm1339_vm14, %v1770_v35, 0.0  ;;  %v2286_v35 = vld [vmem:[%s5064_s4 + $0x30] sm:$0xff] }
 0x32c   : > { %v4262_v62 = vmul.f32 %v1712_v56, %v1657_v40 }
 0x32d   : > { %v1773_v60 = vmul.f32 %v4267_v39, %v4267_v39 }
 0x32e   : > { %v1769_v58 = vmul.f32 %v4262_v62, %v4262_v62 }
 0x32f   : > { %v1815_v32 = vsel %vm1339_vm14, %v1773_v60, 0.0  ;;  %v1742_v4 = vpop.permute.xlu2 %1741 }
 0x330   : > { %v1803_v2 = vsel %vm1339_vm14, %v1769_v58, 0.0  ;;  %v4308_v10 = vmul.f32 %v1742_v4, %v1663_v57  ;;  %v2287_v57 = vld [vmem:[%s5064_s4 + $0x38] sm:$0xff] }
 0x331   : > { %1804 = vadd.xlane.f32.xlu2 %v1803_v2  ;;  %1777 = vadd.xlane.f32.xlu1 %v1776_v28 }
 0x332   : > { %v1692_v18 = vpop.permute.xlu1 %1691  ;;  %v1775_v31 = vmul.f32 %v4308_v10, %v4308_v10 }
 0x333   : > { %v4270_v54 = vmul.f32 %v1692_v18, %v1653_v44  ;;  %v1687_v63 = vpop.permute.xlu0 %1686 }
 0x334   : > { %v4272_v19 = vmul.f32 %v1687_v63, %v1652_v8  ;;  %v1821_v40 = vsel %vm1339_vm14, %v1775_v31, 0.0 }
 0x335   : > { %v1765_v42 = vmul.f32 %v4270_v54, %v4270_v54 }
 0x336   : > { %v1764_v11 = vmul.f32 %v4272_v19, %v4272_v19 }
 0x337   : > { %v1791_v34 = vsel %vm1339_vm14, %v1765_v42, 0.0  ;;  %v1697_v37 = vpop.permute.xlu2 %1696 }
 0x338   : > { %v1788_v21 = vsel %vm1339_vm14, %v1764_v11, 0.0  ;;  %v4317_v15 = vmul.f32 %v1697_v37, %v1654_v50 }
 0x339   : > { %1789 = vadd.xlane.f32.xlu0 %v1788_v21  ;;  %1816 = vadd.xlane.f32.xlu2 %v1815_v32 }
 0x33a   : > { %1792 = vadd.xlane.f32.xlu1 %v1791_v34  ;;  %v1737_v59 = vpop.permute.xlu1 %1736  ;;  %v1766_v56 = vmul.f32 %v4317_v15, %v4317_v15 }
 0x33b   : > { %v4287_v47 = vmul.f32 %v1737_v59, %v1662_v30 }
 0x33c   : > { %v1794_v58 = vsel %vm1339_vm14, %v1766_v56, 0.0 }
 0x33d   : > { %v1722_v48 = vpop.permute.xlu0 %1721  ;;  %v1774_v12 = vmul.f32 %v4287_v47, %v4287_v47 }
 0x33e   : > { %v4289_v43 = vmul.f32 %v1722_v48, %v1659_v5 }
 0x33f   : > { %v1818_v46 = vsel %vm1339_vm14, %v1774_v12, 0.0 }
 0x340   : > { %v1771_v0 = vmul.f32 %v4289_v43, %v4289_v43 }
 0x341   : > { %1780 = vadd.xlane.f32.xlu2 %v1779_v26 }
 0x342   : > { %1819 = vadd.xlane.f32.xlu1 %v1818_v46  ;;  %v1809_v38 = vsel %vm1339_vm14, %v1771_v0, 0.0  ;;  %v1682_v24 = vpop.permute.xlu1 %1681 }
 0x343   : > { %1810 = vadd.xlane.f32.xlu0 %v1809_v38  ;;  %v4302_v6 = vmul.f32 %v1682_v24, %v1651_v16 }
 0x345   : > { %v1677_v1 = vpop.permute.xlu0 %1676  ;;  %v1763_v14 = vmul.f32 %v4302_v6, %v4302_v6 }
 0x346   : > { %v4304_v33 = vmul.f32 %v1677_v1, %v1650_v52 }
 0x347   : > { %v1785_v53 = vsel %vm1339_vm14, %v1763_v14, 0.0 }
 0x348   : > { %v1762_v17 = vmul.f32 %v4304_v33, %v4304_v33 }
 0x349   : > { %1807 = vadd.xlane.f32.xlu2 %v1806_v23 }
 0x34a   : > { %1786 = vadd.xlane.f32.xlu1 %v1785_v53  ;;  %v1782_v27 = vsel %vm1339_vm14, %v1762_v17, 0.0 }
 0x34b   : > { %1783 = vadd.xlane.f32.xlu0 %v1782_v27 }
 0x34e   : > { %v1702_v7 = vpop.permute.xlu0 %1701 }
 0x34f   : > { %v4320_v51 = vmul.f32 %v1702_v7, %v1655_v41  ;;  %v2291_v7 = vpack.c.bf16 %v2287_v57, %v2286_v35 }
 0x351   : > { %1822 = vadd.xlane.f32.xlu2 %v1821_v40  ;;  %v1767_v13 = vmul.f32 %v4320_v51, %v4320_v51  ;;  %2805 = vmatpush.bf16.msra.mxu2 %v2291_v7 }
 0x352   : > { %2804 = vmatpush.bf16.msra.mxu1 %v2291_v7  ;;  %2806 = vmatpush.bf16.msra.mxu3 %v2291_v7 }
 0x353   : > { %v1797_v61 = vsel %vm1339_vm14, %v1767_v13, 0.0  ;;  %2324 = vmatpush.bf16.msra.mxu0 %v2291_v7 }
 0x354   : > { %1798 = vadd.xlane.f32.xlu0 %v1797_v61 }
 0x359   : > { %1795 = vadd.xlane.f32.xlu2 %v1794_v58 }
 0x39b   : > { %v1814_v28 = vpop.xlane.xlu0 %1813 }
 0x39c   : > { %v1802_v55 = vpop.xlane.xlu1 %1801  ;;  %2980 = vrsqrt.f32 %v1814_v28  ;;  %vm1975_vm1 = vcmp.eq.f32.partialorder %v1814_v28, inf  ;;  %v1978_v1 = vand.u32 2147483648, %v1814_v28  ;;  %vm1977_vm10 = vcmp.eq.f32.partialorder %v1814_v28, 0.0 }
 0x39d   : > { %2982 = vrsqrt.f32 %v1802_v55  ;;  %vm1927_vm11 = vcmp.eq.f32.partialorder %v1802_v55, inf  ;;  %v1930_v53 = vand.u32 2147483648, %v1802_v55  ;;  %vm1929_vm0 = vcmp.eq.f32.partialorder %v1802_v55, 0.0 }
 0x3a2   : > { %v2981_v2 = vpop.eup %2980 }
 0x3a3   : > { %v2983_v44 = vpop.eup %2982  ;;  %v1969_v8 = vmul.f32 %v2981_v2, %v1814_v28 }
 0x3a4   : > { %v1921_v18 = vmul.f32 %v2983_v44, %v1802_v55  ;;  %v4328_v63 = vpop.xlane.xlu1 %1777  ;;  %v4330_v60 = vpop.xlane.xlu2 %1804 }
 0x3a5   : > { %v1970_v25 = vmul.f32 %v2981_v2, %v1969_v8  ;;  %2984 = vrsqrt.f32 %v4328_v63  ;;  %vm1831_vm13 = vcmp.eq.f32.partialorder %v4328_v63, inf  ;;  %vm1833_vm12 = vcmp.eq.f32.partialorder %v4328_v63, 0.0 }
 0x3a6   : > { %v1922_v42 = vmul.f32 %v2983_v44, %v1921_v18  ;;  %2986 = vrsqrt.f32 %v4330_v60  ;;  %vm1939_vm3 = vcmp.eq.f32.partialorder %v4330_v60, inf  ;;  %vm1941_vm8 = vcmp.eq.f32.partialorder %v4330_v60, 0.0 }
 0x3a7   : > { %v1971_v11 = vmul.f32 0.5, %v1970_v25 }
 0x3a8   : > { %v1923_v34 = vmul.f32 0.5, %v1922_v42 }
 0x3a9   : > { %v1972_v21 = vsub.f32 1.5, %v1971_v11 }
 0x3aa   : > { %v1924_v32 = vsub.f32 1.5, %v1923_v34 }
 0x3ab   : > { %v2985_v22 = vpop.eup %2984  ;;  %v1973_v30 = vmul.f32 %v2981_v2, %v1972_v21 }
 0x3ac   : > { %v2987_v59 = vpop.eup %2986  ;;  %v1925_v5 = vmul.f32 %v2983_v44, %v1924_v32  ;;  %v1825_v36 = vmul.f32 %v2985_v22, %v4328_v63  ;;  %v4335_v9 = vpop.xlane.xlu0 %1789  ;;  %v1942_v44 = vand.u32 2147483648, %v4330_v60 }
 0x3ad   : > { %v4337_v48 = vpop.xlane.xlu2 %1816  ;;  %v1974_v12 = vmul.f32 %v1973_v30, %v1814_v28  ;;  %v1933_v26 = vmul.f32 %v2987_v59, %v4330_v60  ;;  %2988 = vrsqrt.f32 %v4335_v9  ;;  %v4341_v0 = vpop.xlane.xlu1 %1792  ;;  %vm1879_vm6 = vcmp.eq.f32.partialorder %v4335_v9, inf }
 0x3ae   : > { %v1826_v46 = vmul.f32 %v2985_v22, %v1825_v36  ;;  %v1926_v16 = vmul.f32 %v1925_v5, %v1802_v55  ;;  %2990 = vrsqrt.f32 %v4341_v0  ;;  %v1882_v30 = vand.u32 2147483648, %v4335_v9 }
 0x3af   : > { %v1934_v4 = vmul.f32 %v2987_v59, %v1933_v26  ;;  %v1976_v24 = vsel %vm1975_vm1, %v1814_v28, %v1974_v12  ;;  %2992 = vrsqrt.f32 %v4337_v48  ;;  %vm1891_vm7 = vcmp.eq.f32.partialorder %v4341_v0, inf }
 0x3b0   : > { %v1827_v38 = vmul.f32 0.5, %v1826_v46  ;;  %v1928_v17 = vsel %vm1927_vm11, %v1802_v55, %v1926_v16  ;;  %v1979_v31 = vsel %vm1977_vm10, %v1978_v1, %v1976_v24  ;;  %v1834_v55 = vand.u32 2147483648, %v4328_v63 }
 0x3b1   : > { %v1935_v52 = vmul.f32 0.5, %v1934_v4  ;;  %v1931_v61 = vsel %vm1929_vm0, %v1930_v53, %v1928_v17  ;;  %v4361_v2 = vmax.f32 %v1979_v31, 1e-12  ;;  %v1894_v36 = vand.u32 2147483648, %v4341_v0 }
 0x3b2   : > { %v1828_v14 = vsub.f32 1.5, %v1827_v38  ;;  %v4371_v34 = vmax.f32 %v1931_v61, 1e-12  ;;  %v1990_v26 = vand.u32 2147483648, %v4337_v48  ;;  %vm1881_vm4 = vcmp.eq.f32.partialorder %v4335_v9, 0.0 }
 0x3b3   : > { %v2989_v23 = vpop.eup %2988  ;;  %v1936_v27 = vsub.f32 1.5, %v1935_v52  ;;  %vm1987_vm15 = vcmp.eq.f32.partialorder %v4337_v48, inf  ;;  %vm1893_vm2 = vcmp.eq.f32.partialorder %v4341_v0, 0.0  ;;  %vm1989_vm9 = vcmp.eq.f32.partialorder %v4337_v48, 0.0 }
 0x3b4   : > { %v1829_v50 = vmul.f32 %v2985_v22, %v1828_v14  ;;  %v1873_v37 = vmul.f32 %v2989_v23, %v4335_v9  ;;  %v2991_v40 = vpop.eup %2990 }
 0x3b5   : > { %v4352_v41 = vpop.xlane.xlu2 %1780  ;;  %v1937_v13 = vmul.f32 %v2987_v59, %v1936_v27  ;;  %v4355_v56 = vpop.xlane.xlu1 %1819  ;;  %v1885_v28 = vmul.f32 %v2991_v40, %v4341_v0 }
 0x3b6   : > { %2994 = vrsqrt.f32 %v4352_v41  ;;  %v1874_v58 = vmul.f32 %v2989_v23, %v1873_v37  ;;  %v4366_v8 = vpop.xlane.xlu0 %1810  ;;  %v2993_v18 = vpop.eup %2992  ;;  %v1830_v25 = vmul.f32 %v1829_v50, %v4328_v63  ;;  %vm1843_vm5 = vcmp.eq.f32.partialorder %v4352_v41, inf }
 0x3b7   : > { %2996 = vrsqrt.f32 %v4355_v56  ;;  %v1886_v11 = vmul.f32 %v2991_v40, %v1885_v28  ;;  %v1938_v21 = vmul.f32 %v1937_v13, %v4330_v60  ;;  %v1981_v32 = vmul.f32 %v2993_v18, %v4337_v48 }
 0x3b8   : > { %v1875_v42 = vmul.f32 0.5, %v1874_v58  ;;  %2998 = vrsqrt.f32 %v4366_v8  ;;  %v1832_v16 = vsel %vm1831_vm13, %v4328_v63, %v1830_v25  ;;  %vm1999_vm1 = vcmp.eq.f32.partialorder %v4355_v56, inf }
 0x3b9   : > { %v1887_v59 = vmul.f32 0.5, %v1886_v11  ;;  %3000 = vrcp.f32 %v4361_v2  ;;  %v1982_v12 = vmul.f32 %v2993_v18, %v1981_v32  ;;  %v1940_v35 = vsel %vm1939_vm3, %v4330_v60, %v1938_v21 }
 0x3ba   : > { %v1876_v22 = vsub.f32 1.5, %v1875_v42  ;;  %3002 = vrcp.f32 %v4371_v34  ;;  %v1835_v31 = vsel %vm1833_vm12, %v1834_v55, %v1832_v16  ;;  %v1943_v63 = vsel %vm1941_vm8, %v1942_v44, %v1940_v35 }
 0x3bb   : > { %v1888_v38 = vsub.f32 1.5, %v1887_v59  ;;  %v1983_v57 = vmul.f32 0.5, %v1982_v12  ;;  %v4412_v42 = vmax.f32 %v1835_v31, 1e-12  ;;  %vm1845_vm11 = vcmp.eq.f32.partialorder %v4352_v41, 0.0 }
 0x3bc   : > { %v2995_v5 = vpop.eup %2994  ;;  %v1877_v4 = vmul.f32 %v2989_v23, %v1876_v22  ;;  %vm2001_vm10 = vcmp.eq.f32.partialorder %v4355_v56, 0.0  ;;  %v4426_v12 = vmax.f32 %v1943_v63, 1e-12  ;;  %vm1963_vm0 = vcmp.eq.f32.partialorder %v4366_v8, inf }
 0x3bd   : > { %v2997_v46 = vpop.eup %2996  ;;  %v1837_v24 = vmul.f32 %v2995_v5, %v4352_v41  ;;  %v4387_v52 = vpop.xlane.xlu2 %1807  ;;  %v1889_v53 = vmul.f32 %v2991_v40, %v1888_v38  ;;  %v1984_v50 = vsub.f32 1.5, %v1983_v57  ;;  %v2002_v16 = vand.u32 2147483648, %v4355_v56 }
 0x3be   : > { %v1993_v1 = vmul.f32 %v2997_v46, %v4355_v56  ;;  %v4395_v14 = vpop.xlane.xlu1 %1786  ;;  %v2999_v23 = vpop.eup %2998  ;;  %v1878_v17 = vmul.f32 %v1877_v4, %v4335_v9  ;;  %vm1965_vm13 = vcmp.eq.f32.partialorder %v4366_v8, 0.0 }
 0x3bf   : > { %v1838_v27 = vmul.f32 %v2995_v5, %v1837_v24  ;;  %3004 = vrsqrt.f32 %v4395_v14  ;;  %v1957_v37 = vmul.f32 %v2999_v23, %v4366_v8  ;;  %v4403_v13 = vpop.xlane.xlu0 %1783  ;;  %v1890_v61 = vmul.f32 %v1889_v53, %v4341_v0  ;;  %v4408_v40 = vpop.eup %3000 }
 0x3c0   : > { %v1994_v7 = vmul.f32 %v2997_v46, %v1993_v1  ;;  %3006 = vrsqrt.f32 %v4403_v13  ;;  %v1985_v28 = vmul.f32 %v2993_v18, %v1984_v50  ;;  %v1880_v11 = vsel %vm1879_vm6, %v4335_v9, %v1878_v17  ;;  %v4419_v32 = vpop.eup %3002 }
 0x3c1   : > { %v1839_v58 = vmul.f32 0.5, %v1838_v27  ;;  %v1958_v55 = vmul.f32 %v2999_v23, %v1957_v37  ;;  %v1892_v60 = vsel %vm1891_vm7, %v4341_v0, %v1890_v61  ;;  %v1883_v24 = vsel %vm1881_vm4, %v1882_v30, %v1880_v11 }
 0x3c2   : > { %v1995_v25 = vmul.f32 0.5, %v1994_v7  ;;  %v1986_v44 = vmul.f32 %v1985_v28, %v4337_v48  ;;  %v1895_v53 = vsel %vm1893_vm2, %v1894_v36, %v1892_v60  ;;  %3008 = vrcp.f32 %v4412_v42 }
 0x3c3   : > { %v1840_v21 = vsub.f32 1.5, %v1839_v58  ;;  %v1959_v18 = vmul.f32 0.5, %v1958_v55  ;;  %v4445_v50 = vmax.f32 %v1883_v24, 1e-12  ;;  %v4454_v37 = vmax.f32 %v1895_v53, 1e-12 }
 0x3c4   : > { %v1996_v22 = vsub.f32 1.5, %v1995_v25  ;;  %v1988_v35 = vsel %vm1987_vm15, %v4337_v48, %v1986_v44  ;;  %v1846_v61 = vand.u32 2147483648, %v4352_v41  ;;  %3010 = vrcp.f32 %v4426_v12 }
 0x3c5   : > { %v3005_v59 = vpop.eup %3004  ;;  %v1841_v4 = vmul.f32 %v2995_v5, %v1840_v21  ;;  %v4430_v38 = vpop.xlane.xlu2 %1822  ;;  %v1960_v57 = vsub.f32 1.5, %v1959_v18  ;;  %v1991_v0 = vsel %vm1989_vm9, %v1990_v26, %v1988_v35  ;;  %v1966_v48 = vand.u32 2147483648, %v4366_v8 }
 0x3c6   : > { %v1997_v1 = vmul.f32 %v2997_v46, %v1996_v22  ;;  %v3007_v17 = vpop.eup %3006  ;;  %v1861_v5 = vmul.f32 %v3005_v59, %v4395_v14  ;;  %v4463_v63 = vmax.f32 %v1991_v0, 1e-12  ;;  %3012 = vrsqrt.f32 %v4387_v52 }
 0x3c7   : > { %v1842_v27 = vmul.f32 %v1841_v4, %v4352_v41  ;;  %v1961_v9 = vmul.f32 %v2999_v23, %v1960_v57  ;;  %v1849_v31 = vmul.f32 %v3007_v17, %v4403_v13  ;;  %v4471_v25 = vpop.xlane.xlu0 %1798  ;;  %3014 = vrcp.f32 %v4445_v50 }
 0x3c8   : > { %v1998_v30 = vmul.f32 %v1997_v1, %v4355_v56  ;;  %v1862_v46 = vmul.f32 %v3005_v59, %v1861_v5  ;;  %v4476_v44 = vpop.eup %3008  ;;  %3016 = vrcp.f32 %v4454_v37  ;;  %vm1855_vm12 = vcmp.eq.f32.partialorder %v4403_v13, inf  ;;  %v2283_v5 = vld [vmem:[%s5064_s4 + $0x18] sm:$0xff] }
 0x3c9   : > { %v1844_v36 = vsel %vm1843_vm5, %v4352_v41, %v1842_v27  ;;  %v1962_v23 = vmul.f32 %v1961_v9, %v4366_v8  ;;  %v1850_v26 = vmul.f32 %v3007_v17, %v1849_v31  ;;  %vm1867_vm3 = vcmp.eq.f32.partialorder %v4395_v14, inf  ;;  %v2282_v27 = vld [vmem:[%s5064_s4 + $0x10] sm:$0xff] }
 0x3ca   : > { %v2000_v7 = vsel %vm1999_vm1, %v4355_v56, %v1998_v30  ;;  %v1863_v58 = vmul.f32 0.5, %v1862_v46  ;;  %v1847_v55 = vsel %vm1845_vm11, %v1846_v61, %v1844_v36  ;;  %3018 = vrsqrt.f32 %v4471_v25  ;;  %v2284_v56 = vld [vmem:[%s5064_s4 + $0x20] sm:$0xff]  ;;  %v4499_v35 = vpop.eup %3010 }
 0x3cb   : > { %v1964_v28 = vsel %vm1963_vm0, %v4366_v8, %v1962_v23  ;;  %v2003_v11 = vsel %vm2001_vm10, %v2002_v16, %v2000_v7  ;;  %v1851_v21 = vmul.f32 0.5, %v1850_v26  ;;  %v4483_v41 = vmax.f32 %v1847_v55, 1e-12  ;;  %v2285_v16 = vld [vmem:[%s5064_s4 + $0x28] sm:$0xff] }
 0x3cc   : > { %v1864_v60 = vsub.f32 1.5, %v1863_v58  ;;  %v1967_v18 = vsel %vm1965_vm13, %v1966_v48, %v1964_v28  ;;  %3020 = vrcp.f32 %v4463_v63  ;;  %v4495_v24 = vmax.f32 %v2003_v11, 1e-12  ;;  %v3013_v9 = vpop.eup %3012  ;;  %v2280_v28 = vld [vmem:[%s5064_s4] sm:$0xff]  ;;  %v2281_v55 = vld [vmem:[%s5064_s4 + $0x8] sm:$0xff] }
 0x3cd   : > { %v1852_v22 = vsub.f32 1.5, %v1851_v21  ;;  %v4492_v8 = vpop.xlane.xlu2 %1795  ;;  %vm1857_vm8 = vcmp.eq.f32.partialorder %v4403_v13, 0.0  ;;  %v4501_v57 = vmax.f32 %v1967_v18, 1e-12  ;;  %3022 = vrsqrt.f32 %v4430_v38 }
 0x3ce   : > { %v1865_v4 = vmul.f32 %v3005_v59, %v1864_v60  ;;  %v1858_v59 = vand.u32 2147483648, %v4403_v13  ;;  %vm1869_vm6 = vcmp.eq.f32.partialorder %v4395_v14, 0.0  ;;  %v1870_v30 = vand.u32 2147483648, %v4395_v14 }
 0x3cf   : > { %v1853_v1 = vmul.f32 %v3007_v17, %v1852_v22  ;;  %v2290_v31 = vpack.c.bf16 %v2285_v16, %v2284_v56  ;;  %3024 = vrsqrt.f32 %v4492_v8  ;;  %v4514_v17 = vpop.eup %3014  ;;  %v1945_v46 = vmul.f32 %v3013_v9, %v4387_v52 }
 0x3d0   : > { %v1866_v53 = vmul.f32 %v1865_v4, %v4395_v14  ;;  %3026 = vrcp.f32 %v4483_v41  ;;  %v4522_v23 = vpop.eup %3016  ;;  %v1954_v61 = vand.u32 2147483648, %v4387_v52  ;;  %v2289_v48 = vpack.c.bf16 %v2283_v5, %v2282_v27 }
 0x3d1   : > { %v1854_v0 = vmul.f32 %v1853_v1, %v4403_v13  ;;  %3028 = vrcp.f32 %v4495_v24  ;;  %2808 = vmatpush.bf16.msra.mxu2 %v2290_v31  ;;  %2807 = vmatpush.bf16.msra.mxu1 %v2290_v31  ;;  %v4526_v26 = vpop.eup %3018  ;;  %v1946_v58 = vmul.f32 %v3013_v9, %v1945_v46  ;;  %v2153_v11 = vmul.f32 %v4419_v32, %v4371_v34 }
 0x3d2   : > { %v1868_v36 = vsel %vm1867_vm3, %v4395_v14, %v1866_v53  ;;  %3030 = vrcp.f32 %v4501_v57  ;;  %2809 = vmatpush.bf16.msra.mxu3 %v2290_v31  ;;  %2325 = vmatpush.bf16.msra.mxu0 %v2290_v31  ;;  %v4540_v21 = vpop.eup %3020  ;;  %vm1951_vm7 = vcmp.eq.f32.partialorder %v4387_v52, inf  ;;  %v1909_v18 = vmul.f32 %v4526_v26, %v4471_v25 }
 0x3d3   : > { %v1871_v7 = vsel %vm1869_vm6, %v1870_v30, %v1868_v36  ;;  %v1856_v14 = vsel %vm1855_vm12, %v4403_v13, %v1854_v0  ;;  %v1918_v22 = vand.u32 2147483648, %v4471_v25  ;;  %v3023_v56 = vpop.eup %3022  ;;  %v1947_v1 = vmul.f32 0.5, %v1946_v58 }
 0x3d4   : > { %v1859_v60 = vsel %vm1857_vm8, %v1858_v59, %v1856_v14  ;;  %v4549_v16 = vmax.f32 %v1871_v7, 1e-12  ;;  %v2154_v27 = vsub.f32 1.0, %v2153_v11  ;;  %vm1953_vm4 = vcmp.eq.f32.partialorder %v4387_v52, 0.0 }
 0x3d5   : > { %v3025_v5 = vpop.eup %3024  ;;  %v1910_v13 = vmul.f32 %v4526_v26, %v1909_v18  ;;  %v2005_v59 = vmul.f32 %v3023_v56, %v4430_v38  ;;  %2811 = vmatpush.bf16.msra.mxu2 %v2289_v48  ;;  %v2288_v30 = vpack.c.bf16 %v2281_v55, %v2280_v28  ;;  %vm2157_vm15 = vweird.f32 %v4371_v34  ;;  %2810 = vmatpush.bf16.msra.mxu1 %v2289_v48 }
 0x3d6   : > { %v4556_v31 = vpop.eup %3026  ;;  %v4558_v0 = vmax.f32 %v1859_v60, 1e-12  ;;  %v1948_v36 = vsub.f32 1.5, %v1947_v1  ;;  %vm1915_vm2 = vcmp.eq.f32.partialorder %v4471_v25, inf  ;;  %v1897_v46 = vmul.f32 %v3025_v5, %v4492_v8  ;;  %2812 = vmatpush.bf16.msra.mxu3 %v2289_v48  ;;  %2326 = vmatpush.bf16.msra.mxu0 %v2289_v48 }
 0x3d7   : > { %v2155_v7 = vmul.f32 %v4419_v32, %v2154_v27  ;;  %v4563_v14 = vpop.eup %3028  ;;  %v1911_v58 = vmul.f32 0.5, %v1910_v13  ;;  %v2006_v28 = vmul.f32 %v3023_v56, %v2005_v59  ;;  %vm2158_vm9 = vweird.f32 %v4419_v32 }
 0x3d8   : > { %v2163_v55 = vand.u32 2147483648, %v4371_v34  ;;  %v4567_v11 = vpop.eup %3030  ;;  %3032 = vrcp.f32 %v4549_v16  ;;  %v1949_v60 = vmul.f32 %v3013_v9, %v1948_v36  ;;  %vm2011_vm5 = vcmp.eq.f32.partialorder %v4430_v38, inf  ;;  %vm4590_vm12 = vmor %vm2157_vm15, %vm2158_vm9 }
 0x3d9   : > { %v1898_v18 = vmul.f32 %v3025_v5, %v1897_v46  ;;  %v2168_v1 = vmul.f32 %v4499_v35, %v4426_v12  ;;  %v1912_v48 = vsub.f32 1.5, %v1911_v58  ;;  %vm1917_vm1 = vcmp.eq.f32.partialorder %v4471_v25, 0.0  ;;  %2814 = vmatpush.bf16.msra.mxu2 %v2288_v30  ;;  %2813 = vmatpush.bf16.msra.mxu1 %v2288_v30 }
 0x3da   : > { %v2007_v27 = vmul.f32 0.5, %v2006_v28  ;;  %vm2013_vm11 = vcmp.eq.f32.partialorder %v4430_v38, 0.0  ;;  %vm1903_vm10 = vcmp.eq.f32.partialorder %v4492_v8, inf  ;;  %v2156_v13 = vadd.f32 %v4419_v32, %v2155_v7  ;;  %2815 = vmatpush.bf16.msra.mxu3 %v2288_v30  ;;  %2327 = vmatpush.bf16.msra.mxu0 %v2288_v30 }
 0x3db   : > { %v2161_v59 = vand.u32 2147483647, %v4371_v34  ;;  %3034 = vrcp.f32 %v4558_v0  ;;  %v1950_v9 = vmul.f32 %v1949_v60, %v4387_v52  ;;  %v1899_v36 = vmul.f32 0.5, %v1898_v18 }
 0x3dc   : > { %vm1905_vm0 = vcmp.eq.f32.partialorder %v4492_v8, 0.0  ;;  %v2169_v46 = vsub.f32 1.0, %v2168_v1  ;;  %v1913_v58 = vmul.f32 %v4526_v26, %v1912_v48  ;;  %v2008_v28 = vsub.f32 1.5, %v2007_v27 }
 0x3dd   : > { %v2164_v53 = vor.u32 1.1754944e-38, %v2163_v55  ;;  %vm2173_vm13 = vweird.f32 %v4499_v35  ;;  %v1952_v7 = vsel %vm1951_vm7, %v4387_v52, %v1950_v9  ;;  %v1900_v4 = vsub.f32 1.5, %v1899_v36 }
 0x3de   : > { %v2170_v30 = vmul.f32 %v4499_v35, %v2169_v46  ;;  %v2176_v26 = vand.u32 2147483647, %v4426_v12  ;;  %v1914_v55 = vmul.f32 %v1913_v58, %v4471_v25  ;;  %v2009_v18 = vmul.f32 %v3023_v56, %v2008_v28  ;;  %v4601_v48 = vpop.eup %3032 }
 0x3df   : > { %v2160_v1 = vsel %vm4590_vm12, %v4419_v32, %v2156_v13  ;;  %vm2172_vm3 = vweird.f32 %v4426_v12  ;;  %v1955_v34 = vsel %vm1953_vm4, %v1954_v61, %v1952_v7  ;;  %v1901_v27 = vmul.f32 %v3025_v5, %v1900_v4 }
 0x3e0   : > { %v2171_v9 = vadd.f32 %v4499_v35, %v2170_v30  ;;  %v2178_v36 = vand.u32 2147483648, %v4426_v12  ;;  %v1916_v56 = vsel %vm1915_vm2, %v4471_v25, %v1914_v55  ;;  %v2010_v32 = vmul.f32 %v2009_v18, %v4430_v38  ;;  %vm4615_vm6 = vmor %vm2172_vm3, %vm2173_vm13 }
 0x3e1   : > { %vm2162_vm8 = vcmp.eq.f32.partialorder %v2161_v59, 8.507059e+37  ;;  %v2093_v52 = vmul.f32 %v4514_v17, %v4445_v50  ;;  %v4621_v61 = vpop.eup %3034  ;;  %v1902_v12 = vmul.f32 %v1901_v27, %v4492_v8  ;;  %vm2177_vm7 = vcmp.eq.f32.partialorder %v2176_v26, 8.507059e+37 }
 0x3e2   : > { %v2165_v4 = vsel %vm2162_vm8, %v2164_v53, %v2160_v1  ;;  %v2175_v5 = vsel %vm4615_vm6, %v4499_v35, %v2171_v9  ;;  %v4627_v59 = vmax.f32 %v1955_v34, 1e-12  ;;  %v2012_v46 = vsel %vm2011_vm5, %v4430_v38, %v2010_v32 }
 0x3e3   : > { %v2179_v58 = vor.u32 1.1754944e-38, %v2178_v36  ;;  %v2094_v28 = vsub.f32 1.0, %v2093_v52  ;;  %v1919_v7 = vsel %vm1917_vm1, %v1918_v22, %v1916_v56  ;;  %v5187_v53 = vand.u32 2147483648, %v4430_v38 }
 0x3e4   : > { %v1904_v35 = vsel %vm1903_vm10, %v4492_v8, %v1902_v12  ;;  %v2101_v30 = vand.u32 2147483647, %v4445_v50  ;;  %v5188_v26 = vand.u32 2147483648, %v4492_v8  ;;  %v2166_v18 = vmul.f32 %v2165_v4, %v4250_v45 }
 0x3e5   : > { %v2015_v60 = vsel %vm2013_vm11, %v5187_v53, %v2012_v46  ;;  %v2180_v25 = vsel %vm2177_vm7, %v2179_v58, %v2175_v5  ;;  %vm2097_vm4 = vweird.f32 %v4445_v50  ;;  %v2095_v1 = vmul.f32 %v4514_v17, %v2094_v28 }
 0x3e6   : > { %v1907_v55 = vsel %vm1905_vm0, %v5188_v26, %v1904_v35  ;;  %v4650_v22 = vmax.f32 %v2015_v60, 1e-12  ;;  %v2181_v38 = vmul.f32 %v2180_v25, %v4262_v62  ;;  %vm2098_vm15 = vweird.f32 %v4514_v17 }
 0x3e7   : > { %3036 = vrcp.f32 %v4627_v59  ;;  %v4656_v34 = vmax.f32 %v1919_v7, 1e-12  ;;  %v2103_v8 = vand.u32 2147483648, %v4445_v50  ;;  %v2108_v45 = vmul.f32 %v4522_v23, %v4454_v37  ;;  %vm2099_vm9 = vmor %vm2097_vm4, %vm2098_vm15 }
 0x3e8   : > { %v4661_v27 = vmax.f32 %v1907_v55, 1e-12  ;;  %v2276_v9 = vpack.c.bf16 %v2181_v38, %v2166_v18  ;;  %v2096_v36 = vadd.f32 %v4514_v17, %v2095_v1  ;;  %vm2102_vm2 = vcmp.eq.f32.partialorder %v2101_v30, 8.507059e+37 }
 0x3e9   : > { %v2104_v62 = vor.u32 1.1754944e-38, %v2103_v8  ;;  %v2109_v56 = vsub.f32 1.0, %v2108_v45  ;;  %v2116_v32 = vand.u32 2147483647, %v4454_v37  ;;  %v2118_v13 = vand.u32 2147483648, %v4454_v37 }
 0x3ea   : > { %3038 = vrcp.f32 %v4650_v22  ;;  %2765 = vmatmul.msk.bf16.vlgmr.msra.gmra.mxu2 %vm1339_vm14, %v2276_v9  ;;  %v2100_v50 = vsel %vm2099_vm9, %v4514_v17, %v2096_v36  ;;  %vm2112_vm5 = vweird.f32 %v4454_v37  ;;  %v2213_v52 = vmul.f32 %v4408_v40, %v4361_v2 }
 0x3eb   : > { %v2105_v12 = vsel %vm2102_vm2, %v2104_v62, %v2100_v50  ;;  %v2110_v4 = vmul.f32 %v4522_v23, %v2109_v56  ;;  %vm2113_vm1 = vweird.f32 %v4522_v23  ;;  %vm2217_vm11 = vweird.f32 %v4361_v2 }
 0x3ec   : > { %vm4675_vm10 = vcmp.eq.f32.partialorder %v2116_v32, 8.507059e+37  ;;  %v2214_v46 = vsub.f32 1.0, %v2213_v52  ;;  %vm2218_vm0 = vweird.f32 %v4408_v40  ;;  %v2221_v17 = vand.u32 2147483647, %v4361_v2  ;;  %vm2114_vm13 = vmor %vm2112_vm5, %vm2113_vm1 }
 0x3ed   : > { %v4681_v58 = vpop.eup %3036  ;;  %v2111_v28 = vadd.f32 %v4522_v23, %v2110_v4  ;;  %v2119_v7 = vor.u32 1.1754944e-38, %v2118_v13  ;;  %v2223_v53 = vand.u32 2147483648, %v4361_v2  ;;  %v2228_v60 = vmul.f32 %v4540_v21, %v4463_v63  ;;  %vm2219_vm6 = vmor %vm2217_vm11, %vm2218_vm0 }
 0x3ee   : > { %v2106_v35 = vmul.f32 %v2105_v12, %v4272_v19  ;;  %v2215_v30 = vmul.f32 %v4408_v40, %v2214_v46  ;;  %vm2232_vm12 = vweird.f32 %v4463_v63  ;;  %vm2233_vm3 = vweird.f32 %v4540_v21 }
 0x3ef   : > { %v2115_v26 = vsel %vm2114_vm13, %v4522_v23, %v2111_v28  ;;  %vm4694_vm8 = vcmp.eq.f32.partialorder %v2221_v17, 8.507059e+37  ;;  %v2229_v18 = vsub.f32 1.0, %v2228_v60  ;;  %v2033_v25 = vmul.f32 %v4476_v44, %v4412_v42  ;;  %vm2234_vm4 = vmor %vm2232_vm12, %vm2233_vm3 }
 0x3f0   : > { %v4700_v19 = vpop.eup %3038  ;;  %v2120_v37 = vsel %vm4675_vm10, %v2119_v7, %v2115_v26  ;;  %v2216_v38 = vadd.f32 %v4408_v40, %v2215_v30  ;;  %v2236_v1 = vand.u32 2147483647, %v4463_v63  ;;  %v2238_v8 = vand.u32 2147483648, %v4463_v63 }
 0x3f1   : > { %v2121_v23 = vmul.f32 %v2120_v37, %v4270_v54  ;;  %v2224_v45 = vor.u32 1.1754944e-38, %v2223_v53  ;;  %v2230_v9 = vmul.f32 %v4540_v21, %v2229_v18  ;;  %v2034_v36 = vsub.f32 1.0, %v2033_v25 }
 0x3f2   : > { %v2220_v62 = vsel %vm2219_vm6, %v4408_v40, %v2216_v38  ;;  %vm2038_vm7 = vweird.f32 %v4476_v44  ;;  %v2041_v56 = vand.u32 2147483647, %v4412_v42  ;;  %v2043_v32 = vand.u32 2147483648, %v4412_v42 }
 0x3f3   : > { %v2274_v13 = vpack.c.bf16 %v2121_v23, %v2106_v35  ;;  %v2225_v54 = vsel %vm4694_vm8, %v2224_v45, %v2220_v62  ;;  %v2231_v50 = vadd.f32 %v4540_v21, %v2230_v9  ;;  %v2035_v2 = vmul.f32 %v4476_v44, %v2034_v36 }
 0x3f4   : > { %3040 = vrcp.f32 %v4661_v27  ;;  %vm2237_vm15 = vcmp.eq.f32.partialorder %v2236_v1, 8.507059e+37  ;;  %v2239_v40 = vor.u32 1.1754944e-38, %v2238_v8  ;;  %v2048_v52 = vmul.f32 %v4556_v31, %v4483_v41 }
 0x3f5   : > { %2763 = vmatmul.msk.bf16.vlgmr.msra.gmra.mxu1 %vm1339_vm14, %v2274_v13  ;;  %v2226_v12 = vmul.f32 %v2225_v54, %v4248_v3  ;;  %v2235_v4 = vsel %vm2234_vm4, %v4540_v21, %v2231_v50  ;;  %v2036_v5 = vadd.f32 %v4476_v44, %v2035_v2  ;;  %vm2037_vm2 = vweird.f32 %v4412_v42 }
 0x3f6   : > { %v2240_v46 = vsel %vm2237_vm15, %v2239_v40, %v2235_v4  ;;  %vm2039_vm9 = vmor %vm2037_vm2, %vm2038_vm7  ;;  %vm2042_vm5 = vcmp.eq.f32.partialorder %v2041_v56, 8.507059e+37  ;;  %v2049_v63 = vsub.f32 1.0, %v2048_v52  ;;  %v2058_v17 = vand.u32 2147483648, %v4483_v41 }
 0x3f7   : > { %v2241_v28 = vmul.f32 %v2240_v46, %v4267_v39  ;;  %v2040_v7 = vsel %vm2039_vm9, %v4476_v44, %v2036_v5  ;;  %v2044_v53 = vor.u32 1.1754944e-38, %v2043_v32  ;;  %v2183_v3 = vmul.f32 %v4681_v58, %v4627_v59 }
 0x3f8   : > { %v2050_v21 = vmul.f32 %v4556_v31, %v2049_v63  ;;  %vm2052_vm1 = vweird.f32 %v4483_v41  ;;  %vm2053_vm11 = vweird.f32 %v4556_v31  ;;  %v2056_v42 = vand.u32 2147483647, %v4483_v41 }
 0x3f9   : > { %v2278_v60 = vpack.c.bf16 %v2241_v28, %v2226_v12  ;;  %v2045_v35 = vsel %vm2042_vm5, %v2044_v53, %v2040_v7  ;;  %v2184_v30 = vsub.f32 1.0, %v2183_v3  ;;  %vm2187_vm10 = vweird.f32 %v4627_v59  ;;  %vm2054_vm0 = vmor %vm2052_vm1, %vm2053_vm11 }
 0x3fa   : > { %v4745_v39 = vpop.eup %3040  ;;  %v2051_v44 = vadd.f32 %v4556_v31, %v2050_v21  ;;  %v2059_v26 = vor.u32 1.1754944e-38, %v2058_v17  ;;  %v2193_v55 = vand.u32 2147483648, %v4627_v59  ;;  %v2198_v18 = vmul.f32 %v4567_v11, %v4501_v57 }
 0x3fb   : > { %2767 = vmatmul.msk.bf16.vlgmr.msra.gmra.mxu3 %vm1339_vm14, %v2278_v60  ;;  %v2185_v41 = vmul.f32 %v4681_v58, %v2184_v30  ;;  %vm2188_vm13 = vweird.f32 %v4681_v58  ;;  %v2191_v25 = vand.u32 2147483647, %v4627_v59  ;;  %v2206_v37 = vand.u32 2147483647, %v4501_v57 }
 0x3fc   : > { %v2046_v38 = vmul.f32 %v2045_v35, %v4254_v29  ;;  %v2055_v1 = vsel %vm2054_vm0, %v4556_v31, %v2051_v44  ;;  %vm2057_vm12 = vcmp.eq.f32.partialorder %v2056_v42, 8.507059e+37  ;;  %v2199_v8 = vsub.f32 1.0, %v2198_v18  ;;  %vm2189_vm8 = vmor %vm2187_vm10, %vm2188_vm13 }
 0x3fd   : > { %v2060_v23 = vsel %vm2057_vm12, %v2059_v26, %v2055_v1  ;;  %v2186_v45 = vadd.f32 %v4681_v58, %v2185_v41  ;;  %vm2203_vm3 = vweird.f32 %v4567_v11  ;;  %v2208_v9 = vand.u32 2147483648, %v4501_v57 }
 0x3fe   : > { %v2061_v36 = vmul.f32 %v2060_v23, %v4281_v20  ;;  %v2194_v62 = vor.u32 1.1754944e-38, %v2193_v55  ;;  %v2200_v56 = vmul.f32 %v4567_v11, %v2199_v8  ;;  %v2063_v29 = vmul.f32 %v4621_v61, %v4558_v0 }
 0x3ff   : > { %v2190_v31 = vsel %vm2189_vm8, %v4681_v58, %v2186_v45  ;;  %vm2192_vm6 = vcmp.eq.f32.partialorder %v2191_v25, 8.507059e+37  ;;  %vm2202_vm7 = vweird.f32 %v4501_v57  ;;  %vm4769_vm4 = vcmp.eq.f32.partialorder %v2206_v37, 8.507059e+37 }
 0x400   : > { %v2272_v13 = vpack.c.bf16 %v2061_v36, %v2046_v38  ;;  %v2195_v20 = vsel %vm2192_vm6, %v2194_v62, %v2190_v31  ;;  %v2201_v59 = vadd.f32 %v4567_v11, %v2200_v56  ;;  %v2064_v54 = vsub.f32 1.0, %v2063_v29  ;;  %vm2204_vm15 = vmor %vm2202_vm7, %vm2203_vm3 }
 0x401   : > { %v2209_v50 = vor.u32 1.1754944e-38, %v2208_v9  ;;  %vm2068_vm2 = vweird.f32 %v4621_v61  ;;  %v2073_v58 = vand.u32 2147483648, %v4558_v0  ;;  %v2078_v57 = vmul.f32 %v4601_v48, %v4549_v16 }
 0x402   : > { %2761 = vmatmul.msk.bf16.vlgmr.msra.gmra.mxu0 %vm1339_vm14, %v2272_v13  ;;  %v2196_v2 = vmul.f32 %v2195_v20, %v4293_v49  ;;  %v2205_v40 = vsel %vm2204_vm15, %v4567_v11, %v2201_v59  ;;  %v2065_v52 = vmul.f32 %v4621_v61, %v2064_v54  ;;  %v2071_v12 = vand.u32 2147483647, %v4558_v0 }
 0x403   : > { %3042 = vrcp.f32 %v4656_v34  ;;  %v2210_v4 = vsel %vm4769_vm4, %v2209_v50, %v2205_v40  ;;  %vm2067_vm9 = vweird.f32 %v4558_v0  ;;  %v2079_v5 = vsub.f32 1.0, %v2078_v57 }
 0x404   : > { %v2211_v46 = vmul.f32 %v2210_v4, %v4289_v43  ;;  %v2066_v63 = vadd.f32 %v4621_v61, %v2065_v52  ;;  %v2088_v49 = vand.u32 2147483648, %v4549_v16  ;;  %v2243_v11 = vmul.f32 %v4563_v14, %v4495_v24  ;;  %vm2069_vm5 = vmor %vm2067_vm9, %vm2068_vm2  ;;  %v2947_v4 = vld [vmem:[%s5065_s5] ss:$0 sm:$0xff] }
 0x405   : > { %v2074_v17 = vor.u32 1.1754944e-38, %v2073_v58  ;;  %v2080_v28 = vmul.f32 %v4601_v48, %v2079_v5  ;;  %vm2083_vm1 = vweird.f32 %v4601_v48  ;;  %v2086_v0 = vand.u32 2147483647, %v4549_v16 }
 0x406   : > { %v2277_v7 = vpack.c.bf16 %v2211_v46, %v2196_v2  ;;  %v2070_v43 = vsel %vm2069_vm5, %v4621_v61, %v2066_v63  ;;  %vm2072_vm11 = vcmp.eq.f32.partialorder %v2071_v12, 8.507059e+37  ;;  %v2244_v53 = vsub.f32 1.0, %v2243_v11 }
 0x407   : > { %v2075_v3 = vsel %vm2072_vm11, %v2074_v17, %v2070_v43  ;;  %v2081_v21 = vadd.f32 %v4601_v48, %v2080_v28  ;;  %vm2082_vm10 = vweird.f32 %v4549_v16  ;;  %v2253_v42 = vand.u32 2147483648, %v4495_v24 }
 0x408   : > { %2766 = vmatmul.msk.bf16.gmra.mxu2 %vm1339_vm14, %v2277_v7  ;;  %vm2084_vm0 = vmor %vm2082_vm10, %vm2083_vm1  ;;  %v2089_v60 = vor.u32 1.1754944e-38, %v2088_v49  ;;  %v2245_v35 = vmul.f32 %v4563_v14, %v2244_v53  ;;  %vm2248_vm13 = vweird.f32 %v4563_v14  ;;  %v2258_v61 = vmul.f32 %v4700_v19, %v4650_v22 }
 0x409   : > { %v3043_v30 = vpop.eup %3042  ;;  %v2085_v44 = vsel %vm2084_vm0, %v4601_v48, %v2081_v21  ;;  %vm2087_vm12 = vcmp.eq.f32.partialorder %v2086_v0, 8.507059e+37  ;;  %vm2247_vm3 = vweird.f32 %v4495_v24  ;;  %v2251_v16 = vand.u32 2147483647, %v4495_v24 }
 0x40a   : > { %v2076_v26 = vmul.f32 %v2075_v3, %v4304_v33  ;;  %v2090_v55 = vsel %vm2087_vm12, %v2089_v60, %v2085_v44  ;;  %v2246_v18 = vadd.f32 %v4563_v14, %v2245_v35  ;;  %v2259_v41 = vsub.f32 1.0, %v2258_v61  ;;  %vm2249_vm8 = vmor %vm2247_vm3, %vm2248_vm13 }
 0x40b   : > { %v2254_v25 = vor.u32 1.1754944e-38, %v2253_v42  ;;  %vm2263_vm6 = vweird.f32 %v4700_v19  ;;  %v2268_v37 = vand.u32 2147483648, %v4650_v22  ;;  %v2123_v48 = vmul.f32 %v4745_v39, %v4661_v27 }
 0x40c   : > { %v2091_v38 = vmul.f32 %v2090_v55, %v4302_v6  ;;  %v2250_v1 = vsel %vm2249_vm8, %v4563_v14, %v2246_v18  ;;  %v2260_v24 = vmul.f32 %v4700_v19, %v2259_v41  ;;  %v2266_v33 = vand.u32 2147483647, %v4650_v22 }
 0x40d   : > { %vm2252_vm7 = vcmp.eq.f32.partialorder %v2251_v16, 8.507059e+37  ;;  %vm2262_vm4 = vweird.f32 %v4650_v22  ;;  %v2124_v8 = vsub.f32 1.0, %v2123_v48  ;;  %vm2128_vm15 = vweird.f32 %v4745_v39 }
 0x40e   : > { %v2255_v23 = vsel %vm2252_vm7, %v2254_v25, %v2250_v1  ;;  %v2261_v45 = vadd.f32 %v4700_v19, %v2260_v24  ;;  %v2133_v9 = vand.u32 2147483648, %v4661_v27  ;;  %vm2264_vm2 = vmor %vm2262_vm4, %vm2263_vm6  ;;  %v2269_v36 = vor.u32 1.1754944e-38, %v2268_v37 }
 0x40f   : > { %v2125_v6 = vmul.f32 %v4745_v39, %v2124_v8  ;;  %v2131_v14 = vand.u32 2147483647, %v4661_v27  ;;  %v2138_v62 = vmul.f32 %v3043_v30, %v4656_v34  ;;  %v2273_v56 = vpack.c.bf16 %v2091_v38, %v2076_v26 }
 0x410   : > { %v2265_v29 = vsel %vm2264_vm2, %v4700_v19, %v2261_v45  ;;  %vm2267_vm9 = vcmp.eq.f32.partialorder %v2266_v33, 8.507059e+37  ;;  %vm2127_vm5 = vweird.f32 %v4661_v27  ;;  %v2256_v22 = vmul.f32 %v2255_v23, %v4287_v47 }
 0x411   : > { %v2270_v31 = vsel %vm2267_vm9, %v2269_v36, %v2265_v29  ;;  %v2126_v32 = vadd.f32 %v4745_v39, %v2125_v6  ;;  %v2139_v13 = vsub.f32 1.0, %v2138_v62  ;;  %vm2129_vm1 = vmor %vm2127_vm5, %vm2128_vm15  ;;  %v2134_v59 = vor.u32 1.1754944e-38, %v2133_v9 }
 0x412   : > { %2762 = vmatmul.msk.bf16.gmra.mxu0 %vm1339_vm14, %v2273_v56  ;;  %v2271_v20 = vmul.f32 %v2270_v31, %v4308_v10  ;;  %vm2143_vm11 = vweird.f32 %v3043_v30  ;;  %v2148_v19 = vand.u32 2147483648, %v4656_v34  ;;  %vm2132_vm10 = vcmp.eq.f32.partialorder %v2131_v14, 8.507059e+37 }
 0x413   : > { %v2130_v54 = vsel %vm2129_vm1, %v4745_v39, %v2126_v32  ;;  %v2140_v27 = vmul.f32 %v3043_v30, %v2139_v13  ;;  %v2146_v47 = vand.u32 2147483647, %v4656_v34  ;;  %vm2142_vm0 = vweird.f32 %v4656_v34 }
 0x414   : > { %v2279_v50 = vpack.c.bf16 %v2271_v20, %v2256_v22  ;;  %v2135_v58 = vsel %vm2132_vm10, %v2134_v59, %v2130_v54  ;;  %vm2144_vm13 = vmor %vm2142_vm0, %vm2143_vm11  ;;  %v2149_v10 = vor.u32 1.1754944e-38, %v2148_v19  ;;  %vm2369_vm3 = vcmask 64512  }
 0x415   : > { %v2141_v57 = vadd.f32 %v3043_v30, %v2140_v27  ;;  %v2136_v2 = vmul.f32 %v2135_v58, %v4317_v15  ;;  %vm2147_vm12 = vcmp.eq.f32.partialorder %v2146_v47, 8.507059e+37 }
 0x416   : > { %2768 = vmatmul.msk.bf16.gmra.mxu3 %vm1339_vm14, %v2279_v50 }
 0x417   : > { %v2145_v40 = vsel %vm2144_vm13, %v3043_v30, %v2141_v57 }
 0x418   : > { %v2150_v52 = vsel %vm2147_vm12, %v2149_v10, %v2145_v40 }
 0x419   : > { %v2151_v39 = vmul.f32 %v2150_v52, %v4320_v51 }
 0x41b   : > { %v2275_v12 = vpack.c.bf16 %v2151_v39, %v2136_v2 }
 0x41d   : > { %2764 = vmatmul.msk.bf16.gmra.mxu1 %vm1339_vm14, %v2275_v12 }
 0x46d   : > { %v2349_v5 = vpop.f32.mrf.mxu2 }
 0x46e   : > { %v4847_v34 = vadd.f32 %v2947_v4, %v2349_v5 }
 0x470   : > { %v2394_v46 = vsel %vm2369_vm3, %v4847_v34, -inf }
 0x471   : > { %2395 = vmax.xlane.f32.xlu0 %v2394_v46 }
 0x472   : > { %v2339_v15 = vpop.f32.mrf.mxu1 }
 0x473   : > { %v4851_v63 = vadd.f32 %v2947_v4, %v2339_v15 }
 0x475   : > { %v2382_v51 = vsel %vm2369_vm3, %v4851_v63, -inf  ;;  %v2351_v43 = vpop.f32.mrf.mxu2 }
 0x476   : > { %2383 = vmax.xlane.f32.xlu2 %v2382_v51  ;;  %v4871_v30 = vadd.f32 %v2947_v4, %v2351_v43 }
 0x478   : > { %v2397_v18 = vsel %vm2369_vm3, %v4871_v30, -inf }
 0x47a   : > { %v2341_v49 = vpop.f32.mrf.mxu1 }
 0x47b   : > { %v4855_v11 = vadd.f32 %v2947_v4, %v2341_v49 }
 0x47d   : > { %v2385_v17 = vsel %vm2369_vm3, %v4855_v11, -inf }
 0x47e   : > { %2386 = vmax.xlane.f32.xlu0 %v2385_v17  ;;  %v2359_v53 = vpop.f32.mrf.mxu3 }
 0x47f   : > { %v2329_v28 = vpop.f32.mrf.mxu0  ;;  %v4863_v3 = vadd.f32 %v2947_v4, %v2359_v53 }
 0x480   : > { %v4859_v0 = vadd.f32 %v2947_v4, %v2329_v28 }
 0x481   : > { %v2406_v35 = vsel %vm2369_vm3, %v4863_v3, -inf }
 0x482   : > { %v2370_v7 = vsel %vm2369_vm3, %v4859_v0, -inf }
 0x483   : > { %2371 = vmax.xlane.f32.xlu1 %v2370_v7 }
 0x486   : > { %v2361_v41 = vpop.f32.mrf.mxu3 }
 0x487   : > { %v2331_v21 = vpop.f32.mrf.mxu0  ;;  %v4903_v22 = vadd.f32 %v2947_v4, %v2361_v41 }
 0x488   : > { %v4865_v42 = vadd.f32 %v2947_v4, %v2331_v21 }
 0x489   : > { %v2409_v32 = vsel %vm2369_vm3, %v4903_v22, -inf }
 0x48a   : > { %v2373_v60 = vsel %vm2369_vm3, %v4865_v42, -inf }
 0x48b   : > { %2374 = vmax.xlane.f32.xlu2 %v2373_v60  ;;  %2407 = vmax.xlane.f32.xlu1 %v2406_v35  ;;  %v2354_v61 = vpop.f32.mrf.mxu2 }
 0x48c   : > { %v4873_v44 = vadd.f32 %v2947_v4, %v2354_v61 }
 0x48e   : > { %v2400_v25 = vsel %vm2369_vm3, %v4873_v44, -inf }
 0x48f   : > { %v2334_v16 = vpop.f32.mrf.mxu0 }
 0x490   : > { %v4875_v26 = vadd.f32 %v2947_v4, %v2334_v16 }
 0x492   : > { %v2376_v55 = vsel %vm2369_vm3, %v4875_v26, -inf }
 0x493   : > { %2377 = vmax.xlane.f32.xlu0 %v2376_v55  ;;  %2398 = vmax.xlane.f32.xlu1 %v2397_v18  ;;  %v2356_v37 = vpop.f32.mrf.mxu2 }
 0x494   : > { %2401 = vmax.xlane.f32.xlu2 %v2400_v25  ;;  %v4883_v48 = vadd.f32 %v2947_v4, %v2356_v37 }
 0x496   : > { %v2403_v1 = vsel %vm2369_vm3, %v4883_v48, -inf }
 0x497   : > { %v2336_v45 = vpop.f32.mrf.mxu0 }
 0x498   : > { %v4893_v9 = vadd.f32 %v2947_v4, %v2336_v45 }
 0x499   : > { %v2364_v24 = vpop.f32.mrf.mxu3 }
 0x49a   : > { %v2344_v38 = vpop.f32.mrf.mxu1  ;;  %v4891_v23 = vadd.f32 %v2947_v4, %v2364_v24  ;;  %v2379_v56 = vsel %vm2369_vm3, %v4893_v9, -inf }
 0x49b   : > { %v4887_v33 = vadd.f32 %v2947_v4, %v2344_v38  ;;  %2404 = vmax.xlane.f32.xlu0 %v2403_v1 }
 0x49c   : > { %v2412_v6 = vsel %vm2369_vm3, %v4891_v23, -inf }
 0x49d   : > { %v2388_v8 = vsel %vm2369_vm3, %v4887_v33, -inf }
 0x49e   : > { %2389 = vmax.xlane.f32.xlu1 %v2388_v8 }
 0x4a1   : > { %v2366_v29 = vpop.f32.mrf.mxu3 }
 0x4a2   : > { %v2346_v36 = vpop.f32.mrf.mxu1  ;;  %v4905_v31 = vadd.f32 %v2947_v4, %v2366_v29 }
 0x4a3   : > { %v4897_v14 = vadd.f32 %v2947_v4, %v2346_v36  ;;  %2413 = vmax.xlane.f32.xlu0 %v2412_v6 }
 0x4a4   : > { %v2415_v13 = vsel %vm2369_vm3, %v4905_v31, -inf }
 0x4a5   : > { %v2391_v62 = vsel %vm2369_vm3, %v4897_v14, -inf }
 0x4a6   : > { %2392 = vmax.xlane.f32.xlu2 %v2391_v62  ;;  %2380 = vmax.xlane.f32.xlu1 %v2379_v56 }
 0x4ae   : > { %2410 = vmax.xlane.f32.xlu2 %v2409_v32  ;;  %2416 = vmax.xlane.f32.xlu1 %v2415_v13 }
 0x4e4   : > { %v2396_v20 = vpop.xlane.xlu0 %2395 }
 0x4e5   : > { %v4912_v59 = vsub.f32 %v4847_v34, %v2396_v20 }
 0x4e7   : > { %v2450_v19 = vmul.f32 1.442695, %v4912_v59 }
 0x4e9   : > { %3044 = vpow2.f32 %v2450_v19  ;;  %v2384_v54 = vpop.xlane.xlu2 %2383 }
 0x4ea   : > { %v4916_v27 = vsub.f32 %v4851_v63, %v2384_v54 }
 0x4ec   : > { %v2442_v47 = vmul.f32 1.442695, %v4916_v27 }
 0x4ee   : > { %3046 = vpow2.f32 %v2442_v47 }
 0x4ef   : > { %v3045_v50 = vpop.eup %3044 }
 0x4f0   : > { %v2490_v58 = vsel %vm2369_vm3, %v3045_v50, 0.0 }
 0x4f1   : > { %v2387_v57 = vpop.xlane.xlu0 %2386  ;;  %2491 = vadd.xlane.f32.xlu1 %v2490_v58 }
 0x4f2   : > { %v4921_v10 = vsub.f32 %v4855_v11, %v2387_v57 }
 0x4f4   : > { %v3047_v2 = vpop.eup %3046  ;;  %v2444_v40 = vmul.f32 1.442695, %v4921_v10 }
 0x4f5   : > { %v2478_v52 = vsel %vm2369_vm3, %v3047_v2, 0.0 }
 0x4f6   : > { %3048 = vpow2.f32 %v2444_v40  ;;  %v2372_v39 = vpop.xlane.xlu1 %2371  ;;  %2479 = vadd.xlane.f32.xlu0 %v2478_v52 }
 0x4f7   : > { %v4926_v12 = vsub.f32 %v4859_v0, %v2372_v39 }
 0x4f9   : > { %v2434_v4 = vmul.f32 1.442695, %v4926_v12 }
 0x4fb   : > { %3050 = vpow2.f32 %v2434_v4 }
 0x4fc   : > { %v3049_v5 = vpop.eup %3048 }
 0x4fd   : > { %v2481_v34 = vsel %vm2369_vm3, %v3049_v5, 0.0 }
 0x4fe   : > { %v2408_v46 = vpop.xlane.xlu1 %2407  ;;  %v2375_v15 = vpop.xlane.xlu2 %2374  ;;  %2482 = vadd.xlane.f32.xlu1 %v2481_v34 }
 0x4ff   : > { %v4931_v63 = vsub.f32 %v4863_v3, %v2408_v46  ;;  %v4934_v51 = vsub.f32 %v4865_v42, %v2375_v15 }
 0x501   : > { %v3051_v49 = vpop.eup %3050  ;;  %v2458_v11 = vmul.f32 1.442695, %v4931_v63  ;;  %v2436_v17 = vmul.f32 1.442695, %v4934_v51 }
 0x502   : > { %v2466_v28 = vsel %vm2369_vm3, %v3051_v49, 0.0 }
 0x503   : > { %3052 = vpow2.f32 %v2458_v11  ;;  %2467 = vadd.xlane.f32.xlu2 %v2466_v28 }
 0x504   : > { %3054 = vpow2.f32 %v2436_v17 }
 0x506   : > { %v2378_v0 = vpop.xlane.xlu0 %2377  ;;  %v2399_v7 = vpop.xlane.xlu1 %2398 }
 0x507   : > { %v4940_v43 = vsub.f32 %v4875_v26, %v2378_v0  ;;  %v4943_v53 = vsub.f32 %v4871_v30, %v2399_v7  ;;  %v2402_v3 = vpop.xlane.xlu2 %2401 }
 0x508   : > { %v4946_v21 = vsub.f32 %v4873_v44, %v2402_v3 }
 0x509   : > { %v3053_v42 = vpop.eup %3052  ;;  %v2438_v60 = vmul.f32 1.442695, %v4940_v43  ;;  %v2452_v35 = vmul.f32 1.442695, %v4943_v53 }
 0x50a   : > { %v3055_v61 = vpop.eup %3054  ;;  %v2454_v16 = vmul.f32 1.442695, %v4946_v21  ;;  %v2502_v55 = vsel %vm2369_vm3, %v3053_v42, 0.0 }
 0x50b   : > { %3056 = vpow2.f32 %v2438_v60  ;;  %2503 = vadd.xlane.f32.xlu2 %v2502_v55  ;;  %v2469_v26 = vsel %vm2369_vm3, %v3055_v61, 0.0 }
 0x50c   : > { %3058 = vpow2.f32 %v2452_v35  ;;  %2470 = vadd.xlane.f32.xlu0 %v2469_v26 }
 0x50d   : > { %3060 = vpow2.f32 %v2454_v16 }
 0x50e   : > { %v2405_v30 = vpop.xlane.xlu0 %2404 }
 0x50f   : > { %v4954_v44 = vsub.f32 %v4883_v48, %v2405_v30 }
 0x511   : > { %v3057_v18 = vpop.eup %3056  ;;  %v2456_v41 = vmul.f32 1.442695, %v4954_v44  ;;  %v2390_v25 = vpop.xlane.xlu1 %2389 }
 0x512   : > { %v3059_v37 = vpop.eup %3058  ;;  %v4958_v38 = vsub.f32 %v4887_v33, %v2390_v25  ;;  %v2472_v1 = vsel %vm2369_vm3, %v3057_v18, 0.0 }
 0x513   : > { %v3061_v24 = vpop.eup %3060  ;;  %3062 = vpow2.f32 %v2456_v41  ;;  %v2493_v8 = vsel %vm2369_vm3, %v3059_v37, 0.0  ;;  %2473 = vadd.xlane.f32.xlu1 %v2472_v1 }
 0x514   : > { %v2446_v45 = vmul.f32 1.442695, %v4958_v38  ;;  %2494 = vadd.xlane.f32.xlu2 %v2493_v8  ;;  %v2496_v48 = vsel %vm2369_vm3, %v3061_v24, 0.0 }
 0x515   : > { %2497 = vadd.xlane.f32.xlu0 %v2496_v48 }
 0x516   : > { %3064 = vpow2.f32 %v2446_v45  ;;  %v2414_v36 = vpop.xlane.xlu0 %2413 }
 0x517   : > { %v4965_v6 = vsub.f32 %v4891_v23, %v2414_v36 }
 0x519   : > { %v3063_v33 = vpop.eup %3062  ;;  %v2462_v62 = vmul.f32 1.442695, %v4965_v6  ;;  %v2381_v56 = vpop.xlane.xlu1 %2380 }
 0x51a   : > { %v2393_v29 = vpop.xlane.xlu2 %2392  ;;  %v4969_v32 = vsub.f32 %v4893_v9, %v2381_v56  ;;  %v2499_v20 = vsel %vm2369_vm3, %v3063_v33, 0.0 }
 0x51b   : > { %v4972_v13 = vsub.f32 %v4897_v14, %v2393_v29  ;;  %3066 = vpow2.f32 %v2462_v62  ;;  %2500 = vadd.xlane.f32.xlu1 %v2499_v20 }
 0x51c   : > { %v3065_v19 = vpop.eup %3064  ;;  %v2440_v54 = vmul.f32 1.442695, %v4969_v32 }
 0x51d   : > { %v2448_v23 = vmul.f32 1.442695, %v4972_v13  ;;  %v2484_v47 = vsel %vm2369_vm3, %v3065_v19, 0.0 }
 0x51e   : > { %3068 = vpow2.f32 %v2440_v54  ;;  %2485 = vadd.xlane.f32.xlu2 %v2484_v47 }
 0x51f   : > { %3070 = vpow2.f32 %v2448_v23 }
 0x521   : > { %v3067_v50 = vpop.eup %3066  ;;  %v2417_v9 = vpop.xlane.xlu1 %2416 }
 0x522   : > { %v2411_v58 = vpop.xlane.xlu2 %2410  ;;  %v4979_v14 = vsub.f32 %v4905_v31, %v2417_v9  ;;  %v2508_v2 = vsel %vm2369_vm3, %v3067_v50, 0.0 }
 0x523   : > { %v4982_v57 = vsub.f32 %v4903_v22, %v2411_v58  ;;  %2509 = vadd.xlane.f32.xlu1 %v2508_v2 }
 0x524   : > { %v3069_v40 = vpop.eup %3068  ;;  %v2464_v52 = vmul.f32 1.442695, %v4979_v14 }
 0x525   : > { %v2460_v39 = vmul.f32 1.442695, %v4982_v57  ;;  %v3071_v4 = vpop.eup %3070  ;;  %v2475_v5 = vsel %vm2369_vm3, %v3069_v40, 0.0 }
 0x526   : > { %3072 = vpow2.f32 %v2464_v52  ;;  %2476 = vadd.xlane.f32.xlu2 %v2475_v5  ;;  %v2487_v34 = vsel %vm2369_vm3, %v3071_v4, 0.0 }
 0x527   : > { %3074 = vpow2.f32 %v2460_v39  ;;  %2488 = vadd.xlane.f32.xlu0 %v2487_v34 }
 0x52c   : > { %v3073_v22 = vpop.eup %3072 }
 0x52d   : > { %v3075_v31 = vpop.eup %3074  ;;  %v2511_v46 = vsel %vm2369_vm3, %v3073_v22, 0.0 }
 0x52e   : > { %2512 = vadd.xlane.f32.xlu2 %v2511_v46  ;;  %v2505_v15 = vsel %vm2369_vm3, %v3075_v31, 0.0 }
 0x52f   : > { %2506 = vadd.xlane.f32.xlu0 %v2505_v15 }
 0x564   : > { %v2492_v49 = vpop.xlane.xlu1 %2491 }
 0x565   : > { %3076 = vlog2.f32 %v2492_v49 }
 0x569   : > { %v2480_v11 = vpop.xlane.xlu0 %2479 }
 0x56a   : > { %3078 = vlog2.f32 %v2480_v11 }
 0x56b   : > { %v3077_v17 = vpop.eup %3076 }
 0x56c   : > { %v2531_v28 = vmul.f32 0.6931472, %v3077_v17 }
 0x56e   : > { %v2554_v0 = vsub.f32 %v4912_v59, %v2531_v28 }
 0x570   : > { %v3079_v7 = vpop.eup %3078  ;;  %2570 = vst.msk [vmem:[%s3284_s18 + $0x40] sm:$0xff] %vm2369_vm3, %v2554_v0 }
 0x571   : > { %v2523_v3 = vmul.f32 0.6931472, %v3079_v7  ;;  %v2483_v42 = vpop.xlane.xlu1 %2482 }
 0x572   : > { %3080 = vlog2.f32 %v2483_v42 }
 0x573   : > { %v2550_v60 = vsub.f32 %v4916_v27, %v2523_v3 }
 0x575   : > { %2566 = vst.msk [vmem:[%s3284_s18 + $0x20] sm:$0xff] %vm2369_vm3, %v2550_v60 }
 0x576   : > { %v2468_v35 = vpop.xlane.xlu2 %2467 }
 0x577   : > { %3082 = vlog2.f32 %v2468_v35 }
 0x578   : > { %v3081_v61 = vpop.eup %3080 }
 0x579   : > { %v2525_v16 = vmul.f32 0.6931472, %v3081_v61 }
 0x57b   : > { %v2551_v55 = vsub.f32 %v4921_v10, %v2525_v16 }
 0x57d   : > { %v3083_v26 = vpop.eup %3082  ;;  %2567 = vst.msk [vmem:[%s3284_s18 + $0x28] sm:$0xff] %vm2369_vm3, %v2551_v55 }
 0x57e   : > { %v2515_v59 = vmul.f32 0.6931472, %v3083_v26  ;;  %v2504_v30 = vpop.xlane.xlu2 %2503 }
 0x57f   : > { %v2471_v18 = vpop.xlane.xlu0 %2470  ;;  %3084 = vlog2.f32 %v2504_v30 }
 0x580   : > { %v2546_v41 = vsub.f32 %v4926_v12, %v2515_v59  ;;  %3086 = vlog2.f32 %v2471_v18 }
 0x582   : > { %2562 = vst.msk [vmem:[%s3284_s18] sm:$0xff] %vm2369_vm3, %v2546_v41 }
 0x585   : > { %v3085_v27 = vpop.eup %3084 }
 0x586   : > { %v3087_v25 = vpop.eup %3086  ;;  %v2539_v37 = vmul.f32 0.6931472, %v3085_v27  ;;  %v2474_v1 = vpop.xlane.xlu1 %2473 }
 0x587   : > { %v2517_v24 = vmul.f32 0.6931472, %v3087_v25  ;;  %3088 = vlog2.f32 %v2474_v1  ;;  %v2495_v10 = vpop.xlane.xlu2 %2494 }
 0x588   : > { %v2558_v8 = vsub.f32 %v4931_v63, %v2539_v37  ;;  %v2498_v45 = vpop.xlane.xlu0 %2497  ;;  %3090 = vlog2.f32 %v2495_v10 }
 0x589   : > { %v2547_v48 = vsub.f32 %v4934_v51, %v2517_v24  ;;  %3092 = vlog2.f32 %v2498_v45 }
 0x58a   : > { %2574 = vst.msk [vmem:[%s3284_s18 + $0x60] sm:$0xff] %vm2369_vm3, %v2558_v8 }
 0x58b   : > { %2563 = vst.msk [vmem:[%s3284_s18 + $0x8] sm:$0xff] %vm2369_vm3, %v2547_v48 }
 0x58d   : > { %v3089_v12 = vpop.eup %3088 }
 0x58e   : > { %v3091_v36 = vpop.eup %3090  ;;  %v2519_v33 = vmul.f32 0.6931472, %v3089_v12  ;;  %v2501_v62 = vpop.xlane.xlu1 %2500 }
 0x58f   : > { %v3093_v56 = vpop.eup %3092  ;;  %v2533_v29 = vmul.f32 0.6931472, %v3091_v36  ;;  %3094 = vlog2.f32 %v2501_v62 }
 0x590   : > { %v2548_v63 = vsub.f32 %v4940_v43, %v2519_v33  ;;  %v2535_v20 = vmul.f32 0.6931472, %v3093_v56 }
 0x591   : > { %v2555_v51 = vsub.f32 %v4943_v53, %v2533_v29  ;;  %v2486_v19 = vpop.xlane.xlu2 %2485 }
 0x592   : > { %2564 = vst.msk [vmem:[%s3284_s18 + $0x10] sm:$0xff] %vm2369_vm3, %v2548_v63  ;;  %v2556_v54 = vsub.f32 %v4946_v21, %v2535_v20  ;;  %3096 = vlog2.f32 %v2486_v19 }
 0x593   : > { %2571 = vst.msk [vmem:[%s3284_s18 + $0x48] sm:$0xff] %vm2369_vm3, %v2555_v51 }
 0x594   : > { %2572 = vst.msk [vmem:[%s3284_s18 + $0x50] sm:$0xff] %vm2369_vm3, %v2556_v54 }
 0x595   : > { %v3095_v23 = vpop.eup %3094 }
 0x596   : > { %v2537_v47 = vmul.f32 0.6931472, %v3095_v23  ;;  %v2510_v50 = vpop.xlane.xlu1 %2509 }
 0x597   : > { %3098 = vlog2.f32 %v2510_v50 }
 0x598   : > { %v3097_v43 = vpop.eup %3096  ;;  %v2557_v9 = vsub.f32 %v4954_v44, %v2537_v47 }
 0x599   : > { %v2527_v53 = vmul.f32 0.6931472, %v3097_v43  ;;  %v2477_v58 = vpop.xlane.xlu2 %2476 }
 0x59a   : > { %2573 = vst.msk [vmem:[%s3284_s18 + $0x58] sm:$0xff] %vm2369_vm3, %v2557_v9  ;;  %v2489_v2 = vpop.xlane.xlu0 %2488  ;;  %3100 = vlog2.f32 %v2477_v58 }
 0x59b   : > { %v2552_v21 = vsub.f32 %v4958_v38, %v2527_v53  ;;  %3102 = vlog2.f32 %v2489_v2 }
 0x59d   : > { %v3099_v40 = vpop.eup %3098  ;;  %2568 = vst.msk [vmem:[%s3284_s18 + $0x30] sm:$0xff] %vm2369_vm3, %v2552_v21 }
 0x59e   : > { %v2543_v52 = vmul.f32 0.6931472, %v3099_v40 }
 0x5a0   : > { %v3101_v39 = vpop.eup %3100  ;;  %v2560_v4 = vsub.f32 %v4965_v6, %v2543_v52 }
 0x5a1   : > { %v3103_v44 = vpop.eup %3102  ;;  %v2521_v5 = vmul.f32 0.6931472, %v3101_v39  ;;  %v2513_v34 = vpop.xlane.xlu2 %2512 }
 0x5a2   : > { %2576 = vst.msk [vmem:[%s3284_s18 + $0x70] sm:$0xff] %vm2369_vm3, %v2560_v4  ;;  %v2529_v22 = vmul.f32 0.6931472, %v3103_v44  ;;  %v2507_v31 = vpop.xlane.xlu0 %2506  ;;  %3104 = vlog2.f32 %v2513_v34 }
 0x5a3   : > { %v2549_v38 = vsub.f32 %v4969_v32, %v2521_v5  ;;  %3106 = vlog2.f32 %v2507_v31 }
 0x5a4   : > { %v2553_v46 = vsub.f32 %v4972_v13, %v2529_v22 }
 0x5a5   : > { %2565 = vst.msk [vmem:[%s3284_s18 + $0x18] sm:$0xff] %vm2369_vm3, %v2549_v38 }
 0x5a6   : > { %2569 = vst.msk [vmem:[%s3284_s18 + $0x38] sm:$0xff] %vm2369_vm3, %v2553_v46 }
 0x5a8   : > { %v3105_v6 = vpop.eup %3104 }
 0x5a9   : > { %v3107_v15 = vpop.eup %3106  ;;  %v2545_v49 = vmul.f32 0.6931472, %v3105_v6 }
 0x5aa   : > { %v2541_v11 = vmul.f32 0.6931472, %v3107_v15 }
 0x5ab   : > { %v2561_v17 = vsub.f32 %v4979_v14, %v2545_v49 }
 0x5ac   : > { %v2559_v28 = vsub.f32 %v4982_v57, %v2541_v11 }
 0x5ad   : > { %2577 = vst.msk [vmem:[%s3284_s18 + $0x78] sm:$0xff] %vm2369_vm3, %v2561_v17 }
 0x5ae   : > { %2575 = vst.msk [vmem:[%s3284_s18 + $0x68] sm:$0xff] %vm2369_vm3, %v2559_v28 }
 0x5af PF: > { %s16_s27 = sadd.s32 1, %s3162_s27   ;;  %s5195_s21 = smov %s3142_s22 }
 0x5b0   : > { %p13_p1 = scmp.ge.s32.totalorder %s16_s27, 6   ;;  %s5196_s22 = smov %s3254_s10 }
 0x5b1   : > { %s5197_s23 = smov %s3154_s25  ;;  %s5198_s24 = smov %s3158_s26 }
 0x5b2   : > { %s5199_s25 = smov %s5202_s28  ;;  %s5200_s26 = smov %s5206_s29 }
 0x5b3   :  { %15 = sbr.rel (!%p13_p1) target bundleno = 6 (0x6), region = 134 }

// kernel: gat_forward.5
= control target key start
LH: loop header
LB: loop body
LE: loop exit
PB: predicated region body
PF: predicated region fallthrough
CT: control target
= control target key end

     0   :  { %s6225_s0 = inlined_call_operand.vmem [shape: f32[256,2], index: 0, kind: input, shape index: {}]   ;;  %s6226_s1 = inlined_call_operand.vmem [shape: f32[2,256], index: 1, kind: input, shape index: {}]   ;;  %s6227_s2 = inlined_call_operand.vmem [shape: s8[256,256], index: 2, kind: input, shape index: {}]   ;;  %s6228_s3 = inlined_call_operand.vmem [shape: bf16[256,128], index: 3, kind: input, shape index: {}]   ;;  %s6229_s4 = inlined_call_operand.vmem [shape: bf16[256,128], index: 4, kind: output, shape index: {}]  }
   0x1   :  { %6313 = sst [smem:[#allocation47_spill]] %s6227_s2 }
   0x2   :  { %s3927_s15 = smov 0   ;;  %s3929_s16 = smov 0  }
   0x3   :  { %s3931_s17 = smov 0   ;;  %s3933_s18 = smov 0  }
   0x4   :  { %s3935_s19 = smov 0   ;;  %s3937_s20 = smov 0  }
   0x5   :  { %s3939_s21 = smov 0  }
   0x6 LB: > { %s23_s22 = sadd.s32 1, %s3885_s19  ;;  %s26_s23 = sadd.s32 1, %s3889_s20  ;;  %s3893_s21 = sphi %s3939_s21, %s14_s21   ;;  %s3889_s20 = sphi %s3937_s20, %s6699_s20   ;;  %s3885_s19 = sphi %s3935_s19, %s6698_s19   ;;  %s3881_s18 = sphi %s3933_s18, %s6697_s18   ;;  %s3877_s17 = sphi %s3931_s17, %s6696_s17   ;;  %s3873_s16 = sphi %s3929_s16, %s6695_s16   ;;  %s3869_s15 = sphi %s3927_s15, %s6694_s15  }
   0x7   : > { %p24_p0 = scmp.ge.s32.totalorder %s23_s22, 2  ;;  %p94_p1 = scmp.ne.s32.totalorder %s3873_s16, %s3869_s15 }
   0x8   : > { %p95_p2 = scmp.eq.s32.totalorder %s3893_s21, 0  ;;  %s87_s27 = sadd.s32 1, %s3873_s16 }
   0x9   : > { %s6701_s22 = smov (%p24_p0, %s23_s22), 0  ;;  %s6703_s23 = smov (!%p24_p0, %s26_s23), %s3889_s20 }
   0xa   : > { %p96_p3 = por %p95_p2, %p94_p1  ;;  %p28_p4 = scmp.ge.s32.totalorder %s6703_s23, 2 }
   0xb   : > { %s83_s24 = ssub.s32 %s3885_s19, %s6701_s22  ;;  %p3266_p6 = scmp.ge.s32.totalorder %s3893_s21, 4 }
   0xc   : > { %s6705_s23 = smov (%p28_p4, %s6703_s23), 0 }
   0xd   : > { %s82_s25 = ssub.s32 %s3889_s20, %s6705_s23  ;;  %172 = sbr.rel (%p3266_p6) target bundleno = 32 (0x20), region = 16 }
   0xe   : > { %s84_s26 = sor.u32 %s83_s24, %s82_s25 }
   0xf   : > { %p85_p5 = scmp.eq.s32.totalorder %s84_s26, 0 }
  0x11   : > { %s3978_s28 = scalar_select %p85_p5, %s3873_s16, %s87_s27  }
  0x12   : > { %191 = sbr.rel (!%p96_p3) target bundleno = 32 (0x20), region = 28  ;;  %s193_s29 = sand.u32 (%p96_p3), 1, %s3873_s16  }
  0x13   : > { %s3396_s30 = sshll.u32 (%p96_p3), %s3889_s20, 3  ;;  %s3267_s5 = sshll.u32 (%p96_p3), %s193_s29, 5 }
  0x14   : > { %s198_s6 = sadd.s32 (%p96_p3), %s3885_s19, %s3396_s30  ;;  %s6314_s2 = sld [smem:[#allocation47_spill]] (%p96_p3) }
  0x15   : > { %s3270_s7 = sshll.u32 (%p96_p3), %s198_s6, 3  ;;  %s195_s11 = scalar_lea.vmem (%p96_p3), [#allocation5], %s3267_s5 }
  0x1a   : > { %s200_s10 = scalar_lea.vmem %s6314_s2, %s3270_s7 }
  0x1b   : > { %v235_v0 = vld [vmem:[%s200_s10] sm:$0xff]  ;;  %v237_v1 = vld [vmem:[%s200_s10 + $0x10] sm:$0xff] }
  0x1c   : > { %v239_v2 = vld [vmem:[%s200_s10 + $0x20] sm:$0xff]  ;;  %236 = vst [vmem:[%s195_s11] sm:$0xff] %v235_v0  ;;  %v241_v3 = vld [vmem:[%s200_s10 + $0x30] sm:$0xff] }
  0x1d   : > { %238 = vst [vmem:[%s195_s11 + $0x8] sm:$0xff] %v237_v1 }
  0x1e   : > { %240 = vst [vmem:[%s195_s11 + $0x10] sm:$0xff] %v239_v2 }
  0x1f   : > { %242 = vst [vmem:[%s195_s11 + $0x18] sm:$0xff] %v241_v3 }
  0x20 PF: > { %p3271_p7 = scmp.ge.s32.totalorder %s3893_s21, 1  ;;  %p256_p8 = scmp.lt.s32.totalorder %s3893_s21, 5 }
  0x22   : > { %p257_p9 = pnand %p3271_p7, %p256_p8 }
  0x24   : > { %260 = sbr.rel (%p257_p9) target bundleno = 1390 (0x56e), region = 70 }
  0x29   : > { %s263_s12 = sand.u32 1, %s3869_s15   ;;  %s3273_s13 = sshll.u32 %s3881_s18, 4 }
  0x2a   : > { %s3272_s14 = sshll.u32 %s263_s12, 5  ;;  %p303_p10 = scmp.lt.s32.totalorder %s3273_s13, 31 }
  0x2b   : > { %p308_p11 = scmp.lt.s32.totalorder %s3877_s17, 1  ;;  %s3276_s26 = sshll.u32 %s3877_s17, 4 }
  0x2c   : > { %s6707_s13 = smov (!%p303_p10, %s3273_s13), 31  ;;  %p314_p12 = scmp.lt.s32.totalorder %s3276_s26, 31 }
  0x2d   : > { %s309_s24 = scalar_select %p308_p11, %s3877_s17, 1 }
  0x2e   : > { %s3274_s25 = sshll.u32 %s6707_s13, 3  ;;  %s3279_s15 = sshll.u32 %s6707_s13, 2 }
  0x2f   : > { %s3997_s30 = scalar_lea.vmem %s6225_s0, %s3274_s25  ;;  %s3275_s5 = sshll.u32 %s309_s24, 1 }
  0x30   : > { %s4002_s8 = scalar_lea.vmem %s6226_s1, %s3275_s5  ;;  %s6709_s26 = smov (!%p314_p12, %s3276_s26), 31 }
  0x31   : > { %s4007_s10 = scalar_lea.vmem %s6229_s4, %s3279_s15  ;;  %s3277_s11 = sshll.u32 %s6709_s26, 2 }
  0x32   : > { %s4012_s25 = scalar_lea.vmem %s6228_s3, %s3277_s11  ;;  %s4014_s24 = scalar_lea.vmem [#allocation5], %s3272_s14 }
  0x33   : > { %p3280_p13 = scmp.ne.s32.totalorder %s3877_s17, 0 }
  0x35   : > { %330 = sbr.rel (%p3280_p13) target bundleno = 155 (0x9b), region = 78 }
  0x3a   : > { %vm331_vm0 = vcmask 7168   ;;  %v3895_v4 = vmov -1e+30   ;;  %v3896_v5 = vmov 0.0   ;;  %vm396_vm1 = vcmask 523264  }
  0x3b   : > { %332 = vst.msk [vmem:[#allocation2] sm:$0xff] %vm331_vm0, %v3895_v4 }
  0x3c   : > { %333 = vst.msk [vmem:[#allocation2 + $0x8] sm:$0xff] %vm331_vm0, %v3895_v4 }
  0x3d   : > { %334 = vst.msk [vmem:[#allocation2 + $0x10] sm:$0xff] %vm331_vm0, %v3895_v4 }
  0x3e   : > { %335 = vst.msk [vmem:[#allocation2 + $0x18] sm:$0xff] %vm331_vm0, %v3895_v4 }
  0x3f   : > { %336 = vst.msk [vmem:[#allocation2 + $0x20] sm:$0xff] %vm331_vm0, %v3895_v4 }
  0x40   : > { %337 = vst.msk [vmem:[#allocation2 + $0x28] sm:$0xff] %vm331_vm0, %v3895_v4 }
  0x41   : > { %338 = vst.msk [vmem:[#allocation2 + $0x30] sm:$0xff] %vm331_vm0, %v3895_v4 }
  0x42   : > { %339 = vst.msk [vmem:[#allocation2 + $0x38] sm:$0xff] %vm331_vm0, %v3895_v4 }
  0x43   : > { %340 = vst.msk [vmem:[#allocation2 + $0x40] sm:$0xff] %vm331_vm0, %v3895_v4 }
  0x44   : > { %341 = vst.msk [vmem:[#allocation2 + $0x48] sm:$0xff] %vm331_vm0, %v3895_v4 }
  0x45   : > { %342 = vst.msk [vmem:[#allocation2 + $0x50] sm:$0xff] %vm331_vm0, %v3895_v4 }
  0x46   : > { %343 = vst.msk [vmem:[#allocation2 + $0x58] sm:$0xff] %vm331_vm0, %v3895_v4 }
  0x47   : > { %344 = vst.msk [vmem:[#allocation2 + $0x60] sm:$0xff] %vm331_vm0, %v3895_v4 }
  0x48   : > { %345 = vst.msk [vmem:[#allocation2 + $0x68] sm:$0xff] %vm331_vm0, %v3895_v4 }
  0x49   : > { %346 = vst.msk [vmem:[#allocation2 + $0x70] sm:$0xff] %vm331_vm0, %v3895_v4 }
  0x4a   : > { %347 = vst.msk [vmem:[#allocation2 + $0x78] sm:$0xff] %vm331_vm0, %v3895_v4 }
  0x4b   : > { %348 = vst.msk [vmem:[#allocation2 + $0x80] sm:$0xff] %vm331_vm0, %v3895_v4 }
  0x4c   : > { %349 = vst.msk [vmem:[#allocation2 + $0x88] sm:$0xff] %vm331_vm0, %v3895_v4 }
  0x4d   : > { %350 = vst.msk [vmem:[#allocation2 + $0x90] sm:$0xff] %vm331_vm0, %v3895_v4 }
  0x4e   : > { %351 = vst.msk [vmem:[#allocation2 + $0x98] sm:$0xff] %vm331_vm0, %v3895_v4 }
  0x4f   : > { %352 = vst.msk [vmem:[#allocation2 + $0xa0] sm:$0xff] %vm331_vm0, %v3895_v4 }
  0x50   : > { %353 = vst.msk [vmem:[#allocation2 + $0xa8] sm:$0xff] %vm331_vm0, %v3895_v4 }
  0x51   : > { %354 = vst.msk [vmem:[#allocation2 + $0xb0] sm:$0xff] %vm331_vm0, %v3895_v4 }
  0x52   : > { %355 = vst.msk [vmem:[#allocation2 + $0xb8] sm:$0xff] %vm331_vm0, %v3895_v4 }
  0x53   : > { %356 = vst.msk [vmem:[#allocation2 + $0xc0] sm:$0xff] %vm331_vm0, %v3895_v4 }
  0x54   : > { %357 = vst.msk [vmem:[#allocation2 + $0xc8] sm:$0xff] %vm331_vm0, %v3895_v4 }
  0x55   : > { %358 = vst.msk [vmem:[#allocation2 + $0xd0] sm:$0xff] %vm331_vm0, %v3895_v4 }
  0x56   : > { %359 = vst.msk [vmem:[#allocation2 + $0xd8] sm:$0xff] %vm331_vm0, %v3895_v4 }
  0x57   : > { %360 = vst.msk [vmem:[#allocation2 + $0xe0] sm:$0xff] %vm331_vm0, %v3895_v4 }
  0x58   : > { %361 = vst.msk [vmem:[#allocation2 + $0xe8] sm:$0xff] %vm331_vm0, %v3895_v4 }
  0x59   : > { %362 = vst.msk [vmem:[#allocation2 + $0xf0] sm:$0xff] %vm331_vm0, %v3895_v4 }
  0x5a   : > { %363 = vst.msk [vmem:[#allocation2 + $0xf8] sm:$0xff] %vm331_vm0, %v3895_v4 }
  0x5b   : > { %364 = vst.msk [vmem:[#allocation3] sm:$0xff] %vm331_vm0, %v3896_v5 }
  0x5c   : > { %365 = vst.msk [vmem:[#allocation3 + $0x8] sm:$0xff] %vm331_vm0, %v3896_v5 }
  0x5d   : > { %366 = vst.msk [vmem:[#allocation3 + $0x10] sm:$0xff] %vm331_vm0, %v3896_v5 }
  0x5e   : > { %367 = vst.msk [vmem:[#allocation3 + $0x18] sm:$0xff] %vm331_vm0, %v3896_v5 }
  0x5f   : > { %368 = vst.msk [vmem:[#allocation3 + $0x20] sm:$0xff] %vm331_vm0, %v3896_v5 }
  0x60   : > { %369 = vst.msk [vmem:[#allocation3 + $0x28] sm:$0xff] %vm331_vm0, %v3896_v5 }
  0x61   : > { %370 = vst.msk [vmem:[#allocation3 + $0x30] sm:$0xff] %vm331_vm0, %v3896_v5 }
  0x62   : > { %371 = vst.msk [vmem:[#allocation3 + $0x38] sm:$0xff] %vm331_vm0, %v3896_v5 }
  0x63   : > { %372 = vst.msk [vmem:[#allocation3 + $0x40] sm:$0xff] %vm331_vm0, %v3896_v5 }
  0x64   : > { %373 = vst.msk [vmem:[#allocation3 + $0x48] sm:$0xff] %vm331_vm0, %v3896_v5 }
  0x65   : > { %374 = vst.msk [vmem:[#allocation3 + $0x50] sm:$0xff] %vm331_vm0, %v3896_v5 }
  0x66   : > { %375 = vst.msk [vmem:[#allocation3 + $0x58] sm:$0xff] %vm331_vm0, %v3896_v5 }
  0x67   : > { %376 = vst.msk [vmem:[#allocation3 + $0x60] sm:$0xff] %vm331_vm0, %v3896_v5 }
  0x68   : > { %377 = vst.msk [vmem:[#allocation3 + $0x68] sm:$0xff] %vm331_vm0, %v3896_v5 }
  0x69   : > { %378 = vst.msk [vmem:[#allocation3 + $0x70] sm:$0xff] %vm331_vm0, %v3896_v5 }
  0x6a   : > { %379 = vst.msk [vmem:[#allocation3 + $0x78] sm:$0xff] %vm331_vm0, %v3896_v5 }
  0x6b   : > { %380 = vst.msk [vmem:[#allocation3 + $0x80] sm:$0xff] %vm331_vm0, %v3896_v5 }
  0x6c   : > { %381 = vst.msk [vmem:[#allocation3 + $0x88] sm:$0xff] %vm331_vm0, %v3896_v5 }
  0x6d   : > { %382 = vst.msk [vmem:[#allocation3 + $0x90] sm:$0xff] %vm331_vm0, %v3896_v5 }
  0x6e   : > { %383 = vst.msk [vmem:[#allocation3 + $0x98] sm:$0xff] %vm331_vm0, %v3896_v5 }
  0x6f   : > { %384 = vst.msk [vmem:[#allocation3 + $0xa0] sm:$0xff] %vm331_vm0, %v3896_v5 }
  0x70   : > { %385 = vst.msk [vmem:[#allocation3 + $0xa8] sm:$0xff] %vm331_vm0, %v3896_v5 }
  0x71   : > { %386 = vst.msk [vmem:[#allocation3 + $0xb0] sm:$0xff] %vm331_vm0, %v3896_v5 }
  0x72   : > { %387 = vst.msk [vmem:[#allocation3 + $0xb8] sm:$0xff] %vm331_vm0, %v3896_v5 }
  0x73   : > { %388 = vst.msk [vmem:[#allocation3 + $0xc0] sm:$0xff] %vm331_vm0, %v3896_v5 }
  0x74   : > { %389 = vst.msk [vmem:[#allocation3 + $0xc8] sm:$0xff] %vm331_vm0, %v3896_v5 }
  0x75   : > { %390 = vst.msk [vmem:[#allocation3 + $0xd0] sm:$0xff] %vm331_vm0, %v3896_v5 }
  0x76   : > { %391 = vst.msk [vmem:[#allocation3 + $0xd8] sm:$0xff] %vm331_vm0, %v3896_v5 }
  0x77   : > { %392 = vst.msk [vmem:[#allocation3 + $0xe0] sm:$0xff] %vm331_vm0, %v3896_v5 }
  0x78   : > { %393 = vst.msk [vmem:[#allocation3 + $0xe8] sm:$0xff] %vm331_vm0, %v3896_v5 }
  0x79   : > { %394 = vst.msk [vmem:[#allocation3 + $0xf0] sm:$0xff] %vm331_vm0, %v3896_v5 }
  0x7a   : > { %395 = vst.msk [vmem:[#allocation3 + $0xf8] sm:$0xff] %vm331_vm0, %v3896_v5 }
  0x7b   : > { %397 = vst.msk [vmem:[#allocation4] sm:$0xff] %vm396_vm1, %v3896_v5 }
  0x7c   : > { %398 = vst.msk [vmem:[#allocation4 + $0x8] sm:$0xff] %vm396_vm1, %v3896_v5 }
  0x7d   : > { %399 = vst.msk [vmem:[#allocation4 + $0x10] sm:$0xff] %vm396_vm1, %v3896_v5 }
  0x7e   : > { %400 = vst.msk [vmem:[#allocation4 + $0x18] sm:$0xff] %vm396_vm1, %v3896_v5 }
  0x7f   : > { %401 = vst.msk [vmem:[#allocation4 + $0x20] sm:$0xff] %vm396_vm1, %v3896_v5 }
  0x80   : > { %402 = vst.msk [vmem:[#allocation4 + $0x28] sm:$0xff] %vm396_vm1, %v3896_v5 }
  0x81   : > { %403 = vst.msk [vmem:[#allocation4 + $0x30] sm:$0xff] %vm396_vm1, %v3896_v5 }
  0x82   : > { %404 = vst.msk [vmem:[#allocation4 + $0x38] sm:$0xff] %vm396_vm1, %v3896_v5 }
  0x83   : > { %405 = vst.msk [vmem:[#allocation4 + $0x40] sm:$0xff] %vm396_vm1, %v3896_v5 }
  0x84   : > { %406 = vst.msk [vmem:[#allocation4 + $0x48] sm:$0xff] %vm396_vm1, %v3896_v5 }
  0x85   : > { %407 = vst.msk [vmem:[#allocation4 + $0x50] sm:$0xff] %vm396_vm1, %v3896_v5 }
  0x86   : > { %408 = vst.msk [vmem:[#allocation4 + $0x58] sm:$0xff] %vm396_vm1, %v3896_v5 }
  0x87   : > { %409 = vst.msk [vmem:[#allocation4 + $0x60] sm:$0xff] %vm396_vm1, %v3896_v5 }
  0x88   : > { %410 = vst.msk [vmem:[#allocation4 + $0x68] sm:$0xff] %vm396_vm1, %v3896_v5 }
  0x89   : > { %411 = vst.msk [vmem:[#allocation4 + $0x70] sm:$0xff] %vm396_vm1, %v3896_v5 }
  0x8a   : > { %412 = vst.msk [vmem:[#allocation4 + $0x78] sm:$0xff] %vm396_vm1, %v3896_v5 }
  0x8b   : > { %413 = vst.msk [vmem:[#allocation4 + $0x80] sm:$0xff] %vm396_vm1, %v3896_v5 }
  0x8c   : > { %414 = vst.msk [vmem:[#allocation4 + $0x88] sm:$0xff] %vm396_vm1, %v3896_v5 }
  0x8d   : > { %415 = vst.msk [vmem:[#allocation4 + $0x90] sm:$0xff] %vm396_vm1, %v3896_v5 }
  0x8e   : > { %416 = vst.msk [vmem:[#allocation4 + $0x98] sm:$0xff] %vm396_vm1, %v3896_v5 }
  0x8f   : > { %417 = vst.msk [vmem:[#allocation4 + $0xa0] sm:$0xff] %vm396_vm1, %v3896_v5 }
  0x90   : > { %418 = vst.msk [vmem:[#allocation4 + $0xa8] sm:$0xff] %vm396_vm1, %v3896_v5 }
  0x91   : > { %419 = vst.msk [vmem:[#allocation4 + $0xb0] sm:$0xff] %vm396_vm1, %v3896_v5 }
  0x92   : > { %420 = vst.msk [vmem:[#allocation4 + $0xb8] sm:$0xff] %vm396_vm1, %v3896_v5 }
  0x93   : > { %421 = vst.msk [vmem:[#allocation4 + $0xc0] sm:$0xff] %vm396_vm1, %v3896_v5 }
  0x94   : > { %422 = vst.msk [vmem:[#allocation4 + $0xc8] sm:$0xff] %vm396_vm1, %v3896_v5 }
  0x95   : > { %423 = vst.msk [vmem:[#allocation4 + $0xd0] sm:$0xff] %vm396_vm1, %v3896_v5 }
  0x96   : > { %424 = vst.msk [vmem:[#allocation4 + $0xd8] sm:$0xff] %vm396_vm1, %v3896_v5 }
  0x97   : > { %425 = vst.msk [vmem:[#allocation4 + $0xe0] sm:$0xff] %vm396_vm1, %v3896_v5 }
  0x98   : > { %426 = vst.msk [vmem:[#allocation4 + $0xe8] sm:$0xff] %vm396_vm1, %v3896_v5 }
  0x99   : > { %427 = vst.msk [vmem:[#allocation4 + $0xf0] sm:$0xff] %vm396_vm1, %v3896_v5 }
  0x9a   : > { %428 = vst.msk [vmem:[#allocation4 + $0xf8] sm:$0xff] %vm396_vm1, %v3896_v5 }
  0x9b PF: > { %v4178_v6 = vld [vmem:[%s3997_s30 + $0x10] sm:$0xff]  ;;  %v4181_v7 = vld [vmem:[%s3997_s30] sm:$0xff]  ;;  %v3897_v8 = vmov 0   ;;  %v4193_v10 = vld [vmem:[%s3997_s30 + $0x18] sm:$0xff]  ;;  %v6315_v55 = vmov 0  ;;  %v6317_v56 = vmov 0 }
  0x9c   : > { %3532 = vset.pattern.permute.xlu1 %v3897_v8  ;;  %3531 = vset.pattern.permute.xlu0 %v3897_v8  ;;  %v4186_v9 = vld [vmem:[%s3997_s30 + $0x20] sm:$0xff]  ;;  %v4196_v11 = vld [vmem:[%s3997_s30 + $0x8] sm:$0xff]  ;;  %v4205_v13 = vld [vmem:[%s3997_s30 + $0x38] sm:$0xff]  ;;  %s3899_s2 = smov 64   ;;  %p3361_p0 = scmp.ne.s32.totalorder %s3877_s17, 1 }
  0x9d   : > { %482 = vperm.xlu1 %3532, %v4178_v6   ;;  %472 = vperm.xlu0 %3531, %v4181_v7   ;;  %v4199_v12 = vld [vmem:[%s3997_s30 + $0x28] sm:$0xff]  ;;  %v4208_v14 = vld [vmem:[%s3997_s30 + $0x30] sm:$0xff]  ;;  %v4211_v15 = vld [vmem:[%s3997_s30 + $0x40] sm:$0xff]  ;;  %s3901_s17 = smov (!%p3361_p0), 64  }
  0x9e   : > { %3533 = vset.pattern.permute.xlu2 %v3897_v8  ;;  %v4217_v16 = vld [vmem:[%s3997_s30 + $0x50] sm:$0xff]  ;;  %v4220_v17 = vld [vmem:[%s3997_s30 + $0x48] sm:$0xff]  ;;  %v4223_v18 = vld [vmem:[%s3997_s30 + $0x58] sm:$0xff] }
  0x9f   : > { %492 = vperm.xlu2 %3533, %v4186_v9   ;;  %v4229_v19 = vld [vmem:[%s3997_s30 + $0x68] sm:$0xff]  ;;  %v4232_v20 = vld [vmem:[%s3997_s30 + $0x60] sm:$0xff]  ;;  %v4235_v21 = vld [vmem:[%s3997_s30 + $0x70] sm:$0xff] }
  0xa0   : > { %v4241_v22 = vld [vmem:[%s3997_s30 + $0x78] sm:$0xff]  ;;  %v429_v23 = vld [vmem:[%s4014_s24] sm:$0xff]  ;;  %v430_v25 = vld [vmem:[%s4014_s24 + $0x8] sm:$0xff] }
  0xa1   : > { %vm433_vm2 = vnez %v429_v23  ;;  %vm434_vm3 = vnez %v430_v25  ;;  %v4251_v43 = vld [vmem:[%s4002_s8] sm:$0x3]  ;;  %v431_v46 = vld [vmem:[%s4014_s24 + $0x10] sm:$0xff]  ;;  %v432_v4 = vld [vmem:[%s4014_s24 + $0x18] sm:$0xff] }
  0xa2   : > { %v615_v24 = vsel %vm433_vm2, 16843009, %v3897_v8  ;;  %v616_v30 = vsel %vm434_vm3, 16843009, %v3897_v8  ;;  %v4255_v49 = vperm.slane %v4251_v43, 0  ;;  %vm435_vm8 = vnez %v431_v46 }
  0xa3   : > { %v621_v26 = vunpack.c.2.s8 %v615_v24  ;;  %v619_v27 = vunpack.c.0.s8 %v615_v24  ;;  %v623_v32 = vunpack.c.0.s8 %v616_v30  ;;  %v620_v34 = vunpack.c.1.s8 %v615_v24 }
  0xa4   : > { %v622_v37 = vunpack.c.3.s8 %v615_v24  ;;  %v625_v41 = vunpack.c.2.s8 %v616_v30  ;;  %v626_v42 = vunpack.c.3.s8 %v616_v30  ;;  %v4269_v63 = vsel %vm435_vm8, 16843009, %v3897_v8 }
  0xa5   : > { %487 = vperm.xlu1 %3532, %v4193_v10   ;;  %477 = vperm.xlu0 %3531, %v4196_v11   ;;  %v639_v28 = vpack.c.b16 %v621_v26, %v621_v26  ;;  %v635_v29 = vpack.c.b16 %v619_v27, %v619_v27  ;;  %v643_v35 = vpack.c.b16 %v623_v32, %v623_v32  ;;  %v628_v2 = vunpack.c.1.s8 %v4269_v63 }
  0xa6   : > { %v637_v36 = vpack.c.b16 %v620_v34, %v620_v34  ;;  %v641_v45 = vpack.c.b16 %v622_v37, %v622_v37  ;;  %v647_v50 = vpack.c.b16 %v625_v41, %v625_v41  ;;  %v649_v51 = vpack.c.b16 %v626_v42, %v626_v42 }
  0xa7   : > { %497 = vperm.xlu2 %3533, %v4199_v12   ;;  %v640_v31 = vpack.c.b8 %v639_v28, %v639_v28  ;;  %v636_v33 = vpack.c.b8 %v635_v29, %v635_v29  ;;  %v644_v40 = vpack.c.b8 %v643_v35, %v643_v35  ;;  %v624_v3 = vunpack.c.1.s8 %v616_v30 }
  0xa8   : > { %v638_v44 = vpack.c.b8 %v637_v36, %v637_v36  ;;  %v642_v54 = vpack.c.b8 %v641_v45, %v641_v45  ;;  %v648_v61 = vpack.c.b8 %v647_v50, %v647_v50  ;;  %v650_v62 = vpack.c.b8 %v649_v51, %v649_v51 }
  0xa9   : > { %vm669_vm4 = vnez %v640_v31  ;;  %vm667_vm5 = vnez %v636_v33  ;;  %vm671_vm6 = vnez %v644_v40  ;;  %v629_v24 = vunpack.c.2.s8 %v4269_v63 }
  0xaa   : > { %v685_v38 = vsel %vm669_vm4, 16843009, %v3897_v8  ;;  %v683_v39 = vsel %vm667_vm5, 16843009, %v3897_v8  ;;  %vm668_vm7 = vnez %v638_v44  ;;  %v687_v57 = vsel %vm671_vm6, 16843009, %v3897_v8 }
  0xab   : > { %v701_v47 = vunpack.c.0.s8 %v685_v38  ;;  %v699_v48 = vunpack.c.0.s8 %v683_v39  ;;  %v684_v60 = vsel %vm668_vm7, 16843009, %v3897_v8  ;;  %v703_v5 = vunpack.c.0.s8 %v687_v57 }
  0xac   : > { %vm4275_vm12 = vnez %v642_v54  ;;  %vm4280_vm15 = vnez %v648_v61  ;;  %vm4284_vm0 = vnez %v650_v62  ;;  %vm436_vm1 = vnez %v432_v4 }
  0xad   : > { %507 = vperm.xlu1 %3532, %v4205_v13   ;;  %502 = vperm.xlu0 %3531, %v4208_v14   ;;  %vm4258_vm9 = vcmp.ne.s32.totalorder %v701_v47, 0  ;;  %vm4262_vm10 = vcmp.ne.s32.totalorder %v699_v48, 0  ;;  %v653_v32 = vpack.c.b16 %v628_v2, %v628_v2  ;;  %v645_v33 = vpack.c.b16 %v624_v3, %v624_v3 }
  0xae   : > { %v6316_v55 = vsel %vm4258_vm9, 4294967295, %v6315_v55  ;;  %v6318_v56 = vsel %vm4262_vm10, 4294967295, %v6317_v56  ;;  %v700_v36 = vunpack.c.0.s8 %v684_v60  ;;  %vm4298_vm2 = vcmp.ne.s32.totalorder %v703_v5, 0 }
  0xaf   : > { %512 = vperm.xlu2 %3533, %v4211_v15   ;;  %v686_v38 = vsel %vm4275_vm12, 16843009, %v3897_v8  ;;  %v655_v39 = vpack.c.b16 %v629_v24, %v629_v24  ;;  %v689_v44 = vsel %vm4280_vm15, 16843009, %v3897_v8  ;;  %v690_v45 = vsel %vm4284_vm0, 16843009, %v3897_v8 }
  0xb0   : > { %v4314_v46 = vsel %vm436_vm1, 16843009, %v3897_v8  ;;  %v654_v48 = vpack.c.b8 %v653_v32, %v653_v32  ;;  %v646_v50 = vpack.c.b8 %v645_v33, %v645_v33  ;;  %v627_v51 = vunpack.c.0.s8 %v4269_v63 }
  0xb1   : > { %vm4319_vm3 = vcmp.ne.s32.totalorder %v700_v36, 0  ;;  %v6327_v54 = vmov 0  ;;  %v631_v57 = vunpack.c.0.s8 %v4314_v46  ;;  %v702_v60 = vunpack.c.0.s8 %v686_v38 }
  0xb2   : > { %v6328_v54 = vsel %vm4319_vm3, 4294967295, %v6327_v54  ;;  %v656_v61 = vpack.c.b8 %v655_v39, %v655_v39  ;;  %v630_v2 = vunpack.c.3.s8 %v4269_v63  ;;  %vm4330_vm5 = vnez %v654_v48 }
  0xb3   : > { %vm4334_vm6 = vnez %v646_v50  ;;  %v651_v23 = vpack.c.b16 %v627_v51, %v627_v51  ;;  %vm4345_vm8 = vcmp.ne.s32.totalorder %v702_v60, 0  ;;  %v6333_v63 = vmov 0 }
  0xb4   : > { %v6334_v63 = vsel %vm4345_vm8, 4294967295, %v6333_v63  ;;  %v688_v33 = vsel %vm4334_vm6, 16843009, %v3897_v8  ;;  %v657_v36 = vpack.c.b16 %v630_v2, %v630_v2 }
  0xb5   : > { %522 = vperm.xlu1 %3532, %v4217_v16   ;;  %517 = vperm.xlu0 %3531, %v4220_v17  }
  0xb7   : > { %527 = vperm.xlu2 %3533, %v4223_v18  }
  0xbd   : > { %537 = vperm.xlu1 %3532, %v4229_v19   ;;  %532 = vperm.xlu0 %3531, %v4232_v20  }
  0xbf   : > { %542 = vperm.xlu2 %3533, %v4235_v21  }
  0xc5   : > { %547 = vperm.xlu0 %3531, %v4241_v22  }
  0xf9   : > { %v493_v52 = vpop.permute.xlu2 %492 }
  0xfa   : > { %v555_v53 = vadd.f32 %v4255_v49, %v493_v52 }
  0xfc   : > { %vm571_vm11 = vcmp.gt.f32.partialorder %v555_v53, 0.0  ;;  %v587_v27 = vmul.f32 0.01, %v555_v53 }
  0xfe   : > { %v603_v42 = vsel %vm571_vm11, %v555_v53, %v587_v27  ;;  %vm677_vm11 = vnez %v656_v61 }
  0xff   : > { %v4327_v62 = vsel %vm4298_vm2, %v603_v42, -1e+30 }
 0x101   : > { %v498_v52 = vpop.permute.xlu2 %497 }
 0x102   : > { %v556_v28 = vadd.f32 %v4255_v49, %v498_v52 }
 0x104   : > { %vm572_vm0 = vcmp.gt.f32.partialorder %v556_v28, 0.0 }
 0x109   : > { %v513_v51 = vpop.permute.xlu2 %512 }
 0x10f   : > { %v483_v58 = vpop.permute.xlu1 %482  ;;  %v473_v59 = vpop.permute.xlu0 %472 }
 0x110   : > { %v553_v0 = vadd.f32 %v4255_v49, %v483_v58  ;;  %v551_v1 = vadd.f32 %v4255_v49, %v473_v59  ;;  %v632_v58 = vunpack.c.1.s8 %v4314_v46 }
 0x112   : > { %vm569_vm13 = vcmp.gt.f32.partialorder %v553_v0, 0.0  ;;  %v585_v25 = vmul.f32 0.01, %v553_v0  ;;  %vm567_vm14 = vcmp.gt.f32.partialorder %v551_v1, 0.0  ;;  %v583_v26 = vmul.f32 0.01, %v551_v1 }
 0x113   : > { %v661_v27 = vpack.c.b16 %v632_v58, %v632_v58  ;;  %v704_v58 = vunpack.c.0.s8 %v688_v33 }
 0x114   : > { %v601_v30 = vsel %vm569_vm13, %v553_v0, %v585_v25  ;;  %v599_v31 = vsel %vm567_vm14, %v551_v1, %v583_v26  ;;  %v705_v0 = vunpack.c.0.s8 %v689_v44  ;;  %v706_v1 = vunpack.c.0.s8 %v690_v45 }
 0x115   : > { %v4290_v34 = vsel %vm4258_vm9, %v601_v30, -1e+30  ;;  %v4294_v35 = vsel %vm4262_vm10, %v599_v31, -1e+30  ;;  %v659_v26 = vpack.c.b16 %v631_v57, %v631_v57  ;;  %v693_v44 = vsel %vm677_vm11, 16843009, %v3897_v8 }
 0x116   : > { %767 = vmax.xlane.f32.xlu0 %v4290_v34  ;;  %763 = vmax.xlane.f32.xlu1 %v4294_v35  ;;  %vm4349_vm12 = vcmp.ne.s32.totalorder %v705_v0, 0  ;;  %vm4353_vm13 = vcmp.ne.s32.totalorder %v706_v1, 0  ;;  %v588_v57 = vmul.f32 0.01, %v556_v28  ;;  %v709_v61 = vunpack.c.0.s8 %v693_v44 }
 0x117   : > { %v488_v40 = vpop.permute.xlu1 %487  ;;  %v478_v41 = vpop.permute.xlu0 %477  ;;  %v660_v45 = vpack.c.b8 %v659_v26, %v659_v26  ;;  %v634_v0 = vunpack.c.3.s8 %v4314_v46 }
 0x118   : > { %v552_v47 = vadd.f32 %v4255_v49, %v478_v41  ;;  %v554_v53 = vadd.f32 %v4255_v49, %v488_v40  ;;  %v692_v40 = vsel %vm4330_vm5, 16843009, %v3897_v8  ;;  %v652_v41 = vpack.c.b8 %v651_v23, %v651_v23 }
 0x119   : > { %v708_v52 = vunpack.c.0.s8 %v692_v40  ;;  %vm4381_vm1 = vnez %v660_v45  ;;  %vm4406_vm11 = vcmp.ne.s32.totalorder %v709_v61, 0  ;;  %v633_v45 = vunpack.c.2.s8 %v4314_v46  ;;  %v528_v61 = vpop.permute.xlu2 %527 }
 0x11a   : > { %vm568_vm4 = vcmp.gt.f32.partialorder %v552_v47, 0.0  ;;  %v584_v59 = vmul.f32 0.01, %v552_v47  ;;  %v586_v25 = vmul.f32 0.01, %v554_v53  ;;  %vm570_vm7 = vcmp.gt.f32.partialorder %v554_v53, 0.0 }
 0x11b   : > { %vm4395_vm6 = vcmp.ne.s32.totalorder %v708_v52, 0 }
 0x11c   : > { %v600_v3 = vsel %vm568_vm4, %v552_v47, %v584_v59  ;;  %v602_v42 = vsel %vm570_vm7, %v554_v53, %v586_v25  ;;  %v662_v47 = vpack.c.b8 %v661_v27, %v661_v27  ;;  %vm4385_vm4 = vnez %v652_v41 }
 0x11d   : > { %v4340_v24 = vsel %vm4319_vm3, %v600_v3, -1e+30  ;;  %v4373_v1 = vsel %vm4345_vm8, %v602_v42, -1e+30  ;;  %v658_v3 = vpack.c.b8 %v657_v36, %v657_v36  ;;  %v559_v25 = vadd.f32 %v4255_v49, %v513_v51 }
 0x11e   : > { %765 = vmax.xlane.f32.xlu2 %v4340_v24  ;;  %771 = vmax.xlane.f32.xlu1 %v4327_v62  ;;  %vm4389_vm5 = vnez %v662_v47  ;;  %vm4400_vm7 = vcmp.ne.s32.totalorder %v704_v58, 0  ;;  %v3898_v36 = vmov 1   ;;  %v665_v41 = vpack.c.b16 %v634_v0, %v634_v0 }
 0x11f   : > { %v508_v29 = vpop.permute.xlu1 %507  ;;  %v503_v30 = vpop.permute.xlu0 %502  ;;  %3534 = vset.pattern.permute.xlu0 %v3898_v36  ;;  %3535 = vset.pattern.permute.xlu1 %v3898_v36  ;;  %v691_v42 = vsel %vm4385_vm4, 16843009, %v3897_v8  ;;  %v696_v44 = vsel %vm4389_vm5, 16843009, %v3897_v8  ;;  %v591_v51 = vmul.f32 0.01, %v559_v25 }
 0x120   : > { %v558_v38 = vadd.f32 %v4255_v49, %v508_v29  ;;  %v557_v39 = vadd.f32 %v4255_v49, %v503_v30  ;;  %v6345_v29 = vmov 0  ;;  %v604_v30 = vsel %vm572_vm0, %v556_v28, %v588_v57  ;;  %3536 = vset.pattern.permute.xlu2 %v3898_v36 }
 0x121   : > { %v6346_v29 = vsel %vm4395_vm6, 4294967295, %v6345_v29  ;;  %v695_v28 = vsel %vm4381_vm1, 16843009, %v3897_v8  ;;  %vm575_vm0 = vcmp.gt.f32.partialorder %v559_v25, 0.0  ;;  %vm4424_vm1 = vnez %v658_v3 }
 0x122   : > { %vm573_vm14 = vcmp.gt.f32.partialorder %v557_v39, 0.0  ;;  %v589_v48 = vmul.f32 0.01, %v557_v39  ;;  %vm574_vm15 = vcmp.gt.f32.partialorder %v558_v38, 0.0  ;;  %v590_v50 = vmul.f32 0.01, %v558_v38 }
 0x123   : > { %v711_v4 = vunpack.c.0.s8 %v695_v28  ;;  %v712_v5 = vunpack.c.0.s8 %v696_v44 }
 0x124   : > { %v605_v59 = vsel %vm573_vm14, %v557_v39, %v589_v48  ;;  %v606_v60 = vsel %vm574_vm15, %v558_v38, %v590_v50  ;;  %v4422_v50 = vsel %vm4400_vm7, %v604_v30, -1e+30 }
 0x125   : > { %v4369_v53 = vsel %vm4349_vm12, %v605_v59, -1e+30  ;;  %v4377_v2 = vsel %vm4353_vm13, %v606_v60, -1e+30  ;;  %v707_v59 = vunpack.c.0.s8 %v691_v42  ;;  %v666_v60 = vpack.c.b8 %v665_v41, %v665_v41 }
 0x126   : > { %775 = vmax.xlane.f32.xlu0 %v4369_v53  ;;  %769 = vmax.xlane.f32.xlu2 %v4373_v1  ;;  %vm4446_vm5 = vcmp.ne.s32.totalorder %v711_v4, 0  ;;  %v6353_v41 = vmov 0  ;;  %v543_v4 = vpop.permute.xlu2 %542 }
 0x127   : > { %777 = vmax.xlane.f32.xlu1 %v4377_v2  ;;  %v523_v26 = vpop.permute.xlu1 %522  ;;  %v518_v27 = vpop.permute.xlu0 %517  ;;  %vm682_vm4 = vnez %v666_v60  ;;  %v6354_v41 = vsel %vm4446_vm5, 4294967295, %v6353_v41 }
 0x128   : > { %v561_v38 = vadd.f32 %v4255_v49, %v523_v26  ;;  %v560_v39 = vadd.f32 %v4255_v49, %v518_v27  ;;  %v607_v26 = vsel %vm575_vm0, %v559_v25, %v591_v51  ;;  %v663_v27 = vpack.c.b16 %v633_v45, %v633_v45 }
 0x129   : > { %v6357_v25 = vmov 0  ;;  %v698_v45 = vsel %vm682_vm4, 16843009, %v3897_v8 }
 0x12a   : > { %vm576_vm14 = vcmp.gt.f32.partialorder %v560_v39, 0.0  ;;  %v592_v47 = vmul.f32 0.01, %v560_v39  ;;  %vm577_vm15 = vcmp.gt.f32.partialorder %v561_v38, 0.0  ;;  %v593_v48 = vmul.f32 0.01, %v561_v38 }
 0x12b   : > { %v664_v52 = vpack.c.b8 %v663_v27, %v663_v27  ;;  %v565_v27 = vadd.f32 %v4255_v49, %v543_v4 }
 0x12c   : > { %v608_v57 = vsel %vm576_vm14, %v560_v39, %v592_v47  ;;  %v609_v58 = vsel %vm577_vm15, %v561_v38, %v593_v48  ;;  %v694_v38 = vsel %vm4424_vm1, 16843009, %v3897_v8  ;;  %v562_v39 = vadd.f32 %v4255_v49, %v528_v61 }
 0x12d   : > { %v4430_v46 = vsel %vm4395_vm6, %v608_v57, -1e+30  ;;  %v4434_v0 = vsel %vm4406_vm11, %v609_v58, -1e+30  ;;  %vm4450_vm14 = vcmp.ne.s32.totalorder %v707_v59, 0  ;;  %vm4454_vm15 = vcmp.ne.s32.totalorder %v712_v5, 0 }
 0x12e   : > { %781 = vmax.xlane.f32.xlu0 %v4430_v46  ;;  %773 = vmax.xlane.f32.xlu2 %v4422_v50  ;;  %v6358_v25 = vsel %vm4454_vm15, 4294967295, %v6357_v25  ;;  %v4461_v48 = vsel %vm4450_vm14, %v607_v26, -1e+30  ;;  %v594_v59 = vmul.f32 0.01, %v562_v39  ;;  %v710_v60 = vunpack.c.0.s8 %v694_v38 }
 0x12f   : > { %783 = vmax.xlane.f32.xlu1 %v4434_v0  ;;  %v538_v3 = vpop.permute.xlu1 %537  ;;  %v533_v23 = vpop.permute.xlu0 %532  ;;  %v714_v61 = vunpack.c.0.s8 %v698_v45  ;;  %vm578_vm1 = vcmp.gt.f32.partialorder %v562_v39, 0.0 }
 0x130   : > { %v564_v30 = vadd.f32 %v4255_v49, %v538_v3  ;;  %v563_v36 = vadd.f32 %v4255_v49, %v533_v23  ;;  %v610_v23 = vsel %vm578_vm1, %v562_v39, %v594_v59  ;;  %vm4475_vm4 = vcmp.ne.s32.totalorder %v710_v60, 0  ;;  %v4565_v59 = vld [vmem:[#allocation2 + $0x18] sm:$0xff] }
 0x131   : > { %v4491_v39 = vsel %vm4475_vm4, %v610_v23, -1e+30  ;;  %vm581_vm1 = vcmp.gt.f32.partialorder %v565_v27, 0.0  ;;  %v4567_v60 = vld [vmem:[#allocation2 + $0x38] sm:$0xff] }
 0x132   : > { %vm579_vm0 = vcmp.gt.f32.partialorder %v563_v36, 0.0  ;;  %v595_v42 = vmul.f32 0.01, %v563_v36  ;;  %vm580_vm6 = vcmp.gt.f32.partialorder %v564_v30, 0.0  ;;  %v596_v44 = vmul.f32 0.01, %v564_v30 }
 0x133   : > { %6370 = vst [vmem:[#allocation11_spill] sm:$0xff] %v4567_v60 }
 0x134   : > { %v611_v47 = vsel %vm579_vm0, %v563_v36, %v595_v42  ;;  %v612_v51 = vsel %vm580_vm6, %v564_v30, %v596_v44  ;;  %vm681_vm6 = vnez %v664_v52  ;;  %v6361_v36 = vmov 0 }
 0x135   : > { %v4465_v57 = vsel %vm4446_vm5, %v611_v47, -1e+30  ;;  %v4469_v58 = vsel %vm4454_vm15, %v612_v51, -1e+30  ;;  %vm4480_vm15 = vcmp.ne.s32.totalorder %v714_v61, 0  ;;  %v6364_v51 = vmov 0 }
 0x136   : > { %787 = vmax.xlane.f32.xlu0 %v4465_v57  ;;  %779 = vmax.xlane.f32.xlu2 %v4461_v48  ;;  %v6362_v36 = vsel %vm4480_vm15, 4294967295, %v6361_v36  ;;  %v697_v38 = vsel %vm681_vm6, 16843009, %v3897_v8  ;;  %vm6259_vm6 = vcmask 7168  }
 0x137   : > { %789 = vmax.xlane.f32.xlu1 %v4469_v58  ;;  %v548_v5 = vpop.permute.xlu0 %547  ;;  %6363 = vst [vmem:[#allocation6_spill] sm:$0xff] %v6362_v36  ;;  %v713_v45 = vunpack.c.0.s8 %v697_v38 }
 0x138   : > { %v566_v3 = vadd.f32 %v4255_v49, %v548_v5  ;;  %v597_v49 = vmul.f32 0.01, %v565_v27 }
 0x139   : > { %vm4495_vm5 = vcmp.ne.s32.totalorder %v713_v45, 0  ;;  %v4594_v45 = vld [vmem:[#allocation2 + $0x28] sm:$0xff] }
 0x13a   : > { %vm582_vm0 = vcmp.gt.f32.partialorder %v566_v3, 0.0  ;;  %v598_v30 = vmul.f32 0.01, %v566_v3  ;;  %v613_v47 = vsel %vm581_vm1, %v565_v27, %v597_v49  ;;  %v6365_v51 = vsel %vm4495_vm5, 4294967295, %v6364_v51  ;;  %v4592_v49 = vld [vmem:[#allocation2 + $0x48] sm:$0xff] }
 0x13b   : > { %v4501_v52 = vsel %vm4495_vm5, %v613_v47, -1e+30  ;;  %6373 = vst [vmem:[#allocation14_spill] sm:$0xff] %v4592_v49  ;;  %v4596_v47 = vld [vmem:[#allocation2 + $0x50] sm:$0xff] }
 0x13c   : > { %v614_v42 = vsel %vm582_vm0, %v566_v3, %v598_v30  ;;  %6374 = vst [vmem:[#allocation15_spill] sm:$0xff] %v4596_v47 }
 0x13d   : > { %v4487_v44 = vsel %vm4480_vm15, %v614_v42, -1e+30 }
 0x13e   : > { %793 = vmax.xlane.f32.xlu0 %v4487_v44  ;;  %785 = vmax.xlane.f32.xlu2 %v4491_v39  ;;  %v6508_v40 = vld [vmem:[#allocation6_spill] sm:$0xff] }
 0x146   : > { %791 = vmax.xlane.f32.xlu2 %v4501_v52 }
 0x150   : > { %1371 = vperm.xlu1 %3535, %v4196_v11  }
 0x152   : > { %1367 = vperm.xlu0 %3534, %v4181_v7   ;;  %v4525_v7 = vld [vmem:[#allocation2] sm:$0xff] }
 0x158   : > { %1379 = vperm.xlu1 %3535, %v4193_v10  }
 0x15a   : > { %1387 = vperm.xlu0 %3534, %v4199_v12  }
 0x15e   : > { %1375 = vperm.xlu2 %3536, %v4178_v6   ;;  %v4523_v6 = vld [vmem:[#allocation2 + $0x10] sm:$0xff] }
 0x160   : > { %1391 = vperm.xlu1 %3535, %v4208_v14   ;;  %v4543_v14 = vld [vmem:[#allocation2 + $0x8] sm:$0xff] }
 0x162   : > { %1399 = vperm.xlu0 %3534, %v4211_v15   ;;  %v4545_v15 = vld [vmem:[#allocation2 + $0x20] sm:$0xff] }
 0x163   : > { %6367 = vst [vmem:[#allocation8_spill] sm:$0xff] %v4545_v15 }
 0x166   : > { %1383 = vperm.xlu2 %3536, %v4186_v9  }
 0x168   : > { %1403 = vperm.xlu1 %3535, %v4220_v17  }
 0x16a   : > { %1411 = vperm.xlu0 %3534, %v4223_v18  }
 0x16e   : > { %1395 = vperm.xlu2 %3536, %v4205_v13  }
 0x170   : > { %1415 = vperm.xlu1 %3535, %v4232_v20  }
 0x172   : > { %1423 = vperm.xlu0 %3534, %v4235_v21  }
 0x176   : > { %1407 = vperm.xlu2 %3536, %v4217_v16  }
 0x178   : > { %1427 = vperm.xlu1 %3535, %v4241_v22   ;;  %v4563_v22 = vld [vmem:[#allocation2 + $0x30] sm:$0xff] }
 0x179   : > { %6369 = vst [vmem:[#allocation10_spill] sm:$0xff] %v4563_v22 }
 0x17a   : > { %3539 = vset.pattern.permute.xlu0 %v3897_v8 }
 0x17e   : > { %1419 = vperm.xlu2 %3536, %v4229_v19  }
 0x180   : > { %3537 = vset.pattern.permute.xlu1 %v3897_v8 }
 0x186   : > { %3538 = vset.pattern.permute.xlu2 %v3897_v8 }
 0x189   : > { %v768_v9 = vpop.xlane.xlu0 %767  ;;  %v764_v10 = vpop.xlane.xlu1 %763 }
 0x18a   : > { %v4528_v11 = vmax.f32 %v4523_v6, %v768_v9  ;;  %v4531_v12 = vmax.f32 %v4525_v7, %v764_v10 }
 0x18c   : > { %6366 = vst [vmem:[#allocation7_spill] sm:$0xff] %v4528_v11  ;;  %823 = vperm.xlu0 %3539, %v4528_v11   ;;  %813 = vperm.xlu1 %3537, %v4531_v12  }
 0x18d   : > { %1352 = vst.msk [vmem:[#allocation2 + $0x10] sm:$0xff] %vm6259_vm6, %v4528_v11 }
 0x18e   : > { %1350 = vst.msk [vmem:[#allocation2] sm:$0xff] %vm6259_vm6, %v4531_v12 }
 0x191   : > { %v766_v16 = vpop.xlane.xlu2 %765  ;;  %v772_v17 = vpop.xlane.xlu1 %771 }
 0x192   : > { %v4548_v18 = vmax.f32 %v4543_v14, %v766_v16  ;;  %v4551_v19 = vmax.f32 %v4545_v15, %v772_v17 }
 0x194   : > { %6368 = vst [vmem:[#allocation9_spill] sm:$0xff] %v4551_v19  ;;  %818 = vperm.xlu2 %3538, %v4548_v18   ;;  %833 = vperm.xlu0 %3539, %v4551_v19  }
 0x195   : > { %1351 = vst.msk [vmem:[#allocation2 + $0x8] sm:$0xff] %vm6259_vm6, %v4548_v18 }
 0x196   : > { %1354 = vst.msk [vmem:[#allocation2 + $0x20] sm:$0xff] %vm6259_vm6, %v4551_v19 }
 0x199   : > { %v776_v61 = vpop.xlane.xlu0 %775  ;;  %v770_v4 = vpop.xlane.xlu2 %769 }
 0x19a   : > { %v4570_v5 = vmax.f32 %v4563_v22, %v776_v61  ;;  %v4573_v3 = vmax.f32 %v4565_v59, %v770_v4  ;;  %v778_v23 = vpop.xlane.xlu1 %777 }
 0x19b   : > { %v4576_v27 = vmax.f32 %v4567_v60, %v778_v23  ;;  %v4626_v23 = vld [vmem:[#allocation2 + $0x68] sm:$0xff]  ;;  %v4688_v60 = vld [vmem:[%s4012_s25 + $0x38] sm:$0xff] }
 0x19c   : > { %6371 = vst [vmem:[#allocation12_spill] sm:$0xff] %v4570_v5  ;;  %828 = vperm.xlu1 %3537, %v4573_v3   ;;  %1268 = vmatpush.bf16.msra.mxu0 %v4688_v60 }
 0x19d   : > { %6372 = vst [vmem:[#allocation13_spill] sm:$0xff] %v4576_v27  ;;  %848 = vperm.xlu0 %3539, %v4576_v27   ;;  %3452 = vmatpush.bf16.msra.mxu2 %v4688_v60 }
 0x19e   : > { %1356 = vst.msk [vmem:[#allocation2 + $0x30] sm:$0xff] %vm6259_vm6, %v4570_v5 }
 0x19f   : > { %1353 = vst.msk [vmem:[#allocation2 + $0x18] sm:$0xff] %vm6259_vm6, %v4573_v3 }
 0x1a0   : > { %1357 = vst.msk [vmem:[#allocation2 + $0x38] sm:$0xff] %vm6259_vm6, %v4576_v27 }
 0x1a1   : > { %v782_v9 = vpop.xlane.xlu0 %781  ;;  %v774_v10 = vpop.xlane.xlu2 %773  ;;  %6379 = vst [vmem:[#allocation20_spill] sm:$0xff] %v4626_v23 }
 0x1a2   : > { %v4599_v16 = vmax.f32 %v4592_v49, %v782_v9  ;;  %v4602_v17 = vmax.f32 %v4594_v45, %v774_v10  ;;  %v784_v61 = vpop.xlane.xlu1 %783  ;;  %v4622_v10 = vld [vmem:[#allocation2 + $0x60] sm:$0xff]  ;;  %6389 = vst [vmem:[#allocation30_spill] sm:$0xff] %v4688_v60 }
 0x1a3   : > { %v4605_v4 = vmax.f32 %v4596_v47, %v784_v61  ;;  %6377 = vst [vmem:[#allocation18_spill] sm:$0xff] %v4622_v10  ;;  %v4624_v61 = vld [vmem:[#allocation2 + $0x40] sm:$0xff] }
 0x1a4   : > { %6375 = vst [vmem:[#allocation16_spill] sm:$0xff] %v4599_v16  ;;  %838 = vperm.xlu2 %3538, %v4602_v17   ;;  %843 = vperm.xlu1 %3537, %v4570_v5  }
 0x1a5   : > { %6376 = vst [vmem:[#allocation17_spill] sm:$0xff] %v4605_v4  ;;  %863 = vperm.xlu0 %3539, %v4605_v4  }
 0x1a6   : > { %1359 = vst.msk [vmem:[#allocation2 + $0x48] sm:$0xff] %vm6259_vm6, %v4599_v16 }
 0x1a7   : > { %1355 = vst.msk [vmem:[#allocation2 + $0x28] sm:$0xff] %vm6259_vm6, %v4602_v17 }
 0x1a8   : > { %1360 = vst.msk [vmem:[#allocation2 + $0x50] sm:$0xff] %vm6259_vm6, %v4605_v4 }
 0x1a9   : > { %6378 = vst [vmem:[#allocation19_spill] sm:$0xff] %v4624_v61  ;;  %v788_v21 = vpop.xlane.xlu0 %787  ;;  %v780_v30 = vpop.xlane.xlu2 %779 }
 0x1aa   : > { %v4629_v13 = vmax.f32 %v4622_v10, %v788_v21  ;;  %v4632_v38 = vmax.f32 %v4624_v61, %v780_v30  ;;  %v790_v9 = vpop.xlane.xlu1 %789  ;;  %v4652_v30 = vld [vmem:[#allocation2 + $0x78] sm:$0xff] }
 0x1ab   : > { %v4635_v42 = vmax.f32 %v4626_v23, %v790_v9  ;;  %6383 = vst [vmem:[#allocation24_spill] sm:$0xff] %v4652_v30  ;;  %v4654_v9 = vld [vmem:[#allocation2 + $0x58] sm:$0xff] }
 0x1ac   : > { %6380 = vst [vmem:[#allocation21_spill] sm:$0xff] %v4629_v13  ;;  %853 = vperm.xlu2 %3538, %v4632_v38   ;;  %858 = vperm.xlu1 %3537, %v4599_v16  }
 0x1ad   : > { %6381 = vst [vmem:[#allocation22_spill] sm:$0xff] %v4632_v38  ;;  %878 = vperm.xlu0 %3539, %v4635_v42  }
 0x1ae   : > { %6382 = vst [vmem:[#allocation23_spill] sm:$0xff] %v4635_v42 }
 0x1af   : > { %1362 = vst.msk [vmem:[#allocation2 + $0x60] sm:$0xff] %vm6259_vm6, %v4629_v13 }
 0x1b0   : > { %1358 = vst.msk [vmem:[#allocation2 + $0x40] sm:$0xff] %vm6259_vm6, %v4632_v38 }
 0x1b1   : > { %1363 = vst.msk [vmem:[#allocation2 + $0x68] sm:$0xff] %vm6259_vm6, %v4635_v42  ;;  %v794_v8 = vpop.xlane.xlu0 %793  ;;  %v786_v20 = vpop.xlane.xlu2 %785 }
 0x1b2   : > { %6384 = vst [vmem:[#allocation25_spill] sm:$0xff] %v4654_v9  ;;  %v4657_v4 = vmax.f32 %v4652_v30, %v794_v8  ;;  %v4660_v47 = vmax.f32 %v4654_v9, %v786_v20  ;;  %v4672_v8 = vld [vmem:[#allocation2 + $0x70] sm:$0xff]  ;;  %v4684_v30 = vperm.slane %v4251_v43, 1 }
 0x1b3   : > { %6387 = vst [vmem:[#allocation28_spill] sm:$0xff] %v4672_v8  ;;  %v4693_v43 = vld [vmem:[%s4012_s25 + $0x30] sm:$0xff] }
 0x1b4   : > { %6385 = vst [vmem:[#allocation26_spill] sm:$0xff] %v4657_v4  ;;  %868 = vperm.xlu2 %3538, %v4660_v47   ;;  %873 = vperm.xlu1 %3537, %v4629_v13  }
 0x1b5   : > { %6386 = vst [vmem:[#allocation27_spill] sm:$0xff] %v4660_v47  ;;  %1269 = vmatpush.bf16.msra.mxu0 %v4693_v43  ;;  %3453 = vmatpush.bf16.msra.mxu2 %v4693_v43 }
 0x1b6   : > { %1365 = vst.msk [vmem:[#allocation2 + $0x78] sm:$0xff] %vm6259_vm6, %v4657_v4 }
 0x1b7   : > { %1361 = vst.msk [vmem:[#allocation2 + $0x58] sm:$0xff] %vm6259_vm6, %v4660_v47 }
 0x1b8   : > { %6390 = vst [vmem:[#allocation31_spill] sm:$0xff] %v4693_v43 }
 0x1b9   : > { %v792_v20 = vpop.xlane.xlu2 %791 }
 0x1ba   : > { %v4675_v23 = vmax.f32 %v4672_v8, %v792_v20 }
 0x1bc   : > { %6388 = vst [vmem:[#allocation29_spill] sm:$0xff] %v4675_v23  ;;  %883 = vperm.xlu2 %3538, %v4675_v23   ;;  %888 = vperm.xlu1 %3537, %v4657_v4  }
 0x1bd   : > { %1364 = vst.msk [vmem:[#allocation2 + $0x70] sm:$0xff] %vm6259_vm6, %v4675_v23 }
 0x1c1   : > { %v1376_v42 = vpop.permute.xlu2 %1375 }
 0x1c2   : > { %v1372_v13 = vpop.permute.xlu1 %1371  ;;  %v1433_v9 = vadd.f32 %v4684_v30, %v1376_v42 }
 0x1c3   : > { %v1432_v20 = vadd.f32 %v4684_v30, %v1372_v13  ;;  %v4698_v13 = vld [vmem:[%s4012_s25 + $0x28] sm:$0xff] }
 0x1c4   : > { %v1368_v21 = vpop.permute.xlu0 %1367  ;;  %6391 = vst [vmem:[#allocation32_spill] sm:$0xff] %v4698_v13  ;;  %1270 = vmatpush.bf16.msra.mxu0 %v4698_v13  ;;  %3454 = vmatpush.bf16.msra.mxu2 %v4698_v13  ;;  %v1465_v5 = vmul.f32 0.01, %v1433_v9  ;;  %vm1449_vm6 = vcmp.gt.f32.partialorder %v1433_v9, 0.0 }
 0x1c5   : > { %v1464_v27 = vmul.f32 0.01, %v1432_v20  ;;  %vm1448_vm0 = vcmp.gt.f32.partialorder %v1432_v20, 0.0 }
 0x1c7   : > { %v1480_v23 = vsel %vm1448_vm0, %v1432_v20, %v1464_v27  ;;  %v4708_v27 = vld [vmem:[%s4012_s25 + $0x20] sm:$0xff] }
 0x1c8   : > { %v4703_v49 = vsel %vm4319_vm3, %v1480_v23, -1e+30  ;;  %6393 = vst [vmem:[#allocation34_spill] sm:$0xff] %v4708_v27  ;;  %1271 = vmatpush.bf16.msra.mxu0 %v4708_v27  ;;  %3455 = vmatpush.bf16.msra.mxu2 %v4708_v27 }
 0x1c9   : > { %v1384_v10 = vpop.permute.xlu2 %1383  ;;  %6392 = vst [vmem:[#allocation33_spill] sm:$0xff] %v4703_v49 }
 0x1ca   : > { %v1380_v8 = vpop.permute.xlu1 %1379  ;;  %v1435_v16 = vadd.f32 %v4684_v30, %v1384_v10  ;;  %v1431_v10 = vadd.f32 %v4684_v30, %v1368_v21 }
 0x1cb   : > { %v1434_v42 = vadd.f32 %v4684_v30, %v1380_v8 }
 0x1cc   : > { %v1467_v47 = vmul.f32 0.01, %v1435_v16  ;;  %v1388_v20 = vpop.permute.xlu0 %1387  ;;  %vm1451_vm1 = vcmp.gt.f32.partialorder %v1435_v16, 0.0  ;;  %v1463_v15 = vmul.f32 0.01, %v1431_v10  ;;  %vm1447_vm0 = vcmp.gt.f32.partialorder %v1431_v10, 0.0 }
 0x1ce   : > { %v1483_v19 = vsel %vm1451_vm1, %v1435_v16, %v1467_v47  ;;  %v1479_v16 = vsel %vm1447_vm0, %v1431_v10, %v1463_v15  ;;  %v1466_v15 = vmul.f32 0.01, %v1434_v42 }
 0x1cf   : > { %v4721_v13 = vsel %vm4298_vm2, %v1483_v19, -1e+30  ;;  %v1436_v19 = vadd.f32 %v4684_v30, %v1388_v20  ;;  %v4738_v8 = vsel %vm4262_vm10, %v1479_v16, -1e+30 }
 0x1d0   : > { %6394 = vst [vmem:[#allocation35_spill] sm:$0xff] %v4721_v13 }
 0x1d1   : > { %v1396_v4 = vpop.permute.xlu2 %1395  ;;  %6396 = vst [vmem:[#allocation37_spill] sm:$0xff] %v4738_v8  ;;  %vm1452_vm0 = vcmp.gt.f32.partialorder %v1436_v19, 0.0 }
 0x1d2   : > { %v1392_v60 = vpop.permute.xlu1 %1391  ;;  %v1438_v23 = vadd.f32 %v4684_v30, %v1396_v4  ;;  %v4728_v4 = vld [vmem:[%s4012_s25 + $0x10] sm:$0xff] }
 0x1d3   : > { %6395 = vst [vmem:[#allocation36_spill] sm:$0xff] %v4728_v4 }
 0x1d4   : > { %v1470_v21 = vmul.f32 0.01, %v1438_v23  ;;  %vm1454_vm1 = vcmp.gt.f32.partialorder %v1438_v23, 0.0  ;;  %v1400_v27 = vpop.permute.xlu0 %1399 }
 0x1d6   : > { %v1486_v11 = vsel %vm1454_vm1, %v1438_v23, %v1470_v21  ;;  %v4759_v21 = vld [vmem:[%s4012_s25] sm:$0xff] }
 0x1d7   : > { %1530 = vmax.xlane.f32.xlu0 %v4703_v49  ;;  %v4716_v49 = vld [vmem:[%s4012_s25 + $0x18] sm:$0xff] }
 0x1d8   : > { %1272 = vmatpush.bf16.msra.mxu0 %v4716_v49  ;;  %3456 = vmatpush.bf16.msra.mxu2 %v4716_v49 }
 0x1d9   : > { %v1408_v43 = vpop.permute.xlu2 %1407 }
 0x1da   : > { %v1441_v38 = vadd.f32 %v4684_v30, %v1408_v43  ;;  %v1404_v61 = vpop.permute.xlu1 %1403  ;;  %v4752_v43 = vsel %vm4353_vm13, %v1486_v11, -1e+30 }
 0x1db   : > { %6398 = vst [vmem:[#allocation39_spill] sm:$0xff] %v4752_v43 }
 0x1dc   : > { %1273 = vmatpush.bf16.msra.mxu0 %v4728_v4  ;;  %3457 = vmatpush.bf16.msra.mxu2 %v4728_v4  ;;  %v1473_v10 = vmul.f32 0.01, %v1441_v38  ;;  %vm1457_vm1 = vcmp.gt.f32.partialorder %v1441_v38, 0.0 }
 0x1de   : > { %v1489_v11 = vsel %vm1457_vm1, %v1441_v38, %v1473_v10 }
 0x1df   : > { %1536 = vmax.xlane.f32.xlu0 %v4721_v13  ;;  %v1481_v13 = vsel %vm1449_vm6, %v1433_v9, %v1465_v5  ;;  %v4747_v5 = vld [vmem:[%s4012_s25 + $0x8] sm:$0xff]  ;;  %v1468_v9 = vmul.f32 0.01, %v1436_v19  ;;  %vm1450_vm6 = vcmp.gt.f32.partialorder %v1434_v42, 0.0  ;;  %v4776_v38 = vsel %vm4406_vm11, %v1489_v11, -1e+30 }
 0x1e0   : > { %v4744_v20 = vsel %vm4258_vm9, %v1481_v13, -1e+30  ;;  %1274 = vmatpush.bf16.msra.mxu0 %v4747_v5  ;;  %3458 = vmatpush.bf16.msra.mxu2 %v4747_v5  ;;  %v1437_v13 = vadd.f32 %v4684_v30, %v1392_v60  ;;  %v1482_v23 = vsel %vm1450_vm6, %v1434_v42, %v1466_v15  ;;  %6401 = vst [vmem:[#allocation42_spill] sm:$0xff] %v4776_v38 }
 0x1e1   : > { %v1420_v47 = vpop.permute.xlu2 %1419  ;;  %6397 = vst [vmem:[#allocation38_spill] sm:$0xff] %v4744_v20  ;;  %v1484_v16 = vsel %vm1452_vm0, %v1436_v19, %v1468_v9  ;;  %v1440_v42 = vadd.f32 %v4684_v30, %v1404_v61 }
 0x1e2   : > { %v4732_v22 = vadd.f32 %v4684_v30, %v1420_v47  ;;  %v1439_v47 = vadd.f32 %v4684_v30, %v1400_v27  ;;  %v1416_v4 = vpop.permute.xlu1 %1415  ;;  %v4771_v60 = vsel %vm4400_vm7, %v1484_v16, -1e+30  ;;  %vm1453_vm6 = vcmp.gt.f32.partialorder %v1437_v13, 0.0 }
 0x1e3   : > { %6400 = vst [vmem:[#allocation41_spill] sm:$0xff] %v4771_v60  ;;  %vm1456_vm1 = vcmp.gt.f32.partialorder %v1440_v42, 0.0 }
 0x1e4   : > { %1275 = vmatpush.bf16.msra.mxu0 %v4759_v21  ;;  %3459 = vmatpush.bf16.msra.mxu2 %v4759_v21  ;;  %v1471_v27 = vmul.f32 0.01, %v1439_v47  ;;  %vm1455_vm0 = vcmp.gt.f32.partialorder %v1439_v47, 0.0 }
 0x1e5   : > { %1528 = vmax.xlane.f32.xlu2 %v4738_v8  ;;  %v1412_v8 = vpop.permute.xlu0 %1411 }
 0x1e6   : > { %1532 = vmax.xlane.f32.xlu1 %v4744_v20  ;;  %v1469_v20 = vmul.f32 0.01, %v1437_v13  ;;  %v1442_v15 = vadd.f32 %v4684_v30, %v1412_v8  ;;  %v1487_v9 = vsel %vm1455_vm0, %v1439_v47, %v1471_v27  ;;  %v1443_v8 = vadd.f32 %v4684_v30, %v1416_v4 }
 0x1e7   : > { %1542 = vmax.xlane.f32.xlu0 %v4752_v43  ;;  %v4765_v43 = vsel %vm4345_vm8, %v1482_v23, -1e+30  ;;  %v1472_v23 = vmul.f32 0.01, %v1440_v42  ;;  %v4788_v16 = vsel %vm4450_vm14, %v1487_v9, -1e+30  ;;  %vm6404_vm0 = vnez %v6346_v29 }
 0x1e8   : > { %6399 = vst [vmem:[#allocation40_spill] sm:$0xff] %v4765_v43  ;;  %v1485_v19 = vsel %vm1453_vm6, %v1437_v13, %v1469_v20  ;;  %v1474_v11 = vmul.f32 0.01, %v1442_v15  ;;  %vm1458_vm6 = vcmp.gt.f32.partialorder %v1442_v15, 0.0 }
 0x1e9   : > { %v4783_v10 = vsel %vm4349_vm12, %v1485_v19, -1e+30  ;;  %6403 = vst [vmem:[#allocation44_spill] sm:$0xff] %v4788_v16  ;;  %v1488_v20 = vsel %vm1456_vm1, %v1440_v42, %v1472_v23  ;;  %v1475_v19 = vmul.f32 0.01, %v1443_v8  ;;  %vm1459_vm1 = vcmp.gt.f32.partialorder %v1443_v8, 0.0 }
 0x1ea   : > { %6402 = vst [vmem:[#allocation43_spill] sm:$0xff] %v4783_v10  ;;  %v4793_v61 = vpop.permute.xlu1 %1427  ;;  %v1490_v47 = vsel %vm1458_vm6, %v1442_v15, %v1474_v11  ;;  %v4799_v27 = vsel %vm6404_vm0, %v1488_v20, -1e+30  ;;  %vm6405_vm6 = vnez %v6354_v41 }
 0x1eb   : > { %v4804_v9 = vsel %vm4475_vm4, %v1490_v47, -1e+30  ;;  %v1491_v23 = vsel %vm1459_vm1, %v1443_v8, %v1475_v19  ;;  %vm6275_vm1 = vmpackc.low %vm4319_vm3, %vm4262_vm10 }
 0x1ec   : > { %v4812_v20 = vsel %vm6405_vm6, %v1491_v23, -1e+30 }
 0x1ed   : > { %1534 = vmax.xlane.f32.xlu2 %v4765_v43 }
 0x1ee   : > { %1538 = vmax.xlane.f32.xlu1 %v4771_v60  ;;  %v4790_v60 = vpop.permute.xlu0 %1423 }
 0x1ef   : > { %1548 = vmax.xlane.f32.xlu0 %v4776_v38  ;;  %v819_v38 = vpop.permute.xlu2 %818 }
 0x1f0   : > { %v892_v13 = vsub.f32 %v4340_v24, %v819_v38 }
 0x1f5   : > { %1540 = vmax.xlane.f32.xlu2 %v4783_v10  ;;  %v909_v10 = vmul.f32 1.442695, %v892_v13 }
 0x1f6   : > { %1544 = vmax.xlane.f32.xlu1 %v4788_v16 }
 0x1f7   : > { %3540 = vpow2.f32 %v909_v10 }
 0x1fd   : > { %1546 = vmax.xlane.f32.xlu2 %v4799_v27 }
 0x1fe   : > { %v824_v16 = vpop.permute.xlu0 %823  ;;  %v839_v43 = vpop.permute.xlu2 %838  ;;  %1550 = vmax.xlane.f32.xlu1 %v4804_v9 }
 0x1ff   : > { %v893_v24 = vsub.f32 %v4290_v34, %v824_v16  ;;  %v814_v4 = vpop.permute.xlu1 %813  ;;  %v896_v15 = vsub.f32 %v4422_v50, %v839_v43 }
 0x200   : > { %v891_v38 = vsub.f32 %v4294_v35, %v814_v4  ;;  %v3541_v35 = vpop.eup %3540 }
 0x201   : > { %v911_v42 = vmul.f32 1.442695, %v893_v24  ;;  %v917_v13 = vmul.f32 1.442695, %v896_v15  ;;  %v940_v4 = vsel %vm4319_vm3, %v3541_v35, 0.0 }
 0x202   : > { %v907_v11 = vmul.f32 1.442695, %v891_v38 }
 0x203   : > { %3542 = vpow2.f32 %v911_v42 }
 0x204   : > { %3544 = vpow2.f32 %v907_v11 }
 0x205   : > { %1552 = vmax.xlane.f32.xlu2 %v4812_v20  ;;  %3546 = vpow2.f32 %v917_v13 }
 0x206   : > { %v854_v47 = vpop.permute.xlu2 %853  ;;  %v834_v34 = vpop.permute.xlu0 %833 }
 0x207   : > { %v895_v16 = vsub.f32 %v4327_v62, %v834_v34  ;;  %v899_v50 = vsub.f32 %v4461_v48, %v854_v47 }
 0x209   : > { %v3543_v24 = vpop.eup %3542  ;;  %v915_v43 = vmul.f32 1.442695, %v895_v16  ;;  %v923_v48 = vmul.f32 1.442695, %v899_v50 }
 0x20a   : > { %v941_v10 = vsel %vm4258_vm9, %v3543_v24, 0.0  ;;  %v3545_v8 = vpop.eup %3544 }
 0x20b   : > { %1039 = vadd.xlane.f32.xlu1 %v941_v10  ;;  %3548 = vpow2.f32 %v915_v43  ;;  %v939_v62 = vsel %vm4262_vm10, %v3545_v8, 0.0  ;;  %v3314_v19 = vpack.c.bf16 %v3541_v35, %v3545_v8  ;;  %v4832_v15 = vpop.eup %3546  ;;  %vm6406_vm10 = vnez %v6358_v25 }
 0x20c   : > { %1035 = vadd.xlane.f32.xlu0 %v939_v62  ;;  %3550 = vpow2.f32 %v923_v48  ;;  %v944_v50 = vsel %vm4400_vm7, %v4832_v15, 0.0 }
 0x20d   : > { %1037 = vadd.xlane.f32.xlu2 %v940_v4  ;;  %3315 = vmatmul.msk.bf16.vlgmr.msra.gmra.mxu0 %vm6275_vm1, %v3314_v19  ;;  %vm6276_vm1 = vmpackc.low %vm4345_vm8, %vm4258_vm9 }
 0x20e   : > { %v869_v38 = vpop.permute.xlu2 %868  ;;  %v829_v42 = vpop.permute.xlu1 %828 }
 0x20f   : > { %v849_v23 = vpop.permute.xlu0 %848  ;;  %v894_v11 = vsub.f32 %v4373_v1, %v829_v42  ;;  %v902_v47 = vsub.f32 %v4491_v39, %v869_v38 }
 0x210   : > { %v898_v13 = vsub.f32 %v4377_v2, %v849_v23 }
 0x211   : > { %v913_v34 = vmul.f32 1.442695, %v894_v11  ;;  %v4837_v16 = vpop.eup %3548  ;;  %v929_v1 = vmul.f32 1.442695, %v902_v47 }
 0x212   : > { %v921_v35 = vmul.f32 1.442695, %v898_v13  ;;  %v943_v43 = vsel %vm4298_vm2, %v4837_v16, 0.0  ;;  %v3551_v39 = vpop.eup %3550 }
 0x213   : > { %1045 = vadd.xlane.f32.xlu1 %v944_v50  ;;  %v947_v23 = vsel %vm4450_vm14, %v3551_v39, 0.0 }
 0x214   : > { %3552 = vpow2.f32 %v921_v35 }
 0x215   : > { %3554 = vpow2.f32 %v913_v34  ;;  %1043 = vadd.xlane.f32.xlu2 %v943_v43 }
 0x216   : > { %v884_v2 = vpop.permute.xlu2 %883  ;;  %v844_v10 = vpop.permute.xlu1 %843  ;;  %3556 = vpow2.f32 %v929_v1 }
 0x217   : > { %v864_v8 = vpop.permute.xlu0 %863  ;;  %v897_v62 = vsub.f32 %v4369_v53, %v844_v10  ;;  %v905_v4 = vsub.f32 %v4501_v52, %v884_v2 }
 0x218   : > { %v901_v19 = vsub.f32 %v4434_v0, %v864_v8 }
 0x219   : > { %v919_v48 = vmul.f32 1.442695, %v897_v62  ;;  %v935_v13 = vmul.f32 1.442695, %v905_v4  ;;  %v1445_v4 = vadd.f32 %v4684_v30, %v4790_v60 }
 0x21a   : > { %v4848_v38 = vpop.eup %3552  ;;  %v927_v42 = vmul.f32 1.442695, %v901_v19 }
 0x21b   : > { %v3555_v11 = vpop.eup %3554  ;;  %1051 = vadd.xlane.f32.xlu1 %v947_v23  ;;  %v946_v52 = vsel %vm4353_vm13, %v4848_v38, 0.0  ;;  %v1446_v23 = vadd.f32 %v4684_v30, %v4793_v61  ;;  %v3320_v30 = vpack.c.bf16 %v4832_v15, %v4837_v16  ;;  %vm1461_vm3 = vcmp.gt.f32.partialorder %v1445_v4, 0.0 }
 0x21c   : > { %3558 = vpow2.f32 %v927_v42  ;;  %v942_v53 = vsel %vm4345_vm8, %v3555_v11, 0.0  ;;  %v3317_v0 = vpack.c.bf16 %v3555_v11, %v3543_v24  ;;  %v3557_v34 = vpop.eup %3556  ;;  %vm6285_vm8 = vmpackc.low %vm4400_vm7, %vm4298_vm2 }
 0x21d   : > { %3560 = vpow2.f32 %v919_v48  ;;  %1041 = vadd.xlane.f32.xlu0 %v942_v53  ;;  %1049 = vadd.xlane.f32.xlu2 %v946_v52  ;;  %v950_v10 = vsel %vm4475_vm4, %v3557_v34, 0.0  ;;  %vm1462_vm9 = vcmp.gt.f32.partialorder %v1446_v23, 0.0 }
 0x21e   : > { %3318 = vmatmul.msk.bf16.gmra.mxu0 %vm6276_vm1, %v3317_v0  ;;  %v859_v47 = vpop.permute.xlu1 %858  ;;  %3562 = vpow2.f32 %v935_v13  ;;  %vm6308_vm1 = vmpackc.low %vm6404_vm0, %vm4450_vm14 }
 0x21f   : > { %v879_v35 = vpop.permute.xlu0 %878  ;;  %v900_v50 = vsub.f32 %v4430_v46, %v859_v47 }
 0x220   : > { %v904_v24 = vsub.f32 %v4469_v58, %v879_v35 }
 0x221   : > { %v925_v43 = vmul.f32 1.442695, %v900_v50 }
 0x222   : > { %v3559_v1 = vpop.eup %3558  ;;  %v933_v2 = vmul.f32 1.442695, %v904_v24 }
 0x223   : > { %v3561_v8 = vpop.eup %3560  ;;  %3564 = vpow2.f32 %v925_v43  ;;  %1057 = vadd.xlane.f32.xlu1 %v950_v10  ;;  %v949_v19 = vsel %vm4406_vm11, %v3559_v1, 0.0 }
 0x224   : > { %3566 = vpow2.f32 %v933_v2  ;;  %v945_v62 = vsel %vm4349_vm12, %v3561_v8, 0.0  ;;  %v4874_v58 = vpop.eup %3562 }
 0x225   : > { %1047 = vadd.xlane.f32.xlu0 %v945_v62  ;;  %1055 = vadd.xlane.f32.xlu2 %v949_v19  ;;  %v953_v0 = vsel %vm4495_vm5, %v4874_v58, 0.0  ;;  %v3329_v62 = vpack.c.bf16 %v3557_v34, %v3559_v1  ;;  %v3323_v19 = vpack.c.bf16 %v4848_v38, %v3561_v8  ;;  %v6407_v38 = vsub.f32 %v4543_v14, %v4548_v18 }
 0x226   : > { %v874_v46 = vpop.permute.xlu1 %873  ;;  %v6408_v8 = vsub.f32 %v4525_v7, %v4531_v12  ;;  %v6410_v14 = vsub.f32 %v4594_v45, %v4602_v17  ;;  %v6411_v7 = vsub.f32 %v4565_v59, %v4573_v3  ;;  %v6414_v3 = vld [vmem:[#allocation7_spill] sm:$0xff]  ;;  %v6457_v59 = vld [vmem:[#allocation24_spill] sm:$0xff] }
 0x227   : > { %v903_v48 = vsub.f32 %v4465_v57, %v874_v46  ;;  %v1477_v57 = vmul.f32 0.01, %v1445_v4  ;;  %v1476_v46 = vmul.f32 0.01, %v4732_v22  ;;  %v973_v34 = vmul.f32 1.442695, %v6407_v38 }
 0x228   : > { %v981_v18 = vmul.f32 1.442695, %v6410_v14  ;;  %v977_v12 = vmul.f32 1.442695, %v6411_v7  ;;  %v6415_v45 = vsub.f32 %v4523_v6, %v6414_v3  ;;  %v5016_v38 = vld [vmem:[#allocation2 + $0x80] sm:$0xff]  ;;  %v6429_v14 = vld [vmem:[#allocation25_spill] sm:$0xff] }
 0x229   : > { %v3565_v42 = vpop.eup %3564  ;;  %v931_v11 = vmul.f32 1.442695, %v903_v48  ;;  %v1493_v13 = vsel %vm1461_vm3, %v1445_v4, %v1477_v57  ;;  %vm6286_vm3 = vmpackc.low %vm4353_vm13, %vm4349_vm12  ;;  %v971_v4 = vmul.f32 1.442695, %v6408_v8  ;;  %v6418_v57 = vld [vmem:[#allocation22_spill] sm:$0xff] }
 0x22a   : > { %v3567_v53 = vpop.eup %3566  ;;  %v948_v60 = vsel %vm6404_vm0, %v3565_v42, 0.0  ;;  %v3326_v52 = vpack.c.bf16 %v3565_v42, %v3551_v39  ;;  %v1478_v39 = vmul.f32 0.01, %v1446_v23  ;;  %v4911_v24 = vsel %vm4495_vm5, %v1493_v13, -1e+30  ;;  %v4959_v42 = vld [vmem:[#allocation2 + $0x88] sm:$0xff] }
 0x22b   : > { %3568 = vpow2.f32 %v931_v11  ;;  %1063 = vadd.xlane.f32.xlu1 %v953_v0  ;;  %v952_v61 = vsel %vm6406_vm10, %v3567_v53, 0.0  ;;  %6409 = vst [vmem:[#allocation45_spill] sm:$0xff] %v4959_v42  ;;  %v975_v17 = vmul.f32 1.442695, %v6415_v45  ;;  %v6432_v3 = vld [vmem:[#allocation14_spill] sm:$0xff]  ;;  %v6433_v45 = vld [vmem:[#allocation16_spill] sm:$0xff] }
 0x22c   : > { %3327 = vmatmul.msk.bf16.vlgmr.msra.gmra.mxu2 %vm6308_vm1, %v3326_v52  ;;  %v1494_v50 = vsel %vm1462_vm9, %v1446_v23, %v1478_v39  ;;  %vm6288_vm9 = vmpackc.low %vm4475_vm4, %vm4406_vm11  ;;  %v6417_v52 = vld [vmem:[#allocation19_spill] sm:$0xff]  ;;  %v6420_v39 = vld [vmem:[#allocation10_spill] sm:$0xff]  ;;  %vm6495_vm1 = vnez %v6334_v63 }
 0x22d   : > { %1053 = vadd.xlane.f32.xlu0 %v948_v60  ;;  %1061 = vadd.xlane.f32.xlu2 %v952_v61  ;;  %v4918_v2 = vsel %vm4480_vm15, %v1494_v50, -1e+30  ;;  %6426 = vst [vmem:[#allocation19_spill] sm:$0xff] %v5016_v38 }
 0x22e   : > { %3321 = vmatmul.msk.bf16.gmra.mxu0 %vm6285_vm8, %v3320_v30  ;;  %v889_v15 = vpop.permute.xlu1 %888  ;;  %vm1460_vm8 = vcmp.gt.f32.partialorder %v4732_v22, 0.0  ;;  %v6419_v30 = vsub.f32 %v6417_v52, %v6418_v57 }
 0x22f   : > { %v906_v16 = vsub.f32 %v4487_v44, %v889_v15  ;;  %v1492_v1 = vsel %vm1460_vm8, %v4732_v22, %v1476_v46  ;;  %vm6287_vm8 = vmpackc.low %vm6406_vm10, %vm6405_vm6  ;;  %v6421_v15 = vld [vmem:[#allocation12_spill] sm:$0xff] }
 0x230   : > { %v4956_v48 = vsel %vm6406_vm10, %v1492_v1, -1e+30  ;;  %v987_v61 = vmul.f32 1.442695, %v6419_v30 }
 0x231   : > { %v3569_v47 = vpop.eup %3568  ;;  %v937_v35 = vmul.f32 1.442695, %v906_v16  ;;  %v6422_v16 = vsub.f32 %v6420_v39, %v6421_v15  ;;  %v6458_v15 = vld [vmem:[#allocation26_spill] sm:$0xff] }
 0x232   : > { %v951_v43 = vsel %vm6405_vm6, %v3569_v47, 0.0  ;;  %v3332_v23 = vpack.c.bf16 %v3567_v53, %v3569_v47  ;;  %v4992_v53 = vld [vmem:[#allocation2 + $0xa0] sm:$0xff]  ;;  %v6513_v32 = vld [vmem:[#allocation45_spill] sm:$0xff] }
 0x233   : > { %3570 = vpow2.f32 %v937_v35  ;;  %1556 = vmax.xlane.f32.xlu1 %v4911_v24  ;;  %6416 = vst [vmem:[#allocation7_spill] sm:$0xff] %v4992_v53  ;;  %v983_v13 = vmul.f32 1.442695, %v6422_v16 }
 0x234   : > { %3572 = vpow2.f32 %v973_v34  ;;  %v5018_v34 = vld [vmem:[#allocation2 + $0x90] sm:$0xff]  ;;  %v6511_v25 = vld [vmem:[#allocation19_spill] sm:$0xff] }
 0x235   : > { %1059 = vadd.xlane.f32.xlu0 %v951_v43  ;;  %1558 = vmax.xlane.f32.xlu2 %v4918_v2  ;;  %3574 = vpow2.f32 %v971_v4  ;;  %6427 = vst [vmem:[#allocation22_spill] sm:$0xff] %v5018_v34  ;;  %v5022_v4 = vld [vmem:[#allocation2 + $0xb8] sm:$0xff] }
 0x236   : > { %3576 = vpow2.f32 %v981_v18  ;;  %6428 = vst [vmem:[#allocation10_spill] sm:$0xff] %v5022_v4  ;;  %v6430_v18 = vld [vmem:[#allocation27_spill] sm:$0xff] }
 0x237   : > { %3578 = vpow2.f32 %v977_v12  ;;  %v6431_v7 = vsub.f32 %v6429_v14, %v6430_v18  ;;  %v5076_v18 = vld [vmem:[#allocation2 + $0xd0] sm:$0xff] }
 0x238   : > { %3580 = vpow2.f32 %v975_v17  ;;  %v6434_v17 = vsub.f32 %v6432_v3, %v6433_v45 }
 0x239   : > { %v4921_v44 = vpop.eup %3570  ;;  %3582 = vpow2.f32 %v987_v61  ;;  %v993_v12 = vmul.f32 1.442695, %v6431_v7  ;;  %v6443_v7 = vld [vmem:[#allocation28_spill] sm:$0xff] }
 0x23a   : > { %v954_v10 = vsel %vm4480_vm15, %v4921_v44, 0.0  ;;  %v4971_v11 = vpop.eup %3572  ;;  %3584 = vpow2.f32 %v983_v13  ;;  %v989_v52 = vmul.f32 1.442695, %v6434_v17  ;;  %v3335_v61 = vpack.c.bf16 %v4921_v44, %v4874_v58  ;;  %v6437_v58 = vld [vmem:[#allocation11_spill] sm:$0xff]  ;;  %v6438_v44 = vld [vmem:[#allocation13_spill] sm:$0xff] }
 0x23b   : > { %v4976_v60 = vpop.eup %3574 }
 0x23c   : > { %3330 = vmatmul.msk.bf16.gmra.mxu2 %vm6288_vm9, %v3329_v62  ;;  %v5000_v35 = vpop.eup %3576  ;;  %v6424_v62 = vld [vmem:[#allocation9_spill] sm:$0xff] }
 0x23d   : > { %1065 = vadd.xlane.f32.xlu0 %v954_v10  ;;  %v5005_v6 = vpop.eup %3578  ;;  %v6423_v10 = vld [vmem:[#allocation8_spill] sm:$0xff]  ;;  %6442 = vst [vmem:[#allocation9_spill] sm:$0xff] %v5076_v18 }
 0x23e   : > { %3324 = vmatmul.msk.bf16.gmra.mxu0 %vm6286_vm3, %v3323_v19  ;;  %vm6413_vm3 = vcmask 7168   ;;  %v6425_v19 = vsub.f32 %v6423_v10, %v6424_v62  ;;  %v5020_v1 = vpop.eup %3580  ;;  %v6439_v10 = vsub.f32 %v6437_v58, %v6438_v44 }
 0x23f   : > { %v5043_v39 = vpop.eup %3582 }
 0x240   : > { %v979_v46 = vmul.f32 1.442695, %v6425_v19  ;;  %v5052_v13 = vpop.eup %3584  ;;  %v985_v62 = vmul.f32 1.442695, %v6439_v10  ;;  %v5070_v19 = vld [vmem:[#allocation2 + $0x98] sm:$0xff] }
 0x241   : > { %6440 = vst [vmem:[#allocation12_spill] sm:$0xff] %v5070_v19 }
 0x242   : > { %3586 = vpow2.f32 %v979_v46  ;;  %v5072_v46 = vld [vmem:[#allocation2 + $0xa8] sm:$0xff] }
 0x243   : > { %3588 = vpow2.f32 %v993_v12  ;;  %6441 = vst [vmem:[#allocation8_spill] sm:$0xff] %v5072_v46  ;;  %v6444_v12 = vld [vmem:[#allocation29_spill] sm:$0xff] }
 0x244   : > { %3590 = vpow2.f32 %v989_v52  ;;  %v6447_v52 = vld [vmem:[#allocation18_spill] sm:$0xff] }
 0x245   : > { %1554 = vmax.xlane.f32.xlu0 %v4956_v48  ;;  %3592 = vpow2.f32 %v985_v62 }
 0x24a   : > { %v1531_v22 = vpop.xlane.xlu0 %1530 }
 0x24b   : > { %v4974_v0 = vmax.f32 %v4959_v42, %v1531_v22 }
 0x24c   : > { %1123 = vperm.xlu1 %3537, %v4971_v11   ;;  %3333 = vmatmul.msk.bf16.gmra.mxu2 %vm6287_vm8, %v3332_v23  ;;  %vm6435_vm8 = vcmask 7168  }
 0x24d   : > { %6412 = vst [vmem:[#allocation46_spill] sm:$0xff] %v4974_v0  ;;  %1118 = vperm.xlu2 %3538, %v4976_v60   ;;  %vm6436_vm9 = vmmov %vm6435_vm8 }
 0x24e   : > { %2092 = vst.msk [vmem:[#allocation2 + $0x88] sm:$0xff] %vm6413_vm3, %v4974_v0 }
 0x252   : > { %v1537_v47 = vpop.xlane.xlu0 %1536 }
 0x253   : > { %v5003_v50 = vmax.f32 %v4992_v53, %v1537_v47 }
 0x254   : > { %1143 = vperm.xlu1 %3537, %v5000_v35  }
 0x255   : > { %2095 = vst.msk [vmem:[#allocation2 + $0xa0] sm:$0xff] %vm6413_vm3, %v5003_v50  ;;  %1133 = vperm.xlu2 %3538, %v5005_v6   ;;  %vm6289_vm3 = vmpackc.low %vm4480_vm15, %vm4495_vm5 }
 0x256   : > { %vm6498_vm5 = vmpackc.low %vm6404_vm0, %vm4450_vm14 }
 0x258   : > { %v1529_v8 = vpop.xlane.xlu2 %1528 }
 0x259   : > { %1128 = vperm.xlu0 %3539, %v5020_v1   ;;  %v5029_v22 = vmax.f32 %v5016_v38, %v1529_v8  ;;  %v1533_v23 = vpop.xlane.xlu1 %1532  ;;  %v5074_v8 = vpop.eup %3586 }
 0x25a   : > { %v1543_v57 = vpop.xlane.xlu0 %1542  ;;  %v5039_v30 = vmax.f32 %v5018_v34, %v1533_v23  ;;  %v6445_v23 = vsub.f32 %v6443_v7, %v6444_v12  ;;  %v5091_v43 = vpop.eup %3588 }
 0x25b   : > { %2091 = vst.msk [vmem:[#allocation2 + $0x80] sm:$0xff] %vm6435_vm8, %v5029_v22  ;;  %v5050_v16 = vmax.f32 %v5022_v4, %v1543_v57  ;;  %v6448_v57 = vld [vmem:[#allocation21_spill] sm:$0xff]  ;;  %v5100_v62 = vpop.eup %3590 }
 0x25c   : > { %2093 = vst.msk [vmem:[#allocation2 + $0x90] sm:$0xff] %vm6436_vm9, %v5039_v30  ;;  %1158 = vperm.xlu1 %3537, %v5043_v39   ;;  %3336 = vmatmul.msk.bf16.gmra.mxu2 %vm6289_vm3, %v3335_v61  ;;  %v999_v3 = vmul.f32 1.442695, %v6445_v23  ;;  %v6449_v61 = vsub.f32 %v6447_v52, %v6448_v57  ;;  %vm6450_vm9 = vmmov %vm6435_vm8  ;;  %v6452_v23 = vld [vmem:[#allocation15_spill] sm:$0xff]  ;;  %v5117_v7 = vpop.eup %3592  ;;  %v5146_v4 = vld [vmem:[#allocation2 + $0xd8] sm:$0xff] }
 0x25d   : > { %2098 = vst.msk [vmem:[#allocation2 + $0xb8] sm:$0xff] %vm6435_vm8, %v5050_v16  ;;  %1148 = vperm.xlu2 %3538, %v5052_v13   ;;  %vm6451_vm3 = vmmov %vm6435_vm8 }
 0x25e   : > { %v995_v58 = vmul.f32 1.442695, %v6449_v61  ;;  %3594 = vpow2.f32 %v999_v3  ;;  %v5113_v61 = vld [vmem:[#allocation2 + $0xb0] sm:$0xff]  ;;  %6465 = vst [vmem:[#allocation11_spill] sm:$0xff] %v5146_v4 }
 0x25f   : > { %6455 = vst [vmem:[#allocation27_spill] sm:$0xff] %v5113_v61 }
 0x260   : > { %v1535_v14 = vpop.xlane.xlu2 %1534  ;;  %3596 = vpow2.f32 %v995_v58 }
 0x261   : > { %1138 = vperm.xlu0 %3539, %v5074_v8   ;;  %v5083_v45 = vmax.f32 %v5070_v19, %v1535_v14  ;;  %v1539_v17 = vpop.xlane.xlu1 %1538 }
 0x262   : > { %v1549_v44 = vpop.xlane.xlu0 %1548  ;;  %v5089_v10 = vmax.f32 %v5072_v46, %v1539_v17  ;;  %v6453_v17 = vld [vmem:[#allocation17_spill] sm:$0xff] }
 0x263   : > { %6446 = vst [vmem:[#allocation25_spill] sm:$0xff] %v5083_v45  ;;  %v5098_v14 = vmax.f32 %v5076_v18, %v1549_v44  ;;  %v6454_v52 = vsub.f32 %v6452_v23, %v6453_v17  ;;  %v5115_v44 = vld [vmem:[#allocation2 + $0xc0] sm:$0xff]  ;;  %v6459_v18 = vsub.f32 %v6457_v59, %v6458_v15  ;;  %v6461_v59 = vld [vmem:[#allocation20_spill] sm:$0xff]  ;;  %v6462_v15 = vld [vmem:[#allocation23_spill] sm:$0xff] }
 0x264   : > { %2094 = vst.msk [vmem:[#allocation2 + $0x98] sm:$0xff] %vm6450_vm9, %v5083_v45  ;;  %1173 = vperm.xlu1 %3537, %v5091_v43   ;;  %v5129_v17 = vpop.eup %3594  ;;  %vm6460_vm9 = vmmov %vm6451_vm3 }
 0x265   : > { %2096 = vst.msk [vmem:[#allocation2 + $0xa8] sm:$0xff] %vm6435_vm8, %v5089_v10  ;;  %1163 = vperm.xlu2 %3538, %v5100_v62   ;;  %v991_v57 = vmul.f32 1.442695, %v6454_v52  ;;  %v1001_v23 = vmul.f32 1.442695, %v6459_v18  ;;  %vm6466_vm8 = vmmov %vm6451_vm3 }
 0x266   : > { %2101 = vst.msk [vmem:[#allocation2 + $0xd0] sm:$0xff] %vm6451_vm3, %v5098_v14  ;;  %v5133_v52 = vpop.eup %3596 }
 0x267   : > { %6456 = vst [vmem:[#allocation14_spill] sm:$0xff] %v5115_v44  ;;  %3598 = vpow2.f32 %v991_v57  ;;  %v5144_v57 = vld [vmem:[#allocation2 + $0xc8] sm:$0xff] }
 0x268   : > { %v1541_v3 = vpop.xlane.xlu2 %1540  ;;  %3600 = vpow2.f32 %v1001_v23  ;;  %6464 = vst [vmem:[#allocation16_spill] sm:$0xff] %v5144_v57  ;;  %v1005_v23 = vld [vmem:[#allocation3 + $0x10] sm:$0xff] }
 0x269   : > { %1153 = vperm.xlu0 %3539, %v5117_v7   ;;  %v5121_v12 = vmax.f32 %v5113_v61, %v1541_v3  ;;  %v1545_v47 = vpop.xlane.xlu1 %1544  ;;  %v1021_v46 = vmul.f32 %v5020_v1, %v1005_v23  ;;  %v6471_v1 = vld [vmem:[#allocation31_spill] sm:$0xff] }
 0x26a   : > { %v5127_v58 = vmax.f32 %v5115_v44, %v1545_v47  ;;  %v6463_v47 = vsub.f32 %v6461_v59, %v6462_v15 }
 0x26b   : > { %2097 = vst.msk [vmem:[#allocation2 + $0xb0] sm:$0xff] %vm6451_vm3, %v5121_v12 }
 0x26c   : > { %2099 = vst.msk [vmem:[#allocation2 + $0xc0] sm:$0xff] %vm6460_vm9, %v5127_v58  ;;  %1188 = vperm.xlu1 %3537, %v5129_v17   ;;  %v997_v18 = vmul.f32 1.442695, %v6463_v47  ;;  %vm6468_vm9 = vmmov %vm6451_vm3 }
 0x26d   : > { %1178 = vperm.xlu2 %3538, %v5133_v52   ;;  %v5148_v53 = vpop.eup %3598 }
 0x26e   : > { %3602 = vpow2.f32 %v997_v18  ;;  %v5161_v59 = vpop.eup %3600 }
 0x270   : > { %v1547_v61 = vpop.xlane.xlu2 %1546 }
 0x271   : > { %1168 = vperm.xlu0 %3539, %v5148_v53   ;;  %v5152_v3 = vmax.f32 %v5144_v57, %v1547_v61  ;;  %v1551_v44 = vpop.xlane.xlu1 %1550  ;;  %v5169_v61 = vld [vmem:[#allocation2 + $0xe0] sm:$0xff]  ;;  %v1004_v57 = vld [vmem:[#allocation3 + $0x8] sm:$0xff] }
 0x272   : > { %v5155_v19 = vmax.f32 %v5146_v4, %v1551_v44  ;;  %6467 = vst [vmem:[#allocation13_spill] sm:$0xff] %v5169_v61  ;;  %v1003_v4 = vld [vmem:[#allocation3] sm:$0xff]  ;;  %v1020_v42 = vmul.f32 %v4971_v11, %v1004_v57 }
 0x273   : > { %2100 = vst.msk [vmem:[#allocation2 + $0xc8] sm:$0xff] %vm6466_vm8, %v5152_v3  ;;  %vm6469_vm8 = vmmov %vm6451_vm3  ;;  %v6472_v11 = vld [vmem:[#allocation30_spill] sm:$0xff] }
 0x274   : > { %2102 = vst.msk [vmem:[#allocation2 + $0xd8] sm:$0xff] %vm6451_vm3, %v5155_v19  ;;  %1583 = vperm.xlu1 %3537, %v4974_v0   ;;  %v5171_v44 = vpop.eup %3602  ;;  %v1019_v0 = vmul.f32 %v4976_v60, %v1003_v4  ;;  %v1007_v60 = vld [vmem:[#allocation3 + $0x20] sm:$0xff] }
 0x275   : > { %1193 = vperm.xlu2 %3538, %v5161_v59   ;;  %v1023_v4 = vmul.f32 %v5074_v8, %v1007_v60  ;;  %v1011_v57 = vld [vmem:[#allocation3 + $0x40] sm:$0xff] }
 0x276   : > { %v1027_v8 = vmul.f32 %v5043_v39, %v1011_v57  ;;  %v1013_v39 = vld [vmem:[#allocation3 + $0x50] sm:$0xff] }
 0x278   : > { %v1553_v47 = vpop.xlane.xlu2 %1552 }
 0x279   : > { %1183 = vperm.xlu0 %3539, %v5171_v44   ;;  %v5175_v18 = vmax.f32 %v5169_v61, %v1553_v47 }
 0x27b   : > { %2103 = vst.msk [vmem:[#allocation2 + $0xe0] sm:$0xff] %vm6468_vm9, %v5175_v18  ;;  %vm6470_vm9 = vmmov %vm6451_vm3 }
 0x27c   : > { %1593 = vperm.xlu1 %3537, %v5083_v45   ;;  %v1008_v45 = vld [vmem:[#allocation3 + $0x28] sm:$0xff] }
 0x27d   : > { %1588 = vperm.xlu2 %3538, %v5039_v30  }
 0x27e   : > { %v1040_v34 = vpop.xlane.xlu1 %1039 }
 0x27f   : > { %v1069_v47 = vadd.f32 %v1040_v34, %v1021_v46  ;;  %v1036_v38 = vpop.xlane.xlu0 %1035 }
 0x280   : > { %v1038_v36 = vpop.xlane.xlu2 %1037  ;;  %v1067_v15 = vadd.f32 %v1036_v38, %v1019_v0  ;;  %v1024_v0 = vmul.f32 %v5000_v35, %v1008_v45  ;;  %v1006_v35 = vld [vmem:[#allocation3 + $0x18] sm:$0xff] }
 0x281   : > { %1086 = vst.msk [vmem:[#allocation3 + $0x10] sm:$0xff] %vm6469_vm8, %v1069_v47  ;;  %1578 = vperm.xlu0 %3539, %v5029_v22   ;;  %v1068_v61 = vadd.f32 %v1038_v36, %v1020_v42  ;;  %vm6473_vm8 = vmmov %vm6451_vm3  ;;  %v6474_v42 = vld [vmem:[#allocation32_spill] sm:$0xff]  ;;  %v1010_v45 = vld [vmem:[#allocation3 + $0x38] sm:$0xff]  ;;  %v1022_v47 = vmul.f32 %v5005_v6, %v1006_v35 }
 0x282   : > { %1084 = vst.msk [vmem:[#allocation3] sm:$0xff] %vm6451_vm3, %v1067_v15  ;;  %v6475_v15 = vld [vmem:[#allocation34_spill] sm:$0xff]  ;;  %v1026_v60 = vmul.f32 %v5117_v7, %v1010_v45  ;;  %v1009_v6 = vld [vmem:[#allocation3 + $0x30] sm:$0xff] }
 0x283   : > { %1085 = vst.msk [vmem:[#allocation3 + $0x8] sm:$0xff] %vm6470_vm9, %v1068_v61  ;;  %vm6476_vm9 = vmmov %vm6451_vm3 }
 0x284   : > { %1998 = vrot.lane.b32.xlu1 %v6471_v1, %s3899_s2 }
 0x285   : > { %2000 = vrot.lane.b32.xlu2 %v6472_v11, %s3899_s2 }
 0x286   : > { %v1046_v38 = vpop.xlane.xlu1 %1045 }
 0x287   : > { %v1072_v34 = vadd.f32 %v1046_v38, %v1024_v0 }
 0x288   : > { %v1044_v36 = vpop.xlane.xlu2 %1043 }
 0x289   : > { %1089 = vst.msk [vmem:[#allocation3 + $0x28] sm:$0xff] %vm6473_vm8, %v1072_v34  ;;  %1996 = vrot.lane.b32.xlu0 %v6474_v42, %s3899_s2  ;;  %v1071_v46 = vadd.f32 %v1044_v36, %v1023_v4  ;;  %v1014_v4 = vld [vmem:[#allocation3 + $0x58] sm:$0xff]  ;;  %vm6477_vm8 = vmmov %vm6451_vm3 }
 0x28a   : > { %v5200_v23 = vpop.f32.mrf.mxu0  ;;  %v1030_v7 = vmul.f32 %v5091_v43, %v1014_v4  ;;  %v1016_v43 = vld [vmem:[#allocation3 + $0x68] sm:$0xff] }
 0x28b   : > { %1088 = vst.msk [vmem:[#allocation3 + $0x20] sm:$0xff] %vm6451_vm3, %v1071_v46  ;;  %v1025_v46 = vmul.f32 %v5052_v13, %v1009_v6  ;;  %v6480_v13 = vld [vmem:[#allocation36_spill] sm:$0xff] }
 0x28c   : > { %1994 = vrot.lane.b32.xlu1 %v6475_v15, %s3899_s2  ;;  %v1029_v15 = vmul.f32 %v5148_v53, %v1013_v39  ;;  %v1012_v53 = vld [vmem:[#allocation3 + $0x48] sm:$0xff]  ;;  %v5242_v39 = vld [vmem:[#allocation2 + $0xf8] sm:$0xff] }
 0x28d   : > { %1598 = vperm.xlu2 %3538, %v5003_v50  }
 0x28e   : > { %v1052_v61 = vpop.xlane.xlu1 %1051 }
 0x28f   : > { %v1075_v1 = vadd.f32 %v1052_v61, %v1027_v8 }
 0x290   : > { %v1042_v11 = vpop.xlane.xlu0 %1041  ;;  %v1050_v0 = vpop.xlane.xlu2 %1049 }
 0x291   : > { %v1070_v38 = vadd.f32 %v1042_v11, %v1022_v47  ;;  %1092 = vst.msk [vmem:[#allocation3 + $0x40] sm:$0xff] %vm6476_vm9, %v1075_v1  ;;  %1618 = vperm.xlu0 %3539, %v5127_v58   ;;  %v1074_v34 = vadd.f32 %v1050_v0, %v1026_v60  ;;  %vm6478_vm9 = vmmov %vm6451_vm3  ;;  %v1017_v47 = vld [vmem:[#allocation3 + $0x70] sm:$0xff]  ;;  %v1032_v0 = vmul.f32 %v5171_v44, %v1016_v43 }
 0x292   : > { %v5211_v36 = vpop.f32.mrf.mxu0  ;;  %v1033_v1 = vmul.f32 %v5129_v17, %v1017_v47  ;;  %v1015_v17 = vld [vmem:[#allocation3 + $0x60] sm:$0xff] }
 0x293   : > { %1087 = vst.msk [vmem:[#allocation3 + $0x18] sm:$0xff] %vm6477_vm8, %v1070_v38  ;;  %vm6479_vm8 = vmmov %vm6451_vm3  ;;  %v1100_v47 = vld [vmem:[#allocation4] sm:$0xff] }
 0x294   : > { %1091 = vst.msk [vmem:[#allocation3 + $0x38] sm:$0xff] %vm6451_vm3, %v1074_v34  ;;  %1623 = vperm.xlu1 %3537, %v5152_v3  }
 0x295   : > { %1992 = vrot.lane.b32.xlu2 %v4716_v49, %s3899_s2 }
 0x296   : > { %v1058_v42 = vpop.xlane.xlu1 %1057 }
 0x297   : > { %v1078_v57 = vadd.f32 %v1058_v42, %v1030_v7  ;;  %v1031_v7 = vmul.f32 %v5133_v52, %v1015_v17 }
 0x298   : > { %v1048_v35 = vpop.xlane.xlu0 %1047  ;;  %v1056_v45 = vpop.xlane.xlu2 %1055 }
 0x299   : > { %v1073_v8 = vadd.f32 %v1048_v35, %v1025_v46  ;;  %1095 = vst.msk [vmem:[#allocation3 + $0x58] sm:$0xff] %vm6478_vm9, %v1078_v57  ;;  %1988 = vrot.lane.b32.xlu0 %v4747_v5, %s3899_s2  ;;  %v1077_v61 = vadd.f32 %v1056_v45, %v1029_v15  ;;  %v1028_v5 = vmul.f32 %v5100_v62, %v1012_v53  ;;  %vm6481_vm9 = vmmov %vm6451_vm3  ;;  %v5239_v62 = vld [vmem:[#allocation2 + $0xf0] sm:$0xff] }
 0x29b   : > { %1090 = vst.msk [vmem:[#allocation3 + $0x30] sm:$0xff] %vm6479_vm8, %v1073_v8  ;;  %v5224_v49 = vpop.f32.mrf.mxu0  ;;  %vm6482_vm8 = vmmov %vm6451_vm3  ;;  %v1018_v8 = vld [vmem:[#allocation3 + $0x78] sm:$0xff] }
 0x29c   : > { %1094 = vst.msk [vmem:[#allocation3 + $0x50] sm:$0xff] %vm6451_vm3, %v1077_v61  ;;  %1986 = vrot.lane.b32.xlu1 %v4759_v21, %s3899_s2  ;;  %v1034_v53 = vmul.f32 %v5161_v59, %v1018_v8 }
 0x29d   : > { %1990 = vrot.lane.b32.xlu2 %v6480_v13, %s3899_s2 }
 0x29e   : > { %v1064_v60 = vpop.xlane.xlu1 %1063 }
 0x29f   : > { %v1081_v11 = vadd.f32 %v1064_v60, %v1033_v1 }
 0x2a0   : > { %v1054_v38 = vpop.xlane.xlu0 %1053  ;;  %v1062_v34 = vpop.xlane.xlu2 %1061 }
 0x2a1   : > { %v1076_v4 = vadd.f32 %v1054_v38, %v1028_v5  ;;  %1098 = vst.msk [vmem:[#allocation3 + $0x70] sm:$0xff] %vm6481_vm9, %v1081_v11  ;;  %1633 = vperm.xlu0 %3539, %v5155_v19   ;;  %v1080_v21 = vadd.f32 %v1062_v34, %v1032_v0  ;;  %vm6483_vm9 = vmmov %vm6451_vm3  ;;  %v5270_v0 = vld [vmem:[#allocation2 + $0xe8] sm:$0xff]  ;;  %v1103_v38 = vld [vmem:[#allocation4 + $0x18] sm:$0xff] }
 0x2a3   : > { %1093 = vst.msk [vmem:[#allocation3 + $0x48] sm:$0xff] %vm6482_vm8, %v1076_v4  ;;  %v1284_v6 = vpop.f32.mrf.mxu0  ;;  %vm6484_vm8 = vmmov %vm6451_vm3 }
 0x2a4   : > { %1097 = vst.msk [vmem:[#allocation3 + $0x68] sm:$0xff] %vm6451_vm3, %v1080_v21  ;;  %1638 = vperm.xlu1 %3537, %v5175_v18  }
 0x2a5   : > { %1628 = vperm.xlu2 %3538, %v5098_v14  }
 0x2a6   : > { %v1557_v44 = vpop.xlane.xlu1 %1556 }
 0x2a7   : > { %v5246_v42 = vmax.f32 %v5239_v62, %v1557_v44 }
 0x2a8   : > { %v1060_v46 = vpop.xlane.xlu0 %1059  ;;  %v1559_v57 = vpop.xlane.xlu2 %1558 }
 0x2a9   : > { %v1079_v15 = vadd.f32 %v1060_v46, %v1031_v7  ;;  %v1734_v35 = vsub.f32 %v5239_v62, %v5246_v42  ;;  %2105 = vst.msk [vmem:[#allocation2 + $0xf0] sm:$0xff] %vm6483_vm9, %v5246_v42  ;;  %1603 = vperm.xlu0 %3539, %v5089_v10   ;;  %v5254_v45 = vmax.f32 %v5242_v39, %v1559_v57  ;;  %vm6307_vm9 = vcmask 523264   ;;  %v1101_v46 = vld [vmem:[#allocation4 + $0x8] sm:$0xff] }
 0x2ab   : > { %1096 = vst.msk [vmem:[#allocation3 + $0x60] sm:$0xff] %vm6484_vm8, %v1079_v15  ;;  %v5262_v61 = vpop.f32.mrf.mxu0  ;;  %vm6485_vm8 = vmmov %vm6451_vm3  ;;  %v1106_v15 = vld [vmem:[#allocation4 + $0x30] sm:$0xff] }
 0x2ac   : > { %2106 = vst.msk [vmem:[#allocation2 + $0xf8] sm:$0xff] %vm6451_vm3, %v5254_v45  ;;  %1648 = vperm.xlu1 %3537, %v5246_v42  }
 0x2af   : > { %v1297_v43 = vpop.f32.mrf.mxu2 }
 0x2b0   : > { %v1066_v13 = vpop.xlane.xlu0 %1065  ;;  %v1119_v1 = vpop.permute.xlu2 %1118 }
 0x2b1   : > { %v1082_v60 = vadd.f32 %v1066_v13, %v1034_v53  ;;  %1608 = vperm.xlu0 %3539, %v5121_v12   ;;  %v1196_v5 = vmul.f32 %v1119_v1, %v1100_v47 }
 0x2b3   : > { %1099 = vst.msk [vmem:[#allocation3 + $0x78] sm:$0xff] %vm6485_vm8, %v1082_v60  ;;  %v1317_v11 = vadd.f32 %v5200_v23, %v1196_v5  ;;  %v1289_v59 = vpop.f32.mrf.mxu0  ;;  %vm6488_vm8 = vnez %v6316_v55 }
 0x2b4   : > { %1613 = vperm.xlu1 %3537, %v5050_v16  }
 0x2b5   : > { %1334 = vst.msk [vmem:[#allocation4] sm:$0xff] %vm6307_vm9, %v1317_v11 }
 0x2b7   : > { %v1299_v34 = vpop.f32.mrf.mxu2 }
 0x2b8   : > { %v1555_v4 = vpop.xlane.xlu0 %1554  ;;  %v1134_v21 = vpop.permute.xlu2 %1133 }
 0x2b9   : > { %v5273_v17 = vmax.f32 %v5270_v0, %v1555_v4  ;;  %v1199_v44 = vmul.f32 %v1134_v21, %v1103_v38  ;;  %v1109_v38 = vld [vmem:[#allocation4 + $0x48] sm:$0xff] }
 0x2bb   : > { %v1733_v7 = vsub.f32 %v5270_v0, %v5273_v17  ;;  %2104 = vst.msk [vmem:[#allocation2 + $0xe8] sm:$0xff] %vm6451_vm3, %v5273_v17  ;;  %v1320_v23 = vadd.f32 %v1284_v6, %v1199_v44  ;;  %1643 = vperm.xlu2 %3538, %v5273_v17   ;;  %v1292_v60 = vpop.f32.mrf.mxu0  ;;  %v1105_v6 = vld [vmem:[#allocation4 + $0x28] sm:$0xff]  ;;  %vm6490_vm3 = vnez %v6328_v54 }
 0x2bd   : > { %1337 = vst.msk [vmem:[#allocation4 + $0x18] sm:$0xff] %vm6307_vm9, %v1320_v23  ;;  %v1762_v62 = vmul.f32 1.442695, %v1733_v7 }
 0x2be   : > { %v1124_v57 = vpop.permute.xlu1 %1123 }
 0x2bf   : > { %v1197_v8 = vmul.f32 %v1124_v57, %v1101_v46  ;;  %v5281_v47 = vpop.f32.mrf.mxu2  ;;  %v1102_v57 = vld [vmem:[#allocation4 + $0x10] sm:$0xff] }
 0x2c0   : > { %v1149_v53 = vpop.permute.xlu2 %1148 }
 0x2c1   : > { %v1318_v13 = vadd.f32 %v5211_v36, %v1197_v8  ;;  %v1202_v1 = vmul.f32 %v1149_v53, %v1106_v15  ;;  %v1108_v53 = vld [vmem:[#allocation4 + $0x40] sm:$0xff] }
 0x2c3   : > { %1335 = vst.msk [vmem:[#allocation4 + $0x8] sm:$0xff] %vm6307_vm9, %v1318_v13  ;;  %v1323_v5 = vadd.f32 %v1292_v60, %v1202_v1  ;;  %1653 = vperm.xlu2 %3538, %v5254_v45   ;;  %v1112_v60 = vld [vmem:[#allocation4 + $0x60] sm:$0xff] }
 0x2c5   : > { %1340 = vst.msk [vmem:[#allocation4 + $0x30] sm:$0xff] %vm6307_vm9, %v1323_v5 }
 0x2c6   : > { %v1144_v11 = vpop.permute.xlu1 %1143 }
 0x2c7   : > { %v1201_v4 = vmul.f32 %v1144_v11, %v1105_v6  ;;  %v1304_v21 = vpop.f32.mrf.mxu2 }
 0x2c8   : > { %v1164_v44 = vpop.permute.xlu2 %1163 }
 0x2c9   : > { %v1322_v23 = vadd.f32 %v1289_v59, %v1201_v4  ;;  %v1205_v46 = vmul.f32 %v1164_v44, %v1109_v38  ;;  %v1104_v38 = vld [vmem:[#allocation4 + $0x20] sm:$0xff] }
 0x2cb   : > { %1339 = vst.msk [vmem:[#allocation4 + $0x28] sm:$0xff] %vm6307_vm9, %v1322_v23  ;;  %v1326_v36 = vadd.f32 %v1299_v34, %v1205_v46  ;;  %v1129_v15 = vpop.permute.xlu0 %1128  ;;  %v1111_v23 = vld [vmem:[#allocation4 + $0x58] sm:$0xff] }
 0x2cc   : > { %v1198_v8 = vmul.f32 %v1129_v15, %v1102_v57 }
 0x2cd   : > { %1343 = vst.msk [vmem:[#allocation4 + $0x48] sm:$0xff] %vm6307_vm9, %v1326_v36 }
 0x2ce   : > { %v1319_v13 = vadd.f32 %v5224_v49, %v1198_v8  ;;  %v1159_v1 = vpop.permute.xlu1 %1158 }
 0x2cf   : > { %v1204_v5 = vmul.f32 %v1159_v1, %v1108_v53  ;;  %v1307_v52 = vpop.f32.mrf.mxu2  ;;  %v1294_v1 = vpop.f32.mrf.mxu0 }
 0x2d0   : > { %1336 = vst.msk [vmem:[#allocation4 + $0x10] sm:$0xff] %vm6307_vm9, %v1319_v13  ;;  %v1179_v6 = vpop.permute.xlu2 %1178 }
 0x2d1   : > { %v1325_v59 = vadd.f32 %v1297_v43, %v1204_v5  ;;  %v1208_v11 = vmul.f32 %v1179_v6, %v1112_v60  ;;  %v1107_v43 = vld [vmem:[#allocation4 + $0x38] sm:$0xff] }
 0x2d3   : > { %1342 = vst.msk [vmem:[#allocation4 + $0x40] sm:$0xff] %vm6307_vm9, %v1325_v59  ;;  %v1329_v34 = vadd.f32 %v1307_v52, %v1208_v11  ;;  %v1139_v4 = vpop.permute.xlu0 %1138  ;;  %v1114_v52 = vld [vmem:[#allocation4 + $0x70] sm:$0xff] }
 0x2d4   : > { %v1200_v44 = vmul.f32 %v1139_v4, %v1104_v38  ;;  %v6486_v38 = vld [vmem:[#allocation38_spill] sm:$0xff]  ;;  %v1110_v4 = vld [vmem:[#allocation4 + $0x50] sm:$0xff] }
 0x2d5   : > { %1346 = vst.msk [vmem:[#allocation4 + $0x60] sm:$0xff] %vm6307_vm9, %v1329_v34 }
 0x2d6   : > { %v1321_v49 = vadd.f32 %v5262_v61, %v1200_v44  ;;  %v1174_v46 = vpop.permute.xlu1 %1173  ;;  %v1115_v44 = vld [vmem:[#allocation4 + $0x78] sm:$0xff] }
 0x2d7   : > { %v1207_v57 = vmul.f32 %v1174_v46, %v1111_v23  ;;  %v1309_v36 = vpop.f32.mrf.mxu2 }
 0x2d8   : > { %1338 = vst.msk [vmem:[#allocation4 + $0x20] sm:$0xff] %vm6307_vm9, %v1321_v49  ;;  %v1194_v15 = vpop.permute.xlu2 %1193 }
 0x2d9   : > { %v1328_v8 = vadd.f32 %v1304_v21, %v1207_v57  ;;  %v1211_v46 = vmul.f32 %v1194_v15, %v1115_v44 }
 0x2db   : > { %1345 = vst.msk [vmem:[#allocation4 + $0x58] sm:$0xff] %vm6307_vm9, %v1328_v8  ;;  %v1154_v53 = vpop.permute.xlu0 %1153 }
 0x2dc   : > { %v1203_v13 = vmul.f32 %v1154_v53, %v1107_v43  ;;  %v6487_v43 = vld [vmem:[#allocation33_spill] sm:$0xff] }
 0x2de   : > { %v1324_v60 = vadd.f32 %v1294_v1, %v1203_v13  ;;  %v1189_v5 = vpop.permute.xlu1 %1188 }
 0x2df   : > { %v1210_v6 = vmul.f32 %v1189_v5, %v1114_v52  ;;  %v1312_v59 = vpop.f32.mrf.mxu2  ;;  %v1113_v5 = vld [vmem:[#allocation4 + $0x68] sm:$0xff] }
 0x2e0   : > { %1341 = vst.msk [vmem:[#allocation4 + $0x38] sm:$0xff] %vm6307_vm9, %v1324_v60  ;;  %v1589_v61 = vpop.permute.xlu2 %1588 }
 0x2e1   : > { %v1331_v11 = vadd.f32 %v1312_v59, %v1210_v6  ;;  %v1658_v34 = vsub.f32 %v6486_v38, %v1589_v61 }
 0x2e3   : > { %1348 = vst.msk [vmem:[#allocation4 + $0x70] sm:$0xff] %vm6307_vm9, %v1331_v11  ;;  %v1676_v21 = vmul.f32 1.442695, %v1658_v34  ;;  %v1169_v23 = vpop.permute.xlu0 %1168 }
 0x2e4   : > { %v1206_v49 = vmul.f32 %v1169_v23, %v1110_v4  ;;  %v6489_v4 = vld [vmem:[#allocation35_spill] sm:$0xff] }
 0x2e5   : > { %3604 = vpow2.f32 %v1676_v21 }
 0x2e6   : > { %v1327_v57 = vadd.f32 %v5281_v47, %v1206_v49  ;;  %v1584_v8 = vpop.permute.xlu1 %1583 }
 0x2e7   : > { %v1657_v53 = vsub.f32 %v6487_v43, %v1584_v8  ;;  %v1314_v13 = vpop.f32.mrf.mxu2  ;;  %v6492_v8 = vld [vmem:[#allocation40_spill] sm:$0xff] }
 0x2e8   : > { %1344 = vst.msk [vmem:[#allocation4 + $0x50] sm:$0xff] %vm6307_vm9, %v1327_v57  ;;  %v1332_v52 = vadd.f32 %v1314_v13, %v1211_v46  ;;  %v2001_v1 = vpop.permute.xlu2 %2000  ;;  %v6491_v46 = vld [vmem:[#allocation37_spill] sm:$0xff] }
 0x2e9   : > { %v1674_v60 = vmul.f32 1.442695, %v1657_v53  ;;  %2010 = vmatpush.bf16.msra.mxu1 %v2001_v1  ;;  %3460 = vmatpush.bf16.msra.mxu3 %v2001_v1 }
 0x2ea   : > { %1349 = vst.msk [vmem:[#allocation4 + $0x78] sm:$0xff] %vm6307_vm9, %v1332_v52 }
 0x2eb   : > { %v5303_v6 = vpop.eup %3604  ;;  %3606 = vpow2.f32 %v1674_v60  ;;  %v1184_v15 = vpop.permute.xlu0 %1183 }
 0x2ec   : > { %v1209_v59 = vmul.f32 %v1184_v15, %v1113_v5  ;;  %v1706_v47 = vsel %vm6488_vm8, %v5303_v6, 0.0 }
 0x2ed   : > { %1805 = vadd.xlane.f32.xlu1 %v1706_v47 }
 0x2ee   : > { %v1330_v61 = vadd.f32 %v1309_v36, %v1209_v59  ;;  %v1594_v11 = vpop.permute.xlu1 %1593 }
 0x2ef   : > { %v1659_v43 = vsub.f32 %v6492_v8, %v1594_v11 }
 0x2f0   : > { %1347 = vst.msk [vmem:[#allocation4 + $0x68] sm:$0xff] %vm6307_vm9, %v1330_v61  ;;  %v1599_v38 = vpop.permute.xlu2 %1598  ;;  %vm6493_vm9 = vnez %v6318_v56 }
 0x2f1   : > { %v3607_v34 = vpop.eup %3606  ;;  %v1660_v44 = vsub.f32 %v6489_v4, %v1599_v38  ;;  %v1678_v13 = vmul.f32 1.442695, %v1659_v43  ;;  %v6494_v38 = vld [vmem:[#allocation44_spill] sm:$0xff]  ;;  %vm6497_vm15 = vmpackc.low %vm6490_vm3, %vm6493_vm9 }
 0x2f2   : > { %v1705_v21 = vsel %vm6490_vm3, %v3607_v34, 0.0 }
 0x2f3   : > { %v1680_v23 = vmul.f32 1.442695, %v1660_v44  ;;  %v1579_v49 = vpop.permute.xlu0 %1578  ;;  %1803 = vadd.xlane.f32.xlu0 %v1705_v21 }
 0x2f4   : > { %v1656_v57 = vsub.f32 %v6491_v46, %v1579_v49 }
 0x2f5   : > { %3608 = vpow2.f32 %v1680_v23 }
 0x2f6   : > { %v1672_v53 = vmul.f32 1.442695, %v1656_v57  ;;  %v1999_v36 = vpop.permute.xlu1 %1998 }
 0x2f7   : > { %2011 = vmatpush.bf16.msra.mxu1 %v1999_v36  ;;  %3461 = vmatpush.bf16.msra.mxu3 %v1999_v36 }
 0x2f8   : > { %3610 = vpow2.f32 %v1672_v53  ;;  %v1993_v60 = vpop.permute.xlu2 %1992 }
 0x2f9   : > { %3612 = vpow2.f32 %v1678_v13 }
 0x2fb   : > { %v5314_v52 = vpop.eup %3608  ;;  %v1997_v1 = vpop.permute.xlu0 %1996 }
 0x2fc   : > { %2012 = vmatpush.bf16.msra.mxu1 %v1997_v1  ;;  %3462 = vmatpush.bf16.msra.mxu3 %v1997_v1  ;;  %v1708_v5 = vsel %vm4298_vm2, %v5314_v52, 0.0 }
 0x2fd   : > { %1809 = vadd.xlane.f32.xlu0 %v1708_v5 }
 0x2fe   : > { %v3611_v15 = vpop.eup %3610  ;;  %v1995_v59 = vpop.permute.xlu1 %1994 }
 0x2ff   : > { %v1704_v47 = vsel %vm6493_vm9, %v3611_v15, 0.0  ;;  %v3613_v11 = vpop.eup %3612  ;;  %v3338_v1 = vpack.c.bf16 %v3607_v34, %v3611_v15 }
 0x300   : > { %1801 = vadd.xlane.f32.xlu2 %v1704_v47  ;;  %2013 = vmatpush.bf16.msra.mxu1 %v1995_v59  ;;  %v1991_v44 = vpop.permute.xlu2 %1990  ;;  %v1707_v49 = vsel %vm6495_vm1, %v3613_v11, 0.0 }
 0x301   : > { %3463 = vmatpush.bf16.msra.mxu3 %v1995_v59 }
 0x303   : > { %v1619_v61 = vpop.permute.xlu0 %1618 }
 0x304   : > { %v1664_v4 = vsub.f32 %v6494_v38, %v1619_v61  ;;  %2014 = vmatpush.bf16.msra.mxu1 %v1993_v60 }
 0x305   : > { %3464 = vmatpush.bf16.msra.mxu3 %v1993_v60 }
 0x306   : > { %v1688_v21 = vmul.f32 1.442695, %v1664_v4  ;;  %v1624_v23 = vpop.permute.xlu1 %1623  ;;  %v6499_v4 = vld [vmem:[#allocation41_spill] sm:$0xff] }
 0x307   : > { %v1665_v46 = vsub.f32 %v4799_v27, %v1624_v23  ;;  %v6496_v27 = vld [vmem:[#allocation42_spill] sm:$0xff] }
 0x308   : > { %1807 = vadd.xlane.f32.xlu2 %v1707_v49  ;;  %2015 = vmatpush.bf16.msra.mxu1 %v1991_v44  ;;  %3614 = vpow2.f32 %v1688_v21  ;;  %v1629_v36 = vpop.permute.xlu2 %1628 }
 0x309   : > { %v1690_v57 = vmul.f32 1.442695, %v1665_v46  ;;  %3465 = vmatpush.bf16.msra.mxu3 %v1991_v44  ;;  %v1666_v5 = vsub.f32 %v6496_v27, %v1629_v36  ;;  %v3341_v46 = vpack.c.bf16 %v3613_v11, %v5303_v6  ;;  %v6501_v36 = vld [vmem:[#allocation43_spill] sm:$0xff] }
 0x30a   : > { %v6503_v27 = vld [vmem:[#allocation39_spill] sm:$0xff] }
 0x30b   : > { %3616 = vpow2.f32 %v1690_v57  ;;  %v1989_v8 = vpop.permute.xlu0 %1988  ;;  %v1692_v61 = vmul.f32 1.442695, %v1666_v5 }
 0x30c   : > { %2016 = vmatpush.bf16.msra.mxu1 %v1989_v8 }
 0x30d   : > { %3466 = vmatpush.bf16.msra.mxu3 %v1989_v8 }
 0x30e   : > { %v1987_v43 = vpop.permute.xlu1 %1986  ;;  %v3615_v53 = vpop.eup %3614 }
 0x310   : > { %2017 = vmatpush.bf16.msra.mxu1 %v1987_v43 }
 0x311   : > { %v5325_v13 = vpop.eup %3616  ;;  %3467 = vmatpush.bf16.msra.mxu3 %v1987_v43 }
 0x312   : > { %v3350_v60 = vpack.c.bf16 %v5325_v13, %v3615_v53  ;;  %v1713_v33 = vsel %vm6404_vm0, %v5325_v13, 0.0 }
 0x313   : > { %v1634_v59 = vpop.permute.xlu0 %1633  ;;  %3339 = vmatmul.msk.bf16.vlgmr.msra.gmra.mxu1 %vm6497_vm15, %v3338_v1  ;;  %vm6502_vm15 = vmpackc.low %vm4475_vm4, %vm4406_vm11 }
 0x314   : > { %v1667_v47 = vsub.f32 %v4804_v9, %v1634_v59  ;;  %3351 = vmatmul.msk.bf16.vlgmr.msra.gmra.mxu3 %vm6498_vm5, %v3350_v60  ;;  %vm6500_vm5 = vmpackc.low %vm6495_vm1, %vm6488_vm8 }
 0x315   : > { %v1644_v23 = vpop.permute.xlu2 %1643  ;;  %vm6505_vm1 = vmpackc.low %vm6406_vm10, %vm6405_vm6 }
 0x316   : > { %v1694_v34 = vmul.f32 1.442695, %v1667_v47  ;;  %v1639_v15 = vpop.permute.xlu1 %1638  ;;  %v1669_v57 = vsub.f32 %v4956_v48, %v1644_v23 }
 0x317   : > { %v1668_v49 = vsub.f32 %v4812_v20, %v1639_v15  ;;  %v1712_v15 = vsel %vm4450_vm14, %v3615_v53, 0.0  ;;  %vm6504_vm14 = vmpackc.low %vm4400_vm7, %vm4298_vm2  ;;  %vm6506_vm2 = vnez %v6365_v51 }
 0x318   : > { %3618 = vpow2.f32 %v1694_v34  ;;  %v1698_v11 = vmul.f32 1.442695, %v1669_v57 }
 0x319   : > { %3620 = vpow2.f32 %v1692_v61  ;;  %v1696_v20 = vmul.f32 1.442695, %v1668_v49 }
 0x31b   : > { %v1604_v38 = vpop.permute.xlu0 %1603 }
 0x31c   : > { %v1661_v54 = vsub.f32 %v6499_v4, %v1604_v38 }
 0x31d   : > { %v1654_v4 = vpop.permute.xlu2 %1653 }
 0x31e   : > { %v1682_v44 = vmul.f32 1.442695, %v1661_v54  ;;  %v1649_v56 = vpop.permute.xlu1 %1648  ;;  %v3619_v21 = vpop.eup %3618 }
 0x31f   : > { %v3621_v9 = vpop.eup %3620  ;;  %v1670_v47 = vsub.f32 %v4911_v24, %v1649_v56  ;;  %v1671_v24 = vsub.f32 %v4918_v2, %v1654_v4  ;;  %v6525_v4 = vld [vmem:[#allocation14_spill] sm:$0xff] }
 0x320   : > { %3622 = vpow2.f32 %v1682_v44  ;;  %v3353_v8 = vpack.c.bf16 %v3619_v21, %v3621_v9  ;;  %v1714_v37 = vsel %vm4406_vm11, %v3621_v9, 0.0  ;;  %vm6509_vm11 = vnez %v6508_v40 }
 0x321   : > { %v1700_v23 = vmul.f32 1.442695, %v1670_v47  ;;  %v1702_v28 = vmul.f32 1.442695, %v1671_v24  ;;  %v6512_v9 = vsub.f32 %v6511_v25, %v5029_v22  ;;  %v6523_v47 = vld [vmem:[#allocation7_spill] sm:$0xff] }
 0x323   : > { %v1609_v43 = vpop.permute.xlu0 %1608  ;;  %3342 = vmatmul.msk.bf16.gmra.mxu1 %vm6500_vm5, %v3341_v46  ;;  %v1736_v57 = vmul.f32 1.442695, %v6512_v9  ;;  %v1773_v9 = vld [vmem:[#allocation3 + $0xa0] sm:$0xff] }
 0x324   : > { %v1662_v1 = vsub.f32 %v6501_v36, %v1609_v43  ;;  %3354 = vmatmul.msk.bf16.gmra.mxu3 %vm6502_vm15, %v3353_v8  ;;  %v6514_v8 = vld [vmem:[#allocation46_spill] sm:$0xff] }
 0x325   : > { %v6515_v31 = vsub.f32 %v6513_v32, %v6514_v8  ;;  %v6516_v36 = vld [vmem:[#allocation22_spill] sm:$0xff] }
 0x326   : > { %v3623_v6 = vpop.eup %3622  ;;  %v1684_v48 = vmul.f32 1.442695, %v1662_v1  ;;  %v1614_v60 = vpop.permute.xlu1 %1613  ;;  %v6517_v1 = vsub.f32 %v6516_v36, %v5039_v30 }
 0x327   : > { %v1709_v63 = vsel %vm4400_vm7, %v3623_v6, 0.0  ;;  %v1663_v55 = vsub.f32 %v6503_v27, %v1614_v60  ;;  %v3344_v44 = vpack.c.bf16 %v3623_v6, %v5314_v52  ;;  %v1715_v52 = vsel %vm4475_vm4, %v3619_v21, 0.0  ;;  %vm6507_vm7 = vmpackc.low %vm4353_vm13, %vm4349_vm12 }
 0x328   : > { %3624 = vpow2.f32 %v1684_v48  ;;  %1811 = vadd.xlane.f32.xlu1 %v1709_v63  ;;  %vm6510_vm4 = vmpackc.low %vm6509_vm11, %vm6506_vm2  ;;  %v1738_v43 = vmul.f32 1.442695, %v6515_v31  ;;  %v1740_v51 = vmul.f32 1.442695, %v6517_v1  ;;  %v6520_v48 = vld [vmem:[#allocation25_spill] sm:$0xff]  ;;  %v1769_v1 = vld [vmem:[#allocation3 + $0x80] sm:$0xff] }
 0x329   : > { %3626 = vpow2.f32 %v1696_v20  ;;  %v1686_v5 = vmul.f32 1.442695, %v1663_v55  ;;  %v6518_v20 = vld [vmem:[#allocation8_spill] sm:$0xff]  ;;  %v1764_v31 = vmul.f32 1.442695, %v1734_v35  ;;  %v6539_v35 = vsub.f32 %v5242_v39, %v5254_v45 }
 0x32a   : > { %3628 = vpow2.f32 %v1698_v11  ;;  %v1725_v6 = vsub.f32 %v6518_v20, %v5089_v10  ;;  %v6519_v11 = vld [vmem:[#allocation12_spill] sm:$0xff] }
 0x32b   : > { %3630 = vpow2.f32 %v1686_v5  ;;  %v6521_v60 = vsub.f32 %v6519_v11, %v6520_v48  ;;  %v6522_v5 = vld [vmem:[#allocation27_spill] sm:$0xff]  ;;  %v1766_v11 = vmul.f32 1.442695, %v6539_v35  ;;  %v1868_v35 = vld [vmem:[#allocation4 + $0x90] sm:$0xff] }
 0x32c   : > { %3632 = vpow2.f32 %v1700_v23  ;;  %v1746_v22 = vmul.f32 1.442695, %v1725_v6 }
 0x32d   : > { %3634 = vpow2.f32 %v1702_v28  ;;  %v1742_v63 = vmul.f32 1.442695, %v6521_v60  ;;  %v1770_v28 = vld [vmem:[#allocation3 + $0x88] sm:$0xff] }
 0x32e   : > { %v3625_v59 = vpop.eup %3624  ;;  %3636 = vpow2.f32 %v1736_v57  ;;  %v6536_v57 = vld [vmem:[#allocation13_spill] sm:$0xff] }
 0x32f   : > { %v3627_v34 = vpop.eup %3626  ;;  %v1710_v61 = vsel %vm4349_vm12, %v3625_v59, 0.0  ;;  %3638 = vpow2.f32 %v1738_v43 }
 0x330   : > { %v3629_v38 = vpop.eup %3628  ;;  %1817 = vadd.xlane.f32.xlu1 %v1712_v15  ;;  %1813 = vadd.xlane.f32.xlu2 %v1710_v61  ;;  %v1716_v53 = vsel %vm6405_vm6, %v3627_v34, 0.0  ;;  %3640 = vpow2.f32 %v1740_v51  ;;  %v1771_v15 = vld [vmem:[#allocation3 + $0x90] sm:$0xff] }
 0x331   : > { %v3631_v54 = vpop.eup %3630  ;;  %v3356_v46 = vpack.c.bf16 %v3629_v38, %v3627_v34  ;;  %v1717_v29 = vsel %vm6406_vm10, %v3629_v38, 0.0  ;;  %3642 = vpow2.f32 %v1742_v63  ;;  %v6524_v34 = vsub.f32 %v6523_v47, %v5003_v50  ;;  %v1772_v63 = vld [vmem:[#allocation3 + $0x98] sm:$0xff] }
 0x332   : > { %v1711_v49 = vsel %vm4353_vm13, %v3631_v54, 0.0  ;;  %v3633_v2 = vpop.eup %3632  ;;  %v3347_v21 = vpack.c.bf16 %v3631_v54, %v3625_v59  ;;  %v1726_v59 = vsub.f32 %v6522_v5, %v5121_v12  ;;  %3644 = vpow2.f32 %v1746_v22  ;;  %v6527_v12 = vld [vmem:[#allocation10_spill] sm:$0xff] }
 0x333   : > { %3345 = vmatmul.msk.bf16.gmra.mxu1 %vm6504_vm14, %v3344_v44  ;;  %1815 = vadd.xlane.f32.xlu0 %v1711_v49  ;;  %v1718_v56 = vsel %vm6506_vm2, %v3633_v2, 0.0  ;;  %v3635_v26 = vpop.eup %3634  ;;  %v1744_v10 = vmul.f32 1.442695, %v6524_v34  ;;  %v6526_v54 = vsub.f32 %v6525_v4, %v5127_v58  ;;  %vm6528_vm10 = vcmask 7168   ;;  %v1776_v4 = vld [vmem:[#allocation3 + $0xb8] sm:$0xff] }
 0x334   : > { %3357 = vmatmul.msk.bf16.gmra.mxu3 %vm6505_vm1, %v3356_v46  ;;  %v3359_v13 = vpack.c.bf16 %v3635_v26, %v3633_v2  ;;  %v1719_v41 = vsel %vm6509_vm11, %v3635_v26, 0.0  ;;  %v3637_v27 = vpop.eup %3636  ;;  %v1748_v61 = vmul.f32 1.442695, %v1726_v59  ;;  %v1727_v46 = vsub.f32 %v6527_v12, %v5050_v16  ;;  %vm6533_vm12 = vmmov %vm6528_vm10 }
 0x335   : > { %v3639_v55 = vpop.eup %3638  ;;  %v1752_v44 = vmul.f32 1.442695, %v6526_v54  ;;  %3646 = vpow2.f32 %v1744_v10  ;;  %vm6538_vm13 = vmmov %vm6528_vm10  ;;  %v1775_v10 = vld [vmem:[#allocation3 + $0xb0] sm:$0xff] }
 0x336   : > { %v3641_v30 = vpop.eup %3640  ;;  %3648 = vpow2.f32 %v1748_v61  ;;  %v1750_v58 = vmul.f32 1.442695, %v1727_v46  ;;  %v1786_v2 = vmul.f32 %v3639_v55, %v1770_v28  ;;  %vm6540_vm0 = vmmov %vm6528_vm10  ;;  %v1778_v28 = vld [vmem:[#allocation3 + $0xc8] sm:$0xff] }
 0x337   : > { %v5421_v38 = vpop.eup %3642  ;;  %v1787_v23 = vmul.f32 %v3641_v30, %v1771_v15  ;;  %3650 = vpow2.f32 %v1752_v44  ;;  %vm6541_vm6 = vmmov %vm6540_vm0  ;;  %v1777_v15 = vld [vmem:[#allocation3 + $0xc0] sm:$0xff] }
 0x338   : > { %1823 = vadd.xlane.f32.xlu1 %v1715_v52  ;;  %1819 = vadd.xlane.f32.xlu2 %v1713_v33  ;;  %v5427_v49 = vpop.eup %3644  ;;  %v6529_v52 = vld [vmem:[#allocation16_spill] sm:$0xff]  ;;  %3652 = vpow2.f32 %v1750_v58  ;;  %vm6542_vm9 = vmmov %vm6540_vm0  ;;  %v1780_v58 = vld [vmem:[#allocation3 + $0xd8] sm:$0xff] }
 0x339   : > { %v6530_v33 = vsub.f32 %v6529_v52, %v5152_v3  ;;  %v6534_v3 = vld [vmem:[#allocation9_spill] sm:$0xff]  ;;  %vm6543_vm8 = vmmov %vm6540_vm0 }
 0x33a   : > { %vm6544_vm3 = vmmov %vm6540_vm0 }
 0x33b   : > { %1821 = vadd.xlane.f32.xlu0 %v1714_v37  ;;  %v1754_v37 = vmul.f32 1.442695, %v6530_v33  ;;  %vm6545_vm5 = vmmov %vm6540_vm0 }
 0x33c   : > { %vm6546_vm15 = vmmov %vm6540_vm0 }
 0x33d   : > { %3654 = vpow2.f32 %v1754_v37  ;;  %vm6547_vm14 = vmmov %vm6540_vm0 }
 0x33e   : > { %vm6548_vm1 = vmmov %vm6540_vm0 }
 0x33f   : > { %vm6549_vm2 = vmmov %vm6540_vm0 }
 0x340   : > { %1825 = vadd.xlane.f32.xlu2 %v1716_v53  ;;  %1829 = vadd.xlane.f32.xlu1 %v1718_v56  ;;  %v3647_v53 = vpop.eup %3646  ;;  %v6531_v56 = vld [vmem:[#allocation11_spill] sm:$0xff]  ;;  %vm6551_vm11 = vmmov %vm6540_vm0 }
 0x341   : > { %v6532_v16 = vsub.f32 %v6531_v56, %v5155_v19  ;;  %v6537_v19 = vsub.f32 %v6536_v57, %v5175_v18  ;;  %v1789_v36 = vmul.f32 %v3647_v53, %v1773_v9  ;;  %v1785_v18 = vmul.f32 %v3637_v27, %v1769_v1 }
 0x343   : > { %3348 = vmatmul.msk.bf16.gmra.mxu1 %vm6507_vm7, %v3347_v21  ;;  %1827 = vadd.xlane.f32.xlu0 %v1717_v29  ;;  %v1758_v26 = vmul.f32 1.442695, %v6532_v16  ;;  %v3649_v29 = vpop.eup %3648  ;;  %v1760_v32 = vmul.f32 1.442695, %v6537_v19  ;;  %v1782_v19 = vld [vmem:[#allocation3 + $0xe8] sm:$0xff]  ;;  %vm6550_vm7 = vmmov %vm6540_vm0 }
 0x344   : > { %3360 = vmatmul.msk.bf16.gmra.mxu3 %vm6510_vm4, %v3359_v13  ;;  %v3651_v40 = vpop.eup %3650  ;;  %v1791_v61 = vmul.f32 %v3649_v29, %v1775_v10  ;;  %vm6552_vm4 = vmmov %vm6540_vm0 }
 0x345   : > { %3656 = vpow2.f32 %v1758_v26  ;;  %v3653_v8 = vpop.eup %3652 }
 0x346   : > { %v5449_v43 = vpop.eup %3654 }
 0x347   : > { %v1794_v33 = vmul.f32 %v5449_v43, %v1778_v28 }
 0x348   : > { %1831 = vadd.xlane.f32.xlu2 %v1719_v41  ;;  %v6535_v41 = vsub.f32 %v6534_v3, %v5098_v14  ;;  %v1781_v3 = vld [vmem:[#allocation3 + $0xe0] sm:$0xff] }
 0x34a   : > { %v1756_v25 = vmul.f32 1.442695, %v6535_v41  ;;  %v1783_v41 = vld [vmem:[#allocation3 + $0xf0] sm:$0xff] }
 0x34b   : > { %v3657_v51 = vpop.eup %3656 }
 0x34c   : > { %3658 = vpow2.f32 %v1756_v25  ;;  %v1796_v37 = vmul.f32 %v3657_v51, %v1780_v58 }
 0x34d   : > { %3660 = vpow2.f32 %v1760_v32 }
 0x34e   : > { %3662 = vpow2.f32 %v1764_v31 }
 0x34f   : > { %3664 = vpow2.f32 %v1762_v62 }
 0x350   : > { %3666 = vpow2.f32 %v1766_v11 }
 0x352   : > { %v3659_v48 = vpop.eup %3658 }
 0x353   : > { %v3661_v60 = vpop.eup %3660 }
 0x354   : > { %v3663_v22 = vpop.eup %3662  ;;  %v1797_v9 = vmul.f32 %v3661_v60, %v1781_v3 }
 0x355   : > { %v3665_v7 = vpop.eup %3664  ;;  %v1799_v57 = vmul.f32 %v3663_v22, %v1783_v41  ;;  %v1873_v41 = vld [vmem:[#allocation4 + $0xb8] sm:$0xff] }
 0x356   : > { %v3667_v39 = vpop.eup %3666 }
 0x357   : > { %1884 = vperm.xlu0 %3539, %v3637_v27   ;;  %v1788_v27 = vmul.f32 %v5421_v38, %v1772_v63 }
 0x359   : > { %1889 = vperm.xlu1 %3537, %v3639_v55   ;;  %v1774_v55 = vld [vmem:[#allocation3 + $0xa8] sm:$0xff] }
 0x35a   : > { %v1790_v5 = vmul.f32 %v5427_v49, %v1774_v55 }
 0x35f   : > { %1899 = vperm.xlu0 %3539, %v5421_v38   ;;  %v1793_v38 = vmul.f32 %v3651_v40, %v1777_v15 }
 0x360   : > { %1894 = vperm.xlu2 %3538, %v3641_v30   ;;  %v1806_v50 = vpop.xlane.xlu1 %1805 }
 0x361   : > { %1909 = vperm.xlu1 %3537, %v5427_v49   ;;  %v1835_v24 = vadd.f32 %v1806_v50, %v1787_v23  ;;  %v1792_v50 = vmul.f32 %v3653_v8, %v1776_v4  ;;  %v1869_v4 = vld [vmem:[#allocation4 + $0x98] sm:$0xff] }
 0x363   : > { %1851 = vst.msk [vmem:[#allocation3 + $0x90] sm:$0xff] %vm6528_vm10, %v1835_v24  ;;  %vm6553_vm10 = vcmask 523264  }
 0x366   : > { %v1804_v21 = vpop.xlane.xlu0 %1803 }
 0x367   : > { %v1834_v13 = vadd.f32 %v1804_v21, %v1786_v2  ;;  %1904 = vperm.xlu0 %3539, %v3647_v53   ;;  %v1779_v2 = vld [vmem:[#allocation3 + $0xd0] sm:$0xff] }
 0x368   : > { %1914 = vperm.xlu2 %3538, %v3649_v29   ;;  %v1795_v21 = vmul.f32 %v3659_v48, %v1779_v2 }
 0x369   : > { %1850 = vst.msk [vmem:[#allocation3 + $0x88] sm:$0xff] %vm6533_vm12, %v1834_v13  ;;  %1924 = vperm.xlu1 %3537, %v3651_v40   ;;  %vm6554_vm12 = vmmov %vm6553_vm10 }
 0x36f   : > { %1919 = vperm.xlu0 %3539, %v3653_v8  }
 0x370   : > { %1929 = vperm.xlu2 %3538, %v5449_v43   ;;  %v1810_v14 = vpop.xlane.xlu0 %1809 }
 0x371   : > { %1939 = vperm.xlu1 %3537, %v3657_v51   ;;  %v1837_v20 = vadd.f32 %v1810_v14, %v1789_v36  ;;  %v1798_v36 = vmul.f32 %v3665_v7, %v1782_v19  ;;  %v1784_v14 = vld [vmem:[#allocation3 + $0xf8] sm:$0xff] }
 0x372   : > { %v1877_v19 = vld [vmem:[#allocation4 + $0xd8] sm:$0xff] }
 0x373   : > { %1853 = vst.msk [vmem:[#allocation3 + $0xa0] sm:$0xff] %vm6538_vm13, %v1837_v20  ;;  %v1802_v6 = vpop.xlane.xlu2 %1801  ;;  %vm6555_vm13 = vmmov %vm6553_vm10 }
 0x374   : > { %v1833_v42 = vadd.f32 %v1802_v6, %v1785_v18  ;;  %v1800_v18 = vmul.f32 %v3667_v39, %v1784_v14 }
 0x376   : > { %1849 = vst.msk [vmem:[#allocation3 + $0x80] sm:$0xff] %vm6540_vm0, %v1833_v42  ;;  %vm6556_vm0 = vmmov %vm6553_vm10 }
 0x377   : > { %1934 = vperm.xlu0 %3539, %v3659_v48  }
 0x378   : > { %1944 = vperm.xlu2 %3538, %v3661_v60  }
 0x379   : > { %1954 = vperm.xlu1 %3537, %v3663_v22  }
 0x37b   : > { %v1808_v0 = vpop.xlane.xlu2 %1807 }
 0x37c   : > { %v1836_v17 = vadd.f32 %v1808_v0, %v1788_v27  ;;  %v1866_v27 = vld [vmem:[#allocation4 + $0x80] sm:$0xff]  ;;  %v1872_v0 = vld [vmem:[#allocation4 + $0xb0] sm:$0xff] }
 0x37e   : > { %1852 = vst.msk [vmem:[#allocation3 + $0x98] sm:$0xff] %vm6541_vm6, %v1836_v17  ;;  %vm6557_vm6 = vmmov %vm6556_vm0 }
 0x37f   : > { %1949 = vperm.xlu0 %3539, %v3665_v7   ;;  %v1867_v7 = vld [vmem:[#allocation4 + $0x88] sm:$0xff] }
 0x380   : > { %1959 = vperm.xlu2 %3538, %v3667_v39  }
 0x390   : > { %v5462_v45 = vpop.f32.mrf.mxu1 }
 0x397   : > { %v5467_v34 = vpop.f32.mrf.mxu3 }
 0x398   : > { %v5465_v59 = vpop.f32.mrf.mxu1 }
 0x39b   : > { %v1812_v30 = vpop.xlane.xlu1 %1811 }
 0x39c   : > { %v1838_v47 = vadd.f32 %v1812_v30, %v1790_v5 }
 0x39e   : > { %1854 = vst.msk [vmem:[#allocation3 + $0xa8] sm:$0xff] %vm6542_vm9, %v1838_v47  ;;  %vm6558_vm9 = vmmov %vm6556_vm0 }
 0x39f   : > { %v5472_v52 = vpop.f32.mrf.mxu3 }
 0x3a0   : > { %v2024_v46 = vpop.f32.mrf.mxu1 }
 0x3a3   : > { %v1814_v54 = vpop.xlane.xlu2 %1813  ;;  %v1818_v44 = vpop.xlane.xlu1 %1817 }
 0x3a4   : > { %v1839_v23 = vadd.f32 %v1814_v54, %v1791_v61  ;;  %v1841_v12 = vadd.f32 %v1818_v44, %v1793_v38  ;;  %v1875_v44 = vld [vmem:[#allocation4 + $0xc8] sm:$0xff] }
 0x3a6   : > { %1855 = vst.msk [vmem:[#allocation3 + $0xb0] sm:$0xff] %vm6543_vm8, %v1839_v23  ;;  %v1816_v49 = vpop.xlane.xlu0 %1815  ;;  %vm6559_vm8 = vmmov %vm6556_vm0 }
 0x3a7   : > { %1857 = vst.msk [vmem:[#allocation3 + $0xc0] sm:$0xff] %vm6544_vm3, %v1841_v12  ;;  %v1840_v24 = vadd.f32 %v1816_v49, %v1792_v50  ;;  %v5479_v25 = vpop.f32.mrf.mxu3  ;;  %v1871_v12 = vld [vmem:[#allocation4 + $0xa8] sm:$0xff]  ;;  %vm6560_vm3 = vmmov %vm6556_vm0 }
 0x3a8   : > { %v2026_v13 = vpop.f32.mrf.mxu1 }
 0x3a9   : > { %1856 = vst.msk [vmem:[#allocation3 + $0xb8] sm:$0xff] %vm6545_vm5, %v1840_v24  ;;  %vm6561_vm5 = vmmov %vm6556_vm0 }
 0x3ab   : > { %v1820_v53 = vpop.xlane.xlu2 %1819  ;;  %v1824_v56 = vpop.xlane.xlu1 %1823 }
 0x3ac   : > { %v1842_v16 = vadd.f32 %v1820_v53, %v1794_v33  ;;  %v1844_v26 = vadd.f32 %v1824_v56, %v1796_v37  ;;  %v1870_v33 = vld [vmem:[#allocation4 + $0xa0] sm:$0xff] }
 0x3ad   : > { %v1878_v37 = vld [vmem:[#allocation4 + $0xe0] sm:$0xff] }
 0x3ae   : > { %1858 = vst.msk [vmem:[#allocation3 + $0xc8] sm:$0xff] %vm6546_vm15, %v1842_v16  ;;  %v1822_v29 = vpop.xlane.xlu0 %1821  ;;  %v1874_v53 = vld [vmem:[#allocation4 + $0xc0] sm:$0xff]  ;;  %vm6562_vm15 = vmmov %vm6556_vm0 }
 0x3af   : > { %1860 = vst.msk [vmem:[#allocation3 + $0xd8] sm:$0xff] %vm6547_vm14, %v1844_v26  ;;  %v1843_v40 = vadd.f32 %v1822_v29, %v1795_v21  ;;  %v5484_v62 = vpop.f32.mrf.mxu3  ;;  %vm6563_vm14 = vmmov %vm6556_vm0 }
 0x3b0   : > { %v2029_v20 = vpop.f32.mrf.mxu1 }
 0x3b1   : > { %1859 = vst.msk [vmem:[#allocation3 + $0xd0] sm:$0xff] %vm6548_vm1, %v1843_v40  ;;  %vm6564_vm1 = vmmov %vm6556_vm0 }
 0x3b3   : > { %v1826_v32 = vpop.xlane.xlu2 %1825  ;;  %v1830_v8 = vpop.xlane.xlu1 %1829 }
 0x3b4   : > { %v1845_v31 = vadd.f32 %v1826_v32, %v1797_v9  ;;  %v1847_v43 = vadd.f32 %v1830_v8, %v1799_v57  ;;  %v1881_v9 = vld [vmem:[#allocation4 + $0xf8] sm:$0xff] }
 0x3b6   : > { %1861 = vst.msk [vmem:[#allocation3 + $0xe0] sm:$0xff] %vm6549_vm2, %v1845_v31  ;;  %v1828_v1 = vpop.xlane.xlu0 %1827  ;;  %vm6565_vm2 = vmmov %vm6556_vm0 }
 0x3b7   : > { %1863 = vst.msk [vmem:[#allocation3 + $0xf0] sm:$0xff] %vm6550_vm7, %v1847_v43  ;;  %v1846_v51 = vadd.f32 %v1828_v1, %v1798_v36  ;;  %v2049_v63 = vpop.f32.mrf.mxu3  ;;  %vm6566_vm7 = vmmov %vm6556_vm0 }
 0x3b8   : > { %v2031_v11 = vpop.f32.mrf.mxu1 }
 0x3b9   : > { %1862 = vst.msk [vmem:[#allocation3 + $0xe8] sm:$0xff] %vm6551_vm11, %v1846_v51  ;;  %vm6567_vm11 = vmmov %vm6556_vm0 }
 0x3bb   : > { %v1832_v6 = vpop.xlane.xlu2 %1831 }
 0x3bc   : > { %v1848_v42 = vadd.f32 %v1832_v6, %v1800_v18  ;;  %v1876_v18 = vld [vmem:[#allocation4 + $0xd0] sm:$0xff] }
 0x3be   : > { %1864 = vst.msk [vmem:[#allocation3 + $0xf8] sm:$0xff] %vm6552_vm4, %v1848_v42  ;;  %v1880_v42 = vld [vmem:[#allocation4 + $0xf0] sm:$0xff]  ;;  %vm6568_vm4 = vmmov %vm6556_vm0 }
 0x3bf   : > { %v5491_v54 = vpop.f32.mrf.mxu3 }
 0x3c0   : > { %v2034_v15 = vpop.f32.mrf.mxu1 }
 0x3c3   : > { %v1895_v48 = vpop.permute.xlu2 %1894 }
 0x3c4   : > { %v1964_v60 = vmul.f32 %v1895_v48, %v1868_v35 }
 0x3c6   : > { %v2061_v22 = vadd.f32 %v2024_v46, %v1964_v60 }
 0x3c7   : > { %v2054_v56 = vpop.f32.mrf.mxu3 }
 0x3c8   : > { %2077 = vst.msk [vmem:[#allocation4 + $0x90] sm:$0xff] %vm6553_vm10, %v2061_v22  ;;  %v2036_v32 = vpop.f32.mrf.mxu1  ;;  %v1879_v22 = vld [vmem:[#allocation4 + $0xe8] sm:$0xff] }
 0x3c9   : > { %v1885_v17 = vpop.permute.xlu0 %1884 }
 0x3ca   : > { %v1962_v55 = vmul.f32 %v1885_v17, %v1866_v27 }
 0x3cb   : > { %v1915_v39 = vpop.permute.xlu2 %1914  ;;  %v1890_v5 = vpop.permute.xlu1 %1889 }
 0x3cc   : > { %v1968_v30 = vmul.f32 %v1915_v39, %v1872_v0  ;;  %v2059_v47 = vadd.f32 %v5462_v45, %v1962_v55  ;;  %v1963_v10 = vmul.f32 %v1890_v5, %v1867_v7 }
 0x3ce   : > { %v2065_v61 = vadd.f32 %v2034_v15, %v1968_v30  ;;  %2075 = vst.msk [vmem:[#allocation4 + $0x80] sm:$0xff] %vm6554_vm12, %v2059_v47  ;;  %v2060_v38 = vadd.f32 %v5465_v59, %v1963_v10 }
 0x3cf   : > { %v2056_v14 = vpop.f32.mrf.mxu3 }
 0x3d0   : > { %2081 = vst.msk [vmem:[#allocation4 + $0xb0] sm:$0xff] %vm6555_vm13, %v2065_v61 }
 0x3d1   : > { %2076 = vst.msk [vmem:[#allocation4 + $0x88] sm:$0xff] %vm6556_vm0, %v2060_v38  ;;  %v1900_v23 = vpop.permute.xlu0 %1899 }
 0x3d2   : > { %v1965_v46 = vmul.f32 %v1900_v23, %v1869_v4 }
 0x3d3   : > { %v1930_v50 = vpop.permute.xlu2 %1929  ;;  %v1910_v45 = vpop.permute.xlu1 %1909 }
 0x3d4   : > { %v1971_v49 = vmul.f32 %v1930_v50, %v1875_v44  ;;  %v2062_v24 = vadd.f32 %v2026_v13, %v1965_v46  ;;  %v1967_v28 = vmul.f32 %v1910_v45, %v1871_v12 }
 0x3d6   : > { %v2068_v58 = vadd.f32 %v5472_v52, %v1971_v49  ;;  %2078 = vst.msk [vmem:[#allocation4 + $0x98] sm:$0xff] %vm6557_vm6, %v2062_v24  ;;  %v2064_v59 = vadd.f32 %v2031_v11, %v1967_v28 }
 0x3d8   : > { %2084 = vst.msk [vmem:[#allocation4 + $0xc8] sm:$0xff] %vm6558_vm9, %v2068_v58 }
 0x3d9   : > { %2080 = vst.msk [vmem:[#allocation4 + $0xa8] sm:$0xff] %vm6559_vm8, %v2064_v59  ;;  %v1905_v2 = vpop.permute.xlu0 %1904 }
 0x3da   : > { %v1966_v16 = vmul.f32 %v1905_v2, %v1870_v33 }
 0x3db   : > { %v1945_v26 = vpop.permute.xlu2 %1944  ;;  %v1925_v21 = vpop.permute.xlu1 %1924 }
 0x3dc   : > { %v1974_v29 = vmul.f32 %v1945_v26, %v1878_v37  ;;  %v2063_v13 = vadd.f32 %v2029_v20, %v1966_v16  ;;  %v1970_v40 = vmul.f32 %v1925_v21, %v1874_v53 }
 0x3de   : > { %v2071_v3 = vadd.f32 %v2049_v63, %v1974_v29  ;;  %2079 = vst.msk [vmem:[#allocation4 + $0xa0] sm:$0xff] %vm6560_vm3, %v2063_v13  ;;  %v2067_v52 = vadd.f32 %v5467_v34, %v1970_v40 }
 0x3e0   : > { %2087 = vst.msk [vmem:[#allocation4 + $0xe0] sm:$0xff] %vm6561_vm5, %v2071_v3 }
 0x3e1   : > { %2083 = vst.msk [vmem:[#allocation4 + $0xc0] sm:$0xff] %vm6562_vm15, %v2067_v52  ;;  %v1920_v57 = vpop.permute.xlu0 %1919 }
 0x3e2   : > { %v1969_v8 = vmul.f32 %v1920_v57, %v1873_v41 }
 0x3e3   : > { %v1960_v31 = vpop.permute.xlu2 %1959  ;;  %v1940_v43 = vpop.permute.xlu1 %1939 }
 0x3e4   : > { %v1977_v36 = vmul.f32 %v1960_v31, %v1881_v9  ;;  %v2066_v1 = vadd.f32 %v2036_v32, %v1969_v8  ;;  %v1973_v51 = vmul.f32 %v1940_v43, %v1877_v19 }
 0x3e6   : > { %v2074_v20 = vadd.f32 %v2056_v14, %v1977_v36  ;;  %2082 = vst.msk [vmem:[#allocation4 + $0xb8] sm:$0xff] %vm6563_vm14, %v2066_v1  ;;  %v2070_v34 = vadd.f32 %v5484_v62, %v1973_v51 }
 0x3e8   : > { %2090 = vst.msk [vmem:[#allocation4 + $0xf8] sm:$0xff] %vm6564_vm1, %v2074_v20 }
 0x3e9   : > { %2086 = vst.msk [vmem:[#allocation4 + $0xd8] sm:$0xff] %vm6565_vm2, %v2070_v34  ;;  %v1935_v6 = vpop.permute.xlu0 %1934 }
 0x3ea   : > { %v1972_v35 = vmul.f32 %v1935_v6, %v1876_v18 }
 0x3eb   : > { %v1955_v11 = vpop.permute.xlu1 %1954 }
 0x3ec   : > { %v2069_v48 = vadd.f32 %v5479_v25, %v1972_v35  ;;  %v1976_v60 = vmul.f32 %v1955_v11, %v1880_v42 }
 0x3ee   : > { %2085 = vst.msk [vmem:[#allocation4 + $0xd0] sm:$0xff] %vm6566_vm7, %v2069_v48  ;;  %v2073_v63 = vadd.f32 %v2054_v56, %v1976_v60 }
 0x3f0   : > { %2089 = vst.msk [vmem:[#allocation4 + $0xf0] sm:$0xff] %vm6567_vm11, %v2073_v63 }
 0x3f1   : > { %v1950_v27 = vpop.permute.xlu0 %1949 }
 0x3f2   : > { %v1975_v62 = vmul.f32 %v1950_v27, %v1879_v22  ;;  %2110 = sbr.rel (%p3361_p0) target bundleno = 1390 (0x56e), region = 82 }
 0x3f4   : > { %v2072_v0 = vadd.f32 %v5491_v54, %v1975_v62 }
 0x3f6   : > { %2088 = vst.msk [vmem:[#allocation4 + $0xe8] sm:$0xff] %vm6568_vm4, %v2072_v0 }
 0x3f7   : > { %v2115_v17 = vld [vmem:[#allocation3 + $0x20] sm:$0xff]  ;;  %v2113_v7 = vld [vmem:[#allocation3 + $0x10] sm:$0xff]  ;;  %v3900_v25 = vmov 0   ;;  %v2116_v61 = vld [vmem:[#allocation3 + $0x28] sm:$0xff] }
 0x3f8   : > { %v2111_v55 = vld [vmem:[#allocation3] sm:$0xff]  ;;  %3670 = vset.pattern.permute.xlu2 %v3900_v25  ;;  %3669 = vset.pattern.permute.xlu1 %v3900_v25  ;;  %v2131_v39 = vmax.f32 %v2115_v17, 1e-30  ;;  %v2129_v5 = vmax.f32 %v2113_v7, 1e-30  ;;  %v2114_v38 = vld [vmem:[#allocation3 + $0x18] sm:$0xff] }
 0x3f9   : > { %v5513_v30 = vmax.f32 %v2111_v55, 1e-30  ;;  %3668 = vset.pattern.permute.xlu0 %v3900_v25  ;;  %v2112_v23 = vld [vmem:[#allocation3 + $0x8] sm:$0xff]  ;;  %v2119_v12 = vld [vmem:[#allocation3 + $0x40] sm:$0xff]  ;;  %v5518_v46 = vmax.f32 %v2116_v61, 1e-30 }
 0x3fa   : > { %3711 = vrcp.f32 %v2131_v39  ;;  %v2212_v47 = vand.u32 2147483647, %v2131_v39  ;;  %v2214_v10 = vand.u32 2147483648, %v2131_v39  ;;  %v2184_v15 = vand.u32 2147483648, %v2129_v5  ;;  %v2118_v45 = vld [vmem:[#allocation3 + $0x38] sm:$0xff]  ;;  %v2125_v6 = vld [vmem:[#allocation3 + $0x70] sm:$0xff] }
 0x3fb   : > { %3713 = vrcp.f32 %v2129_v5  ;;  %v2182_v4 = vand.u32 2147483647, %v2129_v5  ;;  %v2152_v54 = vand.u32 2147483647, %v5513_v30  ;;  %v2154_v44 = vand.u32 2147483648, %v5513_v30 }
 0x3fc   : > { %3715 = vrcp.f32 %v5513_v30  ;;  %vm2208_vm10 = vweird.f32 %v2131_v39  ;;  %vm2178_vm12 = vweird.f32 %v2129_v5  ;;  %v5520_v50 = vmax.f32 %v2114_v38, 1e-30 }
 0x3fd   : > { %vm5522_vm13 = vcmp.eq.f32.partialorder %v2212_v47, 8.507059e+37  ;;  %v2215_v24 = vor.u32 1.1754944e-38, %v2214_v10  ;;  %v2185_v28 = vor.u32 1.1754944e-38, %v2184_v15  ;;  %vm2148_vm0 = vweird.f32 %v5513_v30 }
 0x3fe   : > { %vm5527_vm6 = vcmp.eq.f32.partialorder %v2182_v4, 8.507059e+37  ;;  %v2155_v33 = vor.u32 1.1754944e-38, %v2154_v44  ;;  %3717 = vrcp.f32 %v5518_v46  ;;  %v5532_v37 = vmax.f32 %v2112_v23, 1e-30 }
 0x3ff   : > { %v5534_v2 = vmax.f32 %v2119_v12, 1e-30  ;;  %vm5536_vm9 = vcmp.eq.f32.partialorder %v2152_v54, 8.507059e+37  ;;  %v2227_v26 = vand.u32 2147483647, %v5518_v46  ;;  %3719 = vrcp.f32 %v5520_v50 }
 0x400   : > { %v3712_v58 = vpop.eup %3711  ;;  %v5542_v21 = vmax.f32 %v2118_v45, 1e-30  ;;  %vm2223_vm3 = vweird.f32 %v5518_v46  ;;  %v2229_v40 = vand.u32 2147483648, %v5518_v46  ;;  %vm2193_vm5 = vweird.f32 %v5520_v50 }
 0x401   : > { %v3714_v53 = vpop.eup %3713  ;;  %v2204_v56 = vmul.f32 %v3712_v58, %v2131_v39  ;;  %vm2209_vm8 = vweird.f32 %v3712_v58  ;;  %v2197_v41 = vand.u32 2147483647, %v5520_v50  ;;  %v2199_v57 = vand.u32 2147483648, %v5520_v50 }
 0x402   : > { %v3716_v29 = vpop.eup %3715  ;;  %v2174_v13 = vmul.f32 %v3714_v53, %v2129_v5  ;;  %vm2179_vm15 = vweird.f32 %v3714_v53  ;;  %3721 = vrcp.f32 %v5532_v37  ;;  %vm5551_vm1 = vcmp.eq.f32.partialorder %v2227_v26, 8.507059e+37  ;;  %vm5557_vm2 = vmor %vm2208_vm10, %vm2209_vm8 }
 0x403   : > { %v2205_v3 = vsub.f32 1.0, %v2204_v56  ;;  %v2144_v52 = vmul.f32 %v3716_v29, %v5513_v30  ;;  %vm2149_vm14 = vweird.f32 %v3716_v29  ;;  %v2230_v1 = vor.u32 1.1754944e-38, %v2229_v40  ;;  %vm5565_vm11 = vmor %vm2178_vm12, %vm2179_vm15 }
 0x404   : > { %v2175_v9 = vsub.f32 1.0, %v2174_v13  ;;  %v3718_v31 = vpop.eup %3717  ;;  %vm2163_vm7 = vweird.f32 %v5532_v37  ;;  %3723 = vrcp.f32 %v5534_v2  ;;  %vm5570_vm4 = vcmp.eq.f32.partialorder %v2197_v41, 8.507059e+37  ;;  %vm5577_vm10 = vmor %vm2148_vm0, %vm2149_vm14 }
 0x405   : > { %v2206_v19 = vmul.f32 %v3712_v58, %v2205_v3  ;;  %v2145_v32 = vsub.f32 1.0, %v2144_v52  ;;  %v3720_v51 = vpop.eup %3719  ;;  %v2219_v18 = vmul.f32 %v3718_v31, %v5518_v46  ;;  %v2200_v48 = vor.u32 1.1754944e-38, %v2199_v57 }
 0x406   : > { %v2176_v36 = vmul.f32 %v3714_v53, %v2175_v9  ;;  %v2189_v11 = vmul.f32 %v3720_v51, %v5520_v50  ;;  %v2167_v60 = vand.u32 2147483647, %v5532_v37  ;;  %vm2224_vm12 = vweird.f32 %v3718_v31 }
 0x407   : > { %v2207_v14 = vadd.f32 %v3712_v58, %v2206_v19  ;;  %v2146_v34 = vmul.f32 %v3716_v29, %v2145_v32  ;;  %v2220_v27 = vsub.f32 1.0, %v2219_v18  ;;  %vm2194_vm0 = vweird.f32 %v3720_v51 }
 0x408   : > { %v2177_v42 = vadd.f32 %v3714_v53, %v2176_v36  ;;  %v3722_v62 = vpop.eup %3721  ;;  %v2190_v7 = vsub.f32 1.0, %v2189_v11  ;;  %v2169_v61 = vand.u32 2147483648, %v5532_v37  ;;  %vm5609_vm8 = vmor %vm2193_vm5, %vm2194_vm0  ;;  %v2272_v12 = vand.u32 2147483647, %v5534_v2 }
 0x409   : > { %v2211_v63 = vsel %vm5557_vm2, %v3712_v58, %v2207_v14  ;;  %v2147_v22 = vadd.f32 %v3716_v29, %v2146_v34  ;;  %v2221_v39 = vmul.f32 %v3718_v31, %v2220_v27  ;;  %v2159_v5 = vmul.f32 %v3722_v62, %v5532_v37  ;;  %v2120_v14 = vld [vmem:[#allocation3 + $0x48] sm:$0xff] }
 0x40a   : > { %v2216_v0 = vsel %vm5522_vm13, %v2215_v24, %v2211_v63  ;;  %v2181_v17 = vsel %vm5565_vm11, %v3714_v53, %v2177_v42  ;;  %v5594_v30 = vpop.eup %3723  ;;  %vm5600_vm13 = vmor %vm2223_vm3, %vm2224_vm12  ;;  %v2191_v15 = vmul.f32 %v3720_v51, %v2190_v7  ;;  %3725 = vrcp.f32 %v5542_v21  ;;  %v2117_v24 = vld [vmem:[#allocation3 + $0x30] sm:$0xff] }
 0x40b   : > { %2421 = vperm.xlu2 %3670, %v2216_v0   ;;  %v2186_v55 = vsel %vm5527_vm6, %v2185_v28, %v2181_v17  ;;  %v2151_v25 = vsel %vm5577_vm10, %v3716_v29, %v2147_v22  ;;  %vm2268_vm6 = vweird.f32 %v5534_v2  ;;  %v2222_v38 = vadd.f32 %v3718_v31, %v2221_v39  ;;  %v2122_v28 = vld [vmem:[#allocation3 + $0x58] sm:$0xff]  ;;  %v2121_v29 = vld [vmem:[#allocation3 + $0x50] sm:$0xff]  ;;  %v2124_v22 = vld [vmem:[#allocation3 + $0x68] sm:$0xff] }
 0x40c   : > { %2411 = vperm.xlu1 %3669, %v2186_v55   ;;  %v2156_v47 = vsel %vm5536_vm9, %v2155_v33, %v2151_v25  ;;  %v2160_v54 = vsub.f32 1.0, %v2159_v5  ;;  %vm2164_vm9 = vweird.f32 %v3722_v62  ;;  %v2264_v44 = vmul.f32 %v5594_v30, %v5534_v2 }
 0x40d   : > { %2401 = vperm.xlu0 %3668, %v2156_v47   ;;  %v2192_v23 = vadd.f32 %v3720_v51, %v2191_v15  ;;  %vm2269_vm3 = vweird.f32 %v5594_v30  ;;  %v2226_v46 = vsel %vm5600_vm13, %v3718_v31, %v2222_v38  ;;  %v2274_v49 = vand.u32 2147483648, %v5534_v2  ;;  %vm5627_vm5 = vmor %vm2163_vm7, %vm2164_vm9 }
 0x40e   : > { %v2161_v50 = vmul.f32 %v3722_v62, %v2160_v54  ;;  %v2265_v45 = vsub.f32 1.0, %v2264_v44  ;;  %v2231_v58 = vsel %vm5551_vm1, %v2230_v1, %v2226_v46  ;;  %v2170_v53 = vor.u32 1.1754944e-38, %v2169_v61  ;;  %vm5638_vm14 = vmor %vm2268_vm6, %vm2269_vm3 }
 0x40f   : > { %v2196_v59 = vsel %vm5609_vm8, %v3720_v51, %v2192_v23  ;;  %vm2168_vm15 = vcmp.eq.f32.partialorder %v2167_v60, 8.507059e+37  ;;  %v2257_v37 = vand.u32 2147483647, %v5542_v21  ;;  %v5643_v40 = vmax.f32 %v2117_v24, 1e-30 }
 0x410   : > { %v2201_v56 = vsel %vm5570_vm4, %v2200_v48, %v2196_v59  ;;  %v2162_v16 = vadd.f32 %v3722_v62, %v2161_v50  ;;  %v2266_v26 = vmul.f32 %v5594_v30, %v2265_v45  ;;  %v5645_v3 = vmax.f32 %v2122_v28, 1e-30  ;;  %v3726_v57 = vpop.eup %3725 }
 0x411   : > { %vm5650_vm1 = vcmp.eq.f32.partialorder %v2272_v12, 8.507059e+37  ;;  %v2275_v2 = vor.u32 1.1754944e-38, %v2274_v49  ;;  %v2259_v32 = vand.u32 2147483648, %v5542_v21  ;;  %3727 = vrcp.f32 %v5643_v40 }
 0x412   : > { %v2166_v52 = vsel %vm5627_vm5, %v3722_v62, %v2162_v16  ;;  %v2267_v41 = vadd.f32 %v5594_v30, %v2266_v26  ;;  %v5656_v8 = vmax.f32 %v2121_v29, 1e-30  ;;  %v2249_v43 = vmul.f32 %v3726_v57, %v5542_v21 }
 0x413   : > { %2426 = vperm.xlu2 %3670, %v2231_v58   ;;  %v2171_v19 = vsel %vm2168_vm15, %v2170_v53, %v2166_v52  ;;  %v2242_v36 = vand.u32 2147483647, %v5643_v40  ;;  %v2244_v1 = vand.u32 2147483648, %v5643_v40  ;;  %vm2253_vm2 = vweird.f32 %v5542_v21 }
 0x414   : > { %2416 = vperm.xlu1 %3669, %v2201_v56   ;;  %v2271_v31 = vsel %vm5638_vm14, %v5594_v30, %v2267_v41  ;;  %vm5665_vm7 = vcmp.eq.f32.partialorder %v2257_v37, 8.507059e+37  ;;  %3729 = vrcp.f32 %v5645_v3  ;;  %v2250_v20 = vsub.f32 1.0, %v2249_v43  ;;  %v2576_v41 = vld [vmem:[#allocation3 + $0x88] sm:$0xff] }
 0x415   : > { %2406 = vperm.xlu0 %3668, %v2171_v19   ;;  %vm2254_vm11 = vweird.f32 %v3726_v57  ;;  %v2317_v34 = vand.u32 2147483647, %v5645_v3  ;;  %v2319_v18 = vand.u32 2147483648, %v5645_v3  ;;  %v2276_v42 = vsel %vm5650_vm1, %v2275_v2, %v2271_v31 }
 0x416   : > { %v2260_v35 = vor.u32 1.1754944e-38, %v2259_v32  ;;  %vm2238_vm4 = vweird.f32 %v5643_v40  ;;  %3731 = vrcp.f32 %v5656_v8  ;;  %v2251_v11 = vmul.f32 %v3726_v57, %v2250_v20  ;;  %vm5686_vm0 = vmor %vm2253_vm2, %vm2254_vm11 }
 0x417   : > { %vm5676_vm10 = vcmp.eq.f32.partialorder %v2242_v36, 8.507059e+37  ;;  %v2245_v60 = vor.u32 1.1754944e-38, %v2244_v1  ;;  %vm2313_vm12 = vweird.f32 %v5645_v3  ;;  %v5681_v63 = vmax.f32 %v2120_v14, 1e-30  ;;  %v3728_v27 = vpop.eup %3727 }
 0x418   : > { %vm2298_vm13 = vweird.f32 %v5656_v8  ;;  %v2302_v0 = vand.u32 2147483647, %v5656_v8  ;;  %v2304_v17 = vand.u32 2147483648, %v5656_v8  ;;  %v5693_v7 = vmax.f32 %v2125_v6, 1e-30 }
 0x419   : > { %v2252_v55 = vadd.f32 %v3726_v57, %v2251_v11  ;;  %v2234_v25 = vmul.f32 %v3728_v27, %v5643_v40  ;;  %vm5696_vm6 = vcmp.eq.f32.partialorder %v2317_v34, 8.507059e+37  ;;  %v2320_v21 = vor.u32 1.1754944e-38, %v2319_v18 }
 0x41a   : > { %3733 = vrcp.f32 %v5681_v63  ;;  %v3730_v5 = vpop.eup %3729  ;;  %v2287_v30 = vand.u32 2147483647, %v5681_v63  ;;  %v2289_v47 = vand.u32 2147483648, %v5681_v63  ;;  %v5704_v10 = vmax.f32 %v2124_v22, 1e-30 }
 0x41b   : > { %2441 = vperm.xlu2 %3670, %v2276_v42   ;;  %3735 = vrcp.f32 %v5693_v7  ;;  %v2256_v15 = vsel %vm5686_vm0, %v3726_v57, %v2252_v55  ;;  %v2235_v61 = vsub.f32 1.0, %v2234_v25  ;;  %vm2239_vm8 = vweird.f32 %v3728_v27 }
 0x41c   : > { %v2309_v38 = vmul.f32 %v3730_v5, %v5645_v3  ;;  %v3732_v4 = vpop.eup %3731  ;;  %v2261_v54 = vsel %vm5665_vm7, %v2260_v35, %v2256_v15  ;;  %vm5711_vm9 = vcmp.eq.f32.partialorder %v2302_v0, 8.507059e+37  ;;  %v2305_v23 = vor.u32 1.1754944e-38, %v2304_v17  ;;  %vm5719_vm15 = vmor %vm2238_vm4, %vm2239_vm8  ;;  %v2123_v3 = vld [vmem:[#allocation3 + $0x60] sm:$0xff] }
 0x41d   : > { %vm2283_vm3 = vweird.f32 %v5681_v63  ;;  %2436 = vperm.xlu1 %3669, %v2261_v54   ;;  %v2236_v12 = vmul.f32 %v3728_v27, %v2235_v61  ;;  %vm2314_vm5 = vweird.f32 %v3730_v5  ;;  %v2294_v50 = vmul.f32 %v3732_v4, %v5656_v8  ;;  %v2575_v17 = vld [vmem:[#allocation3 + $0x80] sm:$0xff] }
 0x41e   : > { %v2310_v46 = vsub.f32 1.0, %v2309_v38  ;;  %vm5723_vm14 = vcmp.eq.f32.partialorder %v2287_v30, 8.507059e+37  ;;  %v2290_v24 = vor.u32 1.1754944e-38, %v2289_v47  ;;  %vm2358_vm1 = vweird.f32 %v5693_v7  ;;  %vm5731_vm7 = vmor %vm2313_vm12, %vm2314_vm5  ;;  %v2579_v15 = vld [vmem:[#allocation3 + $0xa0] sm:$0xff] }
 0x41f   : > { %3737 = vrcp.f32 %v5704_v10  ;;  %v2237_v58 = vadd.f32 %v3728_v27, %v2236_v12  ;;  %v2295_v33 = vsub.f32 1.0, %v2294_v50  ;;  %vm2299_vm2 = vweird.f32 %v3732_v4 }
 0x420   : > { %v3734_v28 = vpop.eup %3733  ;;  %v2311_v59 = vmul.f32 %v3730_v5, %v2310_v46  ;;  %v2362_v26 = vand.u32 2147483647, %v5693_v7  ;;  %v2364_v29 = vand.u32 2147483648, %v5693_v7  ;;  %vm2343_vm11 = vweird.f32 %v5704_v10  ;;  %vm5746_vm4 = vmor %vm2298_vm13, %vm2299_vm2 }
 0x421   : > { %v3736_v53 = vpop.eup %3735  ;;  %v2279_v16 = vmul.f32 %v3734_v28, %v5681_v63  ;;  %v2241_v13 = vsel %vm5719_vm15, %v3728_v27, %v2237_v58  ;;  %v2296_v40 = vmul.f32 %v3732_v4, %v2295_v33  ;;  %vm2284_vm12 = vweird.f32 %v3734_v28 }
 0x422   : > { %v2312_v37 = vadd.f32 %v3730_v5, %v2311_v59  ;;  %v2354_v52 = vmul.f32 %v3736_v53, %v5693_v7  ;;  %v2246_v9 = vsel %vm5676_vm10, %v2245_v60, %v2241_v13  ;;  %v2347_v19 = vand.u32 2147483647, %v5704_v10  ;;  %vm5763_vm10 = vmor %vm2283_vm3, %vm2284_vm12  ;;  %v2126_v7 = vld [vmem:[#allocation3 + $0x78] sm:$0xff] }
 0x423   : > { %v2280_v57 = vsub.f32 1.0, %v2279_v16  ;;  %2431 = vperm.xlu0 %3668, %v2246_v9   ;;  %v2297_v31 = vadd.f32 %v3732_v4, %v2296_v40  ;;  %vm2359_vm0 = vweird.f32 %v3736_v53  ;;  %v5755_v51 = vmax.f32 %v2123_v3, 1e-30  ;;  %v2577_v16 = vld [vmem:[#allocation3 + $0x90] sm:$0xff] }
 0x424   : > { %v2316_v32 = vsel %vm5731_vm7, %v3730_v5, %v2312_v37  ;;  %v2355_v43 = vsub.f32 1.0, %v2354_v52  ;;  %v5757_v14 = vmax.f32 %v2576_v41, 1e-30  ;;  %v2365_v6 = vor.u32 1.1754944e-38, %v2364_v29  ;;  %vm5772_vm13 = vmor %vm2358_vm1, %vm2359_vm0 }
 0x425   : > { %v3738_v36 = vpop.eup %3737  ;;  %v2321_v1 = vsel %vm5696_vm6, %v2320_v21, %v2316_v32  ;;  %v2281_v8 = vmul.f32 %v3734_v28, %v2280_v57  ;;  %v2301_v20 = vsel %vm5746_vm4, %v3732_v4, %v2297_v31  ;;  %v2349_v60 = vand.u32 2147483648, %v5704_v10 }
 0x426   : > { %2456 = vperm.xlu2 %3670, %v2321_v1   ;;  %v2356_v18 = vmul.f32 %v3736_v53, %v2355_v43  ;;  %v2339_v42 = vmul.f32 %v3738_v36, %v5704_v10  ;;  %v2306_v35 = vsel %vm5711_vm9, %v2305_v23, %v2301_v20  ;;  %3739 = vrcp.f32 %v5755_v51  ;;  %v2578_v10 = vld [vmem:[#allocation3 + $0x98] sm:$0xff] }
 0x427   : > { %v2282_v11 = vadd.f32 %v3734_v28, %v2281_v8  ;;  %2451 = vperm.xlu1 %3669, %v2306_v35   ;;  %vm2363_vm6 = vcmp.eq.f32.partialorder %v2362_v26, 8.507059e+37  ;;  %vm2344_vm8 = vweird.f32 %v3738_v36  ;;  %v2332_v62 = vand.u32 2147483647, %v5755_v51 }
 0x428   : > { %v2357_v63 = vadd.f32 %v3736_v53, %v2356_v18  ;;  %v2340_v22 = vsub.f32 1.0, %v2339_v42  ;;  %v2334_v0 = vand.u32 2147483648, %v5755_v51  ;;  %3741 = vrcp.f32 %v5757_v14  ;;  %vm5789_vm9 = vmor %vm2343_vm11, %vm2344_vm8 }
 0x429   : > { %v2286_v27 = vsel %vm5763_vm10, %v3734_v28, %v2282_v11  ;;  %vm5793_vm3 = vcmp.eq.f32.partialorder %v2347_v19, 8.507059e+37  ;;  %v2350_v47 = vor.u32 1.1754944e-38, %v2349_v60  ;;  %vm2328_vm5 = vweird.f32 %v5755_v51 }
 0x42a   : > { %v2291_v55 = vsel %vm5723_vm14, %v2290_v24, %v2286_v27  ;;  %v2361_v25 = vsel %vm5772_vm13, %v3736_v53, %v2357_v63  ;;  %v2341_v39 = vmul.f32 %v3738_v36, %v2340_v22  ;;  %vm2627_vm15 = vweird.f32 %v5757_v14 }
 0x42b   : > { %v2366_v21 = vsel %vm2363_vm6, %v2365_v6, %v2361_v25  ;;  %2446 = vperm.xlu0 %3668, %v2291_v55   ;;  %v5799_v38 = vmax.f32 %v2575_v17, 1e-30  ;;  %v5801_v4 = vmax.f32 %v2126_v7, 1e-30  ;;  %vm5803_vm14 = vcmp.eq.f32.partialorder %v2332_v62, 8.507059e+37  ;;  %v2582_v62 = vld [vmem:[#allocation3 + $0xb8] sm:$0xff] }
 0x42c   : > { %v2342_v61 = vadd.f32 %v3738_v36, %v2341_v39  ;;  %v3740_v54 = vpop.eup %3739  ;;  %v2335_v23 = vor.u32 1.1754944e-38, %v2334_v0  ;;  %v2631_v12 = vand.u32 2147483647, %v5757_v14  ;;  %v2633_v46 = vand.u32 2147483648, %v5757_v14 }
 0x42d   : > { %v2324_v45 = vmul.f32 %v3740_v54, %v5755_v51  ;;  %3743 = vrcp.f32 %v5799_v38  ;;  %v5813_v49 = vmax.f32 %v2579_v15, 1e-30  ;;  %v2616_v58 = vand.u32 2147483647, %v5799_v38 }
 0x42e   : > { %2471 = vperm.xlu2 %3670, %v2366_v21   ;;  %v2346_v50 = vsel %vm5789_vm9, %v3738_v36, %v2342_v61  ;;  %v3742_v24 = vpop.eup %3741  ;;  %v2618_v59 = vand.u32 2147483648, %v5799_v38  ;;  %v5819_v33 = vmax.f32 %v2578_v10, 1e-30  ;;  %vm2329_vm1 = vweird.f32 %v3740_v54  ;;  %v2584_v36 = vld [vmem:[#allocation3 + $0xc8] sm:$0xff] }
 0x42f   : > { %v2351_v28 = vsel %vm5793_vm3, %v2350_v47, %v2346_v50  ;;  %v2325_v53 = vsub.f32 1.0, %v2324_v45  ;;  %v2623_v56 = vmul.f32 %v3742_v24, %v5757_v14  ;;  %3745 = vrcp.f32 %v5801_v4  ;;  %vm5832_vm11 = vmor %vm2328_vm5, %vm2329_vm1  ;;  %v2581_v50 = vld [vmem:[#allocation3 + $0xb0] sm:$0xff] }
 0x430   : > { %2466 = vperm.xlu1 %3669, %v2351_v28   ;;  %vm2628_vm2 = vweird.f32 %v3742_v24  ;;  %vm5823_vm7 = vcmp.eq.f32.partialorder %v2631_v12, 8.507059e+37  ;;  %v2634_v29 = vor.u32 1.1754944e-38, %v2633_v46  ;;  %v2377_v13 = vand.u32 2147483647, %v5801_v4 }
 0x431   : > { %v2326_v37 = vmul.f32 %v3740_v54, %v2325_v53  ;;  %v2624_v40 = vsub.f32 1.0, %v2623_v56  ;;  %v2379_v52 = vand.u32 2147483648, %v5801_v4  ;;  %3747 = vrcp.f32 %v5813_v49  ;;  %vm5848_vm10 = vmor %vm2627_vm15, %vm2628_vm2 }
 0x432   : > { %vm2612_vm4 = vweird.f32 %v5799_v38  ;;  %vm5837_vm12 = vcmp.eq.f32.partialorder %v2616_v58, 8.507059e+37  ;;  %v2619_v9 = vor.u32 1.1754944e-38, %v2618_v59  ;;  %v5841_v2 = vmax.f32 %v2577_v16, 1e-30  ;;  %v2580_v59 = vld [vmem:[#allocation3 + $0xa8] sm:$0xff] }
 0x433   : > { %v3744_v57 = vpop.eup %3743  ;;  %v2327_v19 = vadd.f32 %v3740_v54, %v2326_v37  ;;  %v2625_v32 = vmul.f32 %v3742_v24, %v2624_v40  ;;  %vm2373_vm0 = vweird.f32 %v5801_v4  ;;  %3749 = vrcp.f32 %v5819_v33 }
 0x434   : > { %v2608_v43 = vmul.f32 %v3744_v57, %v5799_v38  ;;  %vm5853_vm13 = vcmp.eq.f32.partialorder %v2377_v13, 8.507059e+37  ;;  %vm2672_vm6 = vweird.f32 %v5813_v49  ;;  %v2676_v1 = vand.u32 2147483647, %v5813_v49 }
 0x435   : > { %v3746_v8 = vpop.eup %3745  ;;  %v2331_v51 = vsel %vm5832_vm11, %v3740_v54, %v2327_v19  ;;  %v2626_v20 = vadd.f32 %v3742_v24, %v2625_v32  ;;  %v2380_v14 = vor.u32 1.1754944e-38, %v2379_v52  ;;  %v2678_v34 = vand.u32 2147483648, %v5813_v49  ;;  %v2853_v32 = vld [vmem:[#allocation4 + $0xb0] sm:$0xff] }
 0x436   : > { %v2336_v18 = vsel %vm5803_vm14, %v2335_v23, %v2331_v51  ;;  %v2609_v6 = vsub.f32 1.0, %v2608_v43  ;;  %vm2613_vm8 = vweird.f32 %v3744_v57  ;;  %v2369_v42 = vmul.f32 %v3746_v8, %v5801_v4  ;;  %v2585_v43 = vld [vmem:[#allocation3 + $0xd0] sm:$0xff] }
 0x437   : > { %v3748_v35 = vpop.eup %3747  ;;  %2461 = vperm.xlu0 %3668, %v2336_v18   ;;  %v2630_v11 = vsel %vm5848_vm10, %v3742_v24, %v2626_v20  ;;  %vm2374_vm9 = vweird.f32 %v3746_v8  ;;  %v2661_v48 = vand.u32 2147483647, %v5819_v33  ;;  %3751 = vrcp.f32 %v5841_v2  ;;  %vm5875_vm3 = vmor %vm2612_vm4, %vm2613_vm8  ;;  %v2583_v20 = vld [vmem:[#allocation3 + $0xc0] sm:$0xff] }
 0x438   : > { %v2635_v60 = vsel %vm5823_vm7, %v2634_v29, %v2630_v11  ;;  %v2610_v63 = vmul.f32 %v3744_v57, %v2609_v6  ;;  %v2370_v22 = vsub.f32 1.0, %v2369_v42  ;;  %v2668_v27 = vmul.f32 %v3748_v35, %v5813_v49  ;;  %vm5888_vm14 = vmor %vm2373_vm0, %vm2374_vm9 }
 0x439   : > { %v3750_v0 = vpop.eup %3749  ;;  %2870 = vperm.xlu2 %3670, %v2635_v60   ;;  %vm2673_vm5 = vweird.f32 %v3748_v35  ;;  %vm5879_vm15 = vcmp.eq.f32.partialorder %v2676_v1, 8.507059e+37  ;;  %v2679_v55 = vor.u32 1.1754944e-38, %v2678_v34  ;;  %v2663_v25 = vand.u32 2147483648, %v5819_v33 }
 0x43a   : > { %v2611_v39 = vadd.f32 %v3744_v57, %v2610_v63  ;;  %v2371_v21 = vmul.f32 %v3746_v8, %v2370_v22  ;;  %v2669_v5 = vsub.f32 1.0, %v2668_v27  ;;  %v2653_v30 = vmul.f32 %v3750_v0, %v5819_v33  ;;  %vm5906_vm11 = vmor %vm2672_vm6, %vm2673_vm5 }
 0x43b   : > { %vm2657_vm1 = vweird.f32 %v5819_v33  ;;  %vm2658_vm2 = vweird.f32 %v3750_v0  ;;  %vm5893_vm7 = vcmp.eq.f32.partialorder %v2661_v48, 8.507059e+37  ;;  %v5897_v61 = vmax.f32 %v2582_v62, 1e-30 }
 0x43c   : > { %v2615_v38 = vsel %vm5875_vm3, %v3744_v57, %v2611_v39  ;;  %v2372_v10 = vadd.f32 %v3746_v8, %v2371_v21  ;;  %v2670_v54 = vmul.f32 %v3748_v35, %v2669_v5  ;;  %v2654_v44 = vsub.f32 1.0, %v2653_v30 }
 0x43d   : > { %v3752_v4 = vpop.eup %3751  ;;  %v2620_v23 = vsel %vm5837_vm12, %v2619_v9, %v2615_v38  ;;  %v2664_v46 = vor.u32 1.1754944e-38, %v2663_v25  ;;  %vm2642_vm4 = vweird.f32 %v5841_v2  ;;  %3753 = vrcp.f32 %v5897_v61  ;;  %vm5920_vm12 = vmor %vm2657_vm1, %vm2658_vm2 }
 0x43e   : > { %2865 = vperm.xlu1 %3669, %v2620_v23   ;;  %v2376_v45 = vsel %vm5888_vm14, %v3746_v8, %v2372_v10  ;;  %v2671_v24 = vadd.f32 %v3748_v35, %v2670_v54  ;;  %v2655_v28 = vmul.f32 %v3750_v0, %v2654_v44  ;;  %v2638_v58 = vmul.f32 %v3752_v4, %v5841_v2 }
 0x43f   : > { %v2381_v49 = vsel %vm5853_vm13, %v2380_v14, %v2376_v45  ;;  %vm2643_vm0 = vweird.f32 %v3752_v4  ;;  %v2646_v56 = vand.u32 2147483647, %v5841_v2  ;;  %v2648_v16 = vand.u32 2147483648, %v5841_v2 }
 0x440   : > { %2476 = vperm.xlu0 %3668, %v2381_v49   ;;  %v2675_v26 = vsel %vm5906_vm11, %v3748_v35, %v2671_v24  ;;  %v2656_v29 = vadd.f32 %v3750_v0, %v2655_v28  ;;  %v2639_v13 = vsub.f32 1.0, %v2638_v58  ;;  %v5928_v37 = vmax.f32 %v2581_v50, 1e-30  ;;  %vm5944_vm10 = vmor %vm2642_vm4, %vm2643_vm0 }
 0x441   : > { %v2680_v33 = vsel %vm5879_vm15, %v2679_v55, %v2675_v26  ;;  %v2721_v40 = vand.u32 2147483647, %v5897_v61  ;;  %v2723_v52 = vand.u32 2147483648, %v5897_v61  ;;  %v5934_v3 = vmax.f32 %v2580_v59, 1e-30 }
 0x442   : > { %2885 = vperm.xlu2 %3670, %v2680_v33   ;;  %v2660_v41 = vsel %vm5920_vm12, %v3750_v0, %v2656_v29  ;;  %v2640_v9 = vmul.f32 %v3752_v4, %v2639_v13  ;;  %3755 = vrcp.f32 %v5928_v37  ;;  %v2649_v31 = vor.u32 1.1754944e-38, %v2648_v16  ;;  %v2587_v13 = vld [vmem:[#allocation3 + $0xe0] sm:$0xff] }
 0x443   : > { %v3754_v57 = vpop.eup %3753  ;;  %v2665_v19 = vsel %vm5893_vm7, %v2664_v46, %v2660_v41  ;;  %3757 = vrcp.f32 %v5934_v3  ;;  %vm2647_vm13 = vcmp.eq.f32.partialorder %v2646_v56, 8.507059e+37  ;;  %vm2717_vm6 = vweird.f32 %v5897_v61  ;;  %v2850_v46 = vld [vmem:[#allocation4 + $0x98] sm:$0xff] }
 0x444   : > { %v2641_v1 = vadd.f32 %v3752_v4, %v2640_v9  ;;  %v2713_v8 = vmul.f32 %v3754_v57, %v5897_v61  ;;  %vm2718_vm8 = vweird.f32 %v3754_v57  ;;  %vm5951_vm9 = vcmp.eq.f32.partialorder %v2721_v40, 8.507059e+37  ;;  %v2588_v61 = vld [vmem:[#allocation3 + $0xe8] sm:$0xff] }
 0x445   : > { %v2724_v2 = vor.u32 1.1754944e-38, %v2723_v52  ;;  %v5957_v18 = vmax.f32 %v2585_v43, 1e-30  ;;  %v5959_v6 = vmax.f32 %v2584_v36, 1e-30  ;;  %vm2702_vm3 = vweird.f32 %v5928_v37  ;;  %vm5971_vm15 = vmor %vm2717_vm6, %vm2718_vm8 }
 0x446   : > { %2880 = vperm.xlu1 %3669, %v2665_v19   ;;  %v2645_v14 = vsel %vm5944_vm10, %v3752_v4, %v2641_v1  ;;  %v2714_v34 = vsub.f32 1.0, %v2713_v8  ;;  %v2706_v35 = vand.u32 2147483647, %v5928_v37  ;;  %v2708_v11 = vand.u32 2147483648, %v5928_v37  ;;  %v2586_v19 = vld [vmem:[#allocation3 + $0xd8] sm:$0xff] }
 0x447   : > { %v2650_v42 = vsel %vm2647_vm13, %v2649_v31, %v2645_v14  ;;  %vm2687_vm5 = vweird.f32 %v5934_v3  ;;  %3759 = vrcp.f32 %v5957_v18  ;;  %v5966_v63 = vmax.f32 %v2583_v20, 1e-30  ;;  %v2590_v1 = vld [vmem:[#allocation3 + $0xf8] sm:$0xff] }
 0x448   : > { %v3756_v48 = vpop.eup %3755  ;;  %2875 = vperm.xlu0 %3668, %v2650_v42   ;;  %v2715_v60 = vmul.f32 %v3754_v57, %v2714_v34  ;;  %v2691_v0 = vand.u32 2147483647, %v5934_v3  ;;  %v2693_v17 = vand.u32 2147483648, %v5934_v3  ;;  %3761 = vrcp.f32 %v5959_v6 }
 0x449   : > { %v3758_v22 = vpop.eup %3757  ;;  %v2698_v62 = vmul.f32 %v3756_v48, %v5928_v37  ;;  %v2766_v25 = vand.u32 2147483647, %v5957_v18  ;;  %v2768_v39 = vand.u32 2147483648, %v5957_v18  ;;  %vm2703_vm14 = vweird.f32 %v3756_v48 }
 0x44a   : > { %v2716_v7 = vadd.f32 %v3754_v57, %v2715_v60  ;;  %v2683_v55 = vmul.f32 %v3758_v22, %v5934_v3  ;;  %vm5982_vm1 = vcmp.eq.f32.partialorder %v2706_v35, 8.507059e+37  ;;  %v2709_v30 = vor.u32 1.1754944e-38, %v2708_v11  ;;  %vm5997_vm11 = vmor %vm2702_vm3, %vm2703_vm14 }
 0x44b   : > { %v2699_v21 = vsub.f32 1.0, %v2698_v62  ;;  %vm2688_vm2 = vweird.f32 %v3758_v22  ;;  %3763 = vrcp.f32 %v5966_v63  ;;  %vm5991_vm7 = vcmp.eq.f32.partialorder %v2691_v0, 8.507059e+37 }
 0x44c   : > { %v2720_v47 = vsel %vm5971_vm15, %v3754_v57, %v2716_v7  ;;  %v2684_v15 = vsub.f32 1.0, %v2683_v55  ;;  %v2694_v44 = vor.u32 1.1754944e-38, %v2693_v17  ;;  %vm2762_vm4 = vweird.f32 %v5957_v18  ;;  %vm6009_vm0 = vmor %vm2687_vm5, %vm2688_vm2 }
 0x44d   : > { %v2725_v38 = vsel %vm5951_vm9, %v2724_v2, %v2720_v47  ;;  %v2700_v10 = vmul.f32 %v3756_v48, %v2699_v21  ;;  %v3760_v4 = vpop.eup %3759  ;;  %vm6002_vm12 = vcmp.eq.f32.partialorder %v2766_v25, 8.507059e+37  ;;  %v2769_v50 = vor.u32 1.1754944e-38, %v2768_v39  ;;  %v2589_v39 = vld [vmem:[#allocation3 + $0xf0] sm:$0xff] }
 0x44e   : > { %2900 = vperm.xlu2 %3670, %v2725_v38   ;;  %v2685_v12 = vmul.f32 %v3758_v22, %v2684_v15  ;;  %v3762_v45 = vpop.eup %3761  ;;  %v2758_v58 = vmul.f32 %v3760_v4, %v5957_v18  ;;  %vm2747_vm10 = vweird.f32 %v5959_v6  ;;  %v6015_v59 = vmax.f32 %v2588_v61, 1e-30 }
 0x44f   : > { %v2701_v24 = vadd.f32 %v3756_v48, %v2700_v10  ;;  %v2743_v53 = vmul.f32 %v3762_v45, %v5959_v6  ;;  %v2751_v56 = vand.u32 2147483647, %v5959_v6  ;;  %v2753_v16 = vand.u32 2147483648, %v5959_v6 }
 0x450   : > { %v2686_v49 = vadd.f32 %v3758_v22, %v2685_v12  ;;  %v2759_v29 = vsub.f32 1.0, %v2758_v58  ;;  %vm2763_vm13 = vweird.f32 %v3760_v4  ;;  %3765 = vrcp.f32 %v6015_v59 }
 0x451   : > { %v2705_v26 = vsel %vm5997_vm11, %v3756_v48, %v2701_v24  ;;  %v3764_v37 = vpop.eup %3763  ;;  %v2744_v52 = vsub.f32 1.0, %v2743_v53  ;;  %vm2748_vm6 = vweird.f32 %v3762_v45  ;;  %v2736_v57 = vand.u32 2147483647, %v5966_v63  ;;  %vm6034_vm8 = vmor %vm2762_vm4, %vm2763_vm13 }
 0x452   : > { %v2710_v33 = vsel %vm5982_vm1, %v2709_v30, %v2705_v26  ;;  %v2690_v40 = vsel %vm6009_vm0, %v3758_v22, %v2686_v49  ;;  %v2760_v41 = vmul.f32 %v3760_v4, %v2759_v29  ;;  %v2728_v9 = vmul.f32 %v3764_v37, %v5966_v63  ;;  %vm6043_vm3 = vmor %vm2747_vm10, %vm2748_vm6 }
 0x453   : > { %2895 = vperm.xlu1 %3669, %v2710_v33   ;;  %v2695_v3 = vsel %vm5991_vm7, %v2694_v44, %v2690_v40  ;;  %v2745_v31 = vmul.f32 %v3762_v45, %v2744_v52  ;;  %vm2732_vm9 = vweird.f32 %v5966_v63  ;;  %v2738_v43 = vand.u32 2147483648, %v5966_v63 }
 0x454   : > { %2890 = vperm.xlu0 %3668, %v2695_v3   ;;  %v2603_v36 = vmax.f32 %v2587_v13, 1e-30  ;;  %v2761_v8 = vadd.f32 %v3760_v4, %v2760_v41  ;;  %v2754_v2 = vor.u32 1.1754944e-38, %v2753_v16  ;;  %v2729_v20 = vsub.f32 1.0, %v2728_v9 }
 0x455   : > { %vm2733_vm5 = vweird.f32 %v3764_v37  ;;  %v2746_v14 = vadd.f32 %v3762_v45, %v2745_v31  ;;  %vm2752_vm15 = vcmp.eq.f32.partialorder %v2751_v56, 8.507059e+37  ;;  %v6047_v34 = vmax.f32 %v2586_v19, 1e-30 }
 0x456   : > { %3767 = vrcp.f32 %v2603_v36  ;;  %v3766_v18 = vpop.eup %3765  ;;  %v2765_v42 = vsel %vm6034_vm8, %v3760_v4, %v2761_v8  ;;  %v2730_v35 = vmul.f32 %v3764_v37, %v2729_v20  ;;  %vm6051_vm14 = vcmp.eq.f32.partialorder %v2736_v57, 8.507059e+37  ;;  %vm6063_vm1 = vmor %vm2732_vm9, %vm2733_vm5 }
 0x457   : > { %v6055_v6 = vmax.f32 %v2590_v1, 1e-30  ;;  %v2770_v48 = vsel %vm6002_vm12, %v2769_v50, %v2765_v42  ;;  %v2750_v60 = vsel %vm6043_vm3, %v3762_v45, %v2746_v14  ;;  %v2739_v27 = vor.u32 1.1754944e-38, %v2738_v43 }
 0x458   : > { %v2803_v62 = vmul.f32 %v3766_v18, %v6015_v59  ;;  %2915 = vperm.xlu2 %3670, %v2770_v48   ;;  %v2755_v0 = vsel %vm2752_vm15, %v2754_v2, %v2750_v60  ;;  %v2731_v17 = vadd.f32 %v3764_v37, %v2730_v35  ;;  %vm2807_vm2 = vweird.f32 %v6015_v59 }
 0x459   : > { %v2813_v7 = vand.u32 2147483648, %v6015_v59  ;;  %vm2808_vm7 = vweird.f32 %v3766_v18  ;;  %v2811_v25 = vand.u32 2147483647, %v6015_v59  ;;  %3769 = vrcp.f32 %v6047_v34 }
 0x45a   : > { %v2804_v55 = vsub.f32 1.0, %v2803_v62  ;;  %v2735_v63 = vsel %vm6063_vm1, %v3764_v37, %v2731_v17  ;;  %3771 = vrcp.f32 %v6055_v6  ;;  %v2796_v47 = vand.u32 2147483647, %v2603_v36  ;;  %vm6079_vm11 = vmor %vm2807_vm2, %vm2808_vm7 }
 0x45b   : > { %2910 = vperm.xlu1 %3669, %v2755_v0   ;;  %v2740_v5 = vsel %vm6051_vm14, %v2739_v27, %v2735_v63  ;;  %v2814_v61 = vor.u32 1.1754944e-38, %v2813_v7  ;;  %vm2812_vm4 = vcmp.eq.f32.partialorder %v2811_v25, 8.507059e+37  ;;  %v2798_v54 = vand.u32 2147483648, %v2603_v36 }
 0x45c   : > { %v3768_v21 = vpop.eup %3767  ;;  %v2805_v30 = vmul.f32 %v3766_v18, %v2804_v55  ;;  %2905 = vperm.xlu0 %3668, %v2740_v5   ;;  %v2605_v44 = vmax.f32 %v2589_v39, 1e-30  ;;  %vm2792_vm12 = vweird.f32 %v2603_v36  ;;  %vm6085_vm10 = vcmp.eq.f32.partialorder %v2796_v47, 8.507059e+37  ;;  %v2848_v47 = vld [vmem:[#allocation4 + $0x88] sm:$0xff] }
 0x45d   : > { %v2788_v38 = vmul.f32 %v3768_v21, %v2603_v36  ;;  %vm2793_vm0 = vweird.f32 %v3768_v21  ;;  %vm2777_vm13 = vweird.f32 %v6047_v34  ;;  %v2799_v59 = vor.u32 1.1754944e-38, %v2798_v54 }
 0x45e   : > { %v2806_v10 = vadd.f32 %v3766_v18, %v2805_v30  ;;  %3773 = vrcp.f32 %v2605_v44  ;;  %vm6091_vm6 = vmor %vm2792_vm12, %vm2793_vm0  ;;  %v2781_v49 = vand.u32 2147483647, %v6047_v34  ;;  %v2783_v53 = vand.u32 2147483648, %v6047_v34 }
 0x45f   : > { %v2789_v4 = vsub.f32 1.0, %v2788_v38  ;;  %v3770_v23 = vpop.eup %3769  ;;  %v2841_v29 = vand.u32 2147483647, %v6055_v6  ;;  %vm2837_vm9 = vweird.f32 %v6055_v6  ;;  %v2843_v37 = vand.u32 2147483648, %v6055_v6 }
 0x460   : > { %v2810_v12 = vsel %vm6079_vm11, %v3766_v18, %v2806_v10  ;;  %v3772_v50 = vpop.eup %3771  ;;  %v2773_v28 = vmul.f32 %v3770_v23, %v6047_v34  ;;  %vm2778_vm8 = vweird.f32 %v3770_v23  ;;  %v2784_v9 = vor.u32 1.1754944e-38, %v2783_v53  ;;  %v2847_v10 = vld [vmem:[#allocation4 + $0x80] sm:$0xff] }
 0x461   : > { %v2815_v45 = vsel %vm2812_vm4, %v2814_v61, %v2810_v12  ;;  %v2790_v24 = vmul.f32 %v3768_v21, %v2789_v4  ;;  %v2833_v56 = vmul.f32 %v3772_v50, %v6055_v6  ;;  %vm2838_vm3 = vweird.f32 %v3772_v50  ;;  %vm6107_vm5 = vmor %vm2777_vm13, %vm2778_vm8 }
 0x462   : > { %2930 = vperm.xlu2 %3670, %v2815_v45   ;;  %v2774_v26 = vsub.f32 1.0, %v2773_v28  ;;  %vm2782_vm15 = vcmp.eq.f32.partialorder %v2781_v49, 8.507059e+37  ;;  %vm6111_vm14 = vmor %vm2837_vm9, %vm2838_vm3  ;;  %vm2842_vm1 = vcmp.eq.f32.partialorder %v2841_v29, 8.507059e+37  ;;  %v2844_v36 = vor.u32 1.1754944e-38, %v2843_v37  ;;  %v2851_v29 = vld [vmem:[#allocation4 + $0xa0] sm:$0xff] }
 0x463   : > { %v2791_v16 = vadd.f32 %v3768_v21, %v2790_v24  ;;  %v2834_v13 = vsub.f32 1.0, %v2833_v56  ;;  %vm2822_vm2 = vweird.f32 %v2605_v44  ;;  %v2828_v1 = vand.u32 2147483648, %v2605_v44  ;;  %v2849_v24 = vld [vmem:[#allocation4 + $0x90] sm:$0xff]  ;;  %v2854_v56 = vld [vmem:[#allocation4 + $0xb8] sm:$0xff] }
 0x464   : > { %v2775_v40 = vmul.f32 %v3770_v23, %v2774_v26  ;;  %v3774_v52 = vpop.eup %3773  ;;  %v2826_v2 = vand.u32 2147483647, %v2605_v44 }
 0x465   : > { %v2795_v33 = vsel %vm6091_vm6, %v3768_v21, %v2791_v16  ;;  %v2835_v57 = vmul.f32 %v3772_v50, %v2834_v13  ;;  %v2818_v31 = vmul.f32 %v3774_v52, %v2605_v44  ;;  %vm2823_vm7 = vweird.f32 %v3774_v52  ;;  %v6119_v48 = vpop.permute.xlu2 %2421 }
 0x466   : > { %v2800_v3 = vsel %vm6085_vm10, %v2799_v59, %v2795_v33  ;;  %v2776_v19 = vadd.f32 %v3770_v23, %v2775_v40  ;;  %vm2824_vm11 = vmor %vm2822_vm2, %vm2823_vm7  ;;  %v2829_v42 = vor.u32 1.1754944e-38, %v2828_v1  ;;  %vm2827_vm4 = vcmp.eq.f32.partialorder %v2826_v2, 8.507059e+37 }
 0x467   : > { %2925 = vperm.xlu1 %3669, %v2800_v3   ;;  %v2836_v43 = vadd.f32 %v3772_v50, %v2835_v57  ;;  %v2819_v51 = vsub.f32 1.0, %v2818_v31 }
 0x468   : > { %v2780_v8 = vsel %vm6107_vm5, %v3770_v23, %v2776_v19 }
 0x469   : > { %v2785_v20 = vsel %vm2782_vm15, %v2784_v9, %v2780_v8  ;;  %v2840_v14 = vsel %vm6111_vm14, %v3772_v50, %v2836_v43  ;;  %v2820_v34 = vmul.f32 %v3774_v52, %v2819_v51 }
 0x46a   : > { %2920 = vperm.xlu0 %3668, %v2785_v20   ;;  %v2845_v18 = vsel %vm2842_vm1, %v2844_v36, %v2840_v14  ;;  %v2852_v36 = vld [vmem:[#allocation4 + $0xa8] sm:$0xff] }
 0x46b   : > { %v2821_v35 = vadd.f32 %v3774_v52, %v2820_v34 }
 0x46d   : > { %v2825_v11 = vsel %vm2824_vm11, %v3774_v52, %v2821_v35  ;;  %v6121_v60 = vpop.permute.xlu2 %2426 }
 0x46e   : > { %v2830_v6 = vsel %vm2827_vm4, %v2829_v42, %v2825_v11 }
 0x46f   : > { %2940 = vperm.xlu1 %3669, %v2845_v18  }
 0x472   : > { %2935 = vperm.xlu0 %3668, %v2830_v6   ;;  %v2856_v6 = vld [vmem:[#allocation4 + $0xc8] sm:$0xff] }
 0x475   : > { %v6127_v62 = vpop.permute.xlu2 %2441 }
 0x47e   : > { %v6123_v22 = vpop.permute.xlu1 %2411 }
 0x47f   : > { %v6125_v27 = vpop.permute.xlu0 %2401 }
 0x480   : > { %v6133_v7 = vpop.permute.xlu2 %2456 }
 0x486   : > { %v6129_v0 = vpop.permute.xlu1 %2416 }
 0x487   : > { %v6131_v17 = vpop.permute.xlu0 %2406 }
 0x488   : > { %v6139_v63 = vpop.permute.xlu2 %2471 }
 0x48f   : > { %v6135_v55 = vpop.permute.xlu1 %2436 }
 0x493   : > { %v2871_v5 = vpop.permute.xlu2 %2870 }
 0x494   : > { %v2944_v61 = vmul.f32 %v2871_v5, %v2848_v47 }
 0x495   : > { %v6137_v25 = vpop.permute.xlu0 %2431 }
 0x496   : > { %v2977_v38 = vmul.f32 1.442695, %v2944_v61  ;;  %vm2960_vm0 = vcmp.gt.f32.partialorder %v2944_v61, 0.0 }
 0x498   : > { %3775 = vpow2.f32 %v2977_v38  ;;  %v2855_v38 = vld [vmem:[#allocation4 + $0xc0] sm:$0xff] }
 0x499   : > { %v6141_v39 = vpop.permute.xlu1 %2451 }
 0x49c   : > { %v2886_v54 = vpop.permute.xlu2 %2885 }
 0x49d   : > { %v6143_v21 = vpop.permute.xlu0 %2446  ;;  %v2947_v52 = vmul.f32 %v2886_v54, %v2851_v29 }
 0x49e   : > { %v3776_v50 = vpop.eup %3775 }
 0x49f   : > { %v3379_v53 = vadd.f32 -1.0, %v3776_v50  ;;  %v2983_v19 = vmul.f32 1.442695, %v2947_v52  ;;  %vm2963_vm9 = vcmp.gt.f32.partialorder %v2947_v52, 0.0 }
 0x4a1   : > { %v3024_v3 = vsel %vm2960_vm0, %v2944_v61, %v3379_v53 }
 0x4a2   : > { %v6145_v30 = vpop.permute.xlu1 %2466 }
 0x4a8   : > { %v2901_v58 = vpop.permute.xlu2 %2900 }
 0x4a9   : > { %v6147_v15 = vpop.permute.xlu0 %2461  ;;  %v2950_v33 = vmul.f32 %v2901_v58, %v2854_v56 }
 0x4ab   : > { %v2989_v9 = vmul.f32 1.442695, %v2950_v33  ;;  %vm2966_vm6 = vcmp.gt.f32.partialorder %v2950_v33, 0.0 }
 0x4b0   : > { %v2866_v44 = vpop.permute.xlu1 %2865 }
 0x4b1   : > { %v2943_v4 = vmul.f32 %v2866_v44, %v2847_v10  ;;  %v2860_v10 = vld [vmem:[#allocation4 + $0xe8] sm:$0xff] }
 0x4b2   : > { %v6149_v23 = vpop.permute.xlu0 %2476  ;;  %v2916_v31 = vpop.permute.xlu2 %2915 }
 0x4b3   : > { %v2975_v12 = vmul.f32 1.442695, %v2943_v4  ;;  %vm2959_vm12 = vcmp.gt.f32.partialorder %v2943_v4, 0.0 }
 0x4b5   : > { %3777 = vpow2.f32 %v2975_v12 }
 0x4b8   : > { %v2881_v45 = vpop.permute.xlu1 %2880 }
 0x4b9   : > { %v2946_v28 = vmul.f32 %v2881_v45, %v2850_v46 }
 0x4ba   : > { %v2876_v59 = vpop.permute.xlu0 %2875 }
 0x4bb   : > { %v3778_v49 = vpop.eup %3777  ;;  %v2981_v16 = vmul.f32 1.442695, %v2946_v28  ;;  %v2945_v26 = vmul.f32 %v2876_v59, %v2849_v24  ;;  %vm2962_vm10 = vcmp.gt.f32.partialorder %v2946_v28, 0.0 }
 0x4bc   : > { %v3378_v13 = vadd.f32 -1.0, %v3778_v49  ;;  %v2931_v54 = vpop.permute.xlu2 %2930  ;;  %v2857_v49 = vld [vmem:[#allocation4 + $0xd0] sm:$0xff] }
 0x4bd   : > { %3779 = vpow2.f32 %v2981_v16  ;;  %v2979_v37 = vmul.f32 1.442695, %v2945_v26  ;;  %vm2961_vm13 = vcmp.gt.f32.partialorder %v2945_v26, 0.0  ;;  %v2956_v58 = vmul.f32 %v2931_v54, %v2860_v10 }
 0x4be   : > { %v3023_v40 = vsel %vm2959_vm12, %v2943_v4, %v3378_v13 }
 0x4bf   : > { %3781 = vpow2.f32 %v2979_v37  ;;  %v3671_v41 = vpack.i.bf16 %v3024_v3, %v3023_v40  ;;  %v2953_v40 = vmul.f32 %v2916_v31, %v2857_v49  ;;  %vm2972_vm14 = vcmp.gt.f32.partialorder %v2956_v58, 0.0 }
 0x4c0   : > { %3783 = vpow2.f32 %v2989_v9  ;;  %v2859_v9 = vld [vmem:[#allocation4 + $0xe0] sm:$0xff] }
 0x4c1   : > { %3672 = vrot.lane.b32.xlu2 %v3671_v41, %s3901_s17  ;;  %3785 = vpow2.f32 %v2983_v19  ;;  %v3001_v41 = vmul.f32 1.442695, %v2956_v58  ;;  %v2995_v19 = vmul.f32 1.442695, %v2953_v40  ;;  %vm2969_vm2 = vcmp.gt.f32.partialorder %v2953_v40, 0.0 }
 0x4c3   : > { %v3780_v57 = vpop.eup %3779 }
 0x4c4   : > { %v3381_v43 = vadd.f32 -1.0, %v3780_v57 }
 0x4c5   : > { %v3782_v1 = vpop.eup %3781  ;;  %v2896_v8 = vpop.permute.xlu1 %2895 }
 0x4c6   : > { %v3380_v51 = vadd.f32 -1.0, %v3782_v1  ;;  %v2949_v2 = vmul.f32 %v2896_v8, %v2853_v32  ;;  %v2891_v20 = vpop.permute.xlu0 %2890  ;;  %v3026_v14 = vsel %vm2962_vm10, %v2946_v28, %v3381_v43  ;;  %v3784_v5 = vpop.eup %3783  ;;  %v2858_v8 = vld [vmem:[#allocation4 + $0xd8] sm:$0xff]  ;;  %vm6679_vm10 = vcmask 523264  }
 0x4c7   : > { %v2948_v34 = vmul.f32 %v2891_v20, %v2852_v36  ;;  %v3786_v47 = vpop.eup %3785  ;;  %v3385_v4 = vadd.f32 -1.0, %v3784_v5 }
 0x4c8   : > { %v2987_v18 = vmul.f32 1.442695, %v2949_v2  ;;  %v3025_v42 = vsel %vm2961_vm13, %v2945_v26, %v3380_v51  ;;  %v3382_v50 = vadd.f32 -1.0, %v3786_v47  ;;  %vm2965_vm8 = vcmp.gt.f32.partialorder %v2949_v2, 0.0  ;;  %v2861_v47 = vld [vmem:[#allocation4 + $0xf0] sm:$0xff]  ;;  %vm6680_vm13 = vmmov %vm6679_vm10 }
 0x4c9   : > { %v2985_v35 = vmul.f32 1.442695, %v2948_v34  ;;  %v3676_v11 = vpack.i.bf16 %v3026_v14, %v3025_v42  ;;  %vm2964_vm3 = vcmp.gt.f32.partialorder %v2948_v34, 0.0  ;;  %v3030_v26 = vsel %vm2966_vm6, %v2950_v33, %v3385_v4 }
 0x4ca   : > { %3787 = vpow2.f32 %v2987_v18  ;;  %v3027_v13 = vsel %vm2963_vm9, %v2947_v52, %v3382_v50  ;;  %vm6681_vm9 = vmmov %vm6679_vm10 }
 0x4cb   : > { %3789 = vpow2.f32 %v2985_v35  ;;  %3677 = vrot.lane.b32.xlu0 %v3676_v11, %s3901_s17 }
 0x4cd   : > { %v2911_v61 = vpop.permute.xlu1 %2910 }
 0x4ce   : > { %v2952_v44 = vmul.f32 %v2911_v61, %v2856_v6  ;;  %v2906_v12 = vpop.permute.xlu0 %2905 }
 0x4cf   : > { %v2951_v24 = vmul.f32 %v2906_v12, %v2855_v38 }
 0x4d0   : > { %v3788_v46 = vpop.eup %3787  ;;  %v2993_v45 = vmul.f32 1.442695, %v2952_v44  ;;  %vm2968_vm5 = vcmp.gt.f32.partialorder %v2952_v44, 0.0 }
 0x4d1   : > { %v3790_v28 = vpop.eup %3789  ;;  %v3384_v59 = vadd.f32 -1.0, %v3788_v46  ;;  %v2991_v56 = vmul.f32 1.442695, %v2951_v24  ;;  %vm2967_vm15 = vcmp.gt.f32.partialorder %v2951_v24, 0.0 }
 0x4d2   : > { %v3383_v53 = vadd.f32 -1.0, %v3790_v28  ;;  %3791 = vpow2.f32 %v2993_v45 }
 0x4d3   : > { %v3029_v16 = vsel %vm2965_vm8, %v2949_v2, %v3384_v59  ;;  %3793 = vpow2.f32 %v2991_v56 }
 0x4d4   : > { %v3686_v29 = vpack.i.bf16 %v3030_v26, %v3029_v16  ;;  %v3028_v37 = vsel %vm2964_vm3, %v2948_v34, %v3383_v53  ;;  %3795 = vpow2.f32 %v3001_v41  ;;  %v2862_v34 = vld [vmem:[#allocation4 + $0xf8] sm:$0xff]  ;;  %v2384_v41 = vld [vmem:[#allocation4 + $0x8] sm:$0xff]  ;;  %vm6682_vm3 = vmmov %vm6681_vm9 }
 0x4d5   : > { %v3681_v3 = vpack.i.bf16 %v3028_v37, %v3027_v13  ;;  %3797 = vpow2.f32 %v2995_v19 }
 0x4d6   : > { %3687 = vrot.lane.b32.xlu2 %v3686_v29, %s3901_s17 }
 0x4d7   : > { %3682 = vrot.lane.b32.xlu1 %v3681_v3, %s3901_s17  ;;  %v2383_v3 = vld [vmem:[#allocation4] sm:$0xff] }
 0x4d8   : > { %v3792_v57 = vpop.eup %3791 }
 0x4d9   : > { %v3387_v32 = vadd.f32 -1.0, %v3792_v57  ;;  %v2926_v43 = vpop.permute.xlu1 %2925  ;;  %v3794_v36 = vpop.eup %3793 }
 0x4da   : > { %v2955_v33 = vmul.f32 %v2926_v43, %v2859_v9  ;;  %v3386_v1 = vadd.f32 -1.0, %v3794_v36  ;;  %v3796_v18 = vpop.eup %3795  ;;  %v2479_v9 = vmul.f32 %v6125_v27, %v2383_v3  ;;  %v2390_v36 = vld [vmem:[#allocation4 + $0x38] sm:$0xff]  ;;  %v2391_v3 = vld [vmem:[#allocation4 + $0x40] sm:$0xff] }
 0x4db   : > { %v3032_v52 = vsel %vm2968_vm5, %v2952_v44, %v3387_v32  ;;  %v3798_v6 = vpop.eup %3797  ;;  %v3391_v5 = vadd.f32 -1.0, %v3796_v18 }
 0x4dc   : > { %v2999_v31 = vmul.f32 1.442695, %v2955_v33  ;;  %v2921_v51 = vpop.permute.xlu0 %2920  ;;  %v3031_v2 = vsel %vm2967_vm15, %v2951_v24, %v3386_v1  ;;  %vm2971_vm1 = vcmp.gt.f32.partialorder %v2955_v33, 0.0  ;;  %v3388_v4 = vadd.f32 -1.0, %v3798_v6 }
 0x4dd   : > { %v2954_v20 = vmul.f32 %v2921_v51, %v2858_v8  ;;  %v3691_v14 = vpack.i.bf16 %v3032_v52, %v3031_v2  ;;  %v3036_v46 = vsel %vm2972_vm14, %v2956_v58, %v3391_v5  ;;  %v2511_v57 = vmul.f32 1.442695, %v2479_v9  ;;  %v2389_v8 = vld [vmem:[#allocation4 + $0x30] sm:$0xff]  ;;  %vm6683_vm14 = vmmov %vm6682_vm3 }
 0x4de   : > { %3799 = vpow2.f32 %v2999_v31  ;;  %v3033_v59 = vsel %vm2969_vm2, %v2953_v40, %v3388_v4  ;;  %v2480_v40 = vmul.f32 %v6131_v17, %v2384_v41  ;;  %vm2495_vm12 = vcmp.gt.f32.partialorder %v2479_v9, 0.0  ;;  %v2395_v4 = vld [vmem:[#allocation4 + $0x60] sm:$0xff] }
 0x4df   : > { %v2997_v42 = vmul.f32 1.442695, %v2954_v20  ;;  %3692 = vrot.lane.b32.xlu0 %v3691_v14, %s3901_s17  ;;  %vm2970_vm7 = vcmp.gt.f32.partialorder %v2954_v20, 0.0  ;;  %v2486_v52 = vmul.f32 %v6135_v55, %v2390_v36  ;;  %v2485_v27 = vmul.f32 %v6137_v25, %v2389_v8  ;;  %v2386_v55 = vld [vmem:[#allocation4 + $0x18] sm:$0xff] }
 0x4e0   : > { %v2513_v19 = vmul.f32 1.442695, %v2480_v40  ;;  %vm2496_vm0 = vcmp.gt.f32.partialorder %v2480_v40, 0.0  ;;  %v2482_v25 = vmul.f32 %v6129_v0, %v2386_v55  ;;  %v2388_v0 = vld [vmem:[#allocation4 + $0x28] sm:$0xff] }
 0x4e1   : > { %v2941_v35 = vpop.permute.xlu1 %2940  ;;  %3801 = vpow2.f32 %v2997_v42  ;;  %v2525_v18 = vmul.f32 1.442695, %v2486_v52  ;;  %vm2502_vm6 = vcmp.gt.f32.partialorder %v2486_v52, 0.0  ;;  %vm2501_vm8 = vcmp.gt.f32.partialorder %v2485_v27, 0.0 }
 0x4e2   : > { %v2958_v11 = vmul.f32 %v2941_v35, %v2862_v34  ;;  %v2523_v35 = vmul.f32 1.442695, %v2485_v27  ;;  %vm2498_vm15 = vcmp.gt.f32.partialorder %v2482_v25, 0.0 }
 0x4e4   : > { %v3800_v61 = vpop.eup %3799  ;;  %v3005_v38 = vmul.f32 1.442695, %v2958_v11  ;;  %v2936_v54 = vpop.permute.xlu0 %2935  ;;  %vm2974_vm11 = vcmp.gt.f32.partialorder %v2958_v11, 0.0 }
 0x4e5   : > { %v3390_v10 = vadd.f32 -1.0, %v3800_v61  ;;  %v2957_v44 = vmul.f32 %v2936_v54, %v2861_v47 }
 0x4e6   : > { %3803 = vpow2.f32 %v3005_v38  ;;  %v2396_v38 = vld [vmem:[#allocation4 + $0x68] sm:$0xff] }
 0x4e7   : > { %v3035_v12 = vsel %vm2971_vm1, %v2955_v33, %v3390_v10  ;;  %v3802_v50 = vpop.eup %3801  ;;  %v3003_v45 = vmul.f32 1.442695, %v2957_v44  ;;  %vm2973_vm4 = vcmp.gt.f32.partialorder %v2957_v44, 0.0  ;;  %v2517_v10 = vmul.f32 1.442695, %v2482_v25  ;;  %vm6684_vm1 = vmmov %vm6682_vm3 }
 0x4e8   : > { %v3701_v24 = vpack.i.bf16 %v3036_v46, %v3035_v12  ;;  %v3389_v28 = vadd.f32 -1.0, %v3802_v50  ;;  %v2492_v12 = vmul.f32 %v6145_v30, %v2396_v38  ;;  %v2387_v50 = vld [vmem:[#allocation4 + $0x20] sm:$0xff] }
 0x4e9   : > { %3805 = vpow2.f32 %v3003_v45 }
 0x4ea   : > { %3702 = vrot.lane.b32.xlu2 %v3701_v24, %s3901_s17  ;;  %v3034_v49 = vsel %vm2970_vm7, %v2954_v20, %v3389_v28  ;;  %3807 = vpow2.f32 %v2511_v57  ;;  %vm2508_vm2 = vcmp.gt.f32.partialorder %v2492_v12, 0.0 }
 0x4eb   : > { %v3696_v56 = vpack.i.bf16 %v3034_v49, %v3033_v59  ;;  %3809 = vpow2.f32 %v2513_v19 }
 0x4ec   : > { %v3804_v53 = vpop.eup %3803  ;;  %3811 = vpow2.f32 %v2525_v18 }
 0x4ed   : > { %v3393_v16 = vadd.f32 -1.0, %v3804_v53  ;;  %3697 = vrot.lane.b32.xlu1 %v3696_v56, %s3901_s17  ;;  %3813 = vpow2.f32 %v2523_v35  ;;  %v2483_v56 = vmul.f32 %v6119_v48, %v2387_v50  ;;  %v6176_v48 = vmul.f32 %v6127_v62, %v2391_v3 }
 0x4ef   : > { %v3806_v26 = vpop.eup %3805  ;;  %v3038_v58 = vsel %vm2974_vm11, %v2958_v11, %v3393_v16  ;;  %v2385_v11 = vld [vmem:[#allocation4 + $0x10] sm:$0xff]  ;;  %v2537_v16 = vmul.f32 1.442695, %v2492_v12  ;;  %v2527_v62 = vmul.f32 1.442695, %v6176_v48  ;;  %vm6685_vm11 = vmmov %vm6684_vm1 }
 0x4f0   : > { %v3392_v29 = vadd.f32 -1.0, %v3806_v26  ;;  %v3808_v32 = vpop.eup %3807  ;;  %v2481_v6 = vmul.f32 %v6123_v22, %v2385_v11  ;;  %v2491_v22 = vmul.f32 %v6147_v15, %v2395_v4  ;;  %v2484_v26 = vmul.f32 %v6121_v60, %v2388_v0 }
 0x4f1   : > { %v3810_v43 = vpop.eup %3809  ;;  %v3362_v33 = vadd.f32 -1.0, %v3808_v32 }
 0x4f2   : > { %v3037_v13 = vsel %vm2973_vm4, %v2957_v44, %v3392_v29  ;;  %v3363_v1 = vadd.f32 -1.0, %v3810_v43  ;;  %v3812_v5 = vpop.eup %3811  ;;  %v2515_v61 = vmul.f32 1.442695, %v2481_v6  ;;  %v2535_v29 = vmul.f32 1.442695, %v2491_v22  ;;  %vm6686_vm4 = vmmov %vm6684_vm1 }
 0x4f3   : > { %v3706_v37 = vpack.i.bf16 %v3038_v58, %v3037_v13  ;;  %v2559_v2 = vsel %vm2495_vm12, %v2479_v9, %v3362_v33  ;;  %v3814_v47 = vpop.eup %3813  ;;  %v3369_v54 = vadd.f32 -1.0, %v3812_v5  ;;  %v2519_v13 = vmul.f32 1.442695, %v2483_v56 }
 0x4f4   : > { %v2560_v20 = vsel %vm2496_vm0, %v2480_v40, %v3363_v1  ;;  %v3368_v44 = vadd.f32 -1.0, %v3814_v47  ;;  %3815 = vpow2.f32 %v2515_v61  ;;  %v2392_v40 = vld [vmem:[#allocation4 + $0x48] sm:$0xff]  ;;  %vm2497_vm5 = vcmp.gt.f32.partialorder %v2481_v6, 0.0  ;;  %v2393_v61 = vld [vmem:[#allocation4 + $0x50] sm:$0xff] }
 0x4f5   : > { %3707 = vrot.lane.b32.xlu0 %v3706_v37, %s3901_s17  ;;  %3817 = vpow2.f32 %v2517_v10  ;;  %v2566_v28 = vsel %vm2502_vm6, %v2486_v52, %v3369_v54  ;;  %v2521_v37 = vmul.f32 1.442695, %v2484_v26  ;;  %v2488_v36 = vmul.f32 %v6143_v21, %v2392_v40 }
 0x4f6   : > { %v2565_v59 = vsel %vm2501_vm8, %v2485_v27, %v3368_v44  ;;  %3819 = vpow2.f32 %v2537_v16  ;;  %vm2507_vm7 = vcmp.gt.f32.partialorder %v2491_v22, 0.0  ;;  %vm2499_vm12 = vcmp.gt.f32.partialorder %v2483_v56, 0.0 }
 0x4f7   : > { %3821 = vpow2.f32 %v2535_v29  ;;  %vm2500_vm0 = vcmp.gt.f32.partialorder %v2484_v26, 0.0  ;;  %vm2503_vm6 = vcmp.gt.f32.partialorder %v6176_v48, 0.0  ;;  %vm2504_vm8 = vcmp.gt.f32.partialorder %v2488_v36, 0.0 }
 0x4f8   : > { %3823 = vpow2.f32 %v2519_v13 }
 0x4f9   : > { %3825 = vpow2.f32 %v2521_v37 }
 0x4fa   : > { %v3816_v58 = vpop.eup %3815  ;;  %3827 = vpow2.f32 %v2527_v62 }
 0x4fb   : > { %v3818_v15 = vpop.eup %3817  ;;  %v3364_v41 = vadd.f32 -1.0, %v3816_v58 }
 0x4fc   : > { %v3365_v9 = vadd.f32 -1.0, %v3818_v15  ;;  %v3820_v19 = vpop.eup %3819 }
 0x4fd   : > { %v3822_v43 = vpop.eup %3821  ;;  %v2561_v33 = vsel %vm2497_vm5, %v2481_v6, %v3364_v41 }
 0x4fe   : > { %v2562_v1 = vsel %vm2498_vm15, %v2482_v25, %v3365_v9  ;;  %v3824_v27 = vpop.eup %3823  ;;  %v2394_v25 = vld [vmem:[#allocation4 + $0x58] sm:$0xff] }
 0x4ff   : > { %v3366_v18 = vadd.f32 -1.0, %v3824_v27 }
 0x501   : > { %v2563_v54 = vsel %vm2499_vm12, %v2483_v56, %v3366_v18  ;;  %v2398_v56 = vld [vmem:[#allocation4 + $0x78] sm:$0xff] }
 0x502   : > { %v2494_v58 = vmul.f32 %v6149_v23, %v2398_v56 }
 0x504   : > { %v2541_v41 = vmul.f32 1.442695, %v2494_v58 }
 0x51b   : > { %v3673_v31 = vpop.permute.xlu2 %3672 }
 0x51c   : > { %v3675_v51 = vunpack.i.h.bf16 %v3673_v31  ;;  %v3674_v17 = vunpack.i.l.bf16 %v3673_v31 }
 0x51e   : > { %v3103_v14 = vsel %vm6679_vm10, %v2559_v2, %v3674_v17  ;;  %v3104_v34 = vsel %vm6680_vm13, %v2560_v20, %v3675_v51  ;;  %v3375_v51 = vadd.f32 -1.0, %v3820_v19  ;;  %v3374_v17 = vadd.f32 -1.0, %v3822_v43  ;;  %v3826_v2 = vpop.eup %3825  ;;  %vm6687_vm10 = vmmov %vm6684_vm1 }
 0x51f   : > { %v3408_v42 = vpack.c.bf16 %v3104_v34, %v3103_v14  ;;  %v2529_v20 = vmul.f32 1.442695, %v2488_v36  ;;  %v3367_v11 = vadd.f32 -1.0, %v3826_v2  ;;  %v3828_v4 = vpop.eup %3827  ;;  %vm6688_vm13 = vmmov %vm6684_vm1 }
 0x520   : > { %v2571_v35 = vsel %vm2507_vm7, %v2491_v22, %v3374_v17  ;;  %v3370_v0 = vadd.f32 -1.0, %v3828_v4  ;;  %vm2510_vm7 = vcmp.gt.f32.partialorder %v2494_v58, 0.0 }
 0x521   : > { %3409 = vst [vmem:[%s4007_s10] sm:$0xff] %v3408_v42   ;;  %v2572_v42 = vsel %vm2508_vm2, %v2492_v12, %v3375_v51  ;;  %3829 = vpow2.f32 %v2529_v20  ;;  %v2564_v44 = vsel %vm2500_vm0, %v2484_v26, %v3367_v11  ;;  %v2490_v12 = vmul.f32 %v6133_v7, %v2394_v25 }
 0x523   : > { %vm2506_vm5 = vcmp.gt.f32.partialorder %v2490_v12, 0.0 }
 0x527   : > { %v3830_v22 = vpop.eup %3829 }
 0x530   : > { %v3688_v46 = vpop.permute.xlu2 %3687 }
 0x531   : > { %v3690_v45 = vunpack.i.h.bf16 %v3688_v46  ;;  %v3689_v24 = vunpack.i.l.bf16 %v3688_v46 }
 0x533   : > { %v3110_v49 = vsel %vm6681_vm9, %v2566_v28, %v3690_v45  ;;  %v3109_v53 = vsel %vm6682_vm3, %v2565_v59, %v3689_v24  ;;  %v2489_v45 = vmul.f32 %v6141_v39, %v2393_v61  ;;  %v2533_v28 = vmul.f32 1.442695, %v2490_v12  ;;  %vm6689_vm9 = vmmov %vm6684_vm1 }
 0x534   : > { %v3423_v30 = vpack.c.bf16 %v3110_v49, %v3109_v53  ;;  %v3371_v59 = vadd.f32 -1.0, %v3830_v22  ;;  %v2397_v49 = vld [vmem:[#allocation4 + $0x70] sm:$0xff]  ;;  %v2567_v39 = vsel %vm2503_vm6, %v6176_v48, %v3370_v0  ;;  %vm6690_vm3 = vmmov %vm6684_vm1 }
 0x535   : > { %v2531_v53 = vmul.f32 1.442695, %v2489_v45  ;;  %3831 = vpow2.f32 %v2533_v28  ;;  %v2493_v26 = vmul.f32 %v6139_v63, %v2397_v49  ;;  %vm2505_vm15 = vcmp.gt.f32.partialorder %v2489_v45, 0.0 }
 0x536   : > { %3447 = vst [vmem:[%s4007_s10 + $0x18] sm:$0xff] %v3423_v30   ;;  %v2568_v29 = vsel %vm2504_vm8, %v2488_v36, %v3371_v59 }
 0x537   : > { %3833 = vpow2.f32 %v2531_v53  ;;  %v2539_v3 = vmul.f32 1.442695, %v2493_v26  ;;  %vm2509_vm2 = vcmp.gt.f32.partialorder %v2493_v26, 0.0 }
 0x539   : > { %3835 = vpow2.f32 %v2539_v3 }
 0x53a   : > { %3837 = vpow2.f32 %v2541_v41 }
 0x53b   : > { %v3832_v9 = vpop.eup %3831 }
 0x53d   : > { %v3678_v57 = vpop.permute.xlu0 %3677  ;;  %v3834_v40 = vpop.eup %3833 }
 0x53e   : > { %v3680_v60 = vunpack.i.h.bf16 %v3678_v57  ;;  %v3679_v32 = vunpack.i.l.bf16 %v3678_v57  ;;  %v3373_v57 = vadd.f32 -1.0, %v3832_v9  ;;  %v3372_v63 = vadd.f32 -1.0, %v3834_v40 }
 0x540   : > { %v3106_v8 = vsel %vm6683_vm14, %v2562_v1, %v3680_v60  ;;  %v3105_v52 = vsel %vm6684_vm1, %v2561_v33, %v3679_v32  ;;  %v3836_v60 = vpop.eup %3835  ;;  %v2569_v32 = vsel %vm2505_vm15, %v2489_v45, %v3372_v63  ;;  %v2570_v43 = vsel %vm2506_vm5, %v2490_v12, %v3373_v57  ;;  %vm6691_vm14 = vmmov %vm6684_vm1 }
 0x541   : > { %v3413_v31 = vpack.c.bf16 %v3106_v8, %v3105_v52  ;;  %v3838_v36 = vpop.eup %3837  ;;  %v3376_v52 = vadd.f32 -1.0, %v3836_v60 }
 0x543   : > { %3445 = vst [vmem:[%s4007_s10 + $0x8] sm:$0xff] %v3413_v31   ;;  %v3377_v31 = vadd.f32 -1.0, %v3838_v36  ;;  %v2573_v17 = vsel %vm2509_vm2, %v2493_v26, %v3376_v52 }
 0x544   : > { %v3703_v14 = vpop.permute.xlu2 %3702 }
 0x545   : > { %v3705_v34 = vunpack.i.h.bf16 %v3703_v14  ;;  %v3704_v21 = vunpack.i.l.bf16 %v3703_v14  ;;  %v2574_v2 = vsel %vm2510_vm7, %v2494_v58, %v3377_v31 }
 0x547   : > { %v3116_v55 = vsel %vm6685_vm11, %v2572_v42, %v3705_v34  ;;  %v3115_v6 = vsel %vm6686_vm4, %v2571_v35, %v3704_v21  ;;  %vm6692_vm11 = vmmov %vm6684_vm1 }
 0x548   : > { %v3438_v5 = vpack.c.bf16 %v3116_v55, %v3115_v6  ;;  %vm6693_vm4 = vmmov %vm6684_vm1 }
 0x549   : > { %v3683_v47 = vpop.permute.xlu1 %3682 }
 0x54a   : > { %3450 = vst [vmem:[%s4007_s10 + $0x30] sm:$0xff] %v3438_v5   ;;  %v3685_v38 = vunpack.i.h.bf16 %v3683_v47  ;;  %v3684_v10 = vunpack.i.l.bf16 %v3683_v47 }
 0x54c   : > { %v3108_v46 = vsel %vm6687_vm10, %v2564_v44, %v3685_v38  ;;  %v3107_v50 = vsel %vm6688_vm13, %v2563_v54, %v3684_v10 }
 0x54d   : > { %v3418_v24 = vpack.c.bf16 %v3108_v46, %v3107_v50 }
 0x54f   : > { %3446 = vst [vmem:[%s4007_s10 + $0x10] sm:$0xff] %v3418_v24  }
 0x551   : > { %v3693_v16 = vpop.permute.xlu0 %3692 }
 0x552   : > { %v3695_v7 = vunpack.i.h.bf16 %v3693_v16  ;;  %v3694_v30 = vunpack.i.l.bf16 %v3693_v16 }
 0x554   : > { %v3112_v15 = vsel %vm6689_vm9, %v2568_v29, %v3695_v7  ;;  %v3111_v13 = vsel %vm6690_vm3, %v2567_v39, %v3694_v30 }
 0x555   : > { %v3428_v37 = vpack.c.bf16 %v3112_v15, %v3111_v13 }
 0x557   : > { %3448 = vst [vmem:[%s4007_s10 + $0x20] sm:$0xff] %v3428_v37  }
 0x55f   : > { %v3698_v48 = vpop.permute.xlu1 %3697 }
 0x560   : > { %v3700_v19 = vunpack.i.h.bf16 %v3698_v48  ;;  %v3699_v23 = vunpack.i.l.bf16 %v3698_v48 }
 0x562   : > { %v3114_v33 = vsel %vm6691_vm14, %v2570_v43, %v3700_v19  ;;  %v3113_v1 = vsel %vm6684_vm1, %v2569_v32, %v3699_v23 }
 0x563   : > { %v3433_v8 = vpack.c.bf16 %v3114_v33, %v3113_v1 }
 0x565   : > { %3449 = vst [vmem:[%s4007_s10 + $0x28] sm:$0xff] %v3433_v8  }
 0x567   : > { %v3708_v27 = vpop.permute.xlu0 %3707 }
 0x568   : > { %v3710_v62 = vunpack.i.h.bf16 %v3708_v27  ;;  %v3709_v51 = vunpack.i.l.bf16 %v3708_v27 }
 0x56a   : > { %v3118_v20 = vsel %vm6692_vm11, %v2574_v2, %v3710_v62  ;;  %v3117_v14 = vsel %vm6693_vm4, %v2573_v17, %v3709_v51 }
 0x56b   : > { %v3443_v34 = vpack.c.bf16 %v3118_v20, %v3117_v14 }
 0x56d   : > { %3451 = vst [vmem:[%s4007_s10 + $0x38] sm:$0xff] %v3443_v34  }
 0x56e PF: > { %s14_s21 = sadd.s32 1, %s3893_s21   ;;  %s6694_s15 = smov %s3873_s16 }
 0x56f   : > { %p11_p1 = scmp.ge.s32.totalorder %s14_s21, 6   ;;  %s6695_s16 = smov %s3978_s28 }
 0x570   : > { %s6696_s17 = smov %s3885_s19  ;;  %s6697_s18 = smov %s3889_s20 }
 0x571   : > { %s6698_s19 = smov %s6701_s22  ;;  %s6699_s20 = smov %s6705_s23 }
 0x572   :  { %13 = sbr.rel (!%p11_p1) target bundleno = 6 (0x6), region = 129 }

</bundles_post_ra>
